<compile_context>
chip_gen: v7x
topology: tpu7x:2x2x1
jax: 0.10.0
libtpu: 0.0.40
codegen_flags: <defaults>
</compile_context>

<pallas_src>
import functools

import jax
import jax.numpy as jnp
from jax.experimental import pallas as pl
from jax.experimental.pallas import tpu as pltpu

LANES = 128      # lane-dense channel width for all kernel outputs
POOL_TR = 64     # sublane rows per pool tile (tile = POOL_TR * 128 elements)


def _round_up(x, m):
    return ((x + m - 1) // m) * m


# ----------------------------- Pallas kernels ------------------------------ #

def _matmul_bias_kernel(x_ref, w_ref, bias_ref, o_ref, *, relu):
    # x: (TM, K) bf16   w: (K, 128) bf16 (BN scale folded)   bias: (1, 128) f32
    acc = jnp.dot(x_ref[...], w_ref[...], preferred_element_type=jnp.float32)
    acc = acc + bias_ref[...]
    if relu:
        acc = jnp.maximum(acc, 0.0)
    o_ref[...] = acc.astype(o_ref.dtype)


def _pool_relu_kernel(x_ref, o_ref):
    # x: (9, TR, 128) -> elementwise max over the 9 window taps, then ReLU.
    m = jnp.max(x_ref[...], axis=0)
    o_ref[...] = jnp.maximum(m, 0.0).astype(o_ref.dtype)


def _tail_kernel(x_ref, w3_ref, b3_ref, w4_ref, b4_ref, w5_ref, b5_ref,
                 o_ref, col3_ref, a3_ref, col4_ref, a4_ref, col5_ref):
    """Fused conv3+BN+ReLU -> conv4+BN+ReLU -> conv5+BN (7x7 -> 5x5 -> 3x3 -> 1x1).

    x:  (N, 7, 7, 128) bf16   pool2 output, channel-padded to 128 lanes
    w*: (9*128, 128)   bf16   per-tap (Cin-slot, Cout) matrices, BN scale folded
    b*: (1, 128)       f32
    o:  (No, 128)      f32    rows [0, N) and cols [0, Cout5) valid
    """
    N = x_ref.shape[0]

    # Zero-init the im2col scratch (only the row/lane padding matters).
    col3_ref[...] = jnp.zeros_like(col3_ref)
    col4_ref[...] = jnp.zeros_like(col4_ref)
    col5_ref[...] = jnp.zeros_like(col5_ref)

    # ---- conv3 + BN + ReLU : 7x7 -> 5x5 ------------------------------------
    # In-kernel im2col: each 3x3 tap occupies a lane-aligned 128-wide slot.
    for n in range(N):
        for oh in range(5):
            row = n * 25 + oh * 5
            for di in range(3):
                for dj in range(3):
                    k = di * 3 + dj
                    col3_ref[pl.ds(row, 5), pl.ds(k * LANES, LANES)] = \
                        x_ref[n, oh + di, pl.ds(dj, 5), :]
    y3 = jnp.dot(col3_ref[...], w3_ref[...], preferred_element_type=jnp.float32)
    y3 = jnp.maximum(y3 + b3_ref[...], 0.0)
    a3_ref[...] = y3.astype(a3_ref.dtype)          # rows ordered (n, oh, ow)

    # ---- conv4 + BN + ReLU : 5x5 -> 3x3 ------------------------------------
    for n in range(N):
        for oh in range(3):
            row = n * 9 + oh * 3
            for di in range(3):
                for dj in range(3):
                    k = di * 3 + dj
                    src = n * 25 + (oh + di) * 5 + dj
                    col4_ref[pl.ds(row, 3), pl.ds(k * LANES, LANES)] = \
                        a3_ref[pl.ds(src, 3), :]
    y4 = jnp.dot(col4_ref[...], w4_ref[...], preferred_element_type=jnp.float32)
    y4 = jnp.maximum(y4 + b4_ref[...], 0.0)
    a4_ref[...] = y4.astype(a4_ref.dtype)          # rows ordered (n, oh, ow)

    # ---- conv5 + BN (no ReLU) : 3x3 -> 1x1 ---------------------------------
    for n in range(N):
        for di in range(3):
            for dj in range(3):
                k = di * 3 + dj
                src = n * 9 + di * 3 + dj
                col5_ref[pl.ds(n, 1), pl.ds(k * LANES, LANES)] = \
                    a4_ref[pl.ds(src, 1), :]
    y5 = jnp.dot(col5_ref[...], w5_ref[...], preferred_element_type=jnp.float32)
    o_ref[...] = y5 + b5_ref[...]


# ------------------------------ layer wrappers ----------------------------- #

def conv_bn(x_nhwc, p, *, stride, relu, out_dtype=jnp.bfloat16, eps=1e-5):
    """Conv2d (valid padding) + BatchNorm2d (inference) [+ ReLU] via im2col matmul."""
    w, b = p["w"], p["b"]
    N, H, W, C = x_nhwc.shape
    Cout, Cin, KH, KW = w.shape
    assert Cin == C
    OH = (H - KH) // stride + 1
    OW = (W - KW) // stride + 1

    # im2col (XLA glue, bf16): (N*OH*OW, KH*KW*Cin)
    x_bf = x_nhwc.astype(jnp.bfloat16)
    patches = []
    for i in range(KH):
        for j in range(KW):
            patches.append(jax.lax.slice(
                x_bf, (0, i, j, 0),
                (N, i + stride * (OH - 1) + 1, j + stride * (OW - 1) + 1, C),
                (1, stride, stride, 1)))
    col = jnp.stack(patches, axis=3).reshape(N * OH * OW, KH * KW * C)

    # Fold conv bias + BN (running stats): scale into W columns, rest into bias.
    scale = p["gamma"] / jnp.sqrt(p["var"] + eps)
    bias = p["beta"] + (b - p["mean"]) * scale
    w_mat = jnp.transpose(w, (2, 3, 1, 0)).reshape(KH * KW * Cin, Cout)
    w_mat = w_mat * scale[None, :]

    Cp = _round_up(Cout, LANES)                       # lane-dense output width
    w_pad = jnp.pad(w_mat, ((0, 0), (0, Cp - Cout))).astype(jnp.bfloat16)
    bias_pad = jnp.pad(bias, (0, Cp - Cout)).reshape(1, Cp).astype(jnp.float32)

    M, K = col.shape
    TM = _round_up(M, 8) if M <= 1024 else 512        # per-layer row tile
    M_pad = _round_up(M, TM)
    col_p = jnp.pad(col, ((0, M_pad - M), (0, 0)))

    out = pl.pallas_call(
        functools.partial(_matmul_bias_kernel, relu=relu),
        out_shape=jax.ShapeDtypeStruct((M_pad, Cp), out_dtype),
        grid=(M_pad // TM,),
        in_specs=[
            pl.BlockSpec((TM, K), lambda i: (i, 0)),
            pl.BlockSpec((K, Cp), lambda i: (0, 0)),
            pl.BlockSpec((1, Cp), lambda i: (0, 0)),
        ],
        out_specs=pl.BlockSpec((TM, Cp), lambda i: (i, 0)),
        compiler_params=pltpu.CompilerParams(
            dimension_semantics=("parallel",)),
    )(col_p, w_pad, bias_pad)

    return out[:M, :Cout].reshape(N, OH, OW, Cout)


def maxpool3x3_s2_relu(x_nhwc):
    """MaxPool2d(kernel_size=3, stride=2) + ReLU on a flat lane-dense view."""
    N, H, W, C = x_nhwc.shape
    OH = (H - 3) // 2 + 1
    OW = (W - 3) // 2 + 1
    views = []
    for i in range(3):
        for j in range(3):
            views.append(jax.lax.slice(
                x_nhwc, (0, i, j, 0),
                (N, i + 2 * (OH - 1) + 1, j + 2 * (OW - 1) + 1, C),
                (1, 2, 2, 1)))
    Mf = N * OH * OW * C
    stacked = jnp.stack(views, axis=0).reshape(9, Mf)

    tile = POOL_TR * LANES
    Mp = _round_up(Mf, tile)
    stacked = jnp.pad(stacked, ((0, 0), (0, Mp - Mf)))
    stacked = stacked.reshape(9, Mp // LANES, LANES)

    out = pl.pallas_call(
        _pool_relu_kernel,
        out_shape=jax.ShapeDtypeStruct((Mp // LANES, LANES), x_nhwc.dtype),
        grid=(Mp // tile,),
        in_specs=[pl.BlockSpec((9, POOL_TR, LANES), lambda i: (0, i, 0))],
        out_specs=pl.BlockSpec((POOL_TR, LANES), lambda i: (i, 0)),
        compiler_params=pltpu.CompilerParams(
            dimension_semantics=("parallel",)),
    )(stacked)
    return out.reshape(-1)[:Mf].reshape(N, OH, OW, C)


def _fold_tap_weights(p, eps=1e-5):
    """Per-tap (Cin-slot, Cout) weights with BN scale folded, padded to 128x128."""
    w, b = p["w"], p["b"]
    Cout, Cin, KH, KW = w.shape
    scale = p["gamma"] / jnp.sqrt(p["var"] + eps)
    bias = p["beta"] + (b - p["mean"]) * scale
    wk = w * scale[:, None, None, None]                   # (Cout, Cin, KH, KW)
    wk = jnp.transpose(wk, (2, 3, 1, 0))                  # (KH, KW, Cin, Cout)
    wk = jnp.pad(wk, ((0, 0), (0, 0), (0, LANES - Cin), (0, LANES - Cout)))
    wk = wk.reshape(KH * KW * LANES, LANES).astype(jnp.bfloat16)
    bk = jnp.pad(bias, (0, LANES - Cout)).reshape(1, LANES).astype(jnp.float32)
    return wk, bk


def fused_tail(x_nhwc, p3, p4, p5):
    """conv3+BN+ReLU -> conv4+BN+ReLU -> conv5+BN in a single Pallas kernel."""
    N, H, W, C = x_nhwc.shape
    assert (H, W) == (7, 7) and C <= LANES
    w3, b3 = _fold_tap_weights(p3)
    w4, b4 = _fold_tap_weights(p4)
    w5, b5 = _fold_tap_weights(p5)
    c5 = p5["w"].shape[0]
    No = _round_up(N, 8)

    xp = jnp.pad(x_nhwc.astype(jnp.bfloat16),
                 ((0, 0), (0, 0), (0, 0), (0, LANES - C)))

    out = pl.pallas_call(
        _tail_kernel,
        out_shape=jax.ShapeDtypeStruct((No, LANES), jnp.float32),
        grid=(1,),
        in_specs=[
            pl.BlockSpec((N, 7, 7, LANES), lambda i: (0, 0, 0, 0)),
            pl.BlockSpec((9 * LANES, LANES), lambda i: (0, 0)),
            pl.BlockSpec((1, LANES), lambda i: (0, 0)),
            pl.BlockSpec((9 * LANES, LANES), lambda i: (0, 0)),
            pl.BlockSpec((1, LANES), lambda i: (0, 0)),
            pl.BlockSpec((9 * LANES, LANES), lambda i: (0, 0)),
            pl.BlockSpec((1, LANES), lambda i: (0, 0)),
        ],
        out_specs=pl.BlockSpec((No, LANES), lambda i: (0, 0)),
        scratch_shapes=[
            pltpu.VMEM((_round_up(N * 25, 8), 9 * LANES), jnp.bfloat16),  # col3
            pltpu.VMEM((_round_up(N * 25, 8), LANES), jnp.bfloat16),      # a3
            pltpu.VMEM((_round_up(N * 9, 8), 9 * LANES), jnp.bfloat16),   # col4
            pltpu.VMEM((_round_up(N * 9, 8), LANES), jnp.bfloat16),       # a4
            pltpu.VMEM((No, 9 * LANES), jnp.bfloat16),                    # col5
        ],
    )(xp, w3, b3, w4, b4, w5, b5)

    return out[:N, :c5].reshape(N, 1, 1, c5)


# --------------------------- model: AlexNetLegacy -------------------------- #

CONFIGS = [3, 96, 256, 384, 384, 256]


def init_params(key, width_mult=0.25):
    configs = [3 if c == 3 else int(c * width_mult) for c in CONFIGS]
    specs = [  # (Cin, Cout, kernel)
        (configs[0], configs[1], 11),
        (configs[1], configs[2], 5),
        (configs[2], configs[3], 3),
        (configs[3], configs[4], 3),
        (configs[4], configs[5], 3),
    ]
    params = []
    for (cin, cout, k) in specs:
        key, k1, k2, k3, k4, k5, k6 = jax.random.split(key, 7)
        params.append(dict(
            w=0.05 * jax.random.normal(k1, (cout, cin, k, k), jnp.float32),
            b=0.05 * jax.random.normal(k2, (cout,), jnp.float32),
            gamma=1.0 + 0.1 * jax.random.normal(k3, (cout,), jnp.float32),
            beta=0.1 * jax.random.normal(k4, (cout,), jnp.float32),
            mean=0.1 * jax.random.normal(k5, (cout,), jnp.float32),
            var=jnp.abs(jax.random.normal(k6, (cout,), jnp.float32)) + 0.5,
        ))
    return params


def alexnet_legacy_forward(x_nchw, params):
    """Matches AlexNetLegacy.forward (the single `features` Sequential)."""
    x = jnp.transpose(x_nchw, (0, 2, 3, 1))                 # NCHW -> NHWC

    x = conv_bn(x, params[0], stride=2, relu=False)          # Conv(k11,s2)+BN
    x = maxpool3x3_s2_relu(x)                                # MaxPool(3,2)+ReLU
    x = conv_bn(x, params[1], stride=1, relu=False)          # Conv(k5)+BN
    x = maxpool3x3_s2_relu(x)                                # MaxPool(3,2)+ReLU
    x = fused_tail(x, params[2], params[3], params[4])       # conv3/4/5 fused

    return jnp.transpose(x, (0, 3, 1, 2)).astype(jnp.float32)  # NHWC -> NCHW


# ---------------------------------- main ----------------------------------- #

if __name__ == "__main__":
    key = jax.random.PRNGKey(0)
    k_params, k_x = jax.random.split(key)

    width_mult = 0.25
    params = init_params(k_params, width_mult=width_mult)

    # Smallest spatial size for which this conv/pool stack is valid is 87.
    x = jax.random.normal(k_x, (2, 3, 87, 87), jnp.float32)

    fwd = jax.jit(alexnet_legacy_forward)
    out = jax.block_until_ready(fwd(x, params))

    feature_size = int(CONFIGS[5] * width_mult)
    assert out.shape == (2, feature_size, 1, 1), out.shape
    assert bool(jnp.all(jnp.isfinite(out)))
    print("KERNEL_OK")
</pallas_src>

<mosaic_0001>
module attributes {stable_mosaic.version = 11 : i64} {
  func.func @_matmul_bias_kernel(%arg0: i32, %arg1: memref<512x363xbf16, #tpu.memory_space<vmem>>, %arg2: memref<363x128xbf16, #tpu.memory_space<vmem>>, %arg3: memref<1x128xf32, #tpu.memory_space<vmem>>, %arg4: memref<512x128xbf16, #tpu.memory_space<vmem>>) attributes {dimension_semantics = [#tpu.dimension_semantics<parallel>], iteration_bounds = array<i64: 6>, scalar_prefetch = 0 : i64, scratch_operands = 0 : i64, tpu.core_type = #tpu.core_type<tc>, window_params = [{transform_indices = @transform_0, window_bounds = array<i64: 512, 363>}, {pipeline_mode = #tpu.pipeline_mode<synchronous>, transform_indices = @transform_1, window_bounds = array<i64: 363, 128>}, {pipeline_mode = #tpu.pipeline_mode<synchronous>, transform_indices = @transform_2, window_bounds = array<i64: 1, 128>}, {transform_indices = @transform_3, window_bounds = array<i64: 512, 128>}]} {
    %c0 = arith.constant 0 : index
    %c0_0 = arith.constant 0 : index
    %0 = vector.load %arg1[%c0, %c0_0] : memref<512x363xbf16, #tpu.memory_space<vmem>>, vector<512x363xbf16>
    %c0_1 = arith.constant 0 : index
    %c0_2 = arith.constant 0 : index
    %1 = vector.load %arg2[%c0_1, %c0_2] : memref<363x128xbf16, #tpu.memory_space<vmem>>, vector<363x128xbf16>
    %cst = arith.constant dense<0.000000e+00> : vector<512x128xf32>
    %2 = tpu.matmul %0, %1, %cst {dimension_numbers = #tpu.dot_dimension_numbers<[1], [0], [0], [1], [0, 0, 1, 1], [], []>} : vector<512x363xbf16>, vector<363x128xbf16>, vector<512x128xf32> -> vector<512x128xf32>
    %c0_3 = arith.constant 0 : index
    %c0_4 = arith.constant 0 : index
    %3 = vector.load %arg3[%c0_3, %c0_4] : memref<1x128xf32, #tpu.memory_space<vmem>>, vector<1x128xf32>
    %4 = vector.broadcast %3 : vector<1x128xf32> to vector<512x128xf32>
    %5 = arith.addf %2, %4 : vector<512x128xf32>
    %6 = arith.truncf %5 : vector<512x128xf32> to vector<512x128xbf16>
    %c0_5 = arith.constant 0 : index
    %c0_6 = arith.constant 0 : index
    %7 = vector.load %arg4[%c0_5, %c0_6] : memref<512x128xbf16, #tpu.memory_space<vmem>>, vector<512x128xbf16>
    tpu.vector_store %arg4[%c0_5, %c0_6], %6 {strides = array<i32>} : memref<512x128xbf16, #tpu.memory_space<vmem>>, vector<512x128xbf16>,
    return
  }
  func.func @transform_0(%arg0: i32) -> (i32, i32) {
    %c0_i32 = arith.constant 0 : i32
    %c0_i32_0 = arith.constant 0 : i32
    return %arg0, %c0_i32 : i32, i32
  }
  func.func @transform_1(%arg0: i32) -> (i32, i32) {
    %c0_i32 = arith.constant 0 : i32
    %c0_i32_0 = arith.constant 0 : i32
    %c0_i32_1 = arith.constant 0 : i32
    return %c0_i32, %c0_i32_0 : i32, i32
  }
  func.func @transform_2(%arg0: i32) -> (i32, i32) {
    %c0_i32 = arith.constant 0 : i32
    %c0_i32_0 = arith.constant 0 : i32
    %c0_i32_1 = arith.constant 0 : i32
    return %c0_i32, %c0_i32_0 : i32, i32
  }
  func.func @transform_3(%arg0: i32) -> (i32, i32) {
    %c0_i32 = arith.constant 0 : i32
    %c0_i32_0 = arith.constant 0 : i32
    return %arg0, %c0_i32 : i32, i32
  }
}

module attributes {stable_mosaic.version = 11 : i64} {
  func.func @_pool_relu_kernel(%arg0: i32, %arg1: memref<9x64x128xbf16, #tpu.memory_space<vmem>>, %arg2: memref<64x128xbf16, #tpu.memory_space<vmem>>) attributes {dimension_semantics = [#tpu.dimension_semantics<parallel>], iteration_bounds = array<i64: 3>, scalar_prefetch = 0 : i64, scratch_operands = 0 : i64, tpu.core_type = #tpu.core_type<tc>, window_params = [{transform_indices = @transform_0, window_bounds = array<i64: 9, 64, 128>}, {transform_indices = @transform_1, window_bounds = array<i64: 64, 128>}]} {
    %c0 = arith.constant 0 : index
    %c0_0 = arith.constant 0 : index
    %c0_1 = arith.constant 0 : index
    %0 = vector.load %arg1[%c0, %c0_0, %c0_1] : memref<9x64x128xbf16, #tpu.memory_space<vmem>>, vector<9x64x128xbf16>
    %cst = arith.constant dense<0xFF80> : vector<64x128xbf16>
    %1 = vector.multi_reduction <maximumf>, %0, %cst [0] : vector<9x64x128xbf16> to vector<64x128xbf16>
    %cst_2 = arith.constant 0.000000e+00 : bf16
    %2 = vector.broadcast %cst_2 : bf16 to vector<64x128xbf16>
    %3 = arith.maximumf %1, %2 : vector<64x128xbf16>
    %c0_3 = arith.constant 0 : index
    %c0_4 = arith.constant 0 : index
    %4 = vector.load %arg2[%c0_3, %c0_4] : memref<64x128xbf16, #tpu.memory_space<vmem>>, vector<64x128xbf16>
    tpu.vector_store %arg2[%c0_3, %c0_4], %3 {strides = array<i32>} : memref<64x128xbf16, #tpu.memory_space<vmem>>, vector<64x128xbf16>,
    return
  }
  func.func @transform_0(%arg0: i32) -> (i32, i32, i32) {
    %c0_i32 = arith.constant 0 : i32
    %c0_i32_0 = arith.constant 0 : i32
    %c0_i32_1 = arith.constant 0 : i32
    return %c0_i32, %arg0, %c0_i32_0 : i32, i32, i32
  }
  func.func @transform_1(%arg0: i32) -> (i32, i32) {
    %c0_i32 = arith.constant 0 : i32
    %c0_i32_0 = arith.constant 0 : i32
    return %arg0, %c0_i32 : i32, i32
  }
}

module attributes {stable_mosaic.version = 11 : i64} {
  func.func @_matmul_bias_kernel(%arg0: i32, %arg1: memref<456x600xbf16, #tpu.memory_space<vmem>>, %arg2: memref<600x128xbf16, #tpu.memory_space<vmem>>, %arg3: memref<1x128xf32, #tpu.memory_space<vmem>>, %arg4: memref<456x128xbf16, #tpu.memory_space<vmem>>) attributes {dimension_semantics = [#tpu.dimension_semantics<parallel>], iteration_bounds = array<i64: 1>, scalar_prefetch = 0 : i64, scratch_operands = 0 : i64, tpu.core_type = #tpu.core_type<tc>, window_params = [{transform_indices = @transform_0, window_bounds = array<i64: 456, 600>}, {pipeline_mode = #tpu.pipeline_mode<synchronous>, transform_indices = @transform_1, window_bounds = array<i64: 600, 128>}, {pipeline_mode = #tpu.pipeline_mode<synchronous>, transform_indices = @transform_2, window_bounds = array<i64: 1, 128>}, {transform_indices = @transform_3, window_bounds = array<i64: 456, 128>}]} {
    %c0 = arith.constant 0 : index
    %c0_0 = arith.constant 0 : index
    %0 = vector.load %arg1[%c0, %c0_0] : memref<456x600xbf16, #tpu.memory_space<vmem>>, vector<456x600xbf16>
    %c0_1 = arith.constant 0 : index
    %c0_2 = arith.constant 0 : index
    %1 = vector.load %arg2[%c0_1, %c0_2] : memref<600x128xbf16, #tpu.memory_space<vmem>>, vector<600x128xbf16>
    %cst = arith.constant dense<0.000000e+00> : vector<456x128xf32>
    %2 = tpu.matmul %0, %1, %cst {dimension_numbers = #tpu.dot_dimension_numbers<[1], [0], [0], [1], [0, 0, 1, 1], [], []>} : vector<456x600xbf16>, vector<600x128xbf16>, vector<456x128xf32> -> vector<456x128xf32>
    %c0_3 = arith.constant 0 : index
    %c0_4 = arith.constant 0 : index
    %3 = vector.load %arg3[%c0_3, %c0_4] : memref<1x128xf32, #tpu.memory_space<vmem>>, vector<1x128xf32>
    %4 = vector.broadcast %3 : vector<1x128xf32> to vector<456x128xf32>
    %5 = arith.addf %2, %4 : vector<456x128xf32>
    %6 = arith.truncf %5 : vector<456x128xf32> to vector<456x128xbf16>
    %c0_5 = arith.constant 0 : index
    %c0_6 = arith.constant 0 : index
    %7 = vector.load %arg4[%c0_5, %c0_6] : memref<456x128xbf16, #tpu.memory_space<vmem>>, vector<456x128xbf16>
    tpu.vector_store %arg4[%c0_5, %c0_6], %6 {strides = array<i32>} : memref<456x128xbf16, #tpu.memory_space<vmem>>, vector<456x128xbf16>,
    return
  }
  func.func @transform_0(%arg0: i32) -> (i32, i32) {
    %c0_i32 = arith.constant 0 : i32
    %c0_i32_0 = arith.constant 0 : i32
    return %arg0, %c0_i32 : i32, i32
  }
  func.func @transform_1(%arg0: i32) -> (i32, i32) {
    %c0_i32 = arith.constant 0 : i32
    %c0_i32_0 = arith.constant 0 : i32
    %c0_i32_1 = arith.constant 0 : i32
    return %c0_i32, %c0_i32_0 : i32, i32
  }
  func.func @transform_2(%arg0: i32) -> (i32, i32) {
    %c0_i32 = arith.constant 0 : i32
    %c0_i32_0 = arith.constant 0 : i32
    %c0_i32_1 = arith.constant 0 : i32
    return %c0_i32, %c0_i32_0 : i32, i32
  }
  func.func @transform_3(%arg0: i32) -> (i32, i32) {
    %c0_i32 = arith.constant 0 : i32
    %c0_i32_0 = arith.constant 0 : i32
    return %arg0, %c0_i32 : i32, i32
  }
}

module attributes {stable_mosaic.version = 11 : i64} {
  func.func @_pool_relu_kernel(%arg0: i32, %arg1: memref<9x64x128xbf16, #tpu.memory_space<vmem>>, %arg2: memref<64x128xbf16, #tpu.memory_space<vmem>>) attributes {dimension_semantics = [#tpu.dimension_semantics<parallel>], iteration_bounds = array<i64: 1>, scalar_prefetch = 0 : i64, scratch_operands = 0 : i64, tpu.core_type = #tpu.core_type<tc>, window_params = [{transform_indices = @transform_0, window_bounds = array<i64: 9, 64, 128>}, {transform_indices = @transform_1, window_bounds = array<i64: 64, 128>}]} {
    %c0 = arith.constant 0 : index
    %c0_0 = arith.constant 0 : index
    %c0_1 = arith.constant 0 : index
    %0 = vector.load %arg1[%c0, %c0_0, %c0_1] : memref<9x64x128xbf16, #tpu.memory_space<vmem>>, vector<9x64x128xbf16>
    %cst = arith.constant dense<0xFF80> : vector<64x128xbf16>
    %1 = vector.multi_reduction <maximumf>, %0, %cst [0] : vector<9x64x128xbf16> to vector<64x128xbf16>
    %cst_2 = arith.constant 0.000000e+00 : bf16
    %2 = vector.broadcast %cst_2 : bf16 to vector<64x128xbf16>
    %3 = arith.maximumf %1, %2 : vector<64x128xbf16>
    %c0_3 = arith.constant 0 : index
    %c0_4 = arith.constant 0 : index
    %4 = vector.load %arg2[%c0_3, %c0_4] : memref<64x128xbf16, #tpu.memory_space<vmem>>, vector<64x128xbf16>
    tpu.vector_store %arg2[%c0_3, %c0_4], %3 {strides = array<i32>} : memref<64x128xbf16, #tpu.memory_space<vmem>>, vector<64x128xbf16>,
    return
  }
  func.func @transform_0(%arg0: i32) -> (i32, i32, i32) {
    %c0_i32 = arith.constant 0 : i32
    %c0_i32_0 = arith.constant 0 : i32
    %c0_i32_1 = arith.constant 0 : i32
    return %c0_i32, %arg0, %c0_i32_0 : i32, i32, i32
  }
  func.func @transform_1(%arg0: i32) -> (i32, i32) {
    %c0_i32 = arith.constant 0 : i32
    %c0_i32_0 = arith.constant 0 : i32
    return %arg0, %c0_i32 : i32, i32
  }
}

module attributes {stable_mosaic.version = 11 : i64} {
  func.func @_tail_kernel(%arg0: i32, %arg1: memref<2x7x7x128xbf16, #tpu.memory_space<vmem>>, %arg2: memref<1152x128xbf16, #tpu.memory_space<vmem>>, %arg3: memref<1x128xf32, #tpu.memory_space<vmem>>, %arg4: memref<1152x128xbf16, #tpu.memory_space<vmem>>, %arg5: memref<1x128xf32, #tpu.memory_space<vmem>>, %arg6: memref<1152x128xbf16, #tpu.memory_space<vmem>>, %arg7: memref<1x128xf32, #tpu.memory_space<vmem>>, %arg8: memref<8x128xf32, #tpu.memory_space<vmem>>, %arg9: memref<56x1152xbf16, #tpu.memory_space<vmem>>, %arg10: memref<56x128xbf16, #tpu.memory_space<vmem>>, %arg11: memref<24x1152xbf16, #tpu.memory_space<vmem>>, %arg12: memref<24x128xbf16, #tpu.memory_space<vmem>>, %arg13: memref<8x1152xbf16, #tpu.memory_space<vmem>>) attributes {dimension_semantics = [#tpu.dimension_semantics<arbitrary>], iteration_bounds = array<i64: 1>, scalar_prefetch = 0 : i64, scratch_operands = 5 : i64, tpu.core_type = #tpu.core_type<tc>, window_params = [{pipeline_mode = #tpu.pipeline_mode<synchronous>, transform_indices = @transform_0, window_bounds = array<i64: 2, 7, 7, 128>}, {pipeline_mode = #tpu.pipeline_mode<synchronous>, transform_indices = @transform_1, window_bounds = array<i64: 1152, 128>}, {pipeline_mode = #tpu.pipeline_mode<synchronous>, transform_indices = @transform_2, window_bounds = array<i64: 1, 128>}, {pipeline_mode = #tpu.pipeline_mode<synchronous>, transform_indices = @transform_3, window_bounds = array<i64: 1152, 128>}, {pipeline_mode = #tpu.pipeline_mode<synchronous>, transform_indices = @transform_4, window_bounds = array<i64: 1, 128>}, {pipeline_mode = #tpu.pipeline_mode<synchronous>, transform_indices = @transform_5, window_bounds = array<i64: 1152, 128>}, {pipeline_mode = #tpu.pipeline_mode<synchronous>, transform_indices = @transform_6, window_bounds = array<i64: 1, 128>}, {pipeline_mode = #tpu.pipeline_mode<synchronous>, transform_indices = @transform_7, window_bounds = array<i64: 8, 128>}]} {
    %cst = arith.constant 0.000000e+00 : bf16
    %0 = vector.broadcast %cst : bf16 to vector<56x1152xbf16>
    %c0 = arith.constant 0 : index
    %c0_0 = arith.constant 0 : index
    %1 = vector.load %arg9[%c0, %c0_0] : memref<56x1152xbf16, #tpu.memory_space<vmem>>, vector<56x1152xbf16>
    tpu.vector_store %arg9[%c0, %c0_0], %0 {strides = array<i32>} : memref<56x1152xbf16, #tpu.memory_space<vmem>>, vector<56x1152xbf16>,
    %cst_1 = arith.constant 0.000000e+00 : bf16
    %2 = vector.broadcast %cst_1 : bf16 to vector<24x1152xbf16>
    %c0_2 = arith.constant 0 : index
    %c0_3 = arith.constant 0 : index
    %3 = vector.load %arg11[%c0_2, %c0_3] : memref<24x1152xbf16, #tpu.memory_space<vmem>>, vector<24x1152xbf16>
    tpu.vector_store %arg11[%c0_2, %c0_3], %2 {strides = array<i32>} : memref<24x1152xbf16, #tpu.memory_space<vmem>>, vector<24x1152xbf16>,
    %cst_4 = arith.constant 0.000000e+00 : bf16
    %4 = vector.broadcast %cst_4 : bf16 to vector<8x1152xbf16>
    %c0_5 = arith.constant 0 : index
    %c0_6 = arith.constant 0 : index
    %5 = vector.load %arg13[%c0_5, %c0_6] : memref<8x1152xbf16, #tpu.memory_space<vmem>>, vector<8x1152xbf16>
    tpu.vector_store %arg13[%c0_5, %c0_6], %4 {strides = array<i32>} : memref<8x1152xbf16, #tpu.memory_space<vmem>>, vector<8x1152xbf16>,
    %c0_7 = arith.constant 0 : index
    %c0_8 = arith.constant 0 : index
    %c0_9 = arith.constant 0 : index
    %c0_10 = arith.constant 0 : index
    %6 = vector.load %arg1[%c0_7, %c0_8, %c0_9, %c0_10] : memref<2x7x7x128xbf16, #tpu.memory_space<vmem>>, vector<1x1x5x128xbf16>
    %7 = vector.shape_cast %6 : vector<1x1x5x128xbf16> to vector<5x128xbf16>
    %c0_11 = arith.constant 0 : index
    %c0_12 = arith.constant 0 : index
    %8 = vector.load %arg9[%c0_11, %c0_12] : memref<56x1152xbf16, #tpu.memory_space<vmem>>, vector<5x128xbf16>
    tpu.vector_store %arg9[%c0_11, %c0_12], %7 {strides = array<i32>} : memref<56x1152xbf16, #tpu.memory_space<vmem>>, vector<5x128xbf16>,
    %c0_13 = arith.constant 0 : index
    %c0_14 = arith.constant 0 : index
    %c1 = arith.constant 1 : index
    %c0_15 = arith.constant 0 : index
    %9 = vector.load %arg1[%c0_13, %c0_14, %c1, %c0_15] : memref<2x7x7x128xbf16, #tpu.memory_space<vmem>>, vector<1x1x5x128xbf16>
    %10 = vector.shape_cast %9 : vector<1x1x5x128xbf16> to vector<5x128xbf16>
    %c0_16 = arith.constant 0 : index
    %c128 = arith.constant 128 : index
    %11 = vector.load %arg9[%c0_16, %c128] : memref<56x1152xbf16, #tpu.memory_space<vmem>>, vector<5x128xbf16>
    tpu.vector_store %arg9[%c0_16, %c128], %10 {strides = array<i32>} : memref<56x1152xbf16, #tpu.memory_space<vmem>>, vector<5x128xbf16>,
    %c0_17 = arith.constant 0 : index
    %c0_18 = arith.constant 0 : index
    %c2 = arith.constant 2 : index
    %c0_19 = arith.constant 0 : index
    %12 = vector.load %arg1[%c0_17, %c0_18, %c2, %c0_19] : memref<2x7x7x128xbf16, #tpu.memory_space<vmem>>, vector<1x1x5x128xbf16>
    %13 = vector.shape_cast %12 : vector<1x1x5x128xbf16> to vector<5x128xbf16>
    %c0_20 = arith.constant 0 : index
    %c256 = arith.constant 256 : index
    %14 = vector.load %arg9[%c0_20, %c256] : memref<56x1152xbf16, #tpu.memory_space<vmem>>, vector<5x128xbf16>
    tpu.vector_store %arg9[%c0_20, %c256], %13 {strides = array<i32>} : memref<56x1152xbf16, #tpu.memory_space<vmem>>, vector<5x128xbf16>,
    %c0_21 = arith.constant 0 : index
    %c1_22 = arith.constant 1 : index
    %c0_23 = arith.constant 0 : index
    %c0_24 = arith.constant 0 : index
    %15 = vector.load %arg1[%c0_21, %c1_22, %c0_23, %c0_24] : memref<2x7x7x128xbf16, #tpu.memory_space<vmem>>, vector<1x1x5x128xbf16>
    %16 = vector.shape_cast %15 : vector<1x1x5x128xbf16> to vector<5x128xbf16>
    %c0_25 = arith.constant 0 : index
    %c384 = arith.constant 384 : index
    %17 = vector.load %arg9[%c0_25, %c384] : memref<56x1152xbf16, #tpu.memory_space<vmem>>, vector<5x128xbf16>
    tpu.vector_store %arg9[%c0_25, %c384], %16 {strides = array<i32>} : memref<56x1152xbf16, #tpu.memory_space<vmem>>, vector<5x128xbf16>,
    %c0_26 = arith.constant 0 : index
    %c1_27 = arith.constant 1 : index
    %c1_28 = arith.constant 1 : index
    %c0_29 = arith.constant 0 : index
    %18 = vector.load %arg1[%c0_26, %c1_27, %c1_28, %c0_29] : memref<2x7x7x128xbf16, #tpu.memory_space<vmem>>, vector<1x1x5x128xbf16>
    %19 = vector.shape_cast %18 : vector<1x1x5x128xbf16> to vector<5x128xbf16>
    %c0_30 = arith.constant 0 : index
    %c512 = arith.constant 512 : index
    %20 = vector.load %arg9[%c0_30, %c512] : memref<56x1152xbf16, #tpu.memory_space<vmem>>, vector<5x128xbf16>
    tpu.vector_store %arg9[%c0_30, %c512], %19 {strides = array<i32>} : memref<56x1152xbf16, #tpu.memory_space<vmem>>, vector<5x128xbf16>,
    %c0_31 = arith.constant 0 : index
    %c1_32 = arith.constant 1 : index
    %c2_33 = arith.constant 2 : index
    %c0_34 = arith.constant 0 : index
    %21 = vector.load %arg1[%c0_31, %c1_32, %c2_33, %c0_34] : memref<2x7x7x128xbf16, #tpu.memory_space<vmem>>, vector<1x1x5x128xbf16>
    %22 = vector.shape_cast %21 : vector<1x1x5x128xbf16> to vector<5x128xbf16>
    %c0_35 = arith.constant 0 : index
    %c640 = arith.constant 640 : index
    %23 = vector.load %arg9[%c0_35, %c640] : memref<56x1152xbf16, #tpu.memory_space<vmem>>, vector<5x128xbf16>
    tpu.vector_store %arg9[%c0_35, %c640], %22 {strides = array<i32>} : memref<56x1152xbf16, #tpu.memory_space<vmem>>, vector<5x128xbf16>,
    %c0_36 = arith.constant 0 : index
    %c2_37 = arith.constant 2 : index
    %c0_38 = arith.constant 0 : index
    %c0_39 = arith.constant 0 : index
    %24 = vector.load %arg1[%c0_36, %c2_37, %c0_38, %c0_39] : memref<2x7x7x128xbf16, #tpu.memory_space<vmem>>, vector<1x1x5x128xbf16>
    %25 = vector.shape_cast %24 : vector<1x1x5x128xbf16> to vector<5x128xbf16>
    %c0_40 = arith.constant 0 : index
    %c768 = arith.constant 768 : index
    %26 = vector.load %arg9[%c0_40, %c768] : memref<56x1152xbf16, #tpu.memory_space<vmem>>, vector<5x128xbf16>
    tpu.vector_store %arg9[%c0_40, %c768], %25 {strides = array<i32>} : memref<56x1152xbf16, #tpu.memory_space<vmem>>, vector<5x128xbf16>,
    %c0_41 = arith.constant 0 : index
    %c2_42 = arith.constant 2 : index
    %c1_43 = arith.constant 1 : index
    %c0_44 = arith.constant 0 : index
    %27 = vector.load %arg1[%c0_41, %c2_42, %c1_43, %c0_44] : memref<2x7x7x128xbf16, #tpu.memory_space<vmem>>, vector<1x1x5x128xbf16>
    %28 = vector.shape_cast %27 : vector<1x1x5x128xbf16> to vector<5x128xbf16>
    %c0_45 = arith.constant 0 : index
    %c896 = arith.constant 896 : index
    %29 = vector.load %arg9[%c0_45, %c896] : memref<56x1152xbf16, #tpu.memory_space<vmem>>, vector<5x128xbf16>
    tpu.vector_store %arg9[%c0_45, %c896], %28 {strides = array<i32>} : memref<56x1152xbf16, #tpu.memory_space<vmem>>, vector<5x128xbf16>,
    %c0_46 = arith.constant 0 : index
    %c2_47 = arith.constant 2 : index
    %c2_48 = arith.constant 2 : index
    %c0_49 = arith.constant 0 : index
    %30 = vector.load %arg1[%c0_46, %c2_47, %c2_48, %c0_49] : memref<2x7x7x128xbf16, #tpu.memory_space<vmem>>, vector<1x1x5x128xbf16>
    %31 = vector.shape_cast %30 : vector<1x1x5x128xbf16> to vector<5x128xbf16>
    %c0_50 = arith.constant 0 : index
    %c1024 = arith.constant 1024 : index
    %32 = vector.load %arg9[%c0_50, %c1024] : memref<56x1152xbf16, #tpu.memory_space<vmem>>, vector<5x128xbf16>
    tpu.vector_store %arg9[%c0_50, %c1024], %31 {strides = array<i32>} : memref<56x1152xbf16, #tpu.memory_space<vmem>>, vector<5x128xbf16>,
    %c0_51 = arith.constant 0 : index
    %c1_52 = arith.constant 1 : index
    %c0_53 = arith.constant 0 : index
    %c0_54 = arith.constant 0 : index
    %33 = vector.load %arg1[%c0_51, %c1_52, %c0_53, %c0_54] : memref<2x7x7x128xbf16, #tpu.memory_space<vmem>>, vector<1x1x5x128xbf16>
    %34 = vector.shape_cast %33 : vector<1x1x5x128xbf16> to vector<5x128xbf16>
    %c5 = arith.constant 5 : index
    %c0_55 = arith.constant 0 : index
    %35 = vector.load %arg9[%c5, %c0_55] : memref<56x1152xbf16, #tpu.memory_space<vmem>>, vector<5x128xbf16>
    tpu.vector_store %arg9[%c5, %c0_55], %34 {strides = array<i32>} : memref<56x1152xbf16, #tpu.memory_space<vmem>>, vector<5x128xbf16>,
    %c0_56 = arith.constant 0 : index
    %c1_57 = arith.constant 1 : index
    %c1_58 = arith.constant 1 : index
    %c0_59 = arith.constant 0 : index
    %36 = vector.load %arg1[%c0_56, %c1_57, %c1_58, %c0_59] : memref<2x7x7x128xbf16, #tpu.memory_space<vmem>>, vector<1x1x5x128xbf16>
    %37 = vector.shape_cast %36 : vector<1x1x5x128xbf16> to vector<5x128xbf16>
    %c5_60 = arith.constant 5 : index
    %c128_61 = arith.constant 128 : index
    %38 = vector.load %arg9[%c5_60, %c128_61] : memref<56x1152xbf16, #tpu.memory_space<vmem>>, vector<5x128xbf16>
    tpu.vector_store %arg9[%c5_60, %c128_61], %37 {strides = array<i32>} : memref<56x1152xbf16, #tpu.memory_space<vmem>>, vector<5x128xbf16>,
    %c0_62 = arith.constant 0 : index
    %c1_63 = arith.constant 1 : index
    %c2_64 = arith.constant 2 : index
    %c0_65 = arith.constant 0 : index
    %39 = vector.load %arg1[%c0_62, %c1_63, %c2_64, %c0_65] : memref<2x7x7x128xbf16, #tpu.memory_space<vmem>>, vector<1x1x5x128xbf16>
    %40 = vector.shape_cast %39 : vector<1x1x5x128xbf16> to vector<5x128xbf16>
    %c5_66 = arith.constant 5 : index
    %c256_67 = arith.constant 256 : index
    %41 = vector.load %arg9[%c5_66, %c256_67] : memref<56x1152xbf16, #tpu.memory_space<vmem>>, vector<5x128xbf16>
    tpu.vector_store %arg9[%c5_66, %c256_67], %40 {strides = array<i32>} : memref<56x1152xbf16, #tpu.memory_space<vmem>>, vector<5x128xbf16>,
    %c0_68 = arith.constant 0 : index
    %c2_69 = arith.constant 2 : index
    %c0_70 = arith.constant 0 : index
    %c0_71 = arith.constant 0 : index
    %42 = vector.load %arg1[%c0_68, %c2_69, %c0_70, %c0_71] : memref<2x7x7x128xbf16, #tpu.memory_space<vmem>>, vector<1x1x5x128xbf16>
    %43 = vector.shape_cast %42 : vector<1x1x5x128xbf16> to vector<5x128xbf16>
    %c5_72 = arith.constant 5 : index
    %c384_73 = arith.constant 384 : index
    %44 = vector.load %arg9[%c5_72, %c384_73] : memref<56x1152xbf16, #tpu.memory_space<vmem>>, vector<5x128xbf16>
    tpu.vector_store %arg9[%c5_72, %c384_73], %43 {strides = array<i32>} : memref<56x1152xbf16, #tpu.memory_space<vmem>>, vector<5x128xbf16>,
    %c0_74 = arith.constant 0 : index
    %c2_75 = arith.constant 2 : index
    %c1_76 = arith.constant 1 : index
    %c0_77 = arith.constant 0 : index
    %45 = vector.load %arg1[%c0_74, %c2_75, %c1_76, %c0_77] : memref<2x7x7x128xbf16, #tpu.memory_space<vmem>>, vector<1x1x5x128xbf16>
    %46 = vector.shape_cast %45 : vector<1x1x5x128xbf16> to vector<5x128xbf16>
    %c5_78 = arith.constant 5 : index
    %c512_79 = arith.constant 512 : index
    %47 = vector.load %arg9[%c5_78, %c512_79] : memref<56x1152xbf16, #tpu.memory_space<vmem>>, vector<5x128xbf16>
    tpu.vector_store %arg9[%c5_78, %c512_79], %46 {strides = array<i32>} : memref<56x1152xbf16, #tpu.memory_space<vmem>>, vector<5x128xbf16>,
    %c0_80 = arith.constant 0 : index
    %c2_81 = arith.constant 2 : index
    %c2_82 = arith.constant 2 : index
    %c0_83 = arith.constant 0 : index
    %48 = vector.load %arg1[%c0_80, %c2_81, %c2_82, %c0_83] : memref<2x7x7x128xbf16, #tpu.memory_space<vmem>>, vector<1x1x5x128xbf16>
    %49 = vector.shape_cast %48 : vector<1x1x5x128xbf16> to vector<5x128xbf16>
    %c5_84 = arith.constant 5 : index
    %c640_85 = arith.constant 640 : index
    %50 = vector.load %arg9[%c5_84, %c640_85] : memref<56x1152xbf16, #tpu.memory_space<vmem>>, vector<5x128xbf16>
    tpu.vector_store %arg9[%c5_84, %c640_85], %49 {strides = array<i32>} : memref<56x1152xbf16, #tpu.memory_space<vmem>>, vector<5x128xbf16>,
    %c0_86 = arith.constant 0 : index
    %c3 = arith.constant 3 : index
    %c0_87 = arith.constant 0 : index
    %c0_88 = arith.constant 0 : index
    %51 = vector.load %arg1[%c0_86, %c3, %c0_87, %c0_88] : memref<2x7x7x128xbf16, #tpu.memory_space<vmem>>, vector<1x1x5x128xbf16>
    %52 = vector.shape_cast %51 : vector<1x1x5x128xbf16> to vector<5x128xbf16>
    %c5_89 = arith.constant 5 : index
    %c768_90 = arith.constant 768 : index
    %53 = vector.load %arg9[%c5_89, %c768_90] : memref<56x1152xbf16, #tpu.memory_space<vmem>>, vector<5x128xbf16>
    tpu.vector_store %arg9[%c5_89, %c768_90], %52 {strides = array<i32>} : memref<56x1152xbf16, #tpu.memory_space<vmem>>, vector<5x128xbf16>,
    %c0_91 = arith.constant 0 : index
    %c3_92 = arith.constant 3 : index
    %c1_93 = arith.constant 1 : index
    %c0_94 = arith.constant 0 : index
    %54 = vector.load %arg1[%c0_91, %c3_92, %c1_93, %c0_94] : memref<2x7x7x128xbf16, #tpu.memory_space<vmem>>, vector<1x1x5x128xbf16>
    %55 = vector.shape_cast %54 : vector<1x1x5x128xbf16> to vector<5x128xbf16>
    %c5_95 = arith.constant 5 : index
    %c896_96 = arith.constant 896 : index
    %56 = vector.load %arg9[%c5_95, %c896_96] : memref<56x1152xbf16, #tpu.memory_space<vmem>>, vector<5x128xbf16>
    tpu.vector_store %arg9[%c5_95, %c896_96], %55 {strides = array<i32>} : memref<56x1152xbf16, #tpu.memory_space<vmem>>, vector<5x128xbf16>,
    %c0_97 = arith.constant 0 : index
    %c3_98 = arith.constant 3 : index
    %c2_99 = arith.constant 2 : index
    %c0_100 = arith.constant 0 : index
    %57 = vector.load %arg1[%c0_97, %c3_98, %c2_99, %c0_100] : memref<2x7x7x128xbf16, #tpu.memory_space<vmem>>, vector<1x1x5x128xbf16>
    %58 = vector.shape_cast %57 : vector<1x1x5x128xbf16> to vector<5x128xbf16>
    %c5_101 = arith.constant 5 : index
    %c1024_102 = arith.constant 1024 : index
    %59 = vector.load %arg9[%c5_101, %c1024_102] : memref<56x1152xbf16, #tpu.memory_space<vmem>>, vector<5x128xbf16>
    tpu.vector_store %arg9[%c5_101, %c1024_102], %58 {strides = array<i32>} : memref<56x1152xbf16, #tpu.memory_space<vmem>>, vector<5x128xbf16>,
    %c0_103 = arith.constant 0 : index
    %c2_104 = arith.constant 2 : index
    %c0_105 = arith.constant 0 : index
    %c0_106 = arith.constant 0 : index
    %60 = vector.load %arg1[%c0_103, %c2_104, %c0_105, %c0_106] : memref<2x7x7x128xbf16, #tpu.memory_space<vmem>>, vector<1x1x5x128xbf16>
    %61 = vector.shape_cast %60 : vector<1x1x5x128xbf16> to vector<5x128xbf16>
    %c10 = arith.constant 10 : index
    %c0_107 = arith.constant 0 : index
    %62 = vector.load %arg9[%c10, %c0_107] : memref<56x1152xbf16, #tpu.memory_space<vmem>>, vector<5x128xbf16>
    tpu.vector_store %arg9[%c10, %c0_107], %61 {strides = array<i32>} : memref<56x1152xbf16, #tpu.memory_space<vmem>>, vector<5x128xbf16>,
    %c0_108 = arith.constant 0 : index
    %c2_109 = arith.constant 2 : index
    %c1_110 = arith.constant 1 : index
    %c0_111 = arith.constant 0 : index
    %63 = vector.load %arg1[%c0_108, %c2_109, %c1_110, %c0_111] : memref<2x7x7x128xbf16, #tpu.memory_space<vmem>>, vector<1x1x5x128xbf16>
    %64 = vector.shape_cast %63 : vector<1x1x5x128xbf16> to vector<5x128xbf16>
    %c10_112 = arith.constant 10 : index
    %c128_113 = arith.constant 128 : index
    %65 = vector.load %arg9[%c10_112, %c128_113] : memref<56x1152xbf16, #tpu.memory_space<vmem>>, vector<5x128xbf16>
    tpu.vector_store %arg9[%c10_112, %c128_113], %64 {strides = array<i32>} : memref<56x1152xbf16, #tpu.memory_space<vmem>>, vector<5x128xbf16>,
    %c0_114 = arith.constant 0 : index
    %c2_115 = arith.constant 2 : index
    %c2_116 = arith.constant 2 : index
    %c0_117 = arith.constant 0 : index
    %66 = vector.load %arg1[%c0_114, %c2_115, %c2_116, %c0_117] : memref<2x7x7x128xbf16, #tpu.memory_space<vmem>>, vector<1x1x5x128xbf16>
    %67 = vector.shape_cast %66 : vector<1x1x5x128xbf16> to vector<5x128xbf16>
    %c10_118 = arith.constant 10 : index
    %c256_119 = arith.constant 256 : index
    %68 = vector.load %arg9[%c10_118, %c256_119] : memref<56x1152xbf16, #tpu.memory_space<vmem>>, vector<5x128xbf16>
    tpu.vector_store %arg9[%c10_118, %c256_119], %67 {strides = array<i32>} : memref<56x1152xbf16, #tpu.memory_space<vmem>>, vector<5x128xbf16>,
    %c0_120 = arith.constant 0 : index
    %c3_121 = arith.constant 3 : index
    %c0_122 = arith.constant 0 : index
    %c0_123 = arith.constant 0 : index
    %69 = vector.load %arg1[%c0_120, %c3_121, %c0_122, %c0_123] : memref<2x7x7x128xbf16, #tpu.memory_space<vmem>>, vector<1x1x5x128xbf16>
    %70 = vector.shape_cast %69 : vector<1x1x5x128xbf16> to vector<5x128xbf16>
    %c10_124 = arith.constant 10 : index
    %c384_125 = arith.constant 384 : index
    %71 = vector.load %arg9[%c10_124, %c384_125] : memref<56x1152xbf16, #tpu.memory_space<vmem>>, vector<5x128xbf16>
    tpu.vector_store %arg9[%c10_124, %c384_125], %70 {strides = array<i32>} : memref<56x1152xbf16, #tpu.memory_space<vmem>>, vector<5x128xbf16>,
    %c0_126 = arith.constant 0 : index
    %c3_127 = arith.constant 3 : index
    %c1_128 = arith.constant 1 : index
    %c0_129 = arith.constant 0 : index
    %72 = vector.load %arg1[%c0_126, %c3_127, %c1_128, %c0_129] : memref<2x7x7x128xbf16, #tpu.memory_space<vmem>>, vector<1x1x5x128xbf16>
    %73 = vector.shape_cast %72 : vector<1x1x5x128xbf16> to vector<5x128xbf16>
    %c10_130 = arith.constant 10 : index
    %c512_131 = arith.constant 512 : index
    %74 = vector.load %arg9[%c10_130, %c512_131] : memref<56x1152xbf16, #tpu.memory_space<vmem>>, vector<5x128xbf16>
    tpu.vector_store %arg9[%c10_130, %c512_131], %73 {strides = array<i32>} : memref<56x1152xbf16, #tpu.memory_space<vmem>>, vector<5x128xbf16>,
    %c0_132 = arith.constant 0 : index
    %c3_133 = arith.constant 3 : index
    %c2_134 = arith.constant 2 : index
    %c0_135 = arith.constant 0 : index
    %75 = vector.load %arg1[%c0_132, %c3_133, %c2_134, %c0_135] : memref<2x7x7x128xbf16, #tpu.memory_space<vmem>>, vector<1x1x5x128xbf16>
    %76 = vector.shape_cast %75 : vector<1x1x5x128xbf16> to vector<5x128xbf16>
    %c10_136 = arith.constant 10 : index
    %c640_137 = arith.constant 640 : index
    %77 = vector.load %arg9[%c10_136, %c640_137] : memref<56x1152xbf16, #tpu.memory_space<vmem>>, vector<5x128xbf16>
    tpu.vector_store %arg9[%c10_136, %c640_137], %76 {strides = array<i32>} : memref<56x1152xbf16, #tpu.memory_space<vmem>>, vector<5x128xbf16>,
    %c0_138 = arith.constant 0 : index
    %c4 = arith.constant 4 : index
    %c0_139 = arith.constant 0 : index
    %c0_140 = arith.constant 0 : index
    %78 = vector.load %arg1[%c0_138, %c4, %c0_139, %c0_140] : memref<2x7x7x128xbf16, #tpu.memory_space<vmem>>, vector<1x1x5x128xbf16>
    %79 = vector.shape_cast %78 : vector<1x1x5x128xbf16> to vector<5x128xbf16>
    %c10_141 = arith.constant 10 : index
    %c768_142 = arith.constant 768 : index
    %80 = vector.load %arg9[%c10_141, %c768_142] : memref<56x1152xbf16, #tpu.memory_space<vmem>>, vector<5x128xbf16>
    tpu.vector_store %arg9[%c10_141, %c768_142], %79 {strides = array<i32>} : memref<56x1152xbf16, #tpu.memory_space<vmem>>, vector<5x128xbf16>,
    %c0_143 = arith.constant 0 : index
    %c4_144 = arith.constant 4 : index
    %c1_145 = arith.constant 1 : index
    %c0_146 = arith.constant 0 : index
    %81 = vector.load %arg1[%c0_143, %c4_144, %c1_145, %c0_146] : memref<2x7x7x128xbf16, #tpu.memory_space<vmem>>, vector<1x1x5x128xbf16>
    %82 = vector.shape_cast %81 : vector<1x1x5x128xbf16> to vector<5x128xbf16>
    %c10_147 = arith.constant 10 : index
    %c896_148 = arith.constant 896 : index
    %83 = vector.load %arg9[%c10_147, %c896_148] : memref<56x1152xbf16, #tpu.memory_space<vmem>>, vector<5x128xbf16>
    tpu.vector_store %arg9[%c10_147, %c896_148], %82 {strides = array<i32>} : memref<56x1152xbf16, #tpu.memory_space<vmem>>, vector<5x128xbf16>,
    %c0_149 = arith.constant 0 : index
    %c4_150 = arith.constant 4 : index
    %c2_151 = arith.constant 2 : index
    %c0_152 = arith.constant 0 : index
    %84 = vector.load %arg1[%c0_149, %c4_150, %c2_151, %c0_152] : memref<2x7x7x128xbf16, #tpu.memory_space<vmem>>, vector<1x1x5x128xbf16>
    %85 = vector.shape_cast %84 : vector<1x1x5x128xbf16> to vector<5x128xbf16>
    %c10_153 = arith.constant 10 : index
    %c1024_154 = arith.constant 1024 : index
    %86 = vector.load %arg9[%c10_153, %c1024_154] : memref<56x1152xbf16, #tpu.memory_space<vmem>>, vector<5x128xbf16>
    tpu.vector_store %arg9[%c10_153, %c1024_154], %85 {strides = array<i32>} : memref<56x1152xbf16, #tpu.memory_space<vmem>>, vector<5x128xbf16>,
    %c0_155 = arith.constant 0 : index
    %c3_156 = arith.constant 3 : index
    %c0_157 = arith.constant 0 : index
    %c0_158 = arith.constant 0 : index
    %87 = vector.load %arg1[%c0_155, %c3_156, %c0_157, %c0_158] : memref<2x7x7x128xbf16, #tpu.memory_space<vmem>>, vector<1x1x5x128xbf16>
    %88 = vector.shape_cast %87 : vector<1x1x5x128xbf16> to vector<5x128xbf16>
    %c15 = arith.constant 15 : index
    %c0_159 = arith.constant 0 : index
    %89 = vector.load %arg9[%c15, %c0_159] : memref<56x1152xbf16, #tpu.memory_space<vmem>>, vector<5x128xbf16>
    tpu.vector_store %arg9[%c15, %c0_159], %88 {strides = array<i32>} : memref<56x1152xbf16, #tpu.memory_space<vmem>>, vector<5x128xbf16>,
    %c0_160 = arith.constant 0 : index
    %c3_161 = arith.constant 3 : index
    %c1_162 = arith.constant 1 : index
    %c0_163 = arith.constant 0 : index
    %90 = vector.load %arg1[%c0_160, %c3_161, %c1_162, %c0_163] : memref<2x7x7x128xbf16, #tpu.memory_space<vmem>>, vector<1x1x5x128xbf16>
    %91 = vector.shape_cast %90 : vector<1x1x5x128xbf16> to vector<5x128xbf16>
    %c15_164 = arith.constant 15 : index
    %c128_165 = arith.constant 128 : index
    %92 = vector.load %arg9[%c15_164, %c128_165] : memref<56x1152xbf16, #tpu.memory_space<vmem>>, vector<5x128xbf16>
    tpu.vector_store %arg9[%c15_164, %c128_165], %91 {strides = array<i32>} : memref<56x1152xbf16, #tpu.memory_space<vmem>>, vector<5x128xbf16>,
    %c0_166 = arith.constant 0 : index
    %c3_167 = arith.constant 3 : index
    %c2_168 = arith.constant 2 : index
    %c0_169 = arith.constant 0 : index
    %93 = vector.load %arg1[%c0_166, %c3_167, %c2_168, %c0_169] : memref<2x7x7x128xbf16, #tpu.memory_space<vmem>>, vector<1x1x5x128xbf16>
    %94 = vector.shape_cast %93 : vector<1x1x5x128xbf16> to vector<5x128xbf16>
    %c15_170 = arith.constant 15 : index
    %c256_171 = arith.constant 256 : index
    %95 = vector.load %arg9[%c15_170, %c256_171] : memref<56x1152xbf16, #tpu.memory_space<vmem>>, vector<5x128xbf16>
    tpu.vector_store %arg9[%c15_170, %c256_171], %94 {strides = array<i32>} : memref<56x1152xbf16, #tpu.memory_space<vmem>>, vector<5x128xbf16>,
    %c0_172 = arith.constant 0 : index
    %c4_173 = arith.constant 4 : index
    %c0_174 = arith.constant 0 : index
    %c0_175 = arith.constant 0 : index
    %96 = vector.load %arg1[%c0_172, %c4_173, %c0_174, %c0_175] : memref<2x7x7x128xbf16, #tpu.memory_space<vmem>>, vector<1x1x5x128xbf16>
    %97 = vector.shape_cast %96 : vector<1x1x5x128xbf16> to vector<5x128xbf16>
    %c15_176 = arith.constant 15 : index
    %c384_177 = arith.constant 384 : index
    %98 = vector.load %arg9[%c15_176, %c384_177] : memref<56x1152xbf16, #tpu.memory_space<vmem>>, vector<5x128xbf16>
    tpu.vector_store %arg9[%c15_176, %c384_177], %97 {strides = array<i32>} : memref<56x1152xbf16, #tpu.memory_space<vmem>>, vector<5x128xbf16>,
    %c0_178 = arith.constant 0 : index
    %c4_179 = arith.constant 4 : index
    %c1_180 = arith.constant 1 : index
    %c0_181 = arith.constant 0 : index
    %99 = vector.load %arg1[%c0_178, %c4_179, %c1_180, %c0_181] : memref<2x7x7x128xbf16, #tpu.memory_space<vmem>>, vector<1x1x5x128xbf16>
    %100 = vector.shape_cast %99 : vector<1x1x5x128xbf16> to vector<5x128xbf16>
    %c15_182 = arith.constant 15 : index
    %c512_183 = arith.constant 512 : index
    %101 = vector.load %arg9[%c15_182, %c512_183] : memref<56x1152xbf16, #tpu.memory_space<vmem>>, vector<5x128xbf16>
    tpu.vector_store %arg9[%c15_182, %c512_183], %100 {strides = array<i32>} : memref<56x1152xbf16, #tpu.memory_space<vmem>>, vector<5x128xbf16>,
    %c0_184 = arith.constant 0 : index
    %c4_185 = arith.constant 4 : index
    %c2_186 = arith.constant 2 : index
    %c0_187 = arith.constant 0 : index
    %102 = vector.load %arg1[%c0_184, %c4_185, %c2_186, %c0_187] : memref<2x7x7x128xbf16, #tpu.memory_space<vmem>>, vector<1x1x5x128xbf16>
    %103 = vector.shape_cast %102 : vector<1x1x5x128xbf16> to vector<5x128xbf16>
    %c15_188 = arith.constant 15 : index
    %c640_189 = arith.constant 640 : index
    %104 = vector.load %arg9[%c15_188, %c640_189] : memref<56x1152xbf16, #tpu.memory_space<vmem>>, vector<5x128xbf16>
    tpu.vector_store %arg9[%c15_188, %c640_189], %103 {strides = array<i32>} : memref<56x1152xbf16, #tpu.memory_space<vmem>>, vector<5x128xbf16>,
    %c0_190 = arith.constant 0 : index
    %c5_191 = arith.constant 5 : index
    %c0_192 = arith.constant 0 : index
    %c0_193 = arith.constant 0 : index
    %105 = vector.load %arg1[%c0_190, %c5_191, %c0_192, %c0_193] : memref<2x7x7x128xbf16, #tpu.memory_space<vmem>>, vector<1x1x5x128xbf16>
    %106 = vector.shape_cast %105 : vector<1x1x5x128xbf16> to vector<5x128xbf16>
    %c15_194 = arith.constant 15 : index
    %c768_195 = arith.constant 768 : index
    %107 = vector.load %arg9[%c15_194, %c768_195] : memref<56x1152xbf16, #tpu.memory_space<vmem>>, vector<5x128xbf16>
    tpu.vector_store %arg9[%c15_194, %c768_195], %106 {strides = array<i32>} : memref<56x1152xbf16, #tpu.memory_space<vmem>>, vector<5x128xbf16>,
    %c0_196 = arith.constant 0 : index
    %c5_197 = arith.constant 5 : index
    %c1_198 = arith.constant 1 : index
    %c0_199 = arith.constant 0 : index
    %108 = vector.load %arg1[%c0_196, %c5_197, %c1_198, %c0_199] : memref<2x7x7x128xbf16, #tpu.memory_space<vmem>>, vector<1x1x5x128xbf16>
    %109 = vector.shape_cast %108 : vector<1x1x5x128xbf16> to vector<5x128xbf16>
    %c15_200 = arith.constant 15 : index
    %c896_201 = arith.constant 896 : index
    %110 = vector.load %arg9[%c15_200, %c896_201] : memref<56x1152xbf16, #tpu.memory_space<vmem>>, vector<5x128xbf16>
    tpu.vector_store %arg9[%c15_200, %c896_201], %109 {strides = array<i32>} : memref<56x1152xbf16, #tpu.memory_space<vmem>>, vector<5x128xbf16>,
    %c0_202 = arith.constant 0 : index
    %c5_203 = arith.constant 5 : index
    %c2_204 = arith.constant 2 : index
    %c0_205 = arith.constant 0 : index
    %111 = vector.load %arg1[%c0_202, %c5_203, %c2_204, %c0_205] : memref<2x7x7x128xbf16, #tpu.memory_space<vmem>>, vector<1x1x5x128xbf16>
    %112 = vector.shape_cast %111 : vector<1x1x5x128xbf16> to vector<5x128xbf16>
    %c15_206 = arith.constant 15 : index
    %c1024_207 = arith.constant 1024 : index
    %113 = vector.load %arg9[%c15_206, %c1024_207] : memref<56x1152xbf16, #tpu.memory_space<vmem>>, vector<5x128xbf16>
    tpu.vector_store %arg9[%c15_206, %c1024_207], %112 {strides = array<i32>} : memref<56x1152xbf16, #tpu.memory_space<vmem>>, vector<5x128xbf16>,
    %c0_208 = arith.constant 0 : index
    %c4_209 = arith.constant 4 : index
    %c0_210 = arith.constant 0 : index
    %c0_211 = arith.constant 0 : index
    %114 = vector.load %arg1[%c0_208, %c4_209, %c0_210, %c0_211] : memref<2x7x7x128xbf16, #tpu.memory_space<vmem>>, vector<1x1x5x128xbf16>
    %115 = vector.shape_cast %114 : vector<1x1x5x128xbf16> to vector<5x128xbf16>
    %c20 = arith.constant 20 : index
    %c0_212 = arith.constant 0 : index
    %116 = vector.load %arg9[%c20, %c0_212] : memref<56x1152xbf16, #tpu.memory_space<vmem>>, vector<5x128xbf16>
    tpu.vector_store %arg9[%c20, %c0_212], %115 {strides = array<i32>} : memref<56x1152xbf16, #tpu.memory_space<vmem>>, vector<5x128xbf16>,
    %c0_213 = arith.constant 0 : index
    %c4_214 = arith.constant 4 : index
    %c1_215 = arith.constant 1 : index
    %c0_216 = arith.constant 0 : index
    %117 = vector.load %arg1[%c0_213, %c4_214, %c1_215, %c0_216] : memref<2x7x7x128xbf16, #tpu.memory_space<vmem>>, vector<1x1x5x128xbf16>
    %118 = vector.shape_cast %117 : vector<1x1x5x128xbf16> to vector<5x128xbf16>
    %c20_217 = arith.constant 20 : index
    %c128_218 = arith.constant 128 : index
    %119 = vector.load %arg9[%c20_217, %c128_218] : memref<56x1152xbf16, #tpu.memory_space<vmem>>, vector<5x128xbf16>
    tpu.vector_store %arg9[%c20_217, %c128_218], %118 {strides = array<i32>} : memref<56x1152xbf16, #tpu.memory_space<vmem>>, vector<5x128xbf16>,
    %c0_219 = arith.constant 0 : index
    %c4_220 = arith.constant 4 : index
    %c2_221 = arith.constant 2 : index
    %c0_222 = arith.constant 0 : index
    %120 = vector.load %arg1[%c0_219, %c4_220, %c2_221, %c0_222] : memref<2x7x7x128xbf16, #tpu.memory_space<vmem>>, vector<1x1x5x128xbf16>
    %121 = vector.shape_cast %120 : vector<1x1x5x128xbf16> to vector<5x128xbf16>
    %c20_223 = arith.constant 20 : index
    %c256_224 = arith.constant 256 : index
    %122 = vector.load %arg9[%c20_223, %c256_224] : memref<56x1152xbf16, #tpu.memory_space<vmem>>, vector<5x128xbf16>
    tpu.vector_store %arg9[%c20_223, %c256_224], %121 {strides = array<i32>} : memref<56x1152xbf16, #tpu.memory_space<vmem>>, vector<5x128xbf16>,
    %c0_225 = arith.constant 0 : index
    %c5_226 = arith.constant 5 : index
    %c0_227 = arith.constant 0 : index
    %c0_228 = arith.constant 0 : index
    %123 = vector.load %arg1[%c0_225, %c5_226, %c0_227, %c0_228] : memref<2x7x7x128xbf16, #tpu.memory_space<vmem>>, vector<1x1x5x128xbf16>
    %124 = vector.shape_cast %123 : vector<1x1x5x128xbf16> to vector<5x128xbf16>
    %c20_229 = arith.constant 20 : index
    %c384_230 = arith.constant 384 : index
    %125 = vector.load %arg9[%c20_229, %c384_230] : memref<56x1152xbf16, #tpu.memory_space<vmem>>, vector<5x128xbf16>
    tpu.vector_store %arg9[%c20_229, %c384_230], %124 {strides = array<i32>} : memref<56x1152xbf16, #tpu.memory_space<vmem>>, vector<5x128xbf16>,
    %c0_231 = arith.constant 0 : index
    %c5_232 = arith.constant 5 : index
    %c1_233 = arith.constant 1 : index
    %c0_234 = arith.constant 0 : index
    %126 = vector.load %arg1[%c0_231, %c5_232, %c1_233, %c0_234] : memref<2x7x7x128xbf16, #tpu.memory_space<vmem>>, vector<1x1x5x128xbf16>
    %127 = vector.shape_cast %126 : vector<1x1x5x128xbf16> to vector<5x128xbf16>
    %c20_235 = arith.constant 20 : index
    %c512_236 = arith.constant 512 : index
    %128 = vector.load %arg9[%c20_235, %c512_236] : memref<56x1152xbf16, #tpu.memory_space<vmem>>, vector<5x128xbf16>
    tpu.vector_store %arg9[%c20_235, %c512_236], %127 {strides = array<i32>} : memref<56x1152xbf16, #tpu.memory_space<vmem>>, vector<5x128xbf16>,
    %c0_237 = arith.constant 0 : index
    %c5_238 = arith.constant 5 : index
    %c2_239 = arith.constant 2 : index
    %c0_240 = arith.constant 0 : index
    %129 = vector.load %arg1[%c0_237, %c5_238, %c2_239, %c0_240] : memref<2x7x7x128xbf16, #tpu.memory_space<vmem>>, vector<1x1x5x128xbf16>
    %130 = vector.shape_cast %129 : vector<1x1x5x128xbf16> to vector<5x128xbf16>
    %c20_241 = arith.constant 20 : index
    %c640_242 = arith.constant 640 : index
    %131 = vector.load %arg9[%c20_241, %c640_242] : memref<56x1152xbf16, #tpu.memory_space<vmem>>, vector<5x128xbf16>
    tpu.vector_store %arg9[%c20_241, %c640_242], %130 {strides = array<i32>} : memref<56x1152xbf16, #tpu.memory_space<vmem>>, vector<5x128xbf16>,
    %c0_243 = arith.constant 0 : index
    %c6 = arith.constant 6 : index
    %c0_244 = arith.constant 0 : index
    %c0_245 = arith.constant 0 : index
    %132 = vector.load %arg1[%c0_243, %c6, %c0_244, %c0_245] : memref<2x7x7x128xbf16, #tpu.memory_space<vmem>>, vector<1x1x5x128xbf16>
    %133 = vector.shape_cast %132 : vector<1x1x5x128xbf16> to vector<5x128xbf16>
    %c20_246 = arith.constant 20 : index
    %c768_247 = arith.constant 768 : index
    %134 = vector.load %arg9[%c20_246, %c768_247] : memref<56x1152xbf16, #tpu.memory_space<vmem>>, vector<5x128xbf16>
    tpu.vector_store %arg9[%c20_246, %c768_247], %133 {strides = array<i32>} : memref<56x1152xbf16, #tpu.memory_space<vmem>>, vector<5x128xbf16>,
    %c0_248 = arith.constant 0 : index
    %c6_249 = arith.constant 6 : index
    %c1_250 = arith.constant 1 : index
    %c0_251 = arith.constant 0 : index
    %135 = vector.load %arg1[%c0_248, %c6_249, %c1_250, %c0_251] : memref<2x7x7x128xbf16, #tpu.memory_space<vmem>>, vector<1x1x5x128xbf16>
    %136 = vector.shape_cast %135 : vector<1x1x5x128xbf16> to vector<5x128xbf16>
    %c20_252 = arith.constant 20 : index
    %c896_253 = arith.constant 896 : index
    %137 = vector.load %arg9[%c20_252, %c896_253] : memref<56x1152xbf16, #tpu.memory_space<vmem>>, vector<5x128xbf16>
    tpu.vector_store %arg9[%c20_252, %c896_253], %136 {strides = array<i32>} : memref<56x1152xbf16, #tpu.memory_space<vmem>>, vector<5x128xbf16>,
    %c0_254 = arith.constant 0 : index
    %c6_255 = arith.constant 6 : index
    %c2_256 = arith.constant 2 : index
    %c0_257 = arith.constant 0 : index
    %138 = vector.load %arg1[%c0_254, %c6_255, %c2_256, %c0_257] : memref<2x7x7x128xbf16, #tpu.memory_space<vmem>>, vector<1x1x5x128xbf16>
    %139 = vector.shape_cast %138 : vector<1x1x5x128xbf16> to vector<5x128xbf16>
    %c20_258 = arith.constant 20 : index
    %c1024_259 = arith.constant 1024 : index
    %140 = vector.load %arg9[%c20_258, %c1024_259] : memref<56x1152xbf16, #tpu.memory_space<vmem>>, vector<5x128xbf16>
    tpu.vector_store %arg9[%c20_258, %c1024_259], %139 {strides = array<i32>} : memref<56x1152xbf16, #tpu.memory_space<vmem>>, vector<5x128xbf16>,
    %c1_260 = arith.constant 1 : index
    %c0_261 = arith.constant 0 : index
    %c0_262 = arith.constant 0 : index
    %c0_263 = arith.constant 0 : index
    %141 = vector.load %arg1[%c1_260, %c0_261, %c0_262, %c0_263] : memref<2x7x7x128xbf16, #tpu.memory_space<vmem>>, vector<1x1x5x128xbf16>
    %142 = vector.shape_cast %141 : vector<1x1x5x128xbf16> to vector<5x128xbf16>
    %c25 = arith.constant 25 : index
    %c0_264 = arith.constant 0 : index
    %143 = vector.load %arg9[%c25, %c0_264] : memref<56x1152xbf16, #tpu.memory_space<vmem>>, vector<5x128xbf16>
    tpu.vector_store %arg9[%c25, %c0_264], %142 {strides = array<i32>} : memref<56x1152xbf16, #tpu.memory_space<vmem>>, vector<5x128xbf16>,
    %c1_265 = arith.constant 1 : index
    %c0_266 = arith.constant 0 : index
    %c1_267 = arith.constant 1 : index
    %c0_268 = arith.constant 0 : index
    %144 = vector.load %arg1[%c1_265, %c0_266, %c1_267, %c0_268] : memref<2x7x7x128xbf16, #tpu.memory_space<vmem>>, vector<1x1x5x128xbf16>
    %145 = vector.shape_cast %144 : vector<1x1x5x128xbf16> to vector<5x128xbf16>
    %c25_269 = arith.constant 25 : index
    %c128_270 = arith.constant 128 : index
    %146 = vector.load %arg9[%c25_269, %c128_270] : memref<56x1152xbf16, #tpu.memory_space<vmem>>, vector<5x128xbf16>
    tpu.vector_store %arg9[%c25_269, %c128_270], %145 {strides = array<i32>} : memref<56x1152xbf16, #tpu.memory_space<vmem>>, vector<5x128xbf16>,
    %c1_271 = arith.constant 1 : index
    %c0_272 = arith.constant 0 : index
    %c2_273 = arith.constant 2 : index
    %c0_274 = arith.constant 0 : index
    %147 = vector.load %arg1[%c1_271, %c0_272, %c2_273, %c0_274] : memref<2x7x7x128xbf16, #tpu.memory_space<vmem>>, vector<1x1x5x128xbf16>
    %148 = vector.shape_cast %147 : vector<1x1x5x128xbf16> to vector<5x128xbf16>
    %c25_275 = arith.constant 25 : index
    %c256_276 = arith.constant 256 : index
    %149 = vector.load %arg9[%c25_275, %c256_276] : memref<56x1152xbf16, #tpu.memory_space<vmem>>, vector<5x128xbf16>
    tpu.vector_store %arg9[%c25_275, %c256_276], %148 {strides = array<i32>} : memref<56x1152xbf16, #tpu.memory_space<vmem>>, vector<5x128xbf16>,
    %c1_277 = arith.constant 1 : index
    %c1_278 = arith.constant 1 : index
    %c0_279 = arith.constant 0 : index
    %c0_280 = arith.constant 0 : index
    %150 = vector.load %arg1[%c1_277, %c1_278, %c0_279, %c0_280] : memref<2x7x7x128xbf16, #tpu.memory_space<vmem>>, vector<1x1x5x128xbf16>
    %151 = vector.shape_cast %150 : vector<1x1x5x128xbf16> to vector<5x128xbf16>
    %c25_281 = arith.constant 25 : index
    %c384_282 = arith.constant 384 : index
    %152 = vector.load %arg9[%c25_281, %c384_282] : memref<56x1152xbf16, #tpu.memory_space<vmem>>, vector<5x128xbf16>
    tpu.vector_store %arg9[%c25_281, %c384_282], %151 {strides = array<i32>} : memref<56x1152xbf16, #tpu.memory_space<vmem>>, vector<5x128xbf16>,
    %c1_283 = arith.constant 1 : index
    %c1_284 = arith.constant 1 : index
    %c1_285 = arith.constant 1 : index
    %c0_286 = arith.constant 0 : index
    %153 = vector.load %arg1[%c1_283, %c1_284, %c1_285, %c0_286] : memref<2x7x7x128xbf16, #tpu.memory_space<vmem>>, vector<1x1x5x128xbf16>
    %154 = vector.shape_cast %153 : vector<1x1x5x128xbf16> to vector<5x128xbf16>
    %c25_287 = arith.constant 25 : index
    %c512_288 = arith.constant 512 : index
    %155 = vector.load %arg9[%c25_287, %c512_288] : memref<56x1152xbf16, #tpu.memory_space<vmem>>, vector<5x128xbf16>
    tpu.vector_store %arg9[%c25_287, %c512_288], %154 {strides = array<i32>} : memref<56x1152xbf16, #tpu.memory_space<vmem>>, vector<5x128xbf16>,
    %c1_289 = arith.constant 1 : index
    %c1_290 = arith.constant 1 : index
    %c2_291 = arith.constant 2 : index
    %c0_292 = arith.constant 0 : index
    %156 = vector.load %arg1[%c1_289, %c1_290, %c2_291, %c0_292] : memref<2x7x7x128xbf16, #tpu.memory_space<vmem>>, vector<1x1x5x128xbf16>
    %157 = vector.shape_cast %156 : vector<1x1x5x128xbf16> to vector<5x128xbf16>
    %c25_293 = arith.constant 25 : index
    %c640_294 = arith.constant 640 : index
    %158 = vector.load %arg9[%c25_293, %c640_294] : memref<56x1152xbf16, #tpu.memory_space<vmem>>, vector<5x128xbf16>
    tpu.vector_store %arg9[%c25_293, %c640_294], %157 {strides = array<i32>} : memref<56x1152xbf16, #tpu.memory_space<vmem>>, vector<5x128xbf16>,
    %c1_295 = arith.constant 1 : index
    %c2_296 = arith.constant 2 : index
    %c0_297 = arith.constant 0 : index
    %c0_298 = arith.constant 0 : index
    %159 = vector.load %arg1[%c1_295, %c2_296, %c0_297, %c0_298] : memref<2x7x7x128xbf16, #tpu.memory_space<vmem>>, vector<1x1x5x128xbf16>
    %160 = vector.shape_cast %159 : vector<1x1x5x128xbf16> to vector<5x128xbf16>
    %c25_299 = arith.constant 25 : index
    %c768_300 = arith.constant 768 : index
    %161 = vector.load %arg9[%c25_299, %c768_300] : memref<56x1152xbf16, #tpu.memory_space<vmem>>, vector<5x128xbf16>
    tpu.vector_store %arg9[%c25_299, %c768_300], %160 {strides = array<i32>} : memref<56x1152xbf16, #tpu.memory_space<vmem>>, vector<5x128xbf16>,
    %c1_301 = arith.constant 1 : index
    %c2_302 = arith.constant 2 : index
    %c1_303 = arith.constant 1 : index
    %c0_304 = arith.constant 0 : index
    %162 = vector.load %arg1[%c1_301, %c2_302, %c1_303, %c0_304] : memref<2x7x7x128xbf16, #tpu.memory_space<vmem>>, vector<1x1x5x128xbf16>
    %163 = vector.shape_cast %162 : vector<1x1x5x128xbf16> to vector<5x128xbf16>
    %c25_305 = arith.constant 25 : index
    %c896_306 = arith.constant 896 : index
    %164 = vector.load %arg9[%c25_305, %c896_306] : memref<56x1152xbf16, #tpu.memory_space<vmem>>, vector<5x128xbf16>
    tpu.vector_store %arg9[%c25_305, %c896_306], %163 {strides = array<i32>} : memref<56x1152xbf16, #tpu.memory_space<vmem>>, vector<5x128xbf16>,
    %c1_307 = arith.constant 1 : index
    %c2_308 = arith.constant 2 : index
    %c2_309 = arith.constant 2 : index
    %c0_310 = arith.constant 0 : index
    %165 = vector.load %arg1[%c1_307, %c2_308, %c2_309, %c0_310] : memref<2x7x7x128xbf16, #tpu.memory_space<vmem>>, vector<1x1x5x128xbf16>
    %166 = vector.shape_cast %165 : vector<1x1x5x128xbf16> to vector<5x128xbf16>
    %c25_311 = arith.constant 25 : index
    %c1024_312 = arith.constant 1024 : index
    %167 = vector.load %arg9[%c25_311, %c1024_312] : memref<56x1152xbf16, #tpu.memory_space<vmem>>, vector<5x128xbf16>
    tpu.vector_store %arg9[%c25_311, %c1024_312], %166 {strides = array<i32>} : memref<56x1152xbf16, #tpu.memory_space<vmem>>, vector<5x128xbf16>,
    %c1_313 = arith.constant 1 : index
    %c1_314 = arith.constant 1 : index
    %c0_315 = arith.constant 0 : index
    %c0_316 = arith.constant 0 : index
    %168 = vector.load %arg1[%c1_313, %c1_314, %c0_315, %c0_316] : memref<2x7x7x128xbf16, #tpu.memory_space<vmem>>, vector<1x1x5x128xbf16>
    %169 = vector.shape_cast %168 : vector<1x1x5x128xbf16> to vector<5x128xbf16>
    %c30 = arith.constant 30 : index
    %c0_317 = arith.constant 0 : index
    %170 = vector.load %arg9[%c30, %c0_317] : memref<56x1152xbf16, #tpu.memory_space<vmem>>, vector<5x128xbf16>
    tpu.vector_store %arg9[%c30, %c0_317], %169 {strides = array<i32>} : memref<56x1152xbf16, #tpu.memory_space<vmem>>, vector<5x128xbf16>,
    %c1_318 = arith.constant 1 : index
    %c1_319 = arith.constant 1 : index
    %c1_320 = arith.constant 1 : index
    %c0_321 = arith.constant 0 : index
    %171 = vector.load %arg1[%c1_318, %c1_319, %c1_320, %c0_321] : memref<2x7x7x128xbf16, #tpu.memory_space<vmem>>, vector<1x1x5x128xbf16>
    %172 = vector.shape_cast %171 : vector<1x1x5x128xbf16> to vector<5x128xbf16>
    %c30_322 = arith.constant 30 : index
    %c128_323 = arith.constant 128 : index
    %173 = vector.load %arg9[%c30_322, %c128_323] : memref<56x1152xbf16, #tpu.memory_space<vmem>>, vector<5x128xbf16>
    tpu.vector_store %arg9[%c30_322, %c128_323], %172 {strides = array<i32>} : memref<56x1152xbf16, #tpu.memory_space<vmem>>, vector<5x128xbf16>,
    %c1_324 = arith.constant 1 : index
    %c1_325 = arith.constant 1 : index
    %c2_326 = arith.constant 2 : index
    %c0_327 = arith.constant 0 : index
    %174 = vector.load %arg1[%c1_324, %c1_325, %c2_326, %c0_327] : memref<2x7x7x128xbf16, #tpu.memory_space<vmem>>, vector<1x1x5x128xbf16>
    %175 = vector.shape_cast %174 : vector<1x1x5x128xbf16> to vector<5x128xbf16>
    %c30_328 = arith.constant 30 : index
    %c256_329 = arith.constant 256 : index
    %176 = vector.load %arg9[%c30_328, %c256_329] : memref<56x1152xbf16, #tpu.memory_space<vmem>>, vector<5x128xbf16>
    tpu.vector_store %arg9[%c30_328, %c256_329], %175 {strides = array<i32>} : memref<56x1152xbf16, #tpu.memory_space<vmem>>, vector<5x128xbf16>,
    %c1_330 = arith.constant 1 : index
    %c2_331 = arith.constant 2 : index
    %c0_332 = arith.constant 0 : index
    %c0_333 = arith.constant 0 : index
    %177 = vector.load %arg1[%c1_330, %c2_331, %c0_332, %c0_333] : memref<2x7x7x128xbf16, #tpu.memory_space<vmem>>, vector<1x1x5x128xbf16>
    %178 = vector.shape_cast %177 : vector<1x1x5x128xbf16> to vector<5x128xbf16>
    %c30_334 = arith.constant 30 : index
    %c384_335 = arith.constant 384 : index
    %179 = vector.load %arg9[%c30_334, %c384_335] : memref<56x1152xbf16, #tpu.memory_space<vmem>>, vector<5x128xbf16>
    tpu.vector_store %arg9[%c30_334, %c384_335], %178 {strides = array<i32>} : memref<56x1152xbf16, #tpu.memory_space<vmem>>, vector<5x128xbf16>,
    %c1_336 = arith.constant 1 : index
    %c2_337 = arith.constant 2 : index
    %c1_338 = arith.constant 1 : index
    %c0_339 = arith.constant 0 : index
    %180 = vector.load %arg1[%c1_336, %c2_337, %c1_338, %c0_339] : memref<2x7x7x128xbf16, #tpu.memory_space<vmem>>, vector<1x1x5x128xbf16>
    %181 = vector.shape_cast %180 : vector<1x1x5x128xbf16> to vector<5x128xbf16>
    %c30_340 = arith.constant 30 : index
    %c512_341 = arith.constant 512 : index
    %182 = vector.load %arg9[%c30_340, %c512_341] : memref<56x1152xbf16, #tpu.memory_space<vmem>>, vector<5x128xbf16>
    tpu.vector_store %arg9[%c30_340, %c512_341], %181 {strides = array<i32>} : memref<56x1152xbf16, #tpu.memory_space<vmem>>, vector<5x128xbf16>,
    %c1_342 = arith.constant 1 : index
    %c2_343 = arith.constant 2 : index
    %c2_344 = arith.constant 2 : index
    %c0_345 = arith.constant 0 : index
    %183 = vector.load %arg1[%c1_342, %c2_343, %c2_344, %c0_345] : memref<2x7x7x128xbf16, #tpu.memory_space<vmem>>, vector<1x1x5x128xbf16>
    %184 = vector.shape_cast %183 : vector<1x1x5x128xbf16> to vector<5x128xbf16>
    %c30_346 = arith.constant 30 : index
    %c640_347 = arith.constant 640 : index
    %185 = vector.load %arg9[%c30_346, %c640_347] : memref<56x1152xbf16, #tpu.memory_space<vmem>>, vector<5x128xbf16>
    tpu.vector_store %arg9[%c30_346, %c640_347], %184 {strides = array<i32>} : memref<56x1152xbf16, #tpu.memory_space<vmem>>, vector<5x128xbf16>,
    %c1_348 = arith.constant 1 : index
    %c3_349 = arith.constant 3 : index
    %c0_350 = arith.constant 0 : index
    %c0_351 = arith.constant 0 : index
    %186 = vector.load %arg1[%c1_348, %c3_349, %c0_350, %c0_351] : memref<2x7x7x128xbf16, #tpu.memory_space<vmem>>, vector<1x1x5x128xbf16>
    %187 = vector.shape_cast %186 : vector<1x1x5x128xbf16> to vector<5x128xbf16>
    %c30_352 = arith.constant 30 : index
    %c768_353 = arith.constant 768 : index
    %188 = vector.load %arg9[%c30_352, %c768_353] : memref<56x1152xbf16, #tpu.memory_space<vmem>>, vector<5x128xbf16>
    tpu.vector_store %arg9[%c30_352, %c768_353], %187 {strides = array<i32>} : memref<56x1152xbf16, #tpu.memory_space<vmem>>, vector<5x128xbf16>,
    %c1_354 = arith.constant 1 : index
    %c3_355 = arith.constant 3 : index
    %c1_356 = arith.constant 1 : index
    %c0_357 = arith.constant 0 : index
    %189 = vector.load %arg1[%c1_354, %c3_355, %c1_356, %c0_357] : memref<2x7x7x128xbf16, #tpu.memory_space<vmem>>, vector<1x1x5x128xbf16>
    %190 = vector.shape_cast %189 : vector<1x1x5x128xbf16> to vector<5x128xbf16>
    %c30_358 = arith.constant 30 : index
    %c896_359 = arith.constant 896 : index
    %191 = vector.load %arg9[%c30_358, %c896_359] : memref<56x1152xbf16, #tpu.memory_space<vmem>>, vector<5x128xbf16>
    tpu.vector_store %arg9[%c30_358, %c896_359], %190 {strides = array<i32>} : memref<56x1152xbf16, #tpu.memory_space<vmem>>, vector<5x128xbf16>,
    %c1_360 = arith.constant 1 : index
    %c3_361 = arith.constant 3 : index
    %c2_362 = arith.constant 2 : index
    %c0_363 = arith.constant 0 : index
    %192 = vector.load %arg1[%c1_360, %c3_361, %c2_362, %c0_363] : memref<2x7x7x128xbf16, #tpu.memory_space<vmem>>, vector<1x1x5x128xbf16>
    %193 = vector.shape_cast %192 : vector<1x1x5x128xbf16> to vector<5x128xbf16>
    %c30_364 = arith.constant 30 : index
    %c1024_365 = arith.constant 1024 : index
    %194 = vector.load %arg9[%c30_364, %c1024_365] : memref<56x1152xbf16, #tpu.memory_space<vmem>>, vector<5x128xbf16>
    tpu.vector_store %arg9[%c30_364, %c1024_365], %193 {strides = array<i32>} : memref<56x1152xbf16, #tpu.memory_space<vmem>>, vector<5x128xbf16>,
    %c1_366 = arith.constant 1 : index
    %c2_367 = arith.constant 2 : index
    %c0_368 = arith.constant 0 : index
    %c0_369 = arith.constant 0 : index
    %195 = vector.load %arg1[%c1_366, %c2_367, %c0_368, %c0_369] : memref<2x7x7x128xbf16, #tpu.memory_space<vmem>>, vector<1x1x5x128xbf16>
    %196 = vector.shape_cast %195 : vector<1x1x5x128xbf16> to vector<5x128xbf16>
    %c35 = arith.constant 35 : index
    %c0_370 = arith.constant 0 : index
    %197 = vector.load %arg9[%c35, %c0_370] : memref<56x1152xbf16, #tpu.memory_space<vmem>>, vector<5x128xbf16>
    tpu.vector_store %arg9[%c35, %c0_370], %196 {strides = array<i32>} : memref<56x1152xbf16, #tpu.memory_space<vmem>>, vector<5x128xbf16>,
    %c1_371 = arith.constant 1 : index
    %c2_372 = arith.constant 2 : index
    %c1_373 = arith.constant 1 : index
    %c0_374 = arith.constant 0 : index
    %198 = vector.load %arg1[%c1_371, %c2_372, %c1_373, %c0_374] : memref<2x7x7x128xbf16, #tpu.memory_space<vmem>>, vector<1x1x5x128xbf16>
    %199 = vector.shape_cast %198 : vector<1x1x5x128xbf16> to vector<5x128xbf16>
    %c35_375 = arith.constant 35 : index
    %c128_376 = arith.constant 128 : index
    %200 = vector.load %arg9[%c35_375, %c128_376] : memref<56x1152xbf16, #tpu.memory_space<vmem>>, vector<5x128xbf16>
    tpu.vector_store %arg9[%c35_375, %c128_376], %199 {strides = array<i32>} : memref<56x1152xbf16, #tpu.memory_space<vmem>>, vector<5x128xbf16>,
    %c1_377 = arith.constant 1 : index
    %c2_378 = arith.constant 2 : index
    %c2_379 = arith.constant 2 : index
    %c0_380 = arith.constant 0 : index
    %201 = vector.load %arg1[%c1_377, %c2_378, %c2_379, %c0_380] : memref<2x7x7x128xbf16, #tpu.memory_space<vmem>>, vector<1x1x5x128xbf16>
    %202 = vector.shape_cast %201 : vector<1x1x5x128xbf16> to vector<5x128xbf16>
    %c35_381 = arith.constant 35 : index
    %c256_382 = arith.constant 256 : index
    %203 = vector.load %arg9[%c35_381, %c256_382] : memref<56x1152xbf16, #tpu.memory_space<vmem>>, vector<5x128xbf16>
    tpu.vector_store %arg9[%c35_381, %c256_382], %202 {strides = array<i32>} : memref<56x1152xbf16, #tpu.memory_space<vmem>>, vector<5x128xbf16>,
    %c1_383 = arith.constant 1 : index
    %c3_384 = arith.constant 3 : index
    %c0_385 = arith.constant 0 : index
    %c0_386 = arith.constant 0 : index
    %204 = vector.load %arg1[%c1_383, %c3_384, %c0_385, %c0_386] : memref<2x7x7x128xbf16, #tpu.memory_space<vmem>>, vector<1x1x5x128xbf16>
    %205 = vector.shape_cast %204 : vector<1x1x5x128xbf16> to vector<5x128xbf16>
    %c35_387 = arith.constant 35 : index
    %c384_388 = arith.constant 384 : index
    %206 = vector.load %arg9[%c35_387, %c384_388] : memref<56x1152xbf16, #tpu.memory_space<vmem>>, vector<5x128xbf16>
    tpu.vector_store %arg9[%c35_387, %c384_388], %205 {strides = array<i32>} : memref<56x1152xbf16, #tpu.memory_space<vmem>>, vector<5x128xbf16>,
    %c1_389 = arith.constant 1 : index
    %c3_390 = arith.constant 3 : index
    %c1_391 = arith.constant 1 : index
    %c0_392 = arith.constant 0 : index
    %207 = vector.load %arg1[%c1_389, %c3_390, %c1_391, %c0_392] : memref<2x7x7x128xbf16, #tpu.memory_space<vmem>>, vector<1x1x5x128xbf16>
    %208 = vector.shape_cast %207 : vector<1x1x5x128xbf16> to vector<5x128xbf16>
    %c35_393 = arith.constant 35 : index
    %c512_394 = arith.constant 512 : index
    %209 = vector.load %arg9[%c35_393, %c512_394] : memref<56x1152xbf16, #tpu.memory_space<vmem>>, vector<5x128xbf16>
    tpu.vector_store %arg9[%c35_393, %c512_394], %208 {strides = array<i32>} : memref<56x1152xbf16, #tpu.memory_space<vmem>>, vector<5x128xbf16>,
    %c1_395 = arith.constant 1 : index
    %c3_396 = arith.constant 3 : index
    %c2_397 = arith.constant 2 : index
    %c0_398 = arith.constant 0 : index
    %210 = vector.load %arg1[%c1_395, %c3_396, %c2_397, %c0_398] : memref<2x7x7x128xbf16, #tpu.memory_space<vmem>>, vector<1x1x5x128xbf16>
    %211 = vector.shape_cast %210 : vector<1x1x5x128xbf16> to vector<5x128xbf16>
    %c35_399 = arith.constant 35 : index
    %c640_400 = arith.constant 640 : index
    %212 = vector.load %arg9[%c35_399, %c640_400] : memref<56x1152xbf16, #tpu.memory_space<vmem>>, vector<5x128xbf16>
    tpu.vector_store %arg9[%c35_399, %c640_400], %211 {strides = array<i32>} : memref<56x1152xbf16, #tpu.memory_space<vmem>>, vector<5x128xbf16>,
    %c1_401 = arith.constant 1 : index
    %c4_402 = arith.constant 4 : index
    %c0_403 = arith.constant 0 : index
    %c0_404 = arith.constant 0 : index
    %213 = vector.load %arg1[%c1_401, %c4_402, %c0_403, %c0_404] : memref<2x7x7x128xbf16, #tpu.memory_space<vmem>>, vector<1x1x5x128xbf16>
    %214 = vector.shape_cast %213 : vector<1x1x5x128xbf16> to vector<5x128xbf16>
    %c35_405 = arith.constant 35 : index
    %c768_406 = arith.constant 768 : index
    %215 = vector.load %arg9[%c35_405, %c768_406] : memref<56x1152xbf16, #tpu.memory_space<vmem>>, vector<5x128xbf16>
    tpu.vector_store %arg9[%c35_405, %c768_406], %214 {strides = array<i32>} : memref<56x1152xbf16, #tpu.memory_space<vmem>>, vector<5x128xbf16>,
    %c1_407 = arith.constant 1 : index
    %c4_408 = arith.constant 4 : index
    %c1_409 = arith.constant 1 : index
    %c0_410 = arith.constant 0 : index
    %216 = vector.load %arg1[%c1_407, %c4_408, %c1_409, %c0_410] : memref<2x7x7x128xbf16, #tpu.memory_space<vmem>>, vector<1x1x5x128xbf16>
    %217 = vector.shape_cast %216 : vector<1x1x5x128xbf16> to vector<5x128xbf16>
    %c35_411 = arith.constant 35 : index
    %c896_412 = arith.constant 896 : index
    %218 = vector.load %arg9[%c35_411, %c896_412] : memref<56x1152xbf16, #tpu.memory_space<vmem>>, vector<5x128xbf16>
    tpu.vector_store %arg9[%c35_411, %c896_412], %217 {strides = array<i32>} : memref<56x1152xbf16, #tpu.memory_space<vmem>>, vector<5x128xbf16>,
    %c1_413 = arith.constant 1 : index
    %c4_414 = arith.constant 4 : index
    %c2_415 = arith.constant 2 : index
    %c0_416 = arith.constant 0 : index
    %219 = vector.load %arg1[%c1_413, %c4_414, %c2_415, %c0_416] : memref<2x7x7x128xbf16, #tpu.memory_space<vmem>>, vector<1x1x5x128xbf16>
    %220 = vector.shape_cast %219 : vector<1x1x5x128xbf16> to vector<5x128xbf16>
    %c35_417 = arith.constant 35 : index
    %c1024_418 = arith.constant 1024 : index
    %221 = vector.load %arg9[%c35_417, %c1024_418] : memref<56x1152xbf16, #tpu.memory_space<vmem>>, vector<5x128xbf16>
    tpu.vector_store %arg9[%c35_417, %c1024_418], %220 {strides = array<i32>} : memref<56x1152xbf16, #tpu.memory_space<vmem>>, vector<5x128xbf16>,
    %c1_419 = arith.constant 1 : index
    %c3_420 = arith.constant 3 : index
    %c0_421 = arith.constant 0 : index
    %c0_422 = arith.constant 0 : index
    %222 = vector.load %arg1[%c1_419, %c3_420, %c0_421, %c0_422] : memref<2x7x7x128xbf16, #tpu.memory_space<vmem>>, vector<1x1x5x128xbf16>
    %223 = vector.shape_cast %222 : vector<1x1x5x128xbf16> to vector<5x128xbf16>
    %c40 = arith.constant 40 : index
    %c0_423 = arith.constant 0 : index
    %224 = vector.load %arg9[%c40, %c0_423] : memref<56x1152xbf16, #tpu.memory_space<vmem>>, vector<5x128xbf16>
    tpu.vector_store %arg9[%c40, %c0_423], %223 {strides = array<i32>} : memref<56x1152xbf16, #tpu.memory_space<vmem>>, vector<5x128xbf16>,
    %c1_424 = arith.constant 1 : index
    %c3_425 = arith.constant 3 : index
    %c1_426 = arith.constant 1 : index
    %c0_427 = arith.constant 0 : index
    %225 = vector.load %arg1[%c1_424, %c3_425, %c1_426, %c0_427] : memref<2x7x7x128xbf16, #tpu.memory_space<vmem>>, vector<1x1x5x128xbf16>
    %226 = vector.shape_cast %225 : vector<1x1x5x128xbf16> to vector<5x128xbf16>
    %c40_428 = arith.constant 40 : index
    %c128_429 = arith.constant 128 : index
    %227 = vector.load %arg9[%c40_428, %c128_429] : memref<56x1152xbf16, #tpu.memory_space<vmem>>, vector<5x128xbf16>
    tpu.vector_store %arg9[%c40_428, %c128_429], %226 {strides = array<i32>} : memref<56x1152xbf16, #tpu.memory_space<vmem>>, vector<5x128xbf16>,
    %c1_430 = arith.constant 1 : index
    %c3_431 = arith.constant 3 : index
    %c2_432 = arith.constant 2 : index
    %c0_433 = arith.constant 0 : index
    %228 = vector.load %arg1[%c1_430, %c3_431, %c2_432, %c0_433] : memref<2x7x7x128xbf16, #tpu.memory_space<vmem>>, vector<1x1x5x128xbf16>
    %229 = vector.shape_cast %228 : vector<1x1x5x128xbf16> to vector<5x128xbf16>
    %c40_434 = arith.constant 40 : index
    %c256_435 = arith.constant 256 : index
    %230 = vector.load %arg9[%c40_434, %c256_435] : memref<56x1152xbf16, #tpu.memory_space<vmem>>, vector<5x128xbf16>
    tpu.vector_store %arg9[%c40_434, %c256_435], %229 {strides = array<i32>} : memref<56x1152xbf16, #tpu.memory_space<vmem>>, vector<5x128xbf16>,
    %c1_436 = arith.constant 1 : index
    %c4_437 = arith.constant 4 : index
    %c0_438 = arith.constant 0 : index
    %c0_439 = arith.constant 0 : index
    %231 = vector.load %arg1[%c1_436, %c4_437, %c0_438, %c0_439] : memref<2x7x7x128xbf16, #tpu.memory_space<vmem>>, vector<1x1x5x128xbf16>
    %232 = vector.shape_cast %231 : vector<1x1x5x128xbf16> to vector<5x128xbf16>
    %c40_440 = arith.constant 40 : index
    %c384_441 = arith.constant 384 : index
    %233 = vector.load %arg9[%c40_440, %c384_441] : memref<56x1152xbf16, #tpu.memory_space<vmem>>, vector<5x128xbf16>
    tpu.vector_store %arg9[%c40_440, %c384_441], %232 {strides = array<i32>} : memref<56x1152xbf16, #tpu.memory_space<vmem>>, vector<5x128xbf16>,
    %c1_442 = arith.constant 1 : index
    %c4_443 = arith.constant 4 : index
    %c1_444 = arith.constant 1 : index
    %c0_445 = arith.constant 0 : index
    %234 = vector.load %arg1[%c1_442, %c4_443, %c1_444, %c0_445] : memref<2x7x7x128xbf16, #tpu.memory_space<vmem>>, vector<1x1x5x128xbf16>
    %235 = vector.shape_cast %234 : vector<1x1x5x128xbf16> to vector<5x128xbf16>
    %c40_446 = arith.constant 40 : index
    %c512_447 = arith.constant 512 : index
    %236 = vector.load %arg9[%c40_446, %c512_447] : memref<56x1152xbf16, #tpu.memory_space<vmem>>, vector<5x128xbf16>
    tpu.vector_store %arg9[%c40_446, %c512_447], %235 {strides = array<i32>} : memref<56x1152xbf16, #tpu.memory_space<vmem>>, vector<5x128xbf16>,
    %c1_448 = arith.constant 1 : index
    %c4_449 = arith.constant 4 : index
    %c2_450 = arith.constant 2 : index
    %c0_451 = arith.constant 0 : index
    %237 = vector.load %arg1[%c1_448, %c4_449, %c2_450, %c0_451] : memref<2x7x7x128xbf16, #tpu.memory_space<vmem>>, vector<1x1x5x128xbf16>
    %238 = vector.shape_cast %237 : vector<1x1x5x128xbf16> to vector<5x128xbf16>
    %c40_452 = arith.constant 40 : index
    %c640_453 = arith.constant 640 : index
    %239 = vector.load %arg9[%c40_452, %c640_453] : memref<56x1152xbf16, #tpu.memory_space<vmem>>, vector<5x128xbf16>
    tpu.vector_store %arg9[%c40_452, %c640_453], %238 {strides = array<i32>} : memref<56x1152xbf16, #tpu.memory_space<vmem>>, vector<5x128xbf16>,
    %c1_454 = arith.constant 1 : index
    %c5_455 = arith.constant 5 : index
    %c0_456 = arith.constant 0 : index
    %c0_457 = arith.constant 0 : index
    %240 = vector.load %arg1[%c1_454, %c5_455, %c0_456, %c0_457] : memref<2x7x7x128xbf16, #tpu.memory_space<vmem>>, vector<1x1x5x128xbf16>
    %241 = vector.shape_cast %240 : vector<1x1x5x128xbf16> to vector<5x128xbf16>
    %c40_458 = arith.constant 40 : index
    %c768_459 = arith.constant 768 : index
    %242 = vector.load %arg9[%c40_458, %c768_459] : memref<56x1152xbf16, #tpu.memory_space<vmem>>, vector<5x128xbf16>
    tpu.vector_store %arg9[%c40_458, %c768_459], %241 {strides = array<i32>} : memref<56x1152xbf16, #tpu.memory_space<vmem>>, vector<5x128xbf16>,
    %c1_460 = arith.constant 1 : index
    %c5_461 = arith.constant 5 : index
    %c1_462 = arith.constant 1 : index
    %c0_463 = arith.constant 0 : index
    %243 = vector.load %arg1[%c1_460, %c5_461, %c1_462, %c0_463] : memref<2x7x7x128xbf16, #tpu.memory_space<vmem>>, vector<1x1x5x128xbf16>
    %244 = vector.shape_cast %243 : vector<1x1x5x128xbf16> to vector<5x128xbf16>
    %c40_464 = arith.constant 40 : index
    %c896_465 = arith.constant 896 : index
    %245 = vector.load %arg9[%c40_464, %c896_465] : memref<56x1152xbf16, #tpu.memory_space<vmem>>, vector<5x128xbf16>
    tpu.vector_store %arg9[%c40_464, %c896_465], %244 {strides = array<i32>} : memref<56x1152xbf16, #tpu.memory_space<vmem>>, vector<5x128xbf16>,
    %c1_466 = arith.constant 1 : index
    %c5_467 = arith.constant 5 : index
    %c2_468 = arith.constant 2 : index
    %c0_469 = arith.constant 0 : index
    %246 = vector.load %arg1[%c1_466, %c5_467, %c2_468, %c0_469] : memref<2x7x7x128xbf16, #tpu.memory_space<vmem>>, vector<1x1x5x128xbf16>
    %247 = vector.shape_cast %246 : vector<1x1x5x128xbf16> to vector<5x128xbf16>
    %c40_470 = arith.constant 40 : index
    %c1024_471 = arith.constant 1024 : index
    %248 = vector.load %arg9[%c40_470, %c1024_471] : memref<56x1152xbf16, #tpu.memory_space<vmem>>, vector<5x128xbf16>
    tpu.vector_store %arg9[%c40_470, %c1024_471], %247 {strides = array<i32>} : memref<56x1152xbf16, #tpu.memory_space<vmem>>, vector<5x128xbf16>,
    %c1_472 = arith.constant 1 : index
    %c4_473 = arith.constant 4 : index
    %c0_474 = arith.constant 0 : index
    %c0_475 = arith.constant 0 : index
    %249 = vector.load %arg1[%c1_472, %c4_473, %c0_474, %c0_475] : memref<2x7x7x128xbf16, #tpu.memory_space<vmem>>, vector<1x1x5x128xbf16>
    %250 = vector.shape_cast %249 : vector<1x1x5x128xbf16> to vector<5x128xbf16>
    %c45 = arith.constant 45 : index
    %c0_476 = arith.constant 0 : index
    %251 = vector.load %arg9[%c45, %c0_476] : memref<56x1152xbf16, #tpu.memory_space<vmem>>, vector<5x128xbf16>
    tpu.vector_store %arg9[%c45, %c0_476], %250 {strides = array<i32>} : memref<56x1152xbf16, #tpu.memory_space<vmem>>, vector<5x128xbf16>,
    %c1_477 = arith.constant 1 : index
    %c4_478 = arith.constant 4 : index
    %c1_479 = arith.constant 1 : index
    %c0_480 = arith.constant 0 : index
    %252 = vector.load %arg1[%c1_477, %c4_478, %c1_479, %c0_480] : memref<2x7x7x128xbf16, #tpu.memory_space<vmem>>, vector<1x1x5x128xbf16>
    %253 = vector.shape_cast %252 : vector<1x1x5x128xbf16> to vector<5x128xbf16>
    %c45_481 = arith.constant 45 : index
    %c128_482 = arith.constant 128 : index
    %254 = vector.load %arg9[%c45_481, %c128_482] : memref<56x1152xbf16, #tpu.memory_space<vmem>>, vector<5x128xbf16>
    tpu.vector_store %arg9[%c45_481, %c128_482], %253 {strides = array<i32>} : memref<56x1152xbf16, #tpu.memory_space<vmem>>, vector<5x128xbf16>,
    %c1_483 = arith.constant 1 : index
    %c4_484 = arith.constant 4 : index
    %c2_485 = arith.constant 2 : index
    %c0_486 = arith.constant 0 : index
    %255 = vector.load %arg1[%c1_483, %c4_484, %c2_485, %c0_486] : memref<2x7x7x128xbf16, #tpu.memory_space<vmem>>, vector<1x1x5x128xbf16>
    %256 = vector.shape_cast %255 : vector<1x1x5x128xbf16> to vector<5x128xbf16>
    %c45_487 = arith.constant 45 : index
    %c256_488 = arith.constant 256 : index
    %257 = vector.load %arg9[%c45_487, %c256_488] : memref<56x1152xbf16, #tpu.memory_space<vmem>>, vector<5x128xbf16>
    tpu.vector_store %arg9[%c45_487, %c256_488], %256 {strides = array<i32>} : memref<56x1152xbf16, #tpu.memory_space<vmem>>, vector<5x128xbf16>,
    %c1_489 = arith.constant 1 : index
    %c5_490 = arith.constant 5 : index
    %c0_491 = arith.constant 0 : index
    %c0_492 = arith.constant 0 : index
    %258 = vector.load %arg1[%c1_489, %c5_490, %c0_491, %c0_492] : memref<2x7x7x128xbf16, #tpu.memory_space<vmem>>, vector<1x1x5x128xbf16>
    %259 = vector.shape_cast %258 : vector<1x1x5x128xbf16> to vector<5x128xbf16>
    %c45_493 = arith.constant 45 : index
    %c384_494 = arith.constant 384 : index
    %260 = vector.load %arg9[%c45_493, %c384_494] : memref<56x1152xbf16, #tpu.memory_space<vmem>>, vector<5x128xbf16>
    tpu.vector_store %arg9[%c45_493, %c384_494], %259 {strides = array<i32>} : memref<56x1152xbf16, #tpu.memory_space<vmem>>, vector<5x128xbf16>,
    %c1_495 = arith.constant 1 : index
    %c5_496 = arith.constant 5 : index
    %c1_497 = arith.constant 1 : index
    %c0_498 = arith.constant 0 : index
    %261 = vector.load %arg1[%c1_495, %c5_496, %c1_497, %c0_498] : memref<2x7x7x128xbf16, #tpu.memory_space<vmem>>, vector<1x1x5x128xbf16>
    %262 = vector.shape_cast %261 : vector<1x1x5x128xbf16> to vector<5x128xbf16>
    %c45_499 = arith.constant 45 : index
    %c512_500 = arith.constant 512 : index
    %263 = vector.load %arg9[%c45_499, %c512_500] : memref<56x1152xbf16, #tpu.memory_space<vmem>>, vector<5x128xbf16>
    tpu.vector_store %arg9[%c45_499, %c512_500], %262 {strides = array<i32>} : memref<56x1152xbf16, #tpu.memory_space<vmem>>, vector<5x128xbf16>,
    %c1_501 = arith.constant 1 : index
    %c5_502 = arith.constant 5 : index
    %c2_503 = arith.constant 2 : index
    %c0_504 = arith.constant 0 : index
    %264 = vector.load %arg1[%c1_501, %c5_502, %c2_503, %c0_504] : memref<2x7x7x128xbf16, #tpu.memory_space<vmem>>, vector<1x1x5x128xbf16>
    %265 = vector.shape_cast %264 : vector<1x1x5x128xbf16> to vector<5x128xbf16>
    %c45_505 = arith.constant 45 : index
    %c640_506 = arith.constant 640 : index
    %266 = vector.load %arg9[%c45_505, %c640_506] : memref<56x1152xbf16, #tpu.memory_space<vmem>>, vector<5x128xbf16>
    tpu.vector_store %arg9[%c45_505, %c640_506], %265 {strides = array<i32>} : memref<56x1152xbf16, #tpu.memory_space<vmem>>, vector<5x128xbf16>,
    %c1_507 = arith.constant 1 : index
    %c6_508 = arith.constant 6 : index
    %c0_509 = arith.constant 0 : index
    %c0_510 = arith.constant 0 : index
    %267 = vector.load %arg1[%c1_507, %c6_508, %c0_509, %c0_510] : memref<2x7x7x128xbf16, #tpu.memory_space<vmem>>, vector<1x1x5x128xbf16>
    %268 = vector.shape_cast %267 : vector<1x1x5x128xbf16> to vector<5x128xbf16>
    %c45_511 = arith.constant 45 : index
    %c768_512 = arith.constant 768 : index
    %269 = vector.load %arg9[%c45_511, %c768_512] : memref<56x1152xbf16, #tpu.memory_space<vmem>>, vector<5x128xbf16>
    tpu.vector_store %arg9[%c45_511, %c768_512], %268 {strides = array<i32>} : memref<56x1152xbf16, #tpu.memory_space<vmem>>, vector<5x128xbf16>,
    %c1_513 = arith.constant 1 : index
    %c6_514 = arith.constant 6 : index
    %c1_515 = arith.constant 1 : index
    %c0_516 = arith.constant 0 : index
    %270 = vector.load %arg1[%c1_513, %c6_514, %c1_515, %c0_516] : memref<2x7x7x128xbf16, #tpu.memory_space<vmem>>, vector<1x1x5x128xbf16>
    %271 = vector.shape_cast %270 : vector<1x1x5x128xbf16> to vector<5x128xbf16>
    %c45_517 = arith.constant 45 : index
    %c896_518 = arith.constant 896 : index
    %272 = vector.load %arg9[%c45_517, %c896_518] : memref<56x1152xbf16, #tpu.memory_space<vmem>>, vector<5x128xbf16>
    tpu.vector_store %arg9[%c45_517, %c896_518], %271 {strides = array<i32>} : memref<56x1152xbf16, #tpu.memory_space<vmem>>, vector<5x128xbf16>,
    %c1_519 = arith.constant 1 : index
    %c6_520 = arith.constant 6 : index
    %c2_521 = arith.constant 2 : index
    %c0_522 = arith.constant 0 : index
    %273 = vector.load %arg1[%c1_519, %c6_520, %c2_521, %c0_522] : memref<2x7x7x128xbf16, #tpu.memory_space<vmem>>, vector<1x1x5x128xbf16>
    %274 = vector.shape_cast %273 : vector<1x1x5x128xbf16> to vector<5x128xbf16>
    %c45_523 = arith.constant 45 : index
    %c1024_524 = arith.constant 1024 : index
    %275 = vector.load %arg9[%c45_523, %c1024_524] : memref<56x1152xbf16, #tpu.memory_space<vmem>>, vector<5x128xbf16>
    tpu.vector_store %arg9[%c45_523, %c1024_524], %274 {strides = array<i32>} : memref<56x1152xbf16, #tpu.memory_space<vmem>>, vector<5x128xbf16>,
    %c0_525 = arith.constant 0 : index
    %c0_526 = arith.constant 0 : index
    %276 = vector.load %arg9[%c0_525, %c0_526] : memref<56x1152xbf16, #tpu.memory_space<vmem>>, vector<56x1152xbf16>
    %c0_527 = arith.constant 0 : index
    %c0_528 = arith.constant 0 : index
    %277 = vector.load %arg2[%c0_527, %c0_528] : memref<1152x128xbf16, #tpu.memory_space<vmem>>, vector<1152x128xbf16>
    %cst_529 = arith.constant dense<0.000000e+00> : vector<56x128xf32>
    %278 = tpu.matmul %276, %277, %cst_529 {dimension_numbers = #tpu.dot_dimension_numbers<[1], [0], [0], [1], [0, 0, 1, 1], [], []>} : vector<56x1152xbf16>, vector<1152x128xbf16>, vector<56x128xf32> -> vector<56x128xf32>
    %c0_530 = arith.constant 0 : index
    %c0_531 = arith.constant 0 : index
    %279 = vector.load %arg3[%c0_530, %c0_531] : memref<1x128xf32, #tpu.memory_space<vmem>>, vector<1x128xf32>
    %280 = vector.broadcast %279 : vector<1x128xf32> to vector<56x128xf32>
    %281 = arith.addf %278, %280 : vector<56x128xf32>
    %cst_532 = arith.constant 0.000000e+00 : f32
    %282 = vector.broadcast %cst_532 : f32 to vector<56x128xf32>
    %283 = arith.maximumf %281, %282 : vector<56x128xf32>
    %284 = arith.truncf %283 : vector<56x128xf32> to vector<56x128xbf16>
    %c0_533 = arith.constant 0 : index
    %c0_534 = arith.constant 0 : index
    %285 = vector.load %arg10[%c0_533, %c0_534] : memref<56x128xbf16, #tpu.memory_space<vmem>>, vector<56x128xbf16>
    tpu.vector_store %arg10[%c0_533, %c0_534], %284 {strides = array<i32>} : memref<56x128xbf16, #tpu.memory_space<vmem>>, vector<56x128xbf16>,
    %c0_535 = arith.constant 0 : index
    %c0_536 = arith.constant 0 : index
    %286 = vector.load %arg10[%c0_535, %c0_536] : memref<56x128xbf16, #tpu.memory_space<vmem>>, vector<3x128xbf16>
    %c0_537 = arith.constant 0 : index
    %c0_538 = arith.constant 0 : index
    %287 = vector.load %arg11[%c0_537, %c0_538] : memref<24x1152xbf16, #tpu.memory_space<vmem>>, vector<3x128xbf16>
    tpu.vector_store %arg11[%c0_537, %c0_538], %286 {strides = array<i32>} : memref<24x1152xbf16, #tpu.memory_space<vmem>>, vector<3x128xbf16>,
    %c1_539 = arith.constant 1 : index
    %c0_540 = arith.constant 0 : index
    %288 = vector.load %arg10[%c1_539, %c0_540] : memref<56x128xbf16, #tpu.memory_space<vmem>>, vector<3x128xbf16>
    %c0_541 = arith.constant 0 : index
    %c128_542 = arith.constant 128 : index
    %289 = vector.load %arg11[%c0_541, %c128_542] : memref<24x1152xbf16, #tpu.memory_space<vmem>>, vector<3x128xbf16>
    tpu.vector_store %arg11[%c0_541, %c128_542], %288 {strides = array<i32>} : memref<24x1152xbf16, #tpu.memory_space<vmem>>, vector<3x128xbf16>,
    %c2_543 = arith.constant 2 : index
    %c0_544 = arith.constant 0 : index
    %290 = vector.load %arg10[%c2_543, %c0_544] : memref<56x128xbf16, #tpu.memory_space<vmem>>, vector<3x128xbf16>
    %c0_545 = arith.constant 0 : index
    %c256_546 = arith.constant 256 : index
    %291 = vector.load %arg11[%c0_545, %c256_546] : memref<24x1152xbf16, #tpu.memory_space<vmem>>, vector<3x128xbf16>
    tpu.vector_store %arg11[%c0_545, %c256_546], %290 {strides = array<i32>} : memref<24x1152xbf16, #tpu.memory_space<vmem>>, vector<3x128xbf16>,
    %c5_547 = arith.constant 5 : index
    %c0_548 = arith.constant 0 : index
    %292 = vector.load %arg10[%c5_547, %c0_548] : memref<56x128xbf16, #tpu.memory_space<vmem>>, vector<3x128xbf16>
    %c0_549 = arith.constant 0 : index
    %c384_550 = arith.constant 384 : index
    %293 = vector.load %arg11[%c0_549, %c384_550] : memref<24x1152xbf16, #tpu.memory_space<vmem>>, vector<3x128xbf16>
    tpu.vector_store %arg11[%c0_549, %c384_550], %292 {strides = array<i32>} : memref<24x1152xbf16, #tpu.memory_space<vmem>>, vector<3x128xbf16>,
    %c6_551 = arith.constant 6 : index
    %c0_552 = arith.constant 0 : index
    %294 = vector.load %arg10[%c6_551, %c0_552] : memref<56x128xbf16, #tpu.memory_space<vmem>>, vector<3x128xbf16>
    %c0_553 = arith.constant 0 : index
    %c512_554 = arith.constant 512 : index
    %295 = vector.load %arg11[%c0_553, %c512_554] : memref<24x1152xbf16, #tpu.memory_space<vmem>>, vector<3x128xbf16>
    tpu.vector_store %arg11[%c0_553, %c512_554], %294 {strides = array<i32>} : memref<24x1152xbf16, #tpu.memory_space<vmem>>, vector<3x128xbf16>,
    %c7 = arith.constant 7 : index
    %c0_555 = arith.constant 0 : index
    %296 = vector.load %arg10[%c7, %c0_555] : memref<56x128xbf16, #tpu.memory_space<vmem>>, vector<3x128xbf16>
    %c0_556 = arith.constant 0 : index
    %c640_557 = arith.constant 640 : index
    %297 = vector.load %arg11[%c0_556, %c640_557] : memref<24x1152xbf16, #tpu.memory_space<vmem>>, vector<3x128xbf16>
    tpu.vector_store %arg11[%c0_556, %c640_557], %296 {strides = array<i32>} : memref<24x1152xbf16, #tpu.memory_space<vmem>>, vector<3x128xbf16>,
    %c10_558 = arith.constant 10 : index
    %c0_559 = arith.constant 0 : index
    %298 = vector.load %arg10[%c10_558, %c0_559] : memref<56x128xbf16, #tpu.memory_space<vmem>>, vector<3x128xbf16>
    %c0_560 = arith.constant 0 : index
    %c768_561 = arith.constant 768 : index
    %299 = vector.load %arg11[%c0_560, %c768_561] : memref<24x1152xbf16, #tpu.memory_space<vmem>>, vector<3x128xbf16>
    tpu.vector_store %arg11[%c0_560, %c768_561], %298 {strides = array<i32>} : memref<24x1152xbf16, #tpu.memory_space<vmem>>, vector<3x128xbf16>,
    %c11 = arith.constant 11 : index
    %c0_562 = arith.constant 0 : index
    %300 = vector.load %arg10[%c11, %c0_562] : memref<56x128xbf16, #tpu.memory_space<vmem>>, vector<3x128xbf16>
    %c0_563 = arith.constant 0 : index
    %c896_564 = arith.constant 896 : index
    %301 = vector.load %arg11[%c0_563, %c896_564] : memref<24x1152xbf16, #tpu.memory_space<vmem>>, vector<3x128xbf16>
    tpu.vector_store %arg11[%c0_563, %c896_564], %300 {strides = array<i32>} : memref<24x1152xbf16, #tpu.memory_space<vmem>>, vector<3x128xbf16>,
    %c12 = arith.constant 12 : index
    %c0_565 = arith.constant 0 : index
    %302 = vector.load %arg10[%c12, %c0_565] : memref<56x128xbf16, #tpu.memory_space<vmem>>, vector<3x128xbf16>
    %c0_566 = arith.constant 0 : index
    %c1024_567 = arith.constant 1024 : index
    %303 = vector.load %arg11[%c0_566, %c1024_567] : memref<24x1152xbf16, #tpu.memory_space<vmem>>, vector<3x128xbf16>
    tpu.vector_store %arg11[%c0_566, %c1024_567], %302 {strides = array<i32>} : memref<24x1152xbf16, #tpu.memory_space<vmem>>, vector<3x128xbf16>,
    %c5_568 = arith.constant 5 : index
    %c0_569 = arith.constant 0 : index
    %304 = vector.load %arg10[%c5_568, %c0_569] : memref<56x128xbf16, #tpu.memory_space<vmem>>, vector<3x128xbf16>
    %c3_570 = arith.constant 3 : index
    %c0_571 = arith.constant 0 : index
    %305 = vector.load %arg11[%c3_570, %c0_571] : memref<24x1152xbf16, #tpu.memory_space<vmem>>, vector<3x128xbf16>
    tpu.vector_store %arg11[%c3_570, %c0_571], %304 {strides = array<i32>} : memref<24x1152xbf16, #tpu.memory_space<vmem>>, vector<3x128xbf16>,
    %c6_572 = arith.constant 6 : index
    %c0_573 = arith.constant 0 : index
    %306 = vector.load %arg10[%c6_572, %c0_573] : memref<56x128xbf16, #tpu.memory_space<vmem>>, vector<3x128xbf16>
    %c3_574 = arith.constant 3 : index
    %c128_575 = arith.constant 128 : index
    %307 = vector.load %arg11[%c3_574, %c128_575] : memref<24x1152xbf16, #tpu.memory_space<vmem>>, vector<3x128xbf16>
    tpu.vector_store %arg11[%c3_574, %c128_575], %306 {strides = array<i32>} : memref<24x1152xbf16, #tpu.memory_space<vmem>>, vector<3x128xbf16>,
    %c7_576 = arith.constant 7 : index
    %c0_577 = arith.constant 0 : index
    %308 = vector.load %arg10[%c7_576, %c0_577] : memref<56x128xbf16, #tpu.memory_space<vmem>>, vector<3x128xbf16>
    %c3_578 = arith.constant 3 : index
    %c256_579 = arith.constant 256 : index
    %309 = vector.load %arg11[%c3_578, %c256_579] : memref<24x1152xbf16, #tpu.memory_space<vmem>>, vector<3x128xbf16>
    tpu.vector_store %arg11[%c3_578, %c256_579], %308 {strides = array<i32>} : memref<24x1152xbf16, #tpu.memory_space<vmem>>, vector<3x128xbf16>,
    %c10_580 = arith.constant 10 : index
    %c0_581 = arith.constant 0 : index
    %310 = vector.load %arg10[%c10_580, %c0_581] : memref<56x128xbf16, #tpu.memory_space<vmem>>, vector<3x128xbf16>
    %c3_582 = arith.constant 3 : index
    %c384_583 = arith.constant 384 : index
    %311 = vector.load %arg11[%c3_582, %c384_583] : memref<24x1152xbf16, #tpu.memory_space<vmem>>, vector<3x128xbf16>
    tpu.vector_store %arg11[%c3_582, %c384_583], %310 {strides = array<i32>} : memref<24x1152xbf16, #tpu.memory_space<vmem>>, vector<3x128xbf16>,
    %c11_584 = arith.constant 11 : index
    %c0_585 = arith.constant 0 : index
    %312 = vector.load %arg10[%c11_584, %c0_585] : memref<56x128xbf16, #tpu.memory_space<vmem>>, vector<3x128xbf16>
    %c3_586 = arith.constant 3 : index
    %c512_587 = arith.constant 512 : index
    %313 = vector.load %arg11[%c3_586, %c512_587] : memref<24x1152xbf16, #tpu.memory_space<vmem>>, vector<3x128xbf16>
    tpu.vector_store %arg11[%c3_586, %c512_587], %312 {strides = array<i32>} : memref<24x1152xbf16, #tpu.memory_space<vmem>>, vector<3x128xbf16>,
    %c12_588 = arith.constant 12 : index
    %c0_589 = arith.constant 0 : index
    %314 = vector.load %arg10[%c12_588, %c0_589] : memref<56x128xbf16, #tpu.memory_space<vmem>>, vector<3x128xbf16>
    %c3_590 = arith.constant 3 : index
    %c640_591 = arith.constant 640 : index
    %315 = vector.load %arg11[%c3_590, %c640_591] : memref<24x1152xbf16, #tpu.memory_space<vmem>>, vector<3x128xbf16>
    tpu.vector_store %arg11[%c3_590, %c640_591], %314 {strides = array<i32>} : memref<24x1152xbf16, #tpu.memory_space<vmem>>, vector<3x128xbf16>,
    %c15_592 = arith.constant 15 : index
    %c0_593 = arith.constant 0 : index
    %316 = vector.load %arg10[%c15_592, %c0_593] : memref<56x128xbf16, #tpu.memory_space<vmem>>, vector<3x128xbf16>
    %c3_594 = arith.constant 3 : index
    %c768_595 = arith.constant 768 : index
    %317 = vector.load %arg11[%c3_594, %c768_595] : memref<24x1152xbf16, #tpu.memory_space<vmem>>, vector<3x128xbf16>
    tpu.vector_store %arg11[%c3_594, %c768_595], %316 {strides = array<i32>} : memref<24x1152xbf16, #tpu.memory_space<vmem>>, vector<3x128xbf16>,
    %c16 = arith.constant 16 : index
    %c0_596 = arith.constant 0 : index
    %318 = vector.load %arg10[%c16, %c0_596] : memref<56x128xbf16, #tpu.memory_space<vmem>>, vector<3x128xbf16>
    %c3_597 = arith.constant 3 : index
    %c896_598 = arith.constant 896 : index
    %319 = vector.load %arg11[%c3_597, %c896_598] : memref<24x1152xbf16, #tpu.memory_space<vmem>>, vector<3x128xbf16>
    tpu.vector_store %arg11[%c3_597, %c896_598], %318 {strides = array<i32>} : memref<24x1152xbf16, #tpu.memory_space<vmem>>, vector<3x128xbf16>,
    %c17 = arith.constant 17 : index
    %c0_599 = arith.constant 0 : index
    %320 = vector.load %arg10[%c17, %c0_599] : memref<56x128xbf16, #tpu.memory_space<vmem>>, vector<3x128xbf16>
    %c3_600 = arith.constant 3 : index
    %c1024_601 = arith.constant 1024 : index
    %321 = vector.load %arg11[%c3_600, %c1024_601] : memref<24x1152xbf16, #tpu.memory_space<vmem>>, vector<3x128xbf16>
    tpu.vector_store %arg11[%c3_600, %c1024_601], %320 {strides = array<i32>} : memref<24x1152xbf16, #tpu.memory_space<vmem>>, vector<3x128xbf16>,
    %c10_602 = arith.constant 10 : index
    %c0_603 = arith.constant 0 : index
    %322 = vector.load %arg10[%c10_602, %c0_603] : memref<56x128xbf16, #tpu.memory_space<vmem>>, vector<3x128xbf16>
    %c6_604 = arith.constant 6 : index
    %c0_605 = arith.constant 0 : index
    %323 = vector.load %arg11[%c6_604, %c0_605] : memref<24x1152xbf16, #tpu.memory_space<vmem>>, vector<3x128xbf16>
    tpu.vector_store %arg11[%c6_604, %c0_605], %322 {strides = array<i32>} : memref<24x1152xbf16, #tpu.memory_space<vmem>>, vector<3x128xbf16>,
    %c11_606 = arith.constant 11 : index
    %c0_607 = arith.constant 0 : index
    %324 = vector.load %arg10[%c11_606, %c0_607] : memref<56x128xbf16, #tpu.memory_space<vmem>>, vector<3x128xbf16>
    %c6_608 = arith.constant 6 : index
    %c128_609 = arith.constant 128 : index
    %325 = vector.load %arg11[%c6_608, %c128_609] : memref<24x1152xbf16, #tpu.memory_space<vmem>>, vector<3x128xbf16>
    tpu.vector_store %arg11[%c6_608, %c128_609], %324 {strides = array<i32>} : memref<24x1152xbf16, #tpu.memory_space<vmem>>, vector<3x128xbf16>,
    %c12_610 = arith.constant 12 : index
    %c0_611 = arith.constant 0 : index
    %326 = vector.load %arg10[%c12_610, %c0_611] : memref<56x128xbf16, #tpu.memory_space<vmem>>, vector<3x128xbf16>
    %c6_612 = arith.constant 6 : index
    %c256_613 = arith.constant 256 : index
    %327 = vector.load %arg11[%c6_612, %c256_613] : memref<24x1152xbf16, #tpu.memory_space<vmem>>, vector<3x128xbf16>
    tpu.vector_store %arg11[%c6_612, %c256_613], %326 {strides = array<i32>} : memref<24x1152xbf16, #tpu.memory_space<vmem>>, vector<3x128xbf16>,
    %c15_614 = arith.constant 15 : index
    %c0_615 = arith.constant 0 : index
    %328 = vector.load %arg10[%c15_614, %c0_615] : memref<56x128xbf16, #tpu.memory_space<vmem>>, vector<3x128xbf16>
    %c6_616 = arith.constant 6 : index
    %c384_617 = arith.constant 384 : index
    %329 = vector.load %arg11[%c6_616, %c384_617] : memref<24x1152xbf16, #tpu.memory_space<vmem>>, vector<3x128xbf16>
    tpu.vector_store %arg11[%c6_616, %c384_617], %328 {strides = array<i32>} : memref<24x1152xbf16, #tpu.memory_space<vmem>>, vector<3x128xbf16>,
    %c16_618 = arith.constant 16 : index
    %c0_619 = arith.constant 0 : index
    %330 = vector.load %arg10[%c16_618, %c0_619] : memref<56x128xbf16, #tpu.memory_space<vmem>>, vector<3x128xbf16>
    %c6_620 = arith.constant 6 : index
    %c512_621 = arith.constant 512 : index
    %331 = vector.load %arg11[%c6_620, %c512_621] : memref<24x1152xbf16, #tpu.memory_space<vmem>>, vector<3x128xbf16>
    tpu.vector_store %arg11[%c6_620, %c512_621], %330 {strides = array<i32>} : memref<24x1152xbf16, #tpu.memory_space<vmem>>, vector<3x128xbf16>,
    %c17_622 = arith.constant 17 : index
    %c0_623 = arith.constant 0 : index
    %332 = vector.load %arg10[%c17_622, %c0_623] : memref<56x128xbf16, #tpu.memory_space<vmem>>, vector<3x128xbf16>
    %c6_624 = arith.constant 6 : index
    %c640_625 = arith.constant 640 : index
    %333 = vector.load %arg11[%c6_624, %c640_625] : memref<24x1152xbf16, #tpu.memory_space<vmem>>, vector<3x128xbf16>
    tpu.vector_store %arg11[%c6_624, %c640_625], %332 {strides = array<i32>} : memref<24x1152xbf16, #tpu.memory_space<vmem>>, vector<3x128xbf16>,
    %c20_626 = arith.constant 20 : index
    %c0_627 = arith.constant 0 : index
    %334 = vector.load %arg10[%c20_626, %c0_627] : memref<56x128xbf16, #tpu.memory_space<vmem>>, vector<3x128xbf16>
    %c6_628 = arith.constant 6 : index
    %c768_629 = arith.constant 768 : index
    %335 = vector.load %arg11[%c6_628, %c768_629] : memref<24x1152xbf16, #tpu.memory_space<vmem>>, vector<3x128xbf16>
    tpu.vector_store %arg11[%c6_628, %c768_629], %334 {strides = array<i32>} : memref<24x1152xbf16, #tpu.memory_space<vmem>>, vector<3x128xbf16>,
    %c21 = arith.constant 21 : index
    %c0_630 = arith.constant 0 : index
    %336 = vector.load %arg10[%c21, %c0_630] : memref<56x128xbf16, #tpu.memory_space<vmem>>, vector<3x128xbf16>
    %c6_631 = arith.constant 6 : index
    %c896_632 = arith.constant 896 : index
    %337 = vector.load %arg11[%c6_631, %c896_632] : memref<24x1152xbf16, #tpu.memory_space<vmem>>, vector<3x128xbf16>
    tpu.vector_store %arg11[%c6_631, %c896_632], %336 {strides = array<i32>} : memref<24x1152xbf16, #tpu.memory_space<vmem>>, vector<3x128xbf16>,
    %c22 = arith.constant 22 : index
    %c0_633 = arith.constant 0 : index
    %338 = vector.load %arg10[%c22, %c0_633] : memref<56x128xbf16, #tpu.memory_space<vmem>>, vector<3x128xbf16>
    %c6_634 = arith.constant 6 : index
    %c1024_635 = arith.constant 1024 : index
    %339 = vector.load %arg11[%c6_634, %c1024_635] : memref<24x1152xbf16, #tpu.memory_space<vmem>>, vector<3x128xbf16>
    tpu.vector_store %arg11[%c6_634, %c1024_635], %338 {strides = array<i32>} : memref<24x1152xbf16, #tpu.memory_space<vmem>>, vector<3x128xbf16>,
    %c25_636 = arith.constant 25 : index
    %c0_637 = arith.constant 0 : index
    %340 = vector.load %arg10[%c25_636, %c0_637] : memref<56x128xbf16, #tpu.memory_space<vmem>>, vector<3x128xbf16>
    %c9 = arith.constant 9 : index
    %c0_638 = arith.constant 0 : index
    %341 = vector.load %arg11[%c9, %c0_638] : memref<24x1152xbf16, #tpu.memory_space<vmem>>, vector<3x128xbf16>
    tpu.vector_store %arg11[%c9, %c0_638], %340 {strides = array<i32>} : memref<24x1152xbf16, #tpu.memory_space<vmem>>, vector<3x128xbf16>,
    %c26 = arith.constant 26 : index
    %c0_639 = arith.constant 0 : index
    %342 = vector.load %arg10[%c26, %c0_639] : memref<56x128xbf16, #tpu.memory_space<vmem>>, vector<3x128xbf16>
    %c9_640 = arith.constant 9 : index
    %c128_641 = arith.constant 128 : index
    %343 = vector.load %arg11[%c9_640, %c128_641] : memref<24x1152xbf16, #tpu.memory_space<vmem>>, vector<3x128xbf16>
    tpu.vector_store %arg11[%c9_640, %c128_641], %342 {strides = array<i32>} : memref<24x1152xbf16, #tpu.memory_space<vmem>>, vector<3x128xbf16>,
    %c27 = arith.constant 27 : index
    %c0_642 = arith.constant 0 : index
    %344 = vector.load %arg10[%c27, %c0_642] : memref<56x128xbf16, #tpu.memory_space<vmem>>, vector<3x128xbf16>
    %c9_643 = arith.constant 9 : index
    %c256_644 = arith.constant 256 : index
    %345 = vector.load %arg11[%c9_643, %c256_644] : memref<24x1152xbf16, #tpu.memory_space<vmem>>, vector<3x128xbf16>
    tpu.vector_store %arg11[%c9_643, %c256_644], %344 {strides = array<i32>} : memref<24x1152xbf16, #tpu.memory_space<vmem>>, vector<3x128xbf16>,
    %c30_645 = arith.constant 30 : index
    %c0_646 = arith.constant 0 : index
    %346 = vector.load %arg10[%c30_645, %c0_646] : memref<56x128xbf16, #tpu.memory_space<vmem>>, vector<3x128xbf16>
    %c9_647 = arith.constant 9 : index
    %c384_648 = arith.constant 384 : index
    %347 = vector.load %arg11[%c9_647, %c384_648] : memref<24x1152xbf16, #tpu.memory_space<vmem>>, vector<3x128xbf16>
    tpu.vector_store %arg11[%c9_647, %c384_648], %346 {strides = array<i32>} : memref<24x1152xbf16, #tpu.memory_space<vmem>>, vector<3x128xbf16>,
    %c31 = arith.constant 31 : index
    %c0_649 = arith.constant 0 : index
    %348 = vector.load %arg10[%c31, %c0_649] : memref<56x128xbf16, #tpu.memory_space<vmem>>, vector<3x128xbf16>
    %c9_650 = arith.constant 9 : index
    %c512_651 = arith.constant 512 : index
    %349 = vector.load %arg11[%c9_650, %c512_651] : memref<24x1152xbf16, #tpu.memory_space<vmem>>, vector<3x128xbf16>
    tpu.vector_store %arg11[%c9_650, %c512_651], %348 {strides = array<i32>} : memref<24x1152xbf16, #tpu.memory_space<vmem>>, vector<3x128xbf16>,
    %c32 = arith.constant 32 : index
    %c0_652 = arith.constant 0 : index
    %350 = vector.load %arg10[%c32, %c0_652] : memref<56x128xbf16, #tpu.memory_space<vmem>>, vector<3x128xbf16>
    %c9_653 = arith.constant 9 : index
    %c640_654 = arith.constant 640 : index
    %351 = vector.load %arg11[%c9_653, %c640_654] : memref<24x1152xbf16, #tpu.memory_space<vmem>>, vector<3x128xbf16>
    tpu.vector_store %arg11[%c9_653, %c640_654], %350 {strides = array<i32>} : memref<24x1152xbf16, #tpu.memory_space<vmem>>, vector<3x128xbf16>,
    %c35_655 = arith.constant 35 : index
    %c0_656 = arith.constant 0 : index
    %352 = vector.load %arg10[%c35_655, %c0_656] : memref<56x128xbf16, #tpu.memory_space<vmem>>, vector<3x128xbf16>
    %c9_657 = arith.constant 9 : index
    %c768_658 = arith.constant 768 : index
    %353 = vector.load %arg11[%c9_657, %c768_658] : memref<24x1152xbf16, #tpu.memory_space<vmem>>, vector<3x128xbf16>
    tpu.vector_store %arg11[%c9_657, %c768_658], %352 {strides = array<i32>} : memref<24x1152xbf16, #tpu.memory_space<vmem>>, vector<3x128xbf16>,
    %c36 = arith.constant 36 : index
    %c0_659 = arith.constant 0 : index
    %354 = vector.load %arg10[%c36, %c0_659] : memref<56x128xbf16, #tpu.memory_space<vmem>>, vector<3x128xbf16>
    %c9_660 = arith.constant 9 : index
    %c896_661 = arith.constant 896 : index
    %355 = vector.load %arg11[%c9_660, %c896_661] : memref<24x1152xbf16, #tpu.memory_space<vmem>>, vector<3x128xbf16>
    tpu.vector_store %arg11[%c9_660, %c896_661], %354 {strides = array<i32>} : memref<24x1152xbf16, #tpu.memory_space<vmem>>, vector<3x128xbf16>,
    %c37 = arith.constant 37 : index
    %c0_662 = arith.constant 0 : index
    %356 = vector.load %arg10[%c37, %c0_662] : memref<56x128xbf16, #tpu.memory_space<vmem>>, vector<3x128xbf16>
    %c9_663 = arith.constant 9 : index
    %c1024_664 = arith.constant 1024 : index
    %357 = vector.load %arg11[%c9_663, %c1024_664] : memref<24x1152xbf16, #tpu.memory_space<vmem>>, vector<3x128xbf16>
    tpu.vector_store %arg11[%c9_663, %c1024_664], %356 {strides = array<i32>} : memref<24x1152xbf16, #tpu.memory_space<vmem>>, vector<3x128xbf16>,
    %c30_665 = arith.constant 30 : index
    %c0_666 = arith.constant 0 : index
    %358 = vector.load %arg10[%c30_665, %c0_666] : memref<56x128xbf16, #tpu.memory_space<vmem>>, vector<3x128xbf16>
    %c12_667 = arith.constant 12 : index
    %c0_668 = arith.constant 0 : index
    %359 = vector.load %arg11[%c12_667, %c0_668] : memref<24x1152xbf16, #tpu.memory_space<vmem>>, vector<3x128xbf16>
    tpu.vector_store %arg11[%c12_667, %c0_668], %358 {strides = array<i32>} : memref<24x1152xbf16, #tpu.memory_space<vmem>>, vector<3x128xbf16>,
    %c31_669 = arith.constant 31 : index
    %c0_670 = arith.constant 0 : index
    %360 = vector.load %arg10[%c31_669, %c0_670] : memref<56x128xbf16, #tpu.memory_space<vmem>>, vector<3x128xbf16>
    %c12_671 = arith.constant 12 : index
    %c128_672 = arith.constant 128 : index
    %361 = vector.load %arg11[%c12_671, %c128_672] : memref<24x1152xbf16, #tpu.memory_space<vmem>>, vector<3x128xbf16>
    tpu.vector_store %arg11[%c12_671, %c128_672], %360 {strides = array<i32>} : memref<24x1152xbf16, #tpu.memory_space<vmem>>, vector<3x128xbf16>,
    %c32_673 = arith.constant 32 : index
    %c0_674 = arith.constant 0 : index
    %362 = vector.load %arg10[%c32_673, %c0_674] : memref<56x128xbf16, #tpu.memory_space<vmem>>, vector<3x128xbf16>
    %c12_675 = arith.constant 12 : index
    %c256_676 = arith.constant 256 : index
    %363 = vector.load %arg11[%c12_675, %c256_676] : memref<24x1152xbf16, #tpu.memory_space<vmem>>, vector<3x128xbf16>
    tpu.vector_store %arg11[%c12_675, %c256_676], %362 {strides = array<i32>} : memref<24x1152xbf16, #tpu.memory_space<vmem>>, vector<3x128xbf16>,
    %c35_677 = arith.constant 35 : index
    %c0_678 = arith.constant 0 : index
    %364 = vector.load %arg10[%c35_677, %c0_678] : memref<56x128xbf16, #tpu.memory_space<vmem>>, vector<3x128xbf16>
    %c12_679 = arith.constant 12 : index
    %c384_680 = arith.constant 384 : index
    %365 = vector.load %arg11[%c12_679, %c384_680] : memref<24x1152xbf16, #tpu.memory_space<vmem>>, vector<3x128xbf16>
    tpu.vector_store %arg11[%c12_679, %c384_680], %364 {strides = array<i32>} : memref<24x1152xbf16, #tpu.memory_space<vmem>>, vector<3x128xbf16>,
    %c36_681 = arith.constant 36 : index
    %c0_682 = arith.constant 0 : index
    %366 = vector.load %arg10[%c36_681, %c0_682] : memref<56x128xbf16, #tpu.memory_space<vmem>>, vector<3x128xbf16>
    %c12_683 = arith.constant 12 : index
    %c512_684 = arith.constant 512 : index
    %367 = vector.load %arg11[%c12_683, %c512_684] : memref<24x1152xbf16, #tpu.memory_space<vmem>>, vector<3x128xbf16>
    tpu.vector_store %arg11[%c12_683, %c512_684], %366 {strides = array<i32>} : memref<24x1152xbf16, #tpu.memory_space<vmem>>, vector<3x128xbf16>,
    %c37_685 = arith.constant 37 : index
    %c0_686 = arith.constant 0 : index
    %368 = vector.load %arg10[%c37_685, %c0_686] : memref<56x128xbf16, #tpu.memory_space<vmem>>, vector<3x128xbf16>
    %c12_687 = arith.constant 12 : index
    %c640_688 = arith.constant 640 : index
    %369 = vector.load %arg11[%c12_687, %c640_688] : memref<24x1152xbf16, #tpu.memory_space<vmem>>, vector<3x128xbf16>
    tpu.vector_store %arg11[%c12_687, %c640_688], %368 {strides = array<i32>} : memref<24x1152xbf16, #tpu.memory_space<vmem>>, vector<3x128xbf16>,
    %c40_689 = arith.constant 40 : index
    %c0_690 = arith.constant 0 : index
    %370 = vector.load %arg10[%c40_689, %c0_690] : memref<56x128xbf16, #tpu.memory_space<vmem>>, vector<3x128xbf16>
    %c12_691 = arith.constant 12 : index
    %c768_692 = arith.constant 768 : index
    %371 = vector.load %arg11[%c12_691, %c768_692] : memref<24x1152xbf16, #tpu.memory_space<vmem>>, vector<3x128xbf16>
    tpu.vector_store %arg11[%c12_691, %c768_692], %370 {strides = array<i32>} : memref<24x1152xbf16, #tpu.memory_space<vmem>>, vector<3x128xbf16>,
    %c41 = arith.constant 41 : index
    %c0_693 = arith.constant 0 : index
    %372 = vector.load %arg10[%c41, %c0_693] : memref<56x128xbf16, #tpu.memory_space<vmem>>, vector<3x128xbf16>
    %c12_694 = arith.constant 12 : index
    %c896_695 = arith.constant 896 : index
    %373 = vector.load %arg11[%c12_694, %c896_695] : memref<24x1152xbf16, #tpu.memory_space<vmem>>, vector<3x128xbf16>
    tpu.vector_store %arg11[%c12_694, %c896_695], %372 {strides = array<i32>} : memref<24x1152xbf16, #tpu.memory_space<vmem>>, vector<3x128xbf16>,
    %c42 = arith.constant 42 : index
    %c0_696 = arith.constant 0 : index
    %374 = vector.load %arg10[%c42, %c0_696] : memref<56x128xbf16, #tpu.memory_space<vmem>>, vector<3x128xbf16>
    %c12_697 = arith.constant 12 : index
    %c1024_698 = arith.constant 1024 : index
    %375 = vector.load %arg11[%c12_697, %c1024_698] : memref<24x1152xbf16, #tpu.memory_space<vmem>>, vector<3x128xbf16>
    tpu.vector_store %arg11[%c12_697, %c1024_698], %374 {strides = array<i32>} : memref<24x1152xbf16, #tpu.memory_space<vmem>>, vector<3x128xbf16>,
    %c35_699 = arith.constant 35 : index
    %c0_700 = arith.constant 0 : index
    %376 = vector.load %arg10[%c35_699, %c0_700] : memref<56x128xbf16, #tpu.memory_space<vmem>>, vector<3x128xbf16>
    %c15_701 = arith.constant 15 : index
    %c0_702 = arith.constant 0 : index
    %377 = vector.load %arg11[%c15_701, %c0_702] : memref<24x1152xbf16, #tpu.memory_space<vmem>>, vector<3x128xbf16>
    tpu.vector_store %arg11[%c15_701, %c0_702], %376 {strides = array<i32>} : memref<24x1152xbf16, #tpu.memory_space<vmem>>, vector<3x128xbf16>,
    %c36_703 = arith.constant 36 : index
    %c0_704 = arith.constant 0 : index
    %378 = vector.load %arg10[%c36_703, %c0_704] : memref<56x128xbf16, #tpu.memory_space<vmem>>, vector<3x128xbf16>
    %c15_705 = arith.constant 15 : index
    %c128_706 = arith.constant 128 : index
    %379 = vector.load %arg11[%c15_705, %c128_706] : memref<24x1152xbf16, #tpu.memory_space<vmem>>, vector<3x128xbf16>
    tpu.vector_store %arg11[%c15_705, %c128_706], %378 {strides = array<i32>} : memref<24x1152xbf16, #tpu.memory_space<vmem>>, vector<3x128xbf16>,
    %c37_707 = arith.constant 37 : index
    %c0_708 = arith.constant 0 : index
    %380 = vector.load %arg10[%c37_707, %c0_708] : memref<56x128xbf16, #tpu.memory_space<vmem>>, vector<3x128xbf16>
    %c15_709 = arith.constant 15 : index
    %c256_710 = arith.constant 256 : index
    %381 = vector.load %arg11[%c15_709, %c256_710] : memref<24x1152xbf16, #tpu.memory_space<vmem>>, vector<3x128xbf16>
    tpu.vector_store %arg11[%c15_709, %c256_710], %380 {strides = array<i32>} : memref<24x1152xbf16, #tpu.memory_space<vmem>>, vector<3x128xbf16>,
    %c40_711 = arith.constant 40 : index
    %c0_712 = arith.constant 0 : index
    %382 = vector.load %arg10[%c40_711, %c0_712] : memref<56x128xbf16, #tpu.memory_space<vmem>>, vector<3x128xbf16>
    %c15_713 = arith.constant 15 : index
    %c384_714 = arith.constant 384 : index
    %383 = vector.load %arg11[%c15_713, %c384_714] : memref<24x1152xbf16, #tpu.memory_space<vmem>>, vector<3x128xbf16>
    tpu.vector_store %arg11[%c15_713, %c384_714], %382 {strides = array<i32>} : memref<24x1152xbf16, #tpu.memory_space<vmem>>, vector<3x128xbf16>,
    %c41_715 = arith.constant 41 : index
    %c0_716 = arith.constant 0 : index
    %384 = vector.load %arg10[%c41_715, %c0_716] : memref<56x128xbf16, #tpu.memory_space<vmem>>, vector<3x128xbf16>
    %c15_717 = arith.constant 15 : index
    %c512_718 = arith.constant 512 : index
    %385 = vector.load %arg11[%c15_717, %c512_718] : memref<24x1152xbf16, #tpu.memory_space<vmem>>, vector<3x128xbf16>
    tpu.vector_store %arg11[%c15_717, %c512_718], %384 {strides = array<i32>} : memref<24x1152xbf16, #tpu.memory_space<vmem>>, vector<3x128xbf16>,
    %c42_719 = arith.constant 42 : index
    %c0_720 = arith.constant 0 : index
    %386 = vector.load %arg10[%c42_719, %c0_720] : memref<56x128xbf16, #tpu.memory_space<vmem>>, vector<3x128xbf16>
    %c15_721 = arith.constant 15 : index
    %c640_722 = arith.constant 640 : index
    %387 = vector.load %arg11[%c15_721, %c640_722] : memref<24x1152xbf16, #tpu.memory_space<vmem>>, vector<3x128xbf16>
    tpu.vector_store %arg11[%c15_721, %c640_722], %386 {strides = array<i32>} : memref<24x1152xbf16, #tpu.memory_space<vmem>>, vector<3x128xbf16>,
    %c45_723 = arith.constant 45 : index
    %c0_724 = arith.constant 0 : index
    %388 = vector.load %arg10[%c45_723, %c0_724] : memref<56x128xbf16, #tpu.memory_space<vmem>>, vector<3x128xbf16>
    %c15_725 = arith.constant 15 : index
    %c768_726 = arith.constant 768 : index
    %389 = vector.load %arg11[%c15_725, %c768_726] : memref<24x1152xbf16, #tpu.memory_space<vmem>>, vector<3x128xbf16>
    tpu.vector_store %arg11[%c15_725, %c768_726], %388 {strides = array<i32>} : memref<24x1152xbf16, #tpu.memory_space<vmem>>, vector<3x128xbf16>,
    %c46 = arith.constant 46 : index
    %c0_727 = arith.constant 0 : index
    %390 = vector.load %arg10[%c46, %c0_727] : memref<56x128xbf16, #tpu.memory_space<vmem>>, vector<3x128xbf16>
    %c15_728 = arith.constant 15 : index
    %c896_729 = arith.constant 896 : index
    %391 = vector.load %arg11[%c15_728, %c896_729] : memref<24x1152xbf16, #tpu.memory_space<vmem>>, vector<3x128xbf16>
    tpu.vector_store %arg11[%c15_728, %c896_729], %390 {strides = array<i32>} : memref<24x1152xbf16, #tpu.memory_space<vmem>>, vector<3x128xbf16>,
    %c47 = arith.constant 47 : index
    %c0_730 = arith.constant 0 : index
    %392 = vector.load %arg10[%c47, %c0_730] : memref<56x128xbf16, #tpu.memory_space<vmem>>, vector<3x128xbf16>
    %c15_731 = arith.constant 15 : index
    %c1024_732 = arith.constant 1024 : index
    %393 = vector.load %arg11[%c15_731, %c1024_732] : memref<24x1152xbf16, #tpu.memory_space<vmem>>, vector<3x128xbf16>
    tpu.vector_store %arg11[%c15_731, %c1024_732], %392 {strides = array<i32>} : memref<24x1152xbf16, #tpu.memory_space<vmem>>, vector<3x128xbf16>,
    %c0_733 = arith.constant 0 : index
    %c0_734 = arith.constant 0 : index
    %394 = vector.load %arg11[%c0_733, %c0_734] : memref<24x1152xbf16, #tpu.memory_space<vmem>>, vector<24x1152xbf16>
    %c0_735 = arith.constant 0 : index
    %c0_736 = arith.constant 0 : index
    %395 = vector.load %arg4[%c0_735, %c0_736] : memref<1152x128xbf16, #tpu.memory_space<vmem>>, vector<1152x128xbf16>
    %cst_737 = arith.constant dense<0.000000e+00> : vector<24x128xf32>
    %396 = tpu.matmul %394, %395, %cst_737 {dimension_numbers = #tpu.dot_dimension_numbers<[1], [0], [0], [1], [0, 0, 1, 1], [], []>} : vector<24x1152xbf16>, vector<1152x128xbf16>, vector<24x128xf32> -> vector<24x128xf32>
    %c0_738 = arith.constant 0 : index
    %c0_739 = arith.constant 0 : index
    %397 = vector.load %arg5[%c0_738, %c0_739] : memref<1x128xf32, #tpu.memory_space<vmem>>, vector<1x128xf32>
    %398 = vector.broadcast %397 : vector<1x128xf32> to vector<24x128xf32>
    %399 = arith.addf %396, %398 : vector<24x128xf32>
    %cst_740 = arith.constant 0.000000e+00 : f32
    %400 = vector.broadcast %cst_740 : f32 to vector<24x128xf32>
    %401 = arith.maximumf %399, %400 : vector<24x128xf32>
    %402 = arith.truncf %401 : vector<24x128xf32> to vector<24x128xbf16>
    %c0_741 = arith.constant 0 : index
    %c0_742 = arith.constant 0 : index
    %403 = vector.load %arg12[%c0_741, %c0_742] : memref<24x128xbf16, #tpu.memory_space<vmem>>, vector<24x128xbf16>
    tpu.vector_store %arg12[%c0_741, %c0_742], %402 {strides = array<i32>} : memref<24x128xbf16, #tpu.memory_space<vmem>>, vector<24x128xbf16>,
    %c0_743 = arith.constant 0 : index
    %c0_744 = arith.constant 0 : index
    %404 = vector.load %arg12[%c0_743, %c0_744] : memref<24x128xbf16, #tpu.memory_space<vmem>>, vector<1x128xbf16>
    %c0_745 = arith.constant 0 : index
    %c0_746 = arith.constant 0 : index
    %405 = vector.load %arg13[%c0_745, %c0_746] : memref<8x1152xbf16, #tpu.memory_space<vmem>>, vector<1x128xbf16>
    tpu.vector_store %arg13[%c0_745, %c0_746], %404 {strides = array<i32>} : memref<8x1152xbf16, #tpu.memory_space<vmem>>, vector<1x128xbf16>,
    %c1_747 = arith.constant 1 : index
    %c0_748 = arith.constant 0 : index
    %406 = vector.load %arg12[%c1_747, %c0_748] : memref<24x128xbf16, #tpu.memory_space<vmem>>, vector<1x128xbf16>
    %c0_749 = arith.constant 0 : index
    %c128_750 = arith.constant 128 : index
    %407 = vector.load %arg13[%c0_749, %c128_750] : memref<8x1152xbf16, #tpu.memory_space<vmem>>, vector<1x128xbf16>
    tpu.vector_store %arg13[%c0_749, %c128_750], %406 {strides = array<i32>} : memref<8x1152xbf16, #tpu.memory_space<vmem>>, vector<1x128xbf16>,
    %c2_751 = arith.constant 2 : index
    %c0_752 = arith.constant 0 : index
    %408 = vector.load %arg12[%c2_751, %c0_752] : memref<24x128xbf16, #tpu.memory_space<vmem>>, vector<1x128xbf16>
    %c0_753 = arith.constant 0 : index
    %c256_754 = arith.constant 256 : index
    %409 = vector.load %arg13[%c0_753, %c256_754] : memref<8x1152xbf16, #tpu.memory_space<vmem>>, vector<1x128xbf16>
    tpu.vector_store %arg13[%c0_753, %c256_754], %408 {strides = array<i32>} : memref<8x1152xbf16, #tpu.memory_space<vmem>>, vector<1x128xbf16>,
    %c3_755 = arith.constant 3 : index
    %c0_756 = arith.constant 0 : index
    %410 = vector.load %arg12[%c3_755, %c0_756] : memref<24x128xbf16, #tpu.memory_space<vmem>>, vector<1x128xbf16>
    %c0_757 = arith.constant 0 : index
    %c384_758 = arith.constant 384 : index
    %411 = vector.load %arg13[%c0_757, %c384_758] : memref<8x1152xbf16, #tpu.memory_space<vmem>>, vector<1x128xbf16>
    tpu.vector_store %arg13[%c0_757, %c384_758], %410 {strides = array<i32>} : memref<8x1152xbf16, #tpu.memory_space<vmem>>, vector<1x128xbf16>,
    %c4_759 = arith.constant 4 : index
    %c0_760 = arith.constant 0 : index
    %412 = vector.load %arg12[%c4_759, %c0_760] : memref<24x128xbf16, #tpu.memory_space<vmem>>, vector<1x128xbf16>
    %c0_761 = arith.constant 0 : index
    %c512_762 = arith.constant 512 : index
    %413 = vector.load %arg13[%c0_761, %c512_762] : memref<8x1152xbf16, #tpu.memory_space<vmem>>, vector<1x128xbf16>
    tpu.vector_store %arg13[%c0_761, %c512_762], %412 {strides = array<i32>} : memref<8x1152xbf16, #tpu.memory_space<vmem>>, vector<1x128xbf16>,
    %c5_763 = arith.constant 5 : index
    %c0_764 = arith.constant 0 : index
    %414 = vector.load %arg12[%c5_763, %c0_764] : memref<24x128xbf16, #tpu.memory_space<vmem>>, vector<1x128xbf16>
    %c0_765 = arith.constant 0 : index
    %c640_766 = arith.constant 640 : index
    %415 = vector.load %arg13[%c0_765, %c640_766] : memref<8x1152xbf16, #tpu.memory_space<vmem>>, vector<1x128xbf16>
    tpu.vector_store %arg13[%c0_765, %c640_766], %414 {strides = array<i32>} : memref<8x1152xbf16, #tpu.memory_space<vmem>>, vector<1x128xbf16>,
    %c6_767 = arith.constant 6 : index
    %c0_768 = arith.constant 0 : index
    %416 = vector.load %arg12[%c6_767, %c0_768] : memref<24x128xbf16, #tpu.memory_space<vmem>>, vector<1x128xbf16>
    %c0_769 = arith.constant 0 : index
    %c768_770 = arith.constant 768 : index
    %417 = vector.load %arg13[%c0_769, %c768_770] : memref<8x1152xbf16, #tpu.memory_space<vmem>>, vector<1x128xbf16>
    tpu.vector_store %arg13[%c0_769, %c768_770], %416 {strides = array<i32>} : memref<8x1152xbf16, #tpu.memory_space<vmem>>, vector<1x128xbf16>,
    %c7_771 = arith.constant 7 : index
    %c0_772 = arith.constant 0 : index
    %418 = vector.load %arg12[%c7_771, %c0_772] : memref<24x128xbf16, #tpu.memory_space<vmem>>, vector<1x128xbf16>
    %c0_773 = arith.constant 0 : index
    %c896_774 = arith.constant 896 : index
    %419 = vector.load %arg13[%c0_773, %c896_774] : memref<8x1152xbf16, #tpu.memory_space<vmem>>, vector<1x128xbf16>
    tpu.vector_store %arg13[%c0_773, %c896_774], %418 {strides = array<i32>} : memref<8x1152xbf16, #tpu.memory_space<vmem>>, vector<1x128xbf16>,
    %c8 = arith.constant 8 : index
    %c0_775 = arith.constant 0 : index
    %420 = vector.load %arg12[%c8, %c0_775] : memref<24x128xbf16, #tpu.memory_space<vmem>>, vector<1x128xbf16>
    %c0_776 = arith.constant 0 : index
    %c1024_777 = arith.constant 1024 : index
    %421 = vector.load %arg13[%c0_776, %c1024_777] : memref<8x1152xbf16, #tpu.memory_space<vmem>>, vector<1x128xbf16>
    tpu.vector_store %arg13[%c0_776, %c1024_777], %420 {strides = array<i32>} : memref<8x1152xbf16, #tpu.memory_space<vmem>>, vector<1x128xbf16>,
    %c9_778 = arith.constant 9 : index
    %c0_779 = arith.constant 0 : index
    %422 = vector.load %arg12[%c9_778, %c0_779] : memref<24x128xbf16, #tpu.memory_space<vmem>>, vector<1x128xbf16>
    %c1_780 = arith.constant 1 : index
    %c0_781 = arith.constant 0 : index
    %423 = vector.load %arg13[%c1_780, %c0_781] : memref<8x1152xbf16, #tpu.memory_space<vmem>>, vector<1x128xbf16>
    tpu.vector_store %arg13[%c1_780, %c0_781], %422 {strides = array<i32>} : memref<8x1152xbf16, #tpu.memory_space<vmem>>, vector<1x128xbf16>,
    %c10_782 = arith.constant 10 : index
    %c0_783 = arith.constant 0 : index
    %424 = vector.load %arg12[%c10_782, %c0_783] : memref<24x128xbf16, #tpu.memory_space<vmem>>, vector<1x128xbf16>
    %c1_784 = arith.constant 1 : index
    %c128_785 = arith.constant 128 : index
    %425 = vector.load %arg13[%c1_784, %c128_785] : memref<8x1152xbf16, #tpu.memory_space<vmem>>, vector<1x128xbf16>
    tpu.vector_store %arg13[%c1_784, %c128_785], %424 {strides = array<i32>} : memref<8x1152xbf16, #tpu.memory_space<vmem>>, vector<1x128xbf16>,
    %c11_786 = arith.constant 11 : index
    %c0_787 = arith.constant 0 : index
    %426 = vector.load %arg12[%c11_786, %c0_787] : memref<24x128xbf16, #tpu.memory_space<vmem>>, vector<1x128xbf16>
    %c1_788 = arith.constant 1 : index
    %c256_789 = arith.constant 256 : index
    %427 = vector.load %arg13[%c1_788, %c256_789] : memref<8x1152xbf16, #tpu.memory_space<vmem>>, vector<1x128xbf16>
    tpu.vector_store %arg13[%c1_788, %c256_789], %426 {strides = array<i32>} : memref<8x1152xbf16, #tpu.memory_space<vmem>>, vector<1x128xbf16>,
    %c12_790 = arith.constant 12 : index
    %c0_791 = arith.constant 0 : index
    %428 = vector.load %arg12[%c12_790, %c0_791] : memref<24x128xbf16, #tpu.memory_space<vmem>>, vector<1x128xbf16>
    %c1_792 = arith.constant 1 : index
    %c384_793 = arith.constant 384 : index
    %429 = vector.load %arg13[%c1_792, %c384_793] : memref<8x1152xbf16, #tpu.memory_space<vmem>>, vector<1x128xbf16>
    tpu.vector_store %arg13[%c1_792, %c384_793], %428 {strides = array<i32>} : memref<8x1152xbf16, #tpu.memory_space<vmem>>, vector<1x128xbf16>,
    %c13 = arith.constant 13 : index
    %c0_794 = arith.constant 0 : index
    %430 = vector.load %arg12[%c13, %c0_794] : memref<24x128xbf16, #tpu.memory_space<vmem>>, vector<1x128xbf16>
    %c1_795 = arith.constant 1 : index
    %c512_796 = arith.constant 512 : index
    %431 = vector.load %arg13[%c1_795, %c512_796] : memref<8x1152xbf16, #tpu.memory_space<vmem>>, vector<1x128xbf16>
    tpu.vector_store %arg13[%c1_795, %c512_796], %430 {strides = array<i32>} : memref<8x1152xbf16, #tpu.memory_space<vmem>>, vector<1x128xbf16>,
    %c14 = arith.constant 14 : index
    %c0_797 = arith.constant 0 : index
    %432 = vector.load %arg12[%c14, %c0_797] : memref<24x128xbf16, #tpu.memory_space<vmem>>, vector<1x128xbf16>
    %c1_798 = arith.constant 1 : index
    %c640_799 = arith.constant 640 : index
    %433 = vector.load %arg13[%c1_798, %c640_799] : memref<8x1152xbf16, #tpu.memory_space<vmem>>, vector<1x128xbf16>
    tpu.vector_store %arg13[%c1_798, %c640_799], %432 {strides = array<i32>} : memref<8x1152xbf16, #tpu.memory_space<vmem>>, vector<1x128xbf16>,
    %c15_800 = arith.constant 15 : index
    %c0_801 = arith.constant 0 : index
    %434 = vector.load %arg12[%c15_800, %c0_801] : memref<24x128xbf16, #tpu.memory_space<vmem>>, vector<1x128xbf16>
    %c1_802 = arith.constant 1 : index
    %c768_803 = arith.constant 768 : index
    %435 = vector.load %arg13[%c1_802, %c768_803] : memref<8x1152xbf16, #tpu.memory_space<vmem>>, vector<1x128xbf16>
    tpu.vector_store %arg13[%c1_802, %c768_803], %434 {strides = array<i32>} : memref<8x1152xbf16, #tpu.memory_space<vmem>>, vector<1x128xbf16>,
    %c16_804 = arith.constant 16 : index
    %c0_805 = arith.constant 0 : index
    %436 = vector.load %arg12[%c16_804, %c0_805] : memref<24x128xbf16, #tpu.memory_space<vmem>>, vector<1x128xbf16>
    %c1_806 = arith.constant 1 : index
    %c896_807 = arith.constant 896 : index
    %437 = vector.load %arg13[%c1_806, %c896_807] : memref<8x1152xbf16, #tpu.memory_space<vmem>>, vector<1x128xbf16>
    tpu.vector_store %arg13[%c1_806, %c896_807], %436 {strides = array<i32>} : memref<8x1152xbf16, #tpu.memory_space<vmem>>, vector<1x128xbf16>,
    %c17_808 = arith.constant 17 : index
    %c0_809 = arith.constant 0 : index
    %438 = vector.load %arg12[%c17_808, %c0_809] : memref<24x128xbf16, #tpu.memory_space<vmem>>, vector<1x128xbf16>
    %c1_810 = arith.constant 1 : index
    %c1024_811 = arith.constant 1024 : index
    %439 = vector.load %arg13[%c1_810, %c1024_811] : memref<8x1152xbf16, #tpu.memory_space<vmem>>, vector<1x128xbf16>
    tpu.vector_store %arg13[%c1_810, %c1024_811], %438 {strides = array<i32>} : memref<8x1152xbf16, #tpu.memory_space<vmem>>, vector<1x128xbf16>,
    %c0_812 = arith.constant 0 : index
    %c0_813 = arith.constant 0 : index
    %440 = vector.load %arg13[%c0_812, %c0_813] : memref<8x1152xbf16, #tpu.memory_space<vmem>>, vector<8x1152xbf16>
    %c0_814 = arith.constant 0 : index
    %c0_815 = arith.constant 0 : index
    %441 = vector.load %arg6[%c0_814, %c0_815] : memref<1152x128xbf16, #tpu.memory_space<vmem>>, vector<1152x128xbf16>
    %cst_816 = arith.constant dense<0.000000e+00> : vector<8x128xf32>
    %442 = tpu.matmul %440, %441, %cst_816 {dimension_numbers = #tpu.dot_dimension_numbers<[1], [0], [0], [1], [0, 0, 1, 1], [], []>} : vector<8x1152xbf16>, vector<1152x128xbf16>, vector<8x128xf32> -> vector<8x128xf32>
    %c0_817 = arith.constant 0 : index
    %c0_818 = arith.constant 0 : index
    %443 = vector.load %arg7[%c0_817, %c0_818] : memref<1x128xf32, #tpu.memory_space<vmem>>, vector<1x128xf32>
    %444 = vector.broadcast %443 : vector<1x128xf32> to vector<8x128xf32>
    %445 = arith.addf %442, %444 : vector<8x128xf32>
    %c0_819 = arith.constant 0 : index
    %c0_820 = arith.constant 0 : index
    %446 = vector.load %arg8[%c0_819, %c0_820] : memref<8x128xf32, #tpu.memory_space<vmem>>, vector<8x128xf32>
    tpu.vector_store %arg8[%c0_819, %c0_820], %445 {strides = array<i32>} : memref<8x128xf32, #tpu.memory_space<vmem>>, vector<8x128xf32>,
    return
  }
  func.func @transform_0(%arg0: i32) -> (i32, i32, i32, i32) {
    %c0_i32 = arith.constant 0 : i32
    %c0_i32_0 = arith.constant 0 : i32
    %c0_i32_1 = arith.constant 0 : i32
    %c0_i32_2 = arith.constant 0 : i32
    %c0_i32_3 = arith.constant 0 : i32
    return %c0_i32, %c0_i32_0, %c0_i32_1, %c0_i32_2 : i32, i32, i32, i32
  }
  func.func @transform_1(%arg0: i32) -> (i32, i32) {
    %c0_i32 = arith.constant 0 : i32
    %c0_i32_0 = arith.constant 0 : i32
    %c0_i32_1 = arith.constant 0 : i32
    return %c0_i32, %c0_i32_0 : i32, i32
  }
  func.func @transform_2(%arg0: i32) -> (i32, i32) {
    %c0_i32 = arith.constant 0 : i32
    %c0_i32_0 = arith.constant 0 : i32
    %c0_i32_1 = arith.constant 0 : i32
    return %c0_i32, %c0_i32_0 : i32, i32
  }
  func.func @transform_3(%arg0: i32) -> (i32, i32) {
    %c0_i32 = arith.constant 0 : i32
    %c0_i32_0 = arith.constant 0 : i32
    %c0_i32_1 = arith.constant 0 : i32
    return %c0_i32, %c0_i32_0 : i32, i32
  }
  func.func @transform_4(%arg0: i32) -> (i32, i32) {
    %c0_i32 = arith.constant 0 : i32
    %c0_i32_0 = arith.constant 0 : i32
    %c0_i32_1 = arith.constant 0 : i32
    return %c0_i32, %c0_i32_0 : i32, i32
  }
  func.func @transform_5(%arg0: i32) -> (i32, i32) {
    %c0_i32 = arith.constant 0 : i32
    %c0_i32_0 = arith.constant 0 : i32
    %c0_i32_1 = arith.constant 0 : i32
    return %c0_i32, %c0_i32_0 : i32, i32
  }
  func.func @transform_6(%arg0: i32) -> (i32, i32) {
    %c0_i32 = arith.constant 0 : i32
    %c0_i32_0 = arith.constant 0 : i32
    %c0_i32_1 = arith.constant 0 : i32
    return %c0_i32, %c0_i32_0 : i32, i32
  }
  func.func @transform_7(%arg0: i32) -> (i32, i32) {
    %c0_i32 = arith.constant 0 : i32
    %c0_i32_0 = arith.constant 0 : i32
    %c0_i32_1 = arith.constant 0 : i32
    return %c0_i32, %c0_i32_0 : i32, i32
  }
}

</mosaic_0001>

<bundles_post_ra>
// kernel: alexnet_legacy_forward.5
= control target key start
LH: loop header
LB: loop body
LE: loop exit
PB: predicated region body
PF: predicated region fallthrough
CT: control target
= control target key end

     0   :  { %s2857_s12 = smov 0   ;;  %s3323_s0 = inlined_call_operand.vmem [shape: bf16[3072,363], index: 0, kind: input, shape index: {}]   ;;  %s3324_s1 = inlined_call_operand.vmem [shape: bf16[363,128], index: 1, kind: input, shape index: {}]   ;;  %s3325_s2 = inlined_call_operand.vmem [shape: f32[1,128], index: 2, kind: input, shape index: {}]   ;;  %s3326_s3 = inlined_call_operand.vmem [shape: bf16[3072,128], index: 3, kind: output, shape index: {}]  }
   0x1 LB: > { %s2034_s13 = sadd.s32 4294967295, %s2833_s12   ;;  %p2038_p0 = scmp.ge.s32.totalorder %s2833_s12, 1  ;;  %s2833_s12 = sphi %s2857_s12, %s13_s12  }
   0x2   : > { %p139_p1 = scmp.lt.s32.totalorder %s2833_s12, 7 }
   0x4   : > { %p140_p2 = pnand %p2038_p0, %p139_p1 }
   0x5   : > { %v2676_v0 = vld [vmem:[%s3324_s1] sm:$0xff] (!%p140_p2)   ;;  %v2835_v1 = vmov (!%p140_p2), 0   ;;  %s2039_s16 = sshll.u32 (!%p140_p2), %s2034_s13, 6  ;;  %v2677_v2 = vld [vmem:[%s3324_s1 + $0x8] sm:$0xff] (!%p140_p2)   ;;  %v2678_v3 = vld [vmem:[%s3324_s1 + $0x10] sm:$0xff] (!%p140_p2)   ;;  %vm1073_vm0 = vcmask (!%p140_p2), 1044480  }
   0x6   : > { %143 = sbr.rel (%p140_p2) target bundleno = 475 (0x1db), region = 32  ;;  %1080 = vmatprep.subr.bf16.mxu0 (!%p140_p2), %v2835_v1  ;;  %2633 = vmatprep.subr.bf16.mxu1 (!%p140_p2), %v2835_v1  ;;  %p165_p3 = scmp.lt.s32.totalorder (!%p140_p2), %s2039_s16, 383  ;;  %v2679_v4 = vld [vmem:[%s3324_s1 + $0x18] sm:$0xff] (!%p140_p2)   ;;  %v2680_v5 = vld [vmem:[%s3324_s1 + $0x20] sm:$0xff] (!%p140_p2)   ;;  %v2681_v7 = vld [vmem:[%s3324_s1 + $0x28] sm:$0xff] (!%p140_p2)   ;;  %vm1074_vm1 = vcmask (!%p140_p2), 1045504  }
   0x7   : > { %1081 = vmatpush1.bf16.msra.mxu0 (!%p140_p2), %v2676_v0  ;;  %2649 = vmatpush1.bf16.msra.mxu1 (!%p140_p2), %v2676_v0  ;;  %v2682_v9 = vld [vmem:[%s3324_s1 + $0x30] sm:$0xff] (!%p140_p2)   ;;  %v2683_v10 = vld [vmem:[%s3324_s1 + $0x38] sm:$0xff] (!%p140_p2)   ;;  %v2684_v11 = vld [vmem:[%s3324_s1 + $0x40] sm:$0xff] (!%p140_p2)   ;;  %v2836_v36 = vmov (!%p140_p2), 65535   ;;  %vm976_vm2 = vcmask (!%p140_p2), 875520  }
   0x8   : > { %1082 = vmatprep.subr.bf16.mxu0 (!%p140_p2), %v2835_v1  ;;  %2634 = vmatprep.subr.bf16.mxu1 (!%p140_p2), %v2835_v1  ;;  %v2685_v12 = vld [vmem:[%s3324_s1 + $0x48] sm:$0xff] (!%p140_p2)   ;;  %v2686_v13 = vld [vmem:[%s3324_s1 + $0x50] sm:$0xff] (!%p140_p2)   ;;  %v2687_v14 = vld [vmem:[%s3324_s1 + $0x58] sm:$0xff] (!%p140_p2)   ;;  %v1075_v37 = vsel (!%p140_p2), %vm1073_vm0, 4294967295, %v2836_v36 }
   0x9   : > { %v2688_v15 = vld [vmem:[%s3324_s1 + $0x60] sm:$0xff] (!%p140_p2)   ;;  %v2689_v16 = vld [vmem:[%s3324_s1 + $0x68] sm:$0xff] (!%p140_p2)   ;;  %v2690_v17 = vld [vmem:[%s3324_s1 + $0x70] sm:$0xff] (!%p140_p2)   ;;  %v1076_v40 = vsel (!%p140_p2), %vm1074_vm1, %v1075_v37, 0 }
   0xa   : > { %v2691_v18 = vld [vmem:[%s3324_s1 + $0x78] sm:$0xff] (!%p140_p2)   ;;  %v2698_v20 = vld [vmem:[%s3324_s1 + $0x80] sm:$0xff] (!%p140_p2)   ;;  %v2705_v24 = vld [vmem:[%s3324_s1 + $0x88] sm:$0xff] (!%p140_p2)  }
   0xb   : > { %1083 = vmatpush1.bf16.msra.mxu0 (!%p140_p2), %v2677_v2  ;;  %2650 = vmatpush1.bf16.msra.mxu1 (!%p140_p2), %v2677_v2  ;;  %v2712_v25 = vld [vmem:[%s3324_s1 + $0x90] sm:$0xff] (!%p140_p2)   ;;  %v2719_v30 = vld [vmem:[%s3324_s1 + $0x98] sm:$0xff] (!%p140_p2)   ;;  %v2726_v33 = vld [vmem:[%s3324_s1 + $0xa0] sm:$0xff] (!%p140_p2)  }
   0xc   : > { %1084 = vmatprep.subr.bf16.mxu0 (!%p140_p2), %v2835_v1  ;;  %2635 = vmatprep.subr.bf16.mxu1 (!%p140_p2), %v2835_v1  ;;  %v2733_v38 = vld [vmem:[%s3324_s1 + $0xa8] sm:$0xff] (!%p140_p2)   ;;  %v2744_v39 = vld [vmem:[%s3324_s1 + $0xb0] sm:$0x3f] (!%p140_p2)  }
   0xd   : > { %s3328_s16 = smov (!%p165_p3, %s2039_s16), 383  ;;  %v1078_v45 = vand.u32 %v2744_v39, %v1076_v40 }
   0xe   : > { %s2665_s23 = smul.u32 12, %s3328_s16  ;;  %s2042_s17 = sshll.u32 %s3328_s16, 2 }
   0xf   : > { %1085 = vmatpush1.bf16.msra.mxu0 %v2678_v3  ;;  %2651 = vmatpush1.bf16.msra.mxu1 %v2678_v3  ;;  %s3179_s20 = scalar_lea.vmem %s3326_s3, %s2042_s17 }
  0x10   : > { %1086 = vmatprep.subr.bf16.mxu0 %v2835_v1  ;;  %2636 = vmatprep.subr.bf16.mxu1 %v2835_v1  ;;  %s2894_s28 = scalar_lea.vmem %s3323_s0, %s2665_s23 }
  0x11   : > { %v2694_v6 = vld [vmem:[%s2894_s28 + $0x4] ss:$12 sps:$4 sm:$0xff]   ;;  %v2692_v19 = vld [vmem:[%s2894_s28] ss:$12 sps:$4 sm:$0xff]   ;;  %v2699_v22 = vld [vmem:[%s2894_s28 + $0x1c] ss:$12 sps:$4 sm:$0xff]  }
  0x12   : > { %v2697_v8 = vld [vmem:[%s2894_s28 + $0x244] ss:$12 sps:$4 sm:$0xff]   ;;  %1112 = vmatprep.mubr.bf16.mxu0 %v2694_v6  ;;  %v2695_v21 = vld [vmem:[%s2894_s28 + $0x240] ss:$12 sps:$4 sm:$0xff]   ;;  %v2701_v23 = vld [vmem:[%s2894_s28 + $0x25c] ss:$12 sps:$4 sm:$0xff]  }
  0x13   : > { %1087 = vmatpush1.bf16.msra.mxu0 %v2679_v4  ;;  %2652 = vmatpush1.bf16.msra.mxu1 %v2679_v4  ;;  %v2703_v26 = vld [vmem:[%s2894_s28 + $0x18] ss:$12 sps:$4 sm:$0xff]   ;;  %v2706_v28 = vld [vmem:[%s2894_s28 + $0x34] ss:$12 sps:$4 sm:$0xff]   ;;  %v2710_v31 = vld [vmem:[%s2894_s28 + $0x30] ss:$12 sps:$4 sm:$0xff]  }
  0x14   : > { %1088 = vmatprep.subr.bf16.mxu0 %v2835_v1  ;;  %2637 = vmatprep.subr.bf16.mxu1 %v2835_v1  ;;  %v2704_v27 = vld [vmem:[%s2894_s28 + $0x258] ss:$12 sps:$4 sm:$0xff]   ;;  %v2708_v29 = vld [vmem:[%s2894_s28 + $0x274] ss:$12 sps:$4 sm:$0xff]   ;;  %v2711_v32 = vld [vmem:[%s2894_s28 + $0x270] ss:$12 sps:$4 sm:$0xff]  }
  0x15   : > { %1304 = vmatprep.mubr.bf16.mxu1 %v2697_v8  ;;  %v2713_v34 = vld [vmem:[%s2894_s28 + $0x4c] ss:$12 sps:$4 sm:$0xff]   ;;  %v2717_v41 = vld [vmem:[%s2894_s28 + $0x48] ss:$12 sps:$4 sm:$0xff]   ;;  %v2720_v43 = vld [vmem:[%s2894_s28 + $0x64] ss:$12 sps:$4 sm:$0xff]  }
  0x16   : > { %v2715_v35 = vld [vmem:[%s2894_s28 + $0x28c] ss:$12 sps:$4 sm:$0xff]   ;;  %v2718_v42 = vld [vmem:[%s2894_s28 + $0x288] ss:$12 sps:$4 sm:$0xff]   ;;  %v2722_v44 = vld [vmem:[%s2894_s28 + $0x2a4] ss:$12 sps:$4 sm:$0xff]  }
  0x17   : > { %1089 = vmatpush1.bf16.msra.mxu0 %v2680_v5  ;;  %2653 = vmatpush1.bf16.msra.mxu1 %v2680_v5  ;;  %v2724_v46 = vld [vmem:[%s2894_s28 + $0x60] ss:$12 sps:$4 sm:$0xff]   ;;  %v2727_v48 = vld [vmem:[%s2894_s28 + $0x7c] ss:$12 sps:$4 sm:$0xff]   ;;  %v2731_v50 = vld [vmem:[%s2894_s28 + $0x78] ss:$12 sps:$4 sm:$0xff]  }
  0x18   : > { %1090 = vmatprep.subr.bf16.mxu0 %v2835_v1  ;;  %2638 = vmatprep.subr.bf16.mxu1 %v2835_v1  ;;  %v2725_v47 = vld [vmem:[%s2894_s28 + $0x2a0] ss:$12 sps:$4 sm:$0xff]   ;;  %v2729_v49 = vld [vmem:[%s2894_s28 + $0x2bc] ss:$12 sps:$4 sm:$0xff]   ;;  %v2732_v51 = vld [vmem:[%s2894_s28 + $0x2b8] ss:$12 sps:$4 sm:$0xff]  }
  0x19   : > { %v2734_v52 = vld [vmem:[%s2894_s28 + $0x94] ss:$12 sps:$4 sm:$0xff]   ;;  %v2738_v54 = vld [vmem:[%s2894_s28 + $0x90] ss:$12 sps:$4 sm:$0xff]   ;;  %v2740_v56 = vld [vmem:[%s2894_s28 + $0xac] ss:$12 sps:$4 sm:$0xff]  }
  0x1a   : > { %v2736_v53 = vld [vmem:[%s2894_s28 + $0x2d4] ss:$12 sps:$4 sm:$0xff]   ;;  %v2739_v55 = vld [vmem:[%s2894_s28 + $0x2d0] ss:$12 sps:$4 sm:$0xff]   ;;  %v2742_v57 = vld [vmem:[%s2894_s28 + $0x2ec] ss:$12 sps:$4 sm:$0xff]  }
  0x1b   : > { %1091 = vmatpush1.bf16.msra.mxu0 %v2681_v7  ;;  %2654 = vmatpush1.bf16.msra.mxu1 %v2681_v7  ;;  %v2745_v58 = vld [vmem:[%s2894_s28 + $0xa8] ss:$12 sps:$4 sm:$0xff]   ;;  %v2747_v60 = vld [vmem:[%s2894_s28 + $0xc4] ss:$12 sps:$4 sm:$0xff]   ;;  %v2750_v62 = vld [vmem:[%s2894_s28 + $0xc0] ss:$12 sps:$4 sm:$0xff]  }
  0x1c   : > { %1092 = vmatprep.subr.bf16.mxu0 %v2835_v1  ;;  %2639 = vmatprep.subr.bf16.mxu1 %v2835_v1  ;;  %v2746_v59 = vld [vmem:[%s2894_s28 + $0x2e8] ss:$12 sps:$4 sm:$0xff]   ;;  %v2751_v63 = vld [vmem:[%s2894_s28 + $0x20] ss:$12 sps:$4 sm:$0xff]   ;;  %v2755_v2 = vld [vmem:[%s2894_s28 + $0xd8] ss:$12 sps:$4 sm:$0xff]  }
  0x1d   : > { %v2749_v61 = vld [vmem:[%s2894_s28 + $0x8] ss:$12 sps:$4 sm:$0xff]   ;;  %v2756_v3 = vld [vmem:[%s2894_s28 + $0x50] ss:$12 sps:$4 sm:$0xff]   ;;  %v2761_v7 = vld [vmem:[%s2894_s28 + $0x80] ss:$12 sps:$4 sm:$0xff]  }
  0x1e   : > { %v2752_v0 = vld [vmem:[%s2894_s28 + $0xdc] ss:$12 sps:$4 sm:$0xff]   ;;  %v2757_v4 = vld [vmem:[%s2894_s28 + $0xf4] ss:$12 sps:$4 sm:$0xff]   ;;  %v2762_v8 = vld [vmem:[%s2894_s28 + $0x10c] ss:$12 sps:$4 sm:$0xff]  }
  0x1f   : > { %1093 = vmatpush1.bf16.msra.mxu0 %v2682_v9  ;;  %2655 = vmatpush1.bf16.msra.mxu1 %v2682_v9  ;;  %v2759_v5 = vld [vmem:[%s2894_s28 + $0x68] ss:$12 sps:$4 sm:$0xff]   ;;  %v2760_v6 = vld [vmem:[%s2894_s28 + $0xf0] ss:$12 sps:$4 sm:$0xff]   ;;  %v2764_v9 = vld [vmem:[%s2894_s28 + $0x98] ss:$12 sps:$4 sm:$0xff]  }
  0x20   : > { %1094 = vmatprep.subr.bf16.mxu0 %v2835_v1  ;;  %2640 = vmatprep.subr.bf16.mxu1 %v2835_v1  ;;  %v2797_v36 = vld [vmem:[%s2894_s28 + $0x1b4] ss:$12 sps:$4 sm:$0xff]   ;;  %v2802_v40 = vld [vmem:[%s2894_s28 + $0x1cc] ss:$12 sps:$4 sm:$0xff]  }
  0x21   : > { %v2799_v37 = vld [vmem:[%s2894_s28 + $0x1e8] ss:$12 sps:$4 sm:$0xff]   ;;  %v2801_v39 = vld [vmem:[%s2894_s28 + $0x200] ss:$12 sps:$4 sm:$0xff]  }
  0x23   : > { %1095 = vmatpush1.bf16.msra.mxu0 %v2683_v10  ;;  %2656 = vmatpush1.bf16.msra.mxu1 %v2683_v10  ;;  %v2765_v10 = vld [vmem:[%s2894_s28 + $0x108] ss:$12 sps:$4 sm:$0xff]  }
  0x24   : > { %1096 = vmatprep.subr.bf16.mxu0 %v2835_v1  ;;  %2641 = vmatprep.subr.bf16.mxu1 %v2835_v1 }
  0x27   : > { %1097 = vmatpush1.bf16.msra.mxu0 %v2684_v11  ;;  %2657 = vmatpush1.bf16.msra.mxu1 %v2684_v11  ;;  %v2766_v11 = vld [vmem:[%s2894_s28 + $0xb0] ss:$12 sps:$4 sm:$0xff]  }
  0x28   : > { %1098 = vmatprep.subr.bf16.mxu0 %v2835_v1  ;;  %2642 = vmatprep.subr.bf16.mxu1 %v2835_v1 }
  0x2b   : > { %1099 = vmatpush1.bf16.msra.mxu0 %v2685_v12  ;;  %2658 = vmatpush1.bf16.msra.mxu1 %v2685_v12  ;;  %v2767_v12 = vld [vmem:[%s2894_s28 + $0x124] ss:$12 sps:$4 sm:$0xff]  }
  0x2c   : > { %1100 = vmatprep.subr.bf16.mxu0 %v2835_v1  ;;  %2643 = vmatprep.subr.bf16.mxu1 %v2835_v1 }
  0x2f   : > { %1101 = vmatpush1.bf16.msra.mxu0 %v2686_v13  ;;  %2659 = vmatpush1.bf16.msra.mxu1 %v2686_v13  ;;  %v2769_v13 = vld [vmem:[%s2894_s28 + $0xc8] ss:$12 sps:$4 sm:$0xff]  }
  0x30   : > { %1102 = vmatprep.subr.bf16.mxu0 %v2835_v1  ;;  %2644 = vmatprep.subr.bf16.mxu1 %v2835_v1 }
  0x33   : > { %1103 = vmatpush1.bf16.msra.mxu0 %v2687_v14  ;;  %2660 = vmatpush1.bf16.msra.mxu1 %v2687_v14  ;;  %v2770_v14 = vld [vmem:[%s2894_s28 + $0x120] ss:$12 sps:$4 sm:$0xff]  }
  0x34   : > { %1104 = vmatprep.subr.bf16.mxu0 %v2835_v1  ;;  %2645 = vmatprep.subr.bf16.mxu1 %v2835_v1 }
  0x37   : > { %1105 = vmatpush1.bf16.msra.mxu0 %v2688_v15  ;;  %2661 = vmatpush1.bf16.msra.mxu1 %v2688_v15  ;;  %v2771_v15 = vld [vmem:[%s2894_s28 + $0xe0] ss:$12 sps:$4 sm:$0xff]  }
  0x38   : > { %1106 = vmatprep.subr.bf16.mxu0 %v2835_v1  ;;  %2646 = vmatprep.subr.bf16.mxu1 %v2835_v1 }
  0x3b   : > { %1107 = vmatpush1.bf16.msra.mxu0 %v2689_v16  ;;  %2662 = vmatpush1.bf16.msra.mxu1 %v2689_v16  ;;  %v2772_v16 = vld [vmem:[%s2894_s28 + $0x13c] ss:$12 sps:$4 sm:$0xff]  }
  0x3c   : > { %1108 = vmatprep.subr.bf16.mxu0 %v2835_v1  ;;  %2647 = vmatprep.subr.bf16.mxu1 %v2835_v1 }
  0x3f   : > { %1109 = vmatpush1.bf16.msra.mxu0 %v2690_v17  ;;  %2663 = vmatpush1.bf16.msra.mxu1 %v2690_v17  ;;  %v2774_v17 = vld [vmem:[%s2894_s28 + $0xf8] ss:$12 sps:$4 sm:$0xff]  }
  0x40   : > { %1110 = vmatprep.subr.bf16.mxu0 %v2835_v1  ;;  %2648 = vmatprep.subr.bf16.mxu1 %v2835_v1  ;;  %v2754_v1 = vld [vmem:[%s2894_s28 + $0x38] ss:$12 sps:$4 sm:$0xff]  }
  0x43   : > { %1111 = vmatpush1.bf16.msra.mxu0 %v2691_v18  ;;  %2664 = vmatpush1.bf16.msra.mxu1 %v2691_v18  ;;  %v2775_v18 = vld [vmem:[%s2894_s28 + $0x138] ss:$12 sps:$4 sm:$0xff]  }
  0x44   : > { %2555 = vmatprep.subr.bf16.mxu1 %v2698_v20 }
  0x46   : > { %1113 = vmatmul.mubr.bf16.vlgmr.msra.gmra.mrb[0].mxu0 %v2692_v19  ;;  %1305 = vmatmul.mubr.bf16.vlgmr.msra.gmra.mrb[0].mxu1 %v2695_v21  ;;  %v2776_v19 = vld [vmem:[%s2894_s28 + $0x110] ss:$12 sps:$4 sm:$0xff]   ;;  %v2779_v21 = vld [vmem:[%s2894_s28 + $0x128] ss:$12 sps:$4 sm:$0xff]  }
  0x47   : > { %2556 = vmatpush3.bf16.msra.mxu1 %v2698_v20  ;;  %1120 = vmatprep.mubr.bf16.mxu0 %v2699_v22  ;;  %v2777_v20 = vld [vmem:[%s2894_s28 + $0x154] ss:$12 sps:$4 sm:$0xff]   ;;  %v2780_v22 = vld [vmem:[%s2894_s28 + $0x150] ss:$12 sps:$4 sm:$0xff]  }
  0x48   : > { %1312 = vmatprep.mubr.bf16.mxu1 %v2701_v23  ;;  %2557 = vmatprep.subr.bf16.mxu1 %v2705_v24  ;;  %v2781_v23 = vld [vmem:[%s2894_s28 + $0x140] ss:$12 sps:$4 sm:$0xff]  }
  0x4b   : > { %2558 = vmatpush3.bf16.msra.mxu1 %v2705_v24  ;;  %v2782_v24 = vld [vmem:[%s2894_s28 + $0x16c] ss:$12 sps:$4 sm:$0xff]  }
  0x4c   : > { %2559 = vmatprep.subr.bf16.mxu1 %v2712_v25 }
  0x4e   : > { %1121 = vmatmul.mubr.bf16.gmra.mrb[4].mxu0 %v2703_v26  ;;  %1313 = vmatmul.mubr.bf16.gmra.mrb[4].mxu1 %v2704_v27  ;;  %v2785_v26 = vld [vmem:[%s2894_s28 + $0x168] ss:$12 sps:$4 sm:$0xff]   ;;  %v2786_v27 = vld [vmem:[%s2894_s28 + $0x170] ss:$12 sps:$4 sm:$0xff]  }
  0x4f   : > { %1128 = vmatprep.mubr.bf16.mxu0 %v2706_v28  ;;  %1320 = vmatprep.mubr.bf16.mxu1 %v2708_v29  ;;  %v2787_v28 = vld [vmem:[%s2894_s28 + $0x184] ss:$12 sps:$4 sm:$0xff]   ;;  %v2789_v29 = vld [vmem:[%s2894_s28 + $0x188] ss:$12 sps:$4 sm:$0xff]  }
  0x50   : > { %2560 = vmatpush3.bf16.msra.mxu1 %v2712_v25  ;;  %v2784_v25 = vld [vmem:[%s2894_s28 + $0x158] ss:$12 sps:$4 sm:$0xff]  }
  0x51   : > { %2561 = vmatprep.subr.bf16.mxu1 %v2719_v30 }
  0x54   : > { %2562 = vmatpush3.bf16.msra.mxu1 %v2719_v30  ;;  %v2790_v30 = vld [vmem:[%s2894_s28 + $0x180] ss:$12 sps:$4 sm:$0xff]  }
  0x55   : > { %2563 = vmatprep.subr.bf16.mxu1 %v2726_v33 }
  0x56   : > { %1129 = vmatmul.mubr.bf16.gmra.mrb[8].mxu0 %v2710_v31  ;;  %1321 = vmatmul.mubr.bf16.gmra.mrb[8].mxu1 %v2711_v32  ;;  %v2791_v31 = vld [vmem:[%s2894_s28 + $0x1a0] ss:$12 sps:$4 sm:$0xff]   ;;  %v2792_v32 = vld [vmem:[%s2894_s28 + $0x19c] ss:$12 sps:$4 sm:$0xff]  }
  0x57   : > { %1136 = vmatprep.mubr.bf16.mxu0 %v2713_v34  ;;  %1328 = vmatprep.mubr.bf16.mxu1 %v2715_v35  ;;  %v2795_v34 = vld [vmem:[%s2894_s28 + $0x198] ss:$12 sps:$4 sm:$0xff]   ;;  %v2796_v35 = vld [vmem:[%s2894_s28 + $0x1d0] ss:$12 sps:$4 sm:$0xff]  }
  0x58   : > { %2564 = vmatpush3.bf16.msra.mxu1 %v2726_v33  ;;  %v2794_v33 = vld [vmem:[%s2894_s28 + $0x1b8] ss:$12 sps:$4 sm:$0xff]  }
  0x59   : > { %2565 = vmatprep.subr.bf16.mxu1 %v2733_v38 }
  0x5c   : > { %2566 = vmatpush3.bf16.msra.mxu1 %v2733_v38  ;;  %v2800_v38 = vld [vmem:[%s2894_s28 + $0x1b0] ss:$12 sps:$4 sm:$0xff]  }
  0x5d   : > { %2567 = vmatprep.subr.bf16.mxu1 %v1078_v45 }
  0x5e   : > { %1137 = vmatmul.mubr.bf16.gmra.mrb[12].mxu0 %v2717_v41  ;;  %1329 = vmatmul.mubr.bf16.gmra.mrb[12].mxu1 %v2718_v42  ;;  %v2804_v41 = vld [vmem:[%s2894_s28 + $0x218] ss:$12 sps:$4 sm:$0xff]   ;;  %v2805_v42 = vld [vmem:[%s2894_s28 + $0x1c8] ss:$12 sps:$4 sm:$0xff]  }
  0x5f   : > { %1144 = vmatprep.mubr.bf16.mxu0 %v2720_v43  ;;  %1336 = vmatprep.mubr.bf16.mxu1 %v2722_v44  ;;  %v2806_v43 = vld [vmem:[%s2894_s28 + $0x230] ss:$12 sps:$4 sm:$0xff]  }
  0x60   : > { %2568 = vmatpush3.bf16.msra.mxu1 %v1078_v45  ;;  %v2807_v44 = vld [vmem:[%s2894_s28 + $0x1e4] ss:$12 sps:$4 sm:$0xff]   ;;  %v2809_v45 = vld [vmem:[%s2894_s28 + $0x248] ss:$12 sps:$4 sm:$0xff]  }
  0x66   : > { %1145 = vmatmul.mubr.bf16.gmra.mrb[16].mxu0 %v2724_v46  ;;  %1337 = vmatmul.mubr.bf16.gmra.mrb[16].mxu1 %v2725_v47  ;;  %v2810_v46 = vld [vmem:[%s2894_s28 + $0x1e0] ss:$12 sps:$4 sm:$0xff]  }
  0x67   : > { %1152 = vmatprep.mubr.bf16.mxu0 %v2727_v48  ;;  %1344 = vmatprep.mubr.bf16.mxu1 %v2729_v49  ;;  %v2811_v47 = vld [vmem:[%s2894_s28 + $0x260] ss:$12 sps:$4 sm:$0xff]   ;;  %v2812_v48 = vld [vmem:[%s2894_s28 + $0x1fc] ss:$12 sps:$4 sm:$0xff]   ;;  %v2814_v49 = vld [vmem:[%s2894_s28 + $0x278] ss:$12 sps:$4 sm:$0xff]  }
  0x6e   : > { %1153 = vmatmul.mubr.bf16.gmra.mrb[20].mxu0 %v2731_v50  ;;  %1345 = vmatmul.mubr.bf16.gmra.mrb[20].mxu1 %v2732_v51  ;;  %v2815_v50 = vld [vmem:[%s2894_s28 + $0x1f8] ss:$12 sps:$4 sm:$0xff]   ;;  %v2816_v51 = vld [vmem:[%s2894_s28 + $0x290] ss:$12 sps:$4 sm:$0xff]  }
  0x6f   : > { %1160 = vmatprep.mubr.bf16.mxu0 %v2734_v52  ;;  %1352 = vmatprep.mubr.bf16.mxu1 %v2736_v53  ;;  %v2817_v52 = vld [vmem:[%s2894_s28 + $0x214] ss:$12 sps:$4 sm:$0xff]  }
  0x70   : > { %v2819_v53 = vld [vmem:[%s2894_s28 + $0x2a8] ss:$12 sps:$4 sm:$0xff]  }
  0x76   : > { %1161 = vmatmul.mubr.bf16.gmra.mrb[24].mxu0 %v2738_v54  ;;  %1353 = vmatmul.mubr.bf16.gmra.mrb[24].mxu1 %v2739_v55  ;;  %v2820_v54 = vld [vmem:[%s2894_s28 + $0x210] ss:$12 sps:$4 sm:$0xff]   ;;  %v2821_v55 = vld [vmem:[%s2894_s28 + $0x2c0] ss:$12 sps:$4 sm:$0xff]  }
  0x77   : > { %1168 = vmatprep.mubr.bf16.mxu0 %v2740_v56  ;;  %1360 = vmatprep.mubr.bf16.mxu1 %v2742_v57  ;;  %v2822_v56 = vld [vmem:[%s2894_s28 + $0x22c] ss:$12 sps:$4 sm:$0xff]  }
  0x78   : > { %v2824_v57 = vld [vmem:[%s2894_s28 + $0x2d8] ss:$12 sps:$4 sm:$0xff]  }
  0x7e   : > { %1169 = vmatmul.mubr.bf16.gmra.mrb[28].mxu0 %v2745_v58  ;;  %1361 = vmatmul.mubr.bf16.gmra.mrb[28].mxu1 %v2746_v59  ;;  %v2825_v58 = vld [vmem:[%s2894_s28 + $0x228] ss:$12 sps:$4 sm:$0xff]   ;;  %v2826_v59 = vld [vmem:[%s2894_s28 + $0x2f0] ss:$12 sps:$4 sm:$0xff]  }
  0x7f   : > { %1176 = vmatprep.mubr.bf16.mxu0 %v2747_v60  ;;  %2569 = vmatprep.mubr.msk.bf16.mxu1 %vm976_vm2, %v2749_v61 }
  0x86   : > { %1177 = vmatmul.mubr.bf16.gmra.mrb[32].mxu0 %v2750_v62  ;;  %2570 = vmatmul.mubr.msk.bf16.vlgmr.msra.gmra.mrb[32].mxu1 %vm976_vm2, %v2751_v63 }
  0x87   : > { %1184 = vmatprep.mubr.bf16.mxu0 %v2752_v0  ;;  %2573 = vmatprep.mubr.msk.bf16.mxu1 %vm976_vm2, %v2754_v1 }
  0x8e   : > { %1185 = vmatmul.mubr.bf16.gmra.mrb[36].mxu0 %v2755_v2  ;;  %2574 = vmatmul.mubr.msk.bf16.gmra.mrb[36].mxu1 %vm976_vm2, %v2756_v3 }
  0x8f   : > { %1192 = vmatprep.mubr.bf16.mxu0 %v2757_v4  ;;  %2577 = vmatprep.mubr.msk.bf16.mxu1 %vm976_vm2, %v2759_v5 }
  0x96   : > { %1193 = vmatmul.mubr.bf16.gmra.mrb[40].mxu0 %v2760_v6  ;;  %2578 = vmatmul.mubr.msk.bf16.gmra.mrb[40].mxu1 %vm976_vm2, %v2761_v7 }
  0x97   : > { %1200 = vmatprep.mubr.bf16.mxu0 %v2762_v8  ;;  %2581 = vmatprep.mubr.msk.bf16.mxu1 %vm976_vm2, %v2764_v9 }
  0x9e   : > { %1201 = vmatmul.mubr.bf16.gmra.mrb[44].mxu0 %v2765_v10  ;;  %2582 = vmatmul.mubr.msk.bf16.gmra.mrb[44].mxu1 %vm976_vm2, %v2766_v11 }
  0x9f   : > { %1208 = vmatprep.mubr.bf16.mxu0 %v2767_v12  ;;  %2585 = vmatprep.mubr.msk.bf16.mxu1 %vm976_vm2, %v2769_v13 }
  0xa6   : > { %1209 = vmatmul.mubr.bf16.gmra.mrb[48].mxu0 %v2770_v14  ;;  %2586 = vmatmul.mubr.msk.bf16.gmra.mrb[48].mxu1 %vm976_vm2, %v2771_v15 }
  0xa7   : > { %1216 = vmatprep.mubr.bf16.mxu0 %v2772_v16  ;;  %2589 = vmatprep.mubr.msk.bf16.mxu1 %vm976_vm2, %v2774_v17 }
  0xae   : > { %1217 = vmatmul.mubr.bf16.gmra.mrb[52].mxu0 %v2775_v18  ;;  %2590 = vmatmul.mubr.msk.bf16.gmra.mrb[52].mxu1 %vm976_vm2, %v2776_v19 }
  0xaf   : > { %1224 = vmatprep.mubr.bf16.mxu0 %v2777_v20  ;;  %2593 = vmatprep.mubr.msk.bf16.mxu1 %vm976_vm2, %v2779_v21 }
  0xb6   : > { %1225 = vmatmul.mubr.bf16.gmra.mrb[56].mxu0 %v2780_v22  ;;  %2594 = vmatmul.mubr.msk.bf16.gmra.mrb[56].mxu1 %vm976_vm2, %v2781_v23 }
  0xb7   : > { %1232 = vmatprep.mubr.bf16.mxu0 %v2782_v24  ;;  %2597 = vmatprep.mubr.msk.bf16.mxu1 %vm976_vm2, %v2784_v25 }
  0xbe   : > { %1233 = vmatmul.mubr.bf16.gmra.mrb[60].mxu0 %v2785_v26  ;;  %2598 = vmatmul.mubr.msk.bf16.gmra.mrb[60].mxu1 %vm976_vm2, %v2786_v27 }
  0xbf   : > { %1240 = vmatprep.mubr.bf16.mxu0 %v2787_v28  ;;  %2601 = vmatprep.mubr.msk.bf16.mxu1 %vm976_vm2, %v2789_v29 }
  0xc6   : > { %1241 = vmatmul.mubr.bf16.gmra.mrb[64].mxu0 %v2790_v30  ;;  %2602 = vmatmul.mubr.msk.bf16.gmra.mrb[64].mxu1 %vm976_vm2, %v2791_v31 }
  0xc7   : > { %1248 = vmatprep.mubr.bf16.mxu0 %v2792_v32  ;;  %2605 = vmatprep.mubr.msk.bf16.mxu1 %vm976_vm2, %v2794_v33 }
  0xce   : > { %1249 = vmatmul.mubr.bf16.gmra.mrb[68].mxu0 %v2795_v34  ;;  %2606 = vmatmul.mubr.msk.bf16.gmra.mrb[68].mxu1 %vm976_vm2, %v2796_v35 }
  0xcf   : > { %1256 = vmatprep.mubr.bf16.mxu0 %v2797_v36  ;;  %2609 = vmatprep.mubr.msk.bf16.mxu1 %vm976_vm2, %v2799_v37 }
  0xd6   : > { %1257 = vmatmul.mubr.bf16.gmra.mrb[72].mxu0 %v2800_v38  ;;  %2610 = vmatmul.mubr.msk.bf16.gmra.mrb[72].mxu1 %vm976_vm2, %v2801_v39 }
  0xd7   : > { %1264 = vmatprep.mubr.bf16.mxu0 %v2802_v40  ;;  %2613 = vmatprep.mubr.msk.bf16.mxu1 %vm976_vm2, %v2804_v41 }
  0xde   : > { %1265 = vmatmul.mubr.bf16.gmra.mrb[76].mxu0 %v2805_v42  ;;  %2614 = vmatmul.mubr.msk.bf16.gmra.mrb[76].mxu1 %vm976_vm2, %v2806_v43 }
  0xdf   : > { %1272 = vmatprep.mubr.bf16.mxu0 %v2807_v44  ;;  %2617 = vmatprep.mubr.msk.bf16.mxu1 %vm976_vm2, %v2809_v45 }
  0xe6   : > { %1273 = vmatmul.mubr.bf16.gmra.mrb[80].mxu0 %v2810_v46  ;;  %2618 = vmatmul.mubr.msk.bf16.gmra.mrb[80].mxu1 %vm976_vm2, %v2811_v47 }
  0xe7   : > { %1280 = vmatprep.mubr.bf16.mxu0 %v2812_v48  ;;  %2621 = vmatprep.mubr.msk.bf16.mxu1 %vm976_vm2, %v2814_v49 }
  0xee   : > { %1281 = vmatmul.mubr.bf16.gmra.mrb[84].mxu0 %v2815_v50  ;;  %2622 = vmatmul.mubr.msk.bf16.gmra.mrb[84].mxu1 %vm976_vm2, %v2816_v51 }
  0xef   : > { %1288 = vmatprep.mubr.bf16.mxu0 %v2817_v52  ;;  %2625 = vmatprep.mubr.msk.bf16.mxu1 %vm976_vm2, %v2819_v53 }
  0xf6   : > { %1289 = vmatmul.mubr.bf16.gmra.mrb[88].mxu0 %v2820_v54  ;;  %2626 = vmatmul.mubr.msk.bf16.gmra.mrb[88].mxu1 %vm976_vm2, %v2821_v55 }
  0xf7   : > { %1296 = vmatprep.mubr.bf16.mxu0 %v2822_v56  ;;  %2629 = vmatprep.mubr.msk.bf16.mxu1 %vm976_vm2, %v2824_v57 }
  0xfe   : > { %1297 = vmatmul.mubr.bf16.gmra.mrb[92].mxu0 %v2825_v58  ;;  %2630 = vmatmul.mubr.msk.bf16.gmra.mrb[92].mxu1 %vm976_vm2, %v2826_v59 }
 0x119   : > { %v3102_v60 = vpop.f32.mrb[0].mxu0  ;;  %v3104_v61 = vpop.f32.mrb[0].mxu1 }
 0x11a   : > { %v1116_v62 = vpop.f32.mrb[1].mxu0  ;;  %v1308_v63 = vpop.f32.mrb[1].mxu1 }
 0x11b   : > { %v3106_v0 = vpop.f32.mrb[2].mxu0  ;;  %v3108_v1 = vpop.f32.mrb[2].mxu1  ;;  %v3163_v62 = vld [vmem:[%s3325_s2] ss:$0 sm:$0xff] }
 0x11c   : > { %v1119_v2 = vpop.f32.mrb[3].mxu0  ;;  %v1311_v3 = vpop.f32.mrb[3].mxu1 }
 0x11d   : > { %v1115_v2 = vadd.f32 %v3163_v62, %v3102_v60 }
 0x121   : > { %v1122_v4 = vpop.f32.mrb[4].mxu0  ;;  %v3110_v5 = vpop.f32.mrb[4].mxu1 }
 0x122   : > { %v1124_v6 = vpop.f32.mrb[5].mxu0  ;;  %v1316_v7 = vpop.f32.mrb[5].mxu1  ;;  %v1123_v63 = vadd.f32 %v3163_v62, %v1122_v4 }
 0x123   : > { %v1125_v8 = vpop.f32.mrb[6].mxu0  ;;  %v3112_v9 = vpop.f32.mrb[6].mxu1 }
 0x124   : > { %v1127_v10 = vpop.f32.mrb[7].mxu0  ;;  %v1319_v11 = vpop.f32.mrb[7].mxu1  ;;  %v1126_v7 = vadd.f32 %v3163_v62, %v1125_v8 }
 0x129   : > { %v3114_v12 = vpop.f32.mrb[8].mxu0  ;;  %v3116_v13 = vpop.f32.mrb[8].mxu1 }
 0x12a   : > { %v1132_v14 = vpop.f32.mrb[9].mxu0  ;;  %v1324_v15 = vpop.f32.mrb[9].mxu1 }
 0x12b   : > { %v3118_v16 = vpop.f32.mrb[10].mxu0  ;;  %v3120_v17 = vpop.f32.mrb[10].mxu1  ;;  %v1118_v15 = vadd.f32 %v3163_v62, %v3106_v0  ;;  %v1131_v0 = vadd.f32 %v3163_v62, %v3114_v12 }
 0x12c   : > { %v1135_v18 = vpop.f32.mrb[11].mxu0  ;;  %v1327_v19 = vpop.f32.mrb[11].mxu1 }
 0x131   : > { %v1138_v20 = vpop.f32.mrb[12].mxu0  ;;  %v3122_v21 = vpop.f32.mrb[12].mxu1 }
 0x132   : > { %v1140_v22 = vpop.f32.mrb[13].mxu0  ;;  %v1332_v23 = vpop.f32.mrb[13].mxu1 }
 0x133   : > { %v3124_v24 = vpop.f32.mrb[14].mxu0  ;;  %v3126_v25 = vpop.f32.mrb[14].mxu1 }
 0x134   : > { %v1143_v26 = vpop.f32.mrb[15].mxu0  ;;  %v1335_v27 = vpop.f32.mrb[15].mxu1 }
 0x139   : > { %v3128_v28 = vpop.f32.mrb[16].mxu0  ;;  %v3130_v29 = vpop.f32.mrb[16].mxu1 }
 0x13a   : > { %v1148_v30 = vpop.f32.mrb[17].mxu0  ;;  %v1340_v31 = vpop.f32.mrb[17].mxu1 }
 0x13b   : > { %v3132_v32 = vpop.f32.mrb[18].mxu0  ;;  %v3134_v33 = vpop.f32.mrb[18].mxu1  ;;  %v1139_v30 = vadd.f32 %v3163_v62, %v1138_v20 }
 0x13c   : > { %v1151_v34 = vpop.f32.mrb[19].mxu0  ;;  %v1343_v35 = vpop.f32.mrb[19].mxu1 }
 0x13d   : > { %v1142_v35 = vadd.f32 %v3163_v62, %v3124_v24  ;;  %v1147_v24 = vadd.f32 %v3163_v62, %v3128_v28 }
 0x141   : > { %v3136_v36 = vpop.f32.mrb[20].mxu0  ;;  %v3138_v37 = vpop.f32.mrb[20].mxu1 }
 0x142   : > { %v1156_v38 = vpop.f32.mrb[21].mxu0  ;;  %v1348_v39 = vpop.f32.mrb[21].mxu1 }
 0x143   : > { %v3140_v40 = vpop.f32.mrb[22].mxu0  ;;  %v3142_v41 = vpop.f32.mrb[22].mxu1 }
 0x144   : > { %v1159_v42 = vpop.f32.mrb[23].mxu0  ;;  %v1351_v43 = vpop.f32.mrb[23].mxu1 }
 0x145   : > { %v1134_v43 = vadd.f32 %v3163_v62, %v3118_v16  ;;  %v1158_v16 = vadd.f32 %v3163_v62, %v3140_v40 }
 0x149   : > { %v3144_v44 = vpop.f32.mrb[24].mxu0  ;;  %v3146_v45 = vpop.f32.mrb[24].mxu1 }
 0x14a   : > { %v1164_v46 = vpop.f32.mrb[25].mxu0  ;;  %v1356_v47 = vpop.f32.mrb[25].mxu1  ;;  %v1163_v40 = vadd.f32 %v3163_v62, %v3144_v44 }
 0x14b   : > { %v3148_v48 = vpop.f32.mrb[26].mxu0  ;;  %v3150_v49 = vpop.f32.mrb[26].mxu1 }
 0x14c   : > { %v1167_v50 = vpop.f32.mrb[27].mxu0  ;;  %v1359_v51 = vpop.f32.mrb[27].mxu1 }
 0x151   : > { %v3152_v52 = vpop.f32.mrb[28].mxu0  ;;  %v3154_v53 = vpop.f32.mrb[28].mxu1 }
 0x152   : > { %v1172_v54 = vpop.f32.mrb[29].mxu0  ;;  %v1364_v55 = vpop.f32.mrb[29].mxu1 }
 0x153   : > { %v3156_v56 = vpop.f32.mrb[30].mxu0  ;;  %v3158_v57 = vpop.f32.mrb[30].mxu1 }
 0x154   : > { %v1175_v58 = vpop.f32.mrb[31].mxu0  ;;  %v1367_v59 = vpop.f32.mrb[31].mxu1 }
 0x155   : > { %v1155_v59 = vadd.f32 %v3163_v62, %v3136_v36 }
 0x159   : > { %v3168_v3 = vpop.f32.mrb[32].mxu0  ;;  %v2571_v6 = vpop.f32.mrb[32].mxu1 }
 0x15a   : > { %v1412_v10 = vadd.f32 %v2571_v6, %v1123_v63  ;;  %v1180_v11 = vpop.f32.mrb[33].mxu0  ;;  %v1403_v14 = vpop.f32.mrb[33].mxu1 }
 0x15b   : > { %v1404_v18 = vadd.f32 %v1403_v14, %v1115_v2  ;;  %v3174_v19 = vpop.f32.mrb[34].mxu0  ;;  %v2572_v22 = vpop.f32.mrb[34].mxu1  ;;  %v1150_v11 = vadd.f32 %v3163_v62, %v3132_v32  ;;  %v1174_v32 = vadd.f32 %v3163_v62, %v3156_v56  ;;  %v1179_v56 = vadd.f32 %v3163_v62, %v3168_v3 }
 0x15c   : > { %v1415_v4 = vadd.f32 %v2572_v22, %v1126_v7  ;;  %v1183_v23 = vpop.f32.mrb[35].mxu0  ;;  %v1406_v26 = vpop.f32.mrb[35].mxu1 }
 0x15d   : > { %v1407_v60 = vadd.f32 %v1406_v26, %v1118_v15 }
 0x15e   : > { %v2333_v8 = vpack.c.bf16 %v1415_v4, %v1412_v10 }
 0x15f   : > { %v2328_v27 = vpack.c.bf16 %v1407_v60, %v1404_v18  ;;  %v1171_v60 = vadd.f32 %v3163_v62, %v3152_v52 }
 0x160   : > { %2485 = vst [vmem:[%s3179_s20 + $0x8] sm:$0xff] %v2333_v8  }
 0x161   : > { %2329 = vst [vmem:[%s3179_s20] sm:$0xff] %v2328_v27   ;;  %v1186_v31 = vpop.f32.mrb[36].mxu0  ;;  %v2575_v34 = vpop.f32.mrb[36].mxu1 }
 0x162   : > { %v1428_v38 = vadd.f32 %v2575_v34, %v1139_v30  ;;  %v1188_v39 = vpop.f32.mrb[37].mxu0  ;;  %v1419_v42 = vpop.f32.mrb[37].mxu1 }
 0x163   : > { %v1420_v46 = vadd.f32 %v1419_v42, %v1131_v0  ;;  %v1189_v20 = vpop.f32.mrb[38].mxu0  ;;  %v2576_v47 = vpop.f32.mrb[38].mxu1 }
 0x164   : > { %v1431_v50 = vadd.f32 %v2576_v47, %v1142_v35  ;;  %v1191_v51 = vpop.f32.mrb[39].mxu0  ;;  %v1422_v12 = vpop.f32.mrb[39].mxu1  ;;  %v1166_v35 = vadd.f32 %v3163_v62, %v3148_v48  ;;  %v1190_v48 = vadd.f32 %v3163_v62, %v1189_v20 }
 0x165   : > { %v1423_v54 = vadd.f32 %v1422_v12, %v1134_v43  ;;  %v1187_v51 = vadd.f32 %v3163_v62, %v1186_v31 }
 0x166   : > { %v2343_v55 = vpack.c.bf16 %v1431_v50, %v1428_v38 }
 0x167   : > { %v2338_v58 = vpack.c.bf16 %v1423_v54, %v1420_v46 }
 0x168   : > { %2487 = vst [vmem:[%s3179_s20 + $0x18] sm:$0xff] %v2343_v55  }
 0x169   : > { %2486 = vst [vmem:[%s3179_s20 + $0x10] sm:$0xff] %v2338_v58   ;;  %v1194_v63 = vpop.f32.mrb[40].mxu0  ;;  %v2579_v2 = vpop.f32.mrb[40].mxu1 }
 0x16a   : > { %v1444_v6 = vadd.f32 %v2579_v2, %v1155_v59  ;;  %v1196_v7 = vpop.f32.mrb[41].mxu0  ;;  %v1435_v10 = vpop.f32.mrb[41].mxu1  ;;  %v1195_v20 = vadd.f32 %v3163_v62, %v1194_v63 }
 0x16b   : > { %v1436_v14 = vadd.f32 %v1435_v10, %v1147_v24  ;;  %v1197_v36 = vpop.f32.mrb[42].mxu0  ;;  %v2580_v15 = vpop.f32.mrb[42].mxu1  ;;  %v1182_v24 = vadd.f32 %v3163_v62, %v3174_v19 }
 0x16c   : > { %v1447_v18 = vadd.f32 %v2580_v15, %v1158_v16  ;;  %v1199_v22 = vpop.f32.mrb[43].mxu0  ;;  %v1438_v28 = vpop.f32.mrb[43].mxu1 }
 0x16d   : > { %v1439_v4 = vadd.f32 %v1438_v28, %v1150_v11 }
 0x16e   : > { %v2353_v23 = vpack.c.bf16 %v1447_v18, %v1444_v6 }
 0x16f   : > { %v2348_v26 = vpack.c.bf16 %v1439_v4, %v1436_v14 }
 0x170   : > { %2489 = vst [vmem:[%s3179_s20 + $0x28] sm:$0xff] %v2353_v23  }
 0x171   : > { %2488 = vst [vmem:[%s3179_s20 + $0x20] sm:$0xff] %v2348_v26   ;;  %v1202_v8 = vpop.f32.mrb[44].mxu0  ;;  %v2583_v27 = vpop.f32.mrb[44].mxu1  ;;  %v1198_v26 = vadd.f32 %v3163_v62, %v1197_v36 }
 0x172   : > { %v1460_v30 = vadd.f32 %v2583_v27, %v1171_v60  ;;  %v1204_v0 = vpop.f32.mrb[45].mxu0  ;;  %v1451_v34 = vpop.f32.mrb[45].mxu1  ;;  %v1203_v15 = vadd.f32 %v3163_v62, %v1202_v8 }
 0x173   : > { %v1452_v38 = vadd.f32 %v1451_v34, %v1163_v40  ;;  %v1205_v52 = vpop.f32.mrb[46].mxu0  ;;  %v2584_v39 = vpop.f32.mrb[46].mxu1 }
 0x174   : > { %v1463_v42 = vadd.f32 %v2584_v39, %v1174_v32  ;;  %v1207_v43 = vpop.f32.mrb[47].mxu0  ;;  %v1454_v44 = vpop.f32.mrb[47].mxu1  ;;  %v1206_v19 = vadd.f32 %v3163_v62, %v1205_v52 }
 0x175   : > { %v1455_v46 = vadd.f32 %v1454_v44, %v1166_v35 }
 0x176   : > { %v2363_v47 = vpack.c.bf16 %v1463_v42, %v1460_v30 }
 0x177   : > { %v2358_v50 = vpack.c.bf16 %v1455_v46, %v1452_v38 }
 0x178   : > { %2491 = vst [vmem:[%s3179_s20 + $0x38] sm:$0xff] %v2363_v47  }
 0x179   : > { %2490 = vst [vmem:[%s3179_s20 + $0x30] sm:$0xff] %v2358_v50   ;;  %v1210_v12 = vpop.f32.mrb[48].mxu0  ;;  %v2587_v54 = vpop.f32.mrb[48].mxu1 }
 0x17a   : > { %v1476_v55 = vadd.f32 %v2587_v54, %v1187_v51  ;;  %v1212_v58 = vpop.f32.mrb[49].mxu0  ;;  %v1467_v59 = vpop.f32.mrb[49].mxu1  ;;  %v1211_v38 = vadd.f32 %v3163_v62, %v1210_v12 }
 0x17b   : > { %v1468_v2 = vadd.f32 %v1467_v59, %v1179_v56  ;;  %v1213_v16 = vpop.f32.mrb[50].mxu0  ;;  %v2588_v31 = vpop.f32.mrb[50].mxu1 }
 0x17c   : > { %v1479_v6 = vadd.f32 %v2588_v31, %v1190_v48  ;;  %v1215_v7 = vpop.f32.mrb[51].mxu0  ;;  %v1470_v10 = vpop.f32.mrb[51].mxu1  ;;  %v1214_v46 = vadd.f32 %v3163_v62, %v1213_v16 }
 0x17d   : > { %v1471_v3 = vadd.f32 %v1470_v10, %v1182_v24 }
 0x17e   : > { %v2373_v11 = vpack.c.bf16 %v1479_v6, %v1476_v55 }
 0x17f   : > { %v2368_v14 = vpack.c.bf16 %v1471_v3, %v1468_v2 }
 0x180   : > { %2493 = vst [vmem:[%s3179_s20 + $0x48] sm:$0xff] %v2373_v11  }
 0x181   : > { %2492 = vst [vmem:[%s3179_s20 + $0x40] sm:$0xff] %v2368_v14   ;;  %v1218_v18 = vpop.f32.mrb[52].mxu0  ;;  %v2591_v22 = vpop.f32.mrb[52].mxu1 }
 0x182   : > { %v1492_v28 = vadd.f32 %v2591_v22, %v1203_v15  ;;  %v1220_v4 = vpop.f32.mrb[53].mxu0  ;;  %v1483_v23 = vpop.f32.mrb[53].mxu1  ;;  %v1219_v35 = vadd.f32 %v3163_v62, %v1218_v18 }
 0x183   : > { %v1484_v60 = vadd.f32 %v1483_v23, %v1195_v20  ;;  %v1221_v40 = vpop.f32.mrb[54].mxu0  ;;  %v2592_v27 = vpop.f32.mrb[54].mxu1 }
 0x184   : > { %v1495_v32 = vadd.f32 %v2592_v27, %v1206_v19  ;;  %v1223_v8 = vpop.f32.mrb[55].mxu0  ;;  %v1486_v30 = vpop.f32.mrb[55].mxu1  ;;  %v1222_v36 = vadd.f32 %v3163_v62, %v1221_v40 }
 0x185   : > { %v1487_v0 = vadd.f32 %v1486_v30, %v1198_v26 }
 0x186   : > { %v2383_v63 = vpack.c.bf16 %v1495_v32, %v1492_v28 }
 0x187   : > { %v2378_v34 = vpack.c.bf16 %v1487_v0, %v1484_v60 }
 0x188   : > { %2495 = vst [vmem:[%s3179_s20 + $0x58] sm:$0xff] %v2383_v63  }
 0x189   : > { %2494 = vst [vmem:[%s3179_s20 + $0x50] sm:$0xff] %v2378_v34   ;;  %v1226_v52 = vpop.f32.mrb[56].mxu0  ;;  %v2595_v39 = vpop.f32.mrb[56].mxu1 }
 0x18a   : > { %v1508_v42 = vadd.f32 %v2595_v39, %v1219_v35  ;;  %v1228_v43 = vpop.f32.mrb[57].mxu0  ;;  %v1499_v44 = vpop.f32.mrb[57].mxu1  ;;  %v1227_v59 = vadd.f32 %v3163_v62, %v1226_v52 }
 0x18b   : > { %v1500_v47 = vadd.f32 %v1499_v44, %v1211_v38  ;;  %v1229_v50 = vpop.f32.mrb[58].mxu0  ;;  %v2596_v51 = vpop.f32.mrb[58].mxu1 }
 0x18c   : > { %v1511_v56 = vadd.f32 %v2596_v51, %v1222_v36  ;;  %v1231_v54 = vpop.f32.mrb[59].mxu0  ;;  %v1502_v48 = vpop.f32.mrb[59].mxu1  ;;  %v1230_v7 = vadd.f32 %v3163_v62, %v1229_v50 }
 0x18d   : > { %v1503_v55 = vadd.f32 %v1502_v48, %v1214_v46 }
 0x18e   : > { %v2393_v12 = vpack.c.bf16 %v1511_v56, %v1508_v42 }
 0x18f   : > { %v2388_v58 = vpack.c.bf16 %v1503_v55, %v1500_v47 }
 0x190   : > { %2497 = vst [vmem:[%s3179_s20 + $0x68] sm:$0xff] %v2393_v12  }
 0x191   : > { %2496 = vst [vmem:[%s3179_s20 + $0x60] sm:$0xff] %v2388_v58   ;;  %v1234_v24 = vpop.f32.mrb[60].mxu0  ;;  %v2599_v2 = vpop.f32.mrb[60].mxu1 }
 0x192   : > { %v1235_v31 = vadd.f32 %v3163_v62, %v1234_v24  ;;  %v1236_v6 = vpop.f32.mrb[61].mxu0  ;;  %v1515_v16 = vpop.f32.mrb[61].mxu1 }
 0x193   : > { %v1516_v10 = vadd.f32 %v1515_v16, %v1227_v59  ;;  %v1237_v3 = vpop.f32.mrb[62].mxu0  ;;  %v2600_v11 = vpop.f32.mrb[62].mxu1 }
 0x194   : > { %v1524_v14 = vadd.f32 %v2599_v2, %v1235_v31  ;;  %v1238_v15 = vadd.f32 %v3163_v62, %v1237_v3  ;;  %v1239_v20 = vpop.f32.mrb[63].mxu0  ;;  %v1518_v18 = vpop.f32.mrb[63].mxu1 }
 0x195   : > { %v1519_v22 = vadd.f32 %v1518_v18, %v1230_v7 }
 0x196   : > { %v1527_v19 = vadd.f32 %v2600_v11, %v1238_v15 }
 0x197   : > { %v2398_v28 = vpack.c.bf16 %v1519_v22, %v1516_v10 }
 0x198   : > { %v2403_v4 = vpack.c.bf16 %v1527_v19, %v1524_v14 }
 0x199   : > { %2498 = vst [vmem:[%s3179_s20 + $0x70] sm:$0xff] %v2398_v28   ;;  %v1242_v23 = vpop.f32.mrb[64].mxu0  ;;  %v2603_v26 = vpop.f32.mrb[64].mxu1 }
 0x19a   : > { %2499 = vst [vmem:[%s3179_s20 + $0x78] sm:$0xff] %v2403_v4   ;;  %v1243_v60 = vadd.f32 %v3163_v62, %v1242_v23  ;;  %v1244_v40 = vpop.f32.mrb[65].mxu0  ;;  %v1531_v27 = vpop.f32.mrb[65].mxu1 }
 0x19b   : > { %v1245_v32 = vpop.f32.mrb[66].mxu0  ;;  %v2604_v8 = vpop.f32.mrb[66].mxu1 }
 0x19c   : > { %v1532_v30 = vadd.f32 %v1531_v27, %v1243_v60  ;;  %v1246_v0 = vadd.f32 %v3163_v62, %v1245_v32  ;;  %v1247_v63 = vpop.f32.mrb[67].mxu0  ;;  %v1534_v34 = vpop.f32.mrb[67].mxu1  ;;  %v1315_v27 = vadd.f32 %v3163_v62, %v3110_v5 }
 0x19d   : > { %v1318_v63 = vadd.f32 %v3163_v62, %v3112_v9 }
 0x19e   : > { %v1535_v35 = vadd.f32 %v1534_v34, %v1246_v0 }
 0x1a0   : > { %v2408_v38 = vpack.c.bf16 %v1535_v35, %v1532_v30 }
 0x1a1   : > { %v1250_v52 = vpop.f32.mrb[68].mxu0  ;;  %v2607_v39 = vpop.f32.mrb[68].mxu1 }
 0x1a2   : > { %2500 = vst [vmem:[%s3179_s20 + $0x80] sm:$0xff] %v2408_v38   ;;  %v1251_v36 = vadd.f32 %v3163_v62, %v1250_v52  ;;  %v1252_v42 = vpop.f32.mrb[69].mxu0  ;;  %v1547_v43 = vpop.f32.mrb[69].mxu1 }
 0x1a3   : > { %v1253_v44 = vpop.f32.mrb[70].mxu0  ;;  %v2608_v46 = vpop.f32.mrb[70].mxu1 }
 0x1a4   : > { %v1540_v47 = vadd.f32 %v2603_v26, %v1251_v36  ;;  %v1254_v50 = vadd.f32 %v3163_v62, %v1253_v44  ;;  %v1255_v51 = vpop.f32.mrb[71].mxu0  ;;  %v1550_v56 = vpop.f32.mrb[71].mxu1 }
 0x1a6   : > { %v1543_v54 = vadd.f32 %v2604_v8, %v1254_v50  ;;  %v1307_v8 = vadd.f32 %v3163_v62, %v3104_v61 }
 0x1a8   : > { %v2413_v48 = vpack.c.bf16 %v1543_v54, %v1540_v47  ;;  %v1331_v54 = vadd.f32 %v3163_v62, %v3122_v21  ;;  %v1326_v21 = vadd.f32 %v3163_v62, %v3120_v17  ;;  %v1347_v17 = vadd.f32 %v3163_v62, %v3138_v37 }
 0x1a9   : > { %v1258_v55 = vpop.f32.mrb[72].mxu0  ;;  %v3243_v12 = vpop.f32.mrb[72].mxu1  ;;  %v1342_v37 = vadd.f32 %v3163_v62, %v3134_v33  ;;  %v1363_v33 = vadd.f32 %v3163_v62, %v3154_v53  ;;  %v1358_v53 = vadd.f32 %v3163_v62, %v3150_v49 }
 0x1aa   : > { %2501 = vst [vmem:[%s3179_s20 + $0x88] sm:$0xff] %v2413_v48   ;;  %v1259_v58 = vadd.f32 %v3163_v62, %v1258_v55  ;;  %v1260_v59 = vpop.f32.mrb[73].mxu0  ;;  %v1563_v24 = vpop.f32.mrb[73].mxu1 }
 0x1ab   : > { %v1261_v2 = vpop.f32.mrb[74].mxu0  ;;  %v3247_v31 = vpop.f32.mrb[74].mxu1  ;;  %v1334_v59 = vadd.f32 %v3163_v62, %v3126_v25 }
 0x1ac   : > { %v1548_v6 = vadd.f32 %v1547_v43, %v1259_v58  ;;  %v1262_v16 = vadd.f32 %v3163_v62, %v1261_v2  ;;  %v1263_v7 = vpop.f32.mrb[75].mxu0  ;;  %v1566_v10 = vpop.f32.mrb[75].mxu1 }
 0x1ae   : > { %v1551_v3 = vadd.f32 %v1550_v56, %v1262_v16 }
 0x1b0   : > { %v2418_v11 = vpack.c.bf16 %v1551_v3, %v1548_v6 }
 0x1b1   : > { %v1266_v14 = vpop.f32.mrb[76].mxu0  ;;  %v3250_v15 = vpop.f32.mrb[76].mxu1 }
 0x1b2   : > { %2502 = vst [vmem:[%s3179_s20 + $0x90] sm:$0xff] %v2418_v11   ;;  %v1267_v20 = vadd.f32 %v3163_v62, %v1266_v14  ;;  %v1268_v18 = vpop.f32.mrb[77].mxu0  ;;  %v3254_v22 = vpop.f32.mrb[77].mxu1 }
 0x1b3   : > { %v1269_v19 = vpop.f32.mrb[78].mxu0  ;;  %v3256_v28 = vpop.f32.mrb[78].mxu1 }
 0x1b4   : > { %v1556_v4 = vadd.f32 %v2607_v39, %v1267_v20  ;;  %v1270_v23 = vadd.f32 %v3163_v62, %v1269_v19  ;;  %v1271_v26 = vpop.f32.mrb[79].mxu0  ;;  %v3259_v60 = vpop.f32.mrb[79].mxu1  ;;  %v1310_v39 = vadd.f32 %v3163_v62, %v3108_v1  ;;  %v1323_v1 = vadd.f32 %v3163_v62, %v3116_v13 }
 0x1b6   : > { %v1559_v40 = vadd.f32 %v2608_v46, %v1270_v23 }
 0x1b8   : > { %v2423_v32 = vpack.c.bf16 %v1559_v40, %v1556_v4  ;;  %v1339_v40 = vadd.f32 %v3163_v62, %v3130_v29 }
 0x1b9   : > { %v1274_v30 = vpop.f32.mrb[80].mxu0  ;;  %v2619_v0 = vpop.f32.mrb[80].mxu1 }
 0x1ba   : > { %2503 = vst [vmem:[%s3179_s20 + $0x98] sm:$0xff] %v2423_v32   ;;  %v1275_v34 = vadd.f32 %v3163_v62, %v1274_v30  ;;  %v1604_v35 = vadd.f32 %v2619_v0, %v1315_v27  ;;  %v1276_v38 = vpop.f32.mrb[81].mxu0  ;;  %v1595_v52 = vpop.f32.mrb[81].mxu1  ;;  %v1350_v32 = vadd.f32 %v3163_v62, %v3142_v41 }
 0x1bb   : > { %v1596_v5 = vadd.f32 %v1595_v52, %v1307_v8  ;;  %v1277_v36 = vpop.f32.mrb[82].mxu0  ;;  %v2620_v42 = vpop.f32.mrb[82].mxu1 }
 0x1bc   : > { %v1564_v61 = vadd.f32 %v1563_v24, %v1275_v34  ;;  %v1278_v43 = vadd.f32 %v3163_v62, %v1277_v36  ;;  %v1607_v44 = vadd.f32 %v2620_v42, %v1318_v63  ;;  %v1279_v9 = vpop.f32.mrb[83].mxu0  ;;  %v1598_v46 = vpop.f32.mrb[83].mxu1 }
 0x1bd   : > { %v1599_v47 = vadd.f32 %v1598_v46, %v1310_v39  ;;  %v1366_v46 = vadd.f32 %v3163_v62, %v3158_v57 }
 0x1be   : > { %v1567_v50 = vadd.f32 %v1566_v10, %v1278_v43  ;;  %v2453_v51 = vpack.c.bf16 %v1607_v44, %v1604_v35  ;;  %v1355_v44 = vadd.f32 %v3163_v62, %v3146_v45 }
 0x1bf   : > { %v2448_v56 = vpack.c.bf16 %v1599_v47, %v1596_v5 }
 0x1c0   : > { %v2428_v48 = vpack.c.bf16 %v1567_v50, %v1564_v61  ;;  %2509 = vst [vmem:[%s3179_s20 + $0xc8] sm:$0xff] %v2453_v51  }
 0x1c1   : > { %2508 = vst [vmem:[%s3179_s20 + $0xc0] sm:$0xff] %v2448_v56   ;;  %v1282_v55 = vpop.f32.mrb[84].mxu0  ;;  %v2623_v58 = vpop.f32.mrb[84].mxu1 }
 0x1c2   : > { %2504 = vst [vmem:[%s3179_s20 + $0xa0] sm:$0xff] %v2428_v48   ;;  %v1283_v24 = vadd.f32 %v3163_v62, %v1282_v55  ;;  %v1620_v2 = vadd.f32 %v2623_v58, %v1331_v54  ;;  %v1284_v6 = vpop.f32.mrb[85].mxu0  ;;  %v1611_v16 = vpop.f32.mrb[85].mxu1 }
 0x1c3   : > { %v1612_v7 = vadd.f32 %v1611_v16, %v1323_v1  ;;  %v1285_v10 = vpop.f32.mrb[86].mxu0  ;;  %v2624_v13 = vpop.f32.mrb[86].mxu1 }
 0x1c4   : > { %v1572_v3 = vadd.f32 %v3243_v12, %v1283_v24  ;;  %v1286_v11 = vadd.f32 %v3163_v62, %v1285_v10  ;;  %v1623_v25 = vadd.f32 %v2624_v13, %v1334_v59  ;;  %v1287_v14 = vpop.f32.mrb[87].mxu0  ;;  %v1614_v20 = vpop.f32.mrb[87].mxu1 }
 0x1c5   : > { %v1615_v18 = vadd.f32 %v1614_v20, %v1326_v21 }
 0x1c6   : > { %v1575_v19 = vadd.f32 %v3247_v31, %v1286_v11  ;;  %v2463_v4 = vpack.c.bf16 %v1623_v25, %v1620_v2 }
 0x1c7   : > { %v2458_v23 = vpack.c.bf16 %v1615_v18, %v1612_v7 }
 0x1c8   : > { %v2433_v26 = vpack.c.bf16 %v1575_v19, %v1572_v3  ;;  %2511 = vst [vmem:[%s3179_s20 + $0xd8] sm:$0xff] %v2463_v4  }
 0x1c9   : > { %2510 = vst [vmem:[%s3179_s20 + $0xd0] sm:$0xff] %v2458_v23   ;;  %v1290_v12 = vpop.f32.mrb[88].mxu0  ;;  %v2627_v27 = vpop.f32.mrb[88].mxu1 }
 0x1ca   : > { %2505 = vst [vmem:[%s3179_s20 + $0xa8] sm:$0xff] %v2433_v26   ;;  %v1291_v8 = vadd.f32 %v3163_v62, %v1290_v12  ;;  %v1636_v31 = vadd.f32 %v2627_v27, %v1347_v17  ;;  %v1292_v30 = vpop.f32.mrb[89].mxu0  ;;  %v1627_v0 = vpop.f32.mrb[89].mxu1 }
 0x1cb   : > { %v1628_v63 = vadd.f32 %v1627_v0, %v1339_v40  ;;  %v1293_v34 = vpop.f32.mrb[90].mxu0  ;;  %v2628_v29 = vpop.f32.mrb[90].mxu1 }
 0x1cc   : > { %v1580_v35 = vadd.f32 %v3254_v22, %v1291_v8  ;;  %v1294_v38 = vadd.f32 %v3163_v62, %v1293_v34  ;;  %v1639_v41 = vadd.f32 %v2628_v29, %v1350_v32  ;;  %v1295_v52 = vpop.f32.mrb[91].mxu0  ;;  %v1630_v39 = vpop.f32.mrb[91].mxu1 }
 0x1cd   : > { %v1631_v5 = vadd.f32 %v1630_v39, %v1342_v37 }
 0x1ce   : > { %v1583_v36 = vadd.f32 %v3259_v60, %v1294_v38  ;;  %v2473_v42 = vpack.c.bf16 %v1639_v41, %v1636_v31 }
 0x1cf   : > { %v2468_v61 = vpack.c.bf16 %v1631_v5, %v1628_v63 }
 0x1d0   : > { %v2438_v43 = vpack.c.bf16 %v1583_v36, %v1580_v35  ;;  %2513 = vst [vmem:[%s3179_s20 + $0xe8] sm:$0xff] %v2473_v42  }
 0x1d1   : > { %2512 = vst [vmem:[%s3179_s20 + $0xe0] sm:$0xff] %v2468_v61   ;;  %v1298_v22 = vpop.f32.mrb[92].mxu0  ;;  %v2631_v9 = vpop.f32.mrb[92].mxu1 }
 0x1d2   : > { %2506 = vst [vmem:[%s3179_s20 + $0xb0] sm:$0xff] %v2438_v43   ;;  %v1299_v47 = vadd.f32 %v3163_v62, %v1298_v22  ;;  %v1652_v60 = vadd.f32 %v2631_v9, %v1363_v33  ;;  %v1300_v50 = vpop.f32.mrb[93].mxu0  ;;  %v1643_v51 = vpop.f32.mrb[93].mxu1 }
 0x1d3   : > { %v1644_v56 = vadd.f32 %v1643_v51, %v1355_v44  ;;  %v1301_v45 = vpop.f32.mrb[94].mxu0  ;;  %v2632_v54 = vpop.f32.mrb[94].mxu1 }
 0x1d4   : > { %v1588_v48 = vadd.f32 %v3250_v15, %v1299_v47  ;;  %v1302_v1 = vadd.f32 %v3163_v62, %v1301_v45  ;;  %v1655_v57 = vadd.f32 %v2632_v54, %v1366_v46  ;;  %v1303_v55 = vpop.f32.mrb[95].mxu0  ;;  %v1646_v58 = vpop.f32.mrb[95].mxu1 }
 0x1d5   : > { %v1647_v59 = vadd.f32 %v1646_v58, %v1358_v53 }
 0x1d6   : > { %v1591_v24 = vadd.f32 %v3256_v28, %v1302_v1  ;;  %v2483_v2 = vpack.c.bf16 %v1655_v57, %v1652_v60 }
 0x1d7   : > { %v2478_v6 = vpack.c.bf16 %v1647_v59, %v1644_v56 }
 0x1d8   : > { %v2443_v16 = vpack.c.bf16 %v1591_v24, %v1588_v48  ;;  %2515 = vst [vmem:[%s3179_s20 + $0xf8] sm:$0xff] %v2483_v2  }
 0x1d9   : > { %2514 = vst [vmem:[%s3179_s20 + $0xf0] sm:$0xff] %v2478_v6  }
 0x1da   : > { %2507 = vst [vmem:[%s3179_s20 + $0xb8] sm:$0xff] %v2443_v16  }
 0x1db PF: > { %s13_s12 = sadd.s32 1, %s2833_s12  }
 0x1dc   : > { %p10_p4 = scmp.ge.s32.totalorder %s13_s12, 8  }
 0x1de   :  { %12 = sbr.rel (!%p10_p4) target bundleno = 1 (0x1), region = 62 }

// kernel: alexnet_legacy_forward.6
= control target key start
LH: loop header
LB: loop body
LE: loop exit
PB: predicated region body
PF: predicated region fallthrough
CT: control target
= control target key end

     0   :  { %s980_s6 = smov 0   ;;  %s982_s7 = smov 0   ;;  %s1271_s0 = inlined_call_operand.vmem [shape: bf16[9,192,128], index: 0, kind: input, shape index: {}]   ;;  %s1272_s1 = inlined_call_operand.vmem [shape: bf16[192,128], index: 1, kind: output, shape index: {}]  }
   0x1   :  { %s984_s8 = smov 0  }
   0x2 LB: > { %s879_s9 = sadd.s32 4294967295, %s967_s8   ;;  %s997_s10 = sadd.s32 1, %s967_s8   ;;  %s967_s8 = sphi %s984_s8, %s1275_s8   ;;  %s963_s7 = sphi %s982_s7, %s1274_s7   ;;  %s959_s6 = sphi %s980_s6, %s1273_s6  }
   0x3   : > { %s15_s11 = ssub.s32 %s967_s8, %s997_s10  ;;  %s18_s12 = sadd.s32 1, %s963_s7 }
   0x4   : > { %p16_p0 = scmp.eq.s32.totalorder %s15_s11, 0  ;;  %p25_p1 = scmp.ne.s32.totalorder %s963_s7, %s959_s6 }
   0x5   : > { %p26_p2 = scmp.eq.s32.totalorder %s967_s8, 0  ;;  %p882_p4 = scmp.ge.s32.totalorder %s967_s8, 3 }
   0x6   : > { %s1006_s13 = scalar_select %p16_p0, %s963_s7, %s18_s12  }
   0x7   : > { %p27_p3 = por %p26_p2, %p25_p1  ;;  %77 = sbr.rel (%p882_p4) target bundleno = 37 (0x25), region = 16 }
   0xe   : > { %80 = sbr.rel (!%p27_p3) target bundleno = 37 (0x25), region = 20  ;;  %s82_s14 = sand.u32 (%p27_p3), 1, %s963_s7  }
   0xf   : > { %s890_s15 = sshll.u32 (%p27_p3), %s967_s8, 5  ;;  %s918_s16 = smul.u32 (%p27_p3), 288, %s82_s14 }
  0x10   : > { %s1014_s19 = scalar_lea.vmem (%p27_p3), %s1271_s0, %s890_s15 }
  0x11   : > { %v103_v0 = vld [vmem:[%s1014_s19] sm:$0xff] (%p27_p3)   ;;  %v107_v1 = vld [vmem:[%s1014_s19 + $0x8] sm:$0xff] (%p27_p3)   ;;  %v111_v2 = vld [vmem:[%s1014_s19 + $0x10] sm:$0xff] (%p27_p3)   ;;  %s1022_s20 = scalar_lea.vmem (%p27_p3), [#allocation2], %s918_s16 }
  0x12   : > { %v115_v3 = vld [vmem:[%s1014_s19 + $0x18] sm:$0xff] (%p27_p3)   ;;  %v119_v4 = vld [vmem:[%s1014_s19 + $0x60] sm:$0xff] (%p27_p3)   ;;  %v123_v5 = vld [vmem:[%s1014_s19 + $0x68] sm:$0xff] (%p27_p3)   ;;  %104 = vst [vmem:[%s1022_s20] sm:$0xff] (%p27_p3), %v103_v0  }
  0x13   : > { %108 = vst [vmem:[%s1022_s20 + $0x8] sm:$0xff] (%p27_p3), %v107_v1   ;;  %112 = vst [vmem:[%s1022_s20 + $0x10] sm:$0xff] (%p27_p3), %v111_v2   ;;  %v127_v6 = vld [vmem:[%s1014_s19 + $0x70] sm:$0xff] (%p27_p3)   ;;  %v131_v7 = vld [vmem:[%s1014_s19 + $0x78] sm:$0xff] (%p27_p3)  }
  0x14   : > { %116 = vst [vmem:[%s1022_s20 + $0x18] sm:$0xff] (%p27_p3), %v115_v3   ;;  %120 = vst [vmem:[%s1022_s20 + $0x20] sm:$0xff] (%p27_p3), %v119_v4   ;;  %v135_v8 = vld [vmem:[%s1014_s19 + $0xc0] sm:$0xff] (%p27_p3)   ;;  %v139_v9 = vld [vmem:[%s1014_s19 + $0xc8] sm:$0xff] (%p27_p3)  }
  0x15   : > { %124 = vst [vmem:[%s1022_s20 + $0x28] sm:$0xff] %v123_v5   ;;  %128 = vst [vmem:[%s1022_s20 + $0x30] sm:$0xff] %v127_v6   ;;  %v143_v10 = vld [vmem:[%s1014_s19 + $0xd0] sm:$0xff]   ;;  %v147_v11 = vld [vmem:[%s1014_s19 + $0xd8] sm:$0xff]  }
  0x16   : > { %132 = vst [vmem:[%s1022_s20 + $0x38] sm:$0xff] %v131_v7   ;;  %136 = vst [vmem:[%s1022_s20 + $0x40] sm:$0xff] %v135_v8   ;;  %v151_v12 = vld [vmem:[%s1014_s19 + $0x120] sm:$0xff]   ;;  %v155_v13 = vld [vmem:[%s1014_s19 + $0x128] sm:$0xff]  }
  0x17   : > { %140 = vst [vmem:[%s1022_s20 + $0x48] sm:$0xff] %v139_v9   ;;  %144 = vst [vmem:[%s1022_s20 + $0x50] sm:$0xff] %v143_v10   ;;  %v159_v14 = vld [vmem:[%s1014_s19 + $0x130] sm:$0xff]   ;;  %v163_v15 = vld [vmem:[%s1014_s19 + $0x138] sm:$0xff]  }
  0x18   : > { %148 = vst [vmem:[%s1022_s20 + $0x58] sm:$0xff] %v147_v11   ;;  %152 = vst [vmem:[%s1022_s20 + $0x60] sm:$0xff] %v151_v12   ;;  %v167_v16 = vld [vmem:[%s1014_s19 + $0x180] sm:$0xff]   ;;  %v171_v17 = vld [vmem:[%s1014_s19 + $0x188] sm:$0xff]  }
  0x19   : > { %156 = vst [vmem:[%s1022_s20 + $0x68] sm:$0xff] %v155_v13   ;;  %160 = vst [vmem:[%s1022_s20 + $0x70] sm:$0xff] %v159_v14   ;;  %v175_v18 = vld [vmem:[%s1014_s19 + $0x190] sm:$0xff]   ;;  %v179_v19 = vld [vmem:[%s1014_s19 + $0x198] sm:$0xff]  }
  0x1a   : > { %164 = vst [vmem:[%s1022_s20 + $0x78] sm:$0xff] %v163_v15   ;;  %168 = vst [vmem:[%s1022_s20 + $0x80] sm:$0xff] %v167_v16   ;;  %v183_v20 = vld [vmem:[%s1014_s19 + $0x1e0] sm:$0xff]   ;;  %v187_v21 = vld [vmem:[%s1014_s19 + $0x1e8] sm:$0xff]  }
  0x1b   : > { %172 = vst [vmem:[%s1022_s20 + $0x88] sm:$0xff] %v171_v17   ;;  %176 = vst [vmem:[%s1022_s20 + $0x90] sm:$0xff] %v175_v18   ;;  %v191_v22 = vld [vmem:[%s1014_s19 + $0x1f0] sm:$0xff]   ;;  %v195_v23 = vld [vmem:[%s1014_s19 + $0x1f8] sm:$0xff]  }
  0x1c   : > { %180 = vst [vmem:[%s1022_s20 + $0x98] sm:$0xff] %v179_v19   ;;  %184 = vst [vmem:[%s1022_s20 + $0xa0] sm:$0xff] %v183_v20   ;;  %v199_v24 = vld [vmem:[%s1014_s19 + $0x240] sm:$0xff]   ;;  %v203_v25 = vld [vmem:[%s1014_s19 + $0x248] sm:$0xff]  }
  0x1d   : > { %188 = vst [vmem:[%s1022_s20 + $0xa8] sm:$0xff] %v187_v21   ;;  %192 = vst [vmem:[%s1022_s20 + $0xb0] sm:$0xff] %v191_v22   ;;  %v207_v26 = vld [vmem:[%s1014_s19 + $0x250] sm:$0xff]   ;;  %v211_v27 = vld [vmem:[%s1014_s19 + $0x258] sm:$0xff]  }
  0x1e   : > { %196 = vst [vmem:[%s1022_s20 + $0xb8] sm:$0xff] %v195_v23   ;;  %200 = vst [vmem:[%s1022_s20 + $0xc0] sm:$0xff] %v199_v24   ;;  %v215_v28 = vld [vmem:[%s1014_s19 + $0x2a0] sm:$0xff]   ;;  %v219_v29 = vld [vmem:[%s1014_s19 + $0x2a8] sm:$0xff]  }
  0x1f   : > { %204 = vst [vmem:[%s1022_s20 + $0xc8] sm:$0xff] %v203_v25   ;;  %208 = vst [vmem:[%s1022_s20 + $0xd0] sm:$0xff] %v207_v26   ;;  %v223_v30 = vld [vmem:[%s1014_s19 + $0x2b0] sm:$0xff]   ;;  %v227_v31 = vld [vmem:[%s1014_s19 + $0x2b8] sm:$0xff]  }
  0x20   : > { %212 = vst [vmem:[%s1022_s20 + $0xd8] sm:$0xff] %v211_v27   ;;  %216 = vst [vmem:[%s1022_s20 + $0xe0] sm:$0xff] %v215_v28   ;;  %v231_v32 = vld [vmem:[%s1014_s19 + $0x300] sm:$0xff]   ;;  %v235_v33 = vld [vmem:[%s1014_s19 + $0x308] sm:$0xff]  }
  0x21   : > { %220 = vst [vmem:[%s1022_s20 + $0xe8] sm:$0xff] %v219_v29   ;;  %224 = vst [vmem:[%s1022_s20 + $0xf0] sm:$0xff] %v223_v30   ;;  %v239_v34 = vld [vmem:[%s1014_s19 + $0x310] sm:$0xff]   ;;  %v243_v35 = vld [vmem:[%s1014_s19 + $0x318] sm:$0xff]  }
  0x22   : > { %228 = vst [vmem:[%s1022_s20 + $0xf8] sm:$0xff] %v227_v31   ;;  %232 = vst [vmem:[%s1022_s20 + $0x100] sm:$0xff] %v231_v32  }
  0x23   : > { %236 = vst [vmem:[%s1022_s20 + $0x108] sm:$0xff] %v235_v33   ;;  %240 = vst [vmem:[%s1022_s20 + $0x110] sm:$0xff] %v239_v34  }
  0x24   : > { %244 = vst [vmem:[%s1022_s20 + $0x118] sm:$0xff] %v243_v35  }
  0x25 PF: > { %p885_p5 = scmp.ge.s32.totalorder %s967_s8, 1  ;;  %p412_p6 = scmp.lt.s32.totalorder %s967_s8, 4 }
  0x27   : > { %p413_p7 = pnand %p885_p5, %p412_p6 }
  0x28   : > { %s419_s21 = sand.u32 (!%p413_p7), 1, %s959_s6   ;;  %vm519_vm0 = vcmask (!%p413_p7), 1043456   ;;  %s886_s24 = sshll.u32 (!%p413_p7), %s879_s9, 3 }
  0x29   : > { %416 = sbr.rel (%p413_p7) target bundleno = 109 (0x6d), region = 61  ;;  %p440_p8 = scmp.lt.s32.totalorder (!%p413_p7), %s886_s24, 23 }
  0x2a   : > { %s919_s22 = smul.u32 (!%p413_p7), 288, %s419_s21 }
  0x2c   : > { %s1093_s23 = scalar_lea.vmem (!%p413_p7), [#allocation2], %s919_s22 }
  0x2d   : > { %v447_v36 = vld [vmem:[%s1093_s23] sm:$0xf] (!%p413_p7)  ;;  %v448_v39 = vld [vmem:[%s1093_s23 + $0x4] sm:$0xf] (!%p413_p7)  ;;  %v449_v8 = vld [vmem:[%s1093_s23 + $0x8] sm:$0xf] (!%p413_p7) }
  0x2e   : > { %v455_v37 = vld [vmem:[%s1093_s23 + $0x20] sm:$0xf] (!%p413_p7)  ;;  %v456_v40 = vld [vmem:[%s1093_s23 + $0x24] sm:$0xf] (!%p413_p7)  ;;  %v522_v42 = vsel (!%p413_p7), %vm519_vm0, %v447_v36, 4286644096 }
  0x2f   : > { %v463_v38 = vld [vmem:[%s1093_s23 + $0x40] sm:$0xf] (!%p413_p7)  ;;  %v464_v43 = vld [vmem:[%s1093_s23 + $0x44] sm:$0xf] (!%p413_p7)  ;;  %v525_v44 = vsel (!%p413_p7), %vm519_vm0, %v455_v37, 4286644096 }
  0x30   : > { %v471_v41 = vld [vmem:[%s1093_s23 + $0x60] sm:$0xf]  ;;  %v529_v45 = vsel %vm519_vm0, %v463_v38, 4286644096  ;;  %v527_v47 = vmax.bf16 %v525_v44, %v522_v42  ;;  %v472_v48 = vld [vmem:[%s1093_s23 + $0x64] sm:$0xf] }
  0x31   : > { %v479_v46 = vld [vmem:[%s1093_s23 + $0x80] sm:$0xf]  ;;  %v533_v49 = vsel %vm519_vm0, %v471_v41, 4286644096  ;;  %v557_v50 = vsel %vm519_vm0, %v448_v39, 4286644096 }
  0x32   : > { %v487_v51 = vld [vmem:[%s1093_s23 + $0xa0] sm:$0xf]  ;;  %v531_v52 = vmax.bf16 %v529_v45, %v527_v47  ;;  %v560_v53 = vsel %vm519_vm0, %v456_v40, 4286644096  ;;  %v564_v54 = vsel %vm519_vm0, %v464_v43, 4286644096 }
  0x33   : > { %v480_v55 = vld [vmem:[%s1093_s23 + $0x84] sm:$0xf]  ;;  %v537_v56 = vsel %vm519_vm0, %v479_v46, 4286644096  ;;  %v562_v57 = vmax.bf16 %v560_v53, %v557_v50  ;;  %s1277_s24 = smov (!%p440_p8, %s886_s24), 23 }
  0x34   : > { %v495_v58 = vld [vmem:[%s1093_s23 + $0xc0] sm:$0xf]  ;;  %v535_v59 = vmax.bf16 %v533_v49, %v531_v52  ;;  %v568_v60 = vsel %vm519_vm0, %v472_v48, 4286644096  ;;  %v488_v61 = vld [vmem:[%s1093_s23 + $0xa4] sm:$0xf] }
  0x35   : > { %v496_v62 = vld [vmem:[%s1093_s23 + $0xc4] sm:$0xf]  ;;  %v541_v63 = vsel %vm519_vm0, %v487_v51, 4286644096  ;;  %v566_v0 = vmax.bf16 %v564_v54, %v562_v57  ;;  %v503_v1 = vld [vmem:[%s1093_s23 + $0xe0] sm:$0xf] }
  0x36   : > { %v511_v2 = vld [vmem:[%s1093_s23 + $0x100] sm:$0xf]  ;;  %v539_v3 = vmax.bf16 %v537_v56, %v535_v59  ;;  %v572_v4 = vsel %vm519_vm0, %v480_v55, 4286644096  ;;  %v504_v5 = vld [vmem:[%s1093_s23 + $0xe4] sm:$0xf] }
  0x37   : > { %v545_v6 = vsel %vm519_vm0, %v495_v58, 4286644096  ;;  %v570_v7 = vmax.bf16 %v568_v60, %v566_v0  ;;  %v512_v9 = vld [vmem:[%s1093_s23 + $0x104] sm:$0xf]  ;;  %v576_v11 = vsel %vm519_vm0, %v488_v61, 4286644096 }
  0x38   : > { %v543_v10 = vmax.bf16 %v541_v63, %v539_v3  ;;  %v457_v12 = vld [vmem:[%s1093_s23 + $0x28] sm:$0xf]  ;;  %v549_v14 = vsel %vm519_vm0, %v503_v1, 4286644096  ;;  %v553_v15 = vsel %vm519_vm0, %v511_v2, 4286644096 }
  0x39   : > { %v465_v13 = vld [vmem:[%s1093_s23 + $0x48] sm:$0xf]  ;;  %v574_v16 = vmax.bf16 %v572_v4, %v570_v7  ;;  %v580_v17 = vsel %vm519_vm0, %v496_v62, 4286644096  ;;  %v450_v19 = vld [vmem:[%s1093_s23 + $0xc] sm:$0xf] }
  0x3a   : > { %v547_v18 = vmax.bf16 %v545_v6, %v543_v10  ;;  %v473_v20 = vld [vmem:[%s1093_s23 + $0x68] sm:$0xf]  ;;  %v592_v21 = vsel %vm519_vm0, %v449_v8, 4286644096  ;;  %v458_v23 = vld [vmem:[%s1093_s23 + $0x2c] sm:$0xf] }
  0x3b   : > { %v578_v22 = vmax.bf16 %v576_v11, %v574_v16  ;;  %v595_v24 = vsel %vm519_vm0, %v457_v12, 4286644096  ;;  %v599_v25 = vsel %vm519_vm0, %v465_v13, 4286644096  ;;  %v584_v27 = vsel %vm519_vm0, %v504_v5, 4286644096 }
  0x3c   : > { %v551_v26 = vmax.bf16 %v549_v14, %v547_v18  ;;  %v466_v28 = vld [vmem:[%s1093_s23 + $0x4c] sm:$0xf]  ;;  %v481_v29 = vld [vmem:[%s1093_s23 + $0x88] sm:$0xf]  ;;  %v597_v30 = vmax.bf16 %v595_v24, %v592_v21  ;;  %v588_v32 = vsel %vm519_vm0, %v512_v9, 4286644096 }
  0x3d   : > { %v582_v31 = vmax.bf16 %v580_v17, %v578_v22  ;;  %v474_v33 = vld [vmem:[%s1093_s23 + $0x6c] sm:$0xf]  ;;  %v603_v34 = vsel %vm519_vm0, %v473_v20, 4286644096  ;;  %v489_v36 = vld [vmem:[%s1093_s23 + $0xa8] sm:$0xf] }
  0x3e   : > { %v555_v35 = vmax.bf16 %v553_v15, %v551_v26  ;;  %v601_v37 = vmax.bf16 %v599_v25, %v597_v30  ;;  %v627_v38 = vsel %vm519_vm0, %v450_v19, 4286644096  ;;  %v630_v39 = vsel %vm519_vm0, %v458_v23, 4286644096  ;;  %v482_v41 = vld [vmem:[%s1093_s23 + $0x8c] sm:$0xf] }
  0x3f   : > { %v586_v40 = vmax.bf16 %v584_v27, %v582_v31  ;;  %v607_v42 = vsel %vm519_vm0, %v481_v29, 4286644096  ;;  %v632_v43 = vmax.bf16 %v630_v39, %v627_v38  ;;  %v634_v44 = vsel %vm519_vm0, %v466_v28, 4286644096  ;;  %s887_s25 = sshll.u32 %s1277_s24, 2 }
  0x40   : > { %v497_v45 = vld [vmem:[%s1093_s23 + $0xc8] sm:$0xf]  ;;  %v605_v46 = vmax.bf16 %v603_v34, %v601_v37  ;;  %v638_v47 = vsel %vm519_vm0, %v474_v33, 4286644096  ;;  %v969_v49 = vmov 0   ;;  %s1171_s28 = scalar_lea.vmem %s1272_s1, %s887_s25 }
  0x41   : > { %v590_v48 = vmax.bf16 %v588_v32, %v586_v40  ;;  %v801_v50 = vmax.bf16 %v969_v49, %v555_v35  ;;  %v490_v51 = vld [vmem:[%s1093_s23 + $0xac] sm:$0xf]  ;;  %v611_v53 = vsel %vm519_vm0, %v489_v36, 4286644096  ;;  %v636_v54 = vmax.bf16 %v634_v44, %v632_v43  ;;  %v505_v55 = vld [vmem:[%s1093_s23 + $0xe8] sm:$0xf] }
  0x42   : > { %v498_v52 = vld [vmem:[%s1093_s23 + $0xcc] sm:$0xf]  ;;  %v513_v56 = vld [vmem:[%s1093_s23 + $0x108] sm:$0xf]  ;;  %v609_v57 = vmax.bf16 %v607_v42, %v605_v46  ;;  %v642_v58 = vsel %vm519_vm0, %v482_v41, 4286644096 }
  0x43   : > { %v802_v59 = vmax.bf16 %v969_v49, %v590_v48  ;;  %v506_v60 = vld [vmem:[%s1093_s23 + $0xec] sm:$0xf]  ;;  %v615_v61 = vsel %vm519_vm0, %v497_v45, 4286644096  ;;  %v640_v62 = vmax.bf16 %v638_v47, %v636_v54  ;;  %v451_v63 = vld [vmem:[%s1093_s23 + $0x10] sm:$0xf] }
  0x44   : > { %v514_v0 = vld [vmem:[%s1093_s23 + $0x10c] sm:$0xf]  ;;  %v613_v1 = vmax.bf16 %v611_v53, %v609_v57  ;;  %v646_v2 = vsel %vm519_vm0, %v490_v51, 4286644096  ;;  %v459_v3 = vld [vmem:[%s1093_s23 + $0x30] sm:$0xf] }
  0x45   : > { %v467_v4 = vld [vmem:[%s1093_s23 + $0x50] sm:$0xf]  ;;  %v911_v5 = vcombine.low %v801_v50, %v802_v59  ;;  %v619_v6 = vsel %vm519_vm0, %v505_v55, 4286644096  ;;  %v623_v7 = vsel %vm519_vm0, %v513_v56, 4286644096  ;;  %v644_v8 = vmax.bf16 %v642_v58, %v640_v62 }
  0x46   : > { %v452_v9 = vld [vmem:[%s1093_s23 + $0x14] sm:$0xf]  ;;  %v617_v10 = vmax.bf16 %v615_v61, %v613_v1  ;;  %v650_v11 = vsel %vm519_vm0, %v498_v52, 4286644096  ;;  %v475_v12 = vld [vmem:[%s1093_s23 + $0x70] sm:$0xf] }
  0x47   : > { %v662_v13 = vsel %vm519_vm0, %v451_v63, 4286644096  ;;  %895 = vst [vmem:[%s1171_s28] sm:$0xff] %v911_v5   ;;  %v648_v14 = vmax.bf16 %v646_v2, %v644_v8  ;;  %v460_v15 = vld [vmem:[%s1093_s23 + $0x34] sm:$0xf]  ;;  %v665_v16 = vsel %vm519_vm0, %v459_v3, 4286644096 }
  0x48   : > { %v669_v17 = vsel %vm519_vm0, %v467_v4, 4286644096  ;;  %v621_v18 = vmax.bf16 %v619_v6, %v617_v10  ;;  %v654_v19 = vsel %vm519_vm0, %v506_v60, 4286644096  ;;  %v468_v20 = vld [vmem:[%s1093_s23 + $0x54] sm:$0xf]  ;;  %v667_v22 = vmax.bf16 %v665_v16, %v662_v13 }
  0x49   : > { %v483_v21 = vld [vmem:[%s1093_s23 + $0x90] sm:$0xf]  ;;  %v652_v23 = vmax.bf16 %v650_v11, %v648_v14  ;;  %v658_v24 = vsel %vm519_vm0, %v514_v0, 4286644096  ;;  %v476_v25 = vld [vmem:[%s1093_s23 + $0x74] sm:$0xf] }
  0x4a   : > { %v673_v26 = vsel %vm519_vm0, %v475_v12, 4286644096  ;;  %v625_v27 = vmax.bf16 %v623_v7, %v621_v18  ;;  %v491_v28 = vld [vmem:[%s1093_s23 + $0xb0] sm:$0xf]  ;;  %v671_v29 = vmax.bf16 %v669_v17, %v667_v22  ;;  %v697_v30 = vsel %vm519_vm0, %v452_v9, 4286644096 }
  0x4b   : > { %v700_v31 = vsel %vm519_vm0, %v460_v15, 4286644096  ;;  %v656_v32 = vmax.bf16 %v654_v19, %v652_v23  ;;  %v484_v33 = vld [vmem:[%s1093_s23 + $0x94] sm:$0xf]  ;;  %v677_v34 = vsel %vm519_vm0, %v483_v21, 4286644096 }
  0x4c   : > { %v702_v35 = vmax.bf16 %v700_v31, %v697_v30  ;;  %v704_v36 = vsel %vm519_vm0, %v468_v20, 4286644096  ;;  %v499_v37 = vld [vmem:[%s1093_s23 + $0xd0] sm:$0xf]  ;;  %v675_v38 = vmax.bf16 %v673_v26, %v671_v29  ;;  %v708_v39 = vsel %vm519_vm0, %v476_v25, 4286644096 }
  0x4d   : > { %v660_v40 = vmax.bf16 %v658_v24, %v656_v32  ;;  %v803_v41 = vmax.bf16 %v969_v49, %v625_v27  ;;  %v492_v42 = vld [vmem:[%s1093_s23 + $0xb4] sm:$0xf]  ;;  %v681_v44 = vsel %vm519_vm0, %v491_v28, 4286644096  ;;  %v507_v46 = vld [vmem:[%s1093_s23 + $0xf0] sm:$0xf] }
  0x4e   : > { %v500_v43 = vld [vmem:[%s1093_s23 + $0xd4] sm:$0xf]  ;;  %v706_v45 = vmax.bf16 %v704_v36, %v702_v35  ;;  %v515_v47 = vld [vmem:[%s1093_s23 + $0x110] sm:$0xf]  ;;  %v679_v48 = vmax.bf16 %v677_v34, %v675_v38  ;;  %v712_v50 = vsel %vm519_vm0, %v484_v33, 4286644096 }
  0x4f   : > { %v804_v51 = vmax.bf16 %v969_v49, %v660_v40  ;;  %v508_v52 = vld [vmem:[%s1093_s23 + $0xf4] sm:$0xf]  ;;  %v685_v53 = vsel %vm519_vm0, %v499_v37, 4286644096  ;;  %v453_v55 = vld [vmem:[%s1093_s23 + $0x18] sm:$0xf] }
  0x50   : > { %v710_v54 = vmax.bf16 %v708_v39, %v706_v45  ;;  %v516_v56 = vld [vmem:[%s1093_s23 + $0x114] sm:$0xf]  ;;  %v683_v57 = vmax.bf16 %v681_v44, %v679_v48  ;;  %v716_v58 = vsel %vm519_vm0, %v492_v42, 4286644096  ;;  %v461_v59 = vld [vmem:[%s1093_s23 + $0x38] sm:$0xf] }
  0x51   : > { %v469_v60 = vld [vmem:[%s1093_s23 + $0x58] sm:$0xf]  ;;  %v912_v61 = vcombine.low %v803_v41, %v804_v51  ;;  %v689_v62 = vsel %vm519_vm0, %v507_v46, 4286644096  ;;  %v693_v63 = vsel %vm519_vm0, %v515_v47, 4286644096 }
  0x52   : > { %v714_v0 = vmax.bf16 %v712_v50, %v710_v54  ;;  %v454_v1 = vld [vmem:[%s1093_s23 + $0x1c] sm:$0xf]  ;;  %v687_v2 = vmax.bf16 %v685_v53, %v683_v57  ;;  %v720_v3 = vsel %vm519_vm0, %v500_v43, 4286644096  ;;  %v477_v4 = vld [vmem:[%s1093_s23 + $0x78] sm:$0xf] }
  0x53   : > { %v732_v5 = vsel %vm519_vm0, %v453_v55, 4286644096  ;;  %913 = vst [vmem:[%s1171_s28 + $0x8] sm:$0xff] %v912_v61   ;;  %v462_v7 = vld [vmem:[%s1093_s23 + $0x3c] sm:$0xf] }
  0x54   : > { %v718_v6 = vmax.bf16 %v716_v58, %v714_v0  ;;  %v735_v8 = vsel %vm519_vm0, %v461_v59, 4286644096  ;;  %v739_v9 = vsel %vm519_vm0, %v469_v60, 4286644096  ;;  %v691_v10 = vmax.bf16 %v689_v62, %v687_v2  ;;  %v470_v12 = vld [vmem:[%s1093_s23 + $0x5c] sm:$0xf] }
  0x55   : > { %v724_v11 = vsel %vm519_vm0, %v508_v52, 4286644096  ;;  %v485_v13 = vld [vmem:[%s1093_s23 + $0x98] sm:$0xf]  ;;  %v737_v14 = vmax.bf16 %v735_v8, %v732_v5  ;;  %v728_v16 = vsel %vm519_vm0, %v516_v56, 4286644096 }
  0x56   : > { %v722_v15 = vmax.bf16 %v720_v3, %v718_v6  ;;  %v478_v17 = vld [vmem:[%s1093_s23 + $0x7c] sm:$0xf]  ;;  %v743_v18 = vsel %vm519_vm0, %v477_v4, 4286644096  ;;  %v695_v19 = vmax.bf16 %v693_v63, %v691_v10  ;;  %v493_v20 = vld [vmem:[%s1093_s23 + $0xb8] sm:$0xf] }
  0x57   : > { %v741_v21 = vmax.bf16 %v739_v9, %v737_v14  ;;  %v767_v22 = vsel %vm519_vm0, %v454_v1, 4286644096  ;;  %v770_v23 = vsel %vm519_vm0, %v462_v7, 4286644096  ;;  %v486_v25 = vld [vmem:[%s1093_s23 + $0x9c] sm:$0xf] }
  0x58   : > { %v726_v24 = vmax.bf16 %v724_v11, %v722_v15  ;;  %v747_v26 = vsel %vm519_vm0, %v485_v13, 4286644096  ;;  %v772_v27 = vmax.bf16 %v770_v23, %v767_v22  ;;  %v774_v28 = vsel %vm519_vm0, %v470_v12, 4286644096  ;;  %v501_v29 = vld [vmem:[%s1093_s23 + $0xd8] sm:$0xf] }
  0x59   : > { %v745_v30 = vmax.bf16 %v743_v18, %v741_v21  ;;  %v778_v31 = vsel %vm519_vm0, %v478_v17, 4286644096  ;;  %v805_v33 = vmax.bf16 %v969_v49, %v695_v19  ;;  %v494_v34 = vld [vmem:[%s1093_s23 + $0xbc] sm:$0xf]  ;;  %v751_v35 = vsel %vm519_vm0, %v493_v20, 4286644096 }
  0x5a   : > { %v730_v32 = vmax.bf16 %v728_v16, %v726_v24  ;;  %v776_v36 = vmax.bf16 %v774_v28, %v772_v27  ;;  %v509_v37 = vld [vmem:[%s1093_s23 + $0xf8] sm:$0xf]  ;;  %v782_v39 = vsel %vm519_vm0, %v486_v25, 4286644096  ;;  %v502_v41 = vld [vmem:[%s1093_s23 + $0xdc] sm:$0xf] }
  0x5b   : > { %v749_v38 = vmax.bf16 %v747_v26, %v745_v30  ;;  %v755_v42 = vsel %vm519_vm0, %v501_v29, 4286644096  ;;  %v517_v44 = vld [vmem:[%s1093_s23 + $0x118] sm:$0xf]  ;;  %v786_v46 = vsel %vm519_vm0, %v494_v34, 4286644096 }
  0x5c   : > { %v806_v40 = vmax.bf16 %v969_v49, %v730_v32  ;;  %v780_v43 = vmax.bf16 %v778_v31, %v776_v36  ;;  %v510_v48 = vld [vmem:[%s1093_s23 + $0xfc] sm:$0xf]  ;;  %v759_v50 = vsel %vm519_vm0, %v509_v37, 4286644096  ;;  %v790_v53 = vsel %vm519_vm0, %v502_v41, 4286644096 }
  0x5d   : > { %v753_v45 = vmax.bf16 %v751_v35, %v749_v38  ;;  %v518_v54 = vld [vmem:[%s1093_s23 + $0x11c] sm:$0xf]  ;;  %v763_v55 = vsel %vm519_vm0, %v517_v44, 4286644096  ;;  %v794_v58 = vsel %vm519_vm0, %v510_v48, 4286644096 }
  0x5e   : > { %v914_v47 = vcombine.low %v805_v33, %v806_v40  ;;  %v784_v51 = vmax.bf16 %v782_v39, %v780_v43  ;;  %v798_v61 = vsel %vm519_vm0, %v518_v54, 4286644096 }
  0x5f   : > { %v757_v52 = vmax.bf16 %v755_v42, %v753_v45 }
  0x60   : > { %915 = vst [vmem:[%s1171_s28 + $0x10] sm:$0xff] %v914_v47   ;;  %v788_v56 = vmax.bf16 %v786_v46, %v784_v51 }
  0x61   : > { %v761_v57 = vmax.bf16 %v759_v50, %v757_v52 }
  0x62   : > { %v792_v59 = vmax.bf16 %v790_v53, %v788_v56 }
  0x63   : > { %v765_v60 = vmax.bf16 %v763_v55, %v761_v57 }
  0x64   : > { %v796_v62 = vmax.bf16 %v794_v58, %v792_v59 }
  0x65   : > { %v807_v0 = vmax.bf16 %v969_v49, %v765_v60 }
  0x66   : > { %v800_v63 = vmax.bf16 %v798_v61, %v796_v62 }
  0x68   : > { %v808_v1 = vmax.bf16 %v969_v49, %v800_v63 }
  0x6a   : > { %v916_v2 = vcombine.low %v807_v0, %v808_v1 }
  0x6c   : > { %917 = vst [vmem:[%s1171_s28 + $0x18] sm:$0xff] %v916_v2  }
  0x6d PF: > { %p8_p9 = scmp.ge.s32.totalorder %s997_s10, 5   ;;  %s1273_s6 = smov %s963_s7 }
  0x6e   : > { %s1274_s7 = smov %s1006_s13  ;;  %s1275_s8 = smov %s997_s10 }
  0x6f   :  { %10 = sbr.rel (!%p8_p9) target bundleno = 2 (0x2), region = 100 }

// kernel: alexnet_legacy_forward.7
= control target key start
LH: loop header
LB: loop body
LE: loop exit
PB: predicated region body
PF: predicated region fallthrough
CT: control target
= control target key end

     0   :  { %v3545_v0 = vmov 0   ;;  %v3546_v39 = vmov 0.0   ;;  %vm1298_vm0 = vcmask 1043456   ;;  %vm3547_vm1 = vmmov 0   ;;  %s4555_s1 = inlined_call_operand.vmem [shape: bf16[600,128], index: 1, kind: input, shape index: {}]   ;;  %s4556_s0 = inlined_call_operand.vmem [shape: bf16[456,600], index: 0, kind: input, shape index: {}]   ;;  %s4557_s2 = inlined_call_operand.vmem [shape: f32[1,128], index: 2, kind: input, shape index: {}]   ;;  %s4558_s3 = inlined_call_operand.vmem [shape: bf16[456,128], index: 3, kind: output, shape index: {}]  }
   0x1   :  { %1302 = vmatprep.subr.bf16.mxu1 %v3545_v0  ;;  %1566 = vmatprep.subr.bf16.mxu0 %v3545_v0  ;;  %v3306_v1 = vld [vmem:[%s4555_s1] sm:$0xff]   ;;  %v3308_v3 = vld [vmem:[%s4555_s1 + $0x8] sm:$0xff]   ;;  %v3310_v5 = vld [vmem:[%s4555_s1 + $0x10] sm:$0xff]   ;;  %vm1210_vm2 = vcmask 719872  }
   0x2   :  { %v3576_v2 = vld [vmem:[%s4555_s1 + $0x80] sm:$0xff]   ;;  %1303 = vmatpush1.bf16.msra.mxu1 %v3306_v1  ;;  %v3586_v4 = vld [vmem:[%s4555_s1 + $0x88] sm:$0xff]   ;;  %v3597_v6 = vld [vmem:[%s4555_s1 + $0x90] sm:$0xff]  }
   0x3   :  { %1567 = vmatpush1.bf16.msra.mxu0 %v3576_v2  ;;  %1304 = vmatprep.subr.bf16.mxu1 %v3545_v0  ;;  %v3312_v7 = vld [vmem:[%s4555_s1 + $0x18] sm:$0xff]   ;;  %v3314_v9 = vld [vmem:[%s4555_s1 + $0x20] sm:$0xff]   ;;  %v3316_v11 = vld [vmem:[%s4555_s1 + $0x28] sm:$0xff]  }
   0x4   :  { %1568 = vmatprep.subr.bf16.mxu0 %v3545_v0  ;;  %v3608_v8 = vld [vmem:[%s4555_s1 + $0x98] sm:$0xff]   ;;  %v3619_v10 = vld [vmem:[%s4555_s1 + $0xa0] sm:$0xff]   ;;  %v3630_v12 = vld [vmem:[%s4555_s1 + $0xa8] sm:$0xff]  }
   0x5   :  { %v3318_v13 = vld [vmem:[%s4555_s1 + $0x30] sm:$0xff]   ;;  %v3320_v15 = vld [vmem:[%s4555_s1 + $0x38] sm:$0xff]   ;;  %v3322_v17 = vld [vmem:[%s4555_s1 + $0x40] sm:$0xff]  }
   0x6   :  { %1305 = vmatpush1.bf16.msra.mxu1 %v3308_v3  ;;  %v3641_v14 = vld [vmem:[%s4555_s1 + $0xb0] sm:$0xff]   ;;  %v3652_v16 = vld [vmem:[%s4555_s1 + $0xb8] sm:$0xff]   ;;  %v3663_v18 = vld [vmem:[%s4555_s1 + $0xc0] sm:$0xff]  }
   0x7   :  { %1569 = vmatpush1.bf16.msra.mxu0 %v3586_v4  ;;  %1306 = vmatprep.subr.bf16.mxu1 %v3545_v0  ;;  %v3340_v19 = vld [vmem:[%s4556_s0 + $0x4] ss:$20 sps:$4 sm:$0xff]   ;;  %v3324_v20 = vld [vmem:[%s4555_s1 + $0x48] sm:$0xff]   ;;  %v3326_v23 = vld [vmem:[%s4555_s1 + $0x50] sm:$0xff]  }
   0x8   :  { %1570 = vmatprep.subr.bf16.mxu0 %v3545_v0  ;;  %v3343_v21 = vld [vmem:[%s4556_s0 + $0xc] ss:$20 sps:$4 sm:$0xff]   ;;  %1334 = vmatprep.mubr.bf16.mxu1 %v3340_v19  ;;  %v3691_v24 = vld [vmem:[%s4555_s1 + $0xd0] sm:$0xff]   ;;  %v3328_v25 = vld [vmem:[%s4555_s1 + $0x58] sm:$0xff]  }
   0x9   :  { %v3680_v22 = vld [vmem:[%s4555_s1 + $0xc8] sm:$0xff]   ;;  %1598 = vmatprep.mubr.bf16.mxu0 %v3343_v21  ;;  %v3702_v26 = vld [vmem:[%s4555_s1 + $0xd8] sm:$0xff]   ;;  %v3330_v27 = vld [vmem:[%s4555_s1 + $0x60] sm:$0xff]  }
   0xa   :  { %1307 = vmatpush1.bf16.msra.mxu1 %v3310_v5  ;;  %v3713_v28 = vld [vmem:[%s4555_s1 + $0xe0] sm:$0xff]   ;;  %v3332_v29 = vld [vmem:[%s4555_s1 + $0x68] sm:$0xff]   ;;  %v3334_v31 = vld [vmem:[%s4555_s1 + $0x70] sm:$0xff]  }
   0xb   :  { %1571 = vmatpush1.bf16.msra.mxu0 %v3597_v6  ;;  %1308 = vmatprep.subr.bf16.mxu1 %v3545_v0  ;;  %v3724_v30 = vld [vmem:[%s4555_s1 + $0xe8] sm:$0xff]   ;;  %v3735_v32 = vld [vmem:[%s4555_s1 + $0xf0] sm:$0xff]   ;;  %v3336_v33 = vld [vmem:[%s4555_s1 + $0x78] sm:$0xff]  }
   0xc   :  { %1572 = vmatprep.subr.bf16.mxu0 %v3545_v0  ;;  %v3746_v34 = vld [vmem:[%s4555_s1 + $0xf8] sm:$0xff]   ;;  %v3338_v35 = vld [vmem:[%s4556_s0] ss:$20 sps:$4 sm:$0xff]   ;;  %v3357_v41 = vld [vmem:[%s4555_s1 + $0x108] sm:$0xff]  }
   0xd   :  { %v3341_v36 = vld [vmem:[%s4556_s0 + $0x8] ss:$20 sps:$4 sm:$0xff]   ;;  %v3345_v37 = vld [vmem:[%s4556_s0 + $0x2c] ss:$20 sps:$4 sm:$0xff]   ;;  %v3350_v43 = vld [vmem:[%s4556_s0 + $0x30] ss:$20 sps:$4 sm:$0xff]  }
   0xe   :  { %1309 = vmatpush1.bf16.msra.mxu1 %v3312_v7  ;;  %v3344_v38 = vld [vmem:[%s4555_s1 + $0x100] sm:$0xff]   ;;  %v3347_v40 = vld [vmem:[%s4556_s0 + $0x34] ss:$20 sps:$4 sm:$0xff]   ;;  %v3353_v45 = vld [vmem:[%s4556_s0 + $0x5c] ss:$20 sps:$4 sm:$0xff]  }
   0xf   :  { %1573 = vmatpush1.bf16.msra.mxu0 %v3608_v8  ;;  %1310 = vmatprep.subr.bf16.mxu1 %v3545_v0  ;;  %v3349_v42 = vld [vmem:[%s4556_s0 + $0x28] ss:$20 sps:$4 sm:$0xff]   ;;  %v3376_v46 = vld [vmem:[%s4555_s1 + $0x110] sm:$0xff]   ;;  %v3356_v49 = vld [vmem:[%s4556_s0 + $0x58] ss:$20 sps:$4 sm:$0xff]  }
  0x10   :  { %1574 = vmatprep.subr.bf16.mxu0 %v3545_v0  ;;  %v3351_v44 = vld [vmem:[%s4556_s0 + $0x54] ss:$20 sps:$4 sm:$0xff]   ;;  %v3389_v47 = vld [vmem:[%s4555_s1 + $0x118] sm:$0xff]   ;;  %v3355_v48 = vld [vmem:[%s4556_s0 + $0x50] ss:$20 sps:$4 sm:$0xff]  }
  0x11   :  { %v3358_v50 = vld [vmem:[%s4556_s0 + $0x7c] ss:$20 sps:$4 sm:$0xff]   ;;  %v3360_v51 = vld [vmem:[%s4556_s0 + $0x84] ss:$20 sps:$4 sm:$0xff]   ;;  %v3421_v53 = vld [vmem:[%s4555_s1 + $0x128] ss:$0 sps:$4 sm:$0xff]  }
  0x12   :  { %1311 = vmatpush1.bf16.msra.mxu1 %v3314_v9  ;;  %v3408_v52 = vld [vmem:[%s4555_s1 + $0x120] sm:$0xff]   ;;  %v3362_v54 = vld [vmem:[%s4556_s0 + $0x78] ss:$20 sps:$4 sm:$0xff]   ;;  %v1300_v56 = vsel %vm1298_vm0, %v3421_v53, 0  ;;  %v3369_v60 = vld [vmem:[%s4556_s0 + $0xa8] ss:$20 sps:$4 sm:$0xff]  }
  0x13   :  { %1575 = vmatpush1.bf16.msra.mxu0 %v3619_v10  ;;  %1312 = vmatprep.subr.bf16.mxu1 %v3545_v0  ;;  %v3363_v55 = vld [vmem:[%s4556_s0 + $0x80] ss:$20 sps:$4 sm:$0xff]   ;;  %v3364_v57 = vld [vmem:[%s4556_s0 + $0xa4] ss:$20 sps:$4 sm:$0xff]   ;;  %v3374_v63 = vld [vmem:[%s4556_s0 + $0xc8] ss:$20 sps:$4 sm:$0xff]  }
  0x14   :  { %1576 = vmatprep.subr.bf16.mxu0 %v3545_v0  ;;  %v3366_v58 = vld [vmem:[%s4556_s0 + $0xac] ss:$20 sps:$4 sm:$0xff]   ;;  %v3372_v62 = vld [vmem:[%s4556_s0 + $0xd4] ss:$20 sps:$4 sm:$0xff]   ;;  %v3375_v1 = vld [vmem:[%s4556_s0 + $0xd0] ss:$20 sps:$4 sm:$0xff]  }
  0x15   :  { %v3368_v59 = vld [vmem:[%s4556_s0 + $0xa0] ss:$20 sps:$4 sm:$0xff]   ;;  %v3379_v3 = vld [vmem:[%s4556_s0 + $0xfc] ss:$20 sps:$4 sm:$0xff]   ;;  %v3382_v5 = vld [vmem:[%s4556_s0 + $0xf8] ss:$20 sps:$4 sm:$0xff]  }
  0x16   :  { %1313 = vmatpush1.bf16.msra.mxu1 %v3316_v11  ;;  %v3370_v61 = vld [vmem:[%s4556_s0 + $0xcc] ss:$20 sps:$4 sm:$0xff]   ;;  %v3385_v7 = vld [vmem:[%s4556_s0 + $0x124] ss:$20 sps:$4 sm:$0xff]   ;;  %v3409_v21 = vld [vmem:[%s4556_s0 + $0x1bc] ss:$20 sps:$4 sm:$0xff]  }
  0x17   :  { %1577 = vmatpush1.bf16.msra.mxu0 %v3630_v12  ;;  %1314 = vmatprep.subr.bf16.mxu1 %v3545_v0  ;;  %v3388_v9 = vld [vmem:[%s4556_s0 + $0x120] ss:$20 sps:$4 sm:$0xff]   ;;  %v3406_v19 = vld [vmem:[%s4556_s0 + $0x190] ss:$20 sps:$4 sm:$0xff]  }
  0x18   :  { %1578 = vmatprep.subr.bf16.mxu0 %v3545_v0  ;;  %v3392_v11 = vld [vmem:[%s4556_s0 + $0x14c] ss:$20 sps:$4 sm:$0xff]   ;;  %v3454_v53 = vld [vmem:[%s4556_s0 + $0x324] ss:$20 sps:$4 sm:$0xff]  }
  0x1a   :  { %1315 = vmatpush1.bf16.msra.mxu1 %v3318_v13  ;;  %v3395_v13 = vld [vmem:[%s4556_s0 + $0x148] ss:$20 sps:$4 sm:$0xff]  }
  0x1b   :  { %1579 = vmatpush1.bf16.msra.mxu0 %v3641_v14  ;;  %1316 = vmatprep.subr.bf16.mxu1 %v3545_v0 }
  0x1c   :  { %1580 = vmatprep.subr.bf16.mxu0 %v3545_v0 }
  0x1e   :  { %1317 = vmatpush1.bf16.msra.mxu1 %v3320_v15  ;;  %v3398_v15 = vld [vmem:[%s4556_s0 + $0x174] ss:$20 sps:$4 sm:$0xff]  }
  0x1f   :  { %1581 = vmatpush1.bf16.msra.mxu0 %v3652_v16  ;;  %1318 = vmatprep.subr.bf16.mxu1 %v3545_v0 }
  0x20   :  { %1582 = vmatprep.subr.bf16.mxu0 %v3545_v0 }
  0x22   :  { %1319 = vmatpush1.bf16.msra.mxu1 %v3322_v17  ;;  %v3402_v17 = vld [vmem:[%s4556_s0 + $0x194] ss:$20 sps:$4 sm:$0xff]  }
  0x23   :  { %1583 = vmatpush1.bf16.msra.mxu0 %v3663_v18  ;;  %1320 = vmatprep.subr.bf16.mxu1 %v3545_v0 }
  0x24   :  { %1584 = vmatprep.subr.bf16.mxu0 %v3545_v0 }
  0x26   :  { %1321 = vmatpush1.bf16.msra.mxu1 %v3324_v20  ;;  %v3407_v20 = vld [vmem:[%s4556_s0 + $0x198] ss:$20 sps:$4 sm:$0xff]  }
  0x27   :  { %1585 = vmatpush1.bf16.msra.mxu0 %v3680_v22  ;;  %1322 = vmatprep.subr.bf16.mxu1 %v3545_v0 }
  0x28   :  { %1586 = vmatprep.subr.bf16.mxu0 %v3545_v0 }
  0x2a   :  { %1323 = vmatpush1.bf16.msra.mxu1 %v3326_v23  ;;  %v3413_v23 = vld [vmem:[%s4556_s0 + $0x1b8] ss:$20 sps:$4 sm:$0xff]  }
  0x2b   :  { %1587 = vmatpush1.bf16.msra.mxu0 %v3691_v24  ;;  %1324 = vmatprep.subr.bf16.mxu1 %v3545_v0 }
  0x2c   :  { %1588 = vmatprep.subr.bf16.mxu0 %v3545_v0 }
  0x2e   :  { %1325 = vmatpush1.bf16.msra.mxu1 %v3328_v25  ;;  %v3415_v25 = vld [vmem:[%s4556_s0 + $0x1e4] ss:$20 sps:$4 sm:$0xff]  }
  0x2f   :  { %1589 = vmatpush1.bf16.msra.mxu0 %v3702_v26  ;;  %1326 = vmatprep.subr.bf16.mxu1 %v3545_v0 }
  0x30   :  { %1590 = vmatprep.subr.bf16.mxu0 %v3545_v0 }
  0x32   :  { %1327 = vmatpush1.bf16.msra.mxu1 %v3330_v27  ;;  %v3419_v27 = vld [vmem:[%s4556_s0 + $0x1e0] ss:$20 sps:$4 sm:$0xff]  }
  0x33   :  { %1591 = vmatpush1.bf16.msra.mxu0 %v3713_v28  ;;  %1328 = vmatprep.subr.bf16.mxu1 %v3545_v0 }
  0x34   :  { %1592 = vmatprep.subr.bf16.mxu0 %v3545_v0 }
  0x36   :  { %1329 = vmatpush1.bf16.msra.mxu1 %v3332_v29  ;;  %v3422_v29 = vld [vmem:[%s4556_s0 + $0x20c] ss:$20 sps:$4 sm:$0xff]  }
  0x37   :  { %1593 = vmatpush1.bf16.msra.mxu0 %v3724_v30  ;;  %1330 = vmatprep.subr.bf16.mxu1 %v3545_v0 }
  0x38   :  { %1594 = vmatprep.subr.bf16.mxu0 %v3545_v0 }
  0x3a   :  { %1331 = vmatpush1.bf16.msra.mxu1 %v3334_v31  ;;  %v3426_v31 = vld [vmem:[%s4556_s0 + $0x208] ss:$20 sps:$4 sm:$0xff]  }
  0x3b   :  { %1595 = vmatpush1.bf16.msra.mxu0 %v3735_v32  ;;  %1332 = vmatprep.subr.bf16.mxu1 %v3545_v0 }
  0x3c   :  { %1596 = vmatprep.subr.bf16.mxu0 %v3545_v0 }
  0x3e   :  { %1333 = vmatpush1.bf16.msra.mxu1 %v3336_v33  ;;  %v3428_v33 = vld [vmem:[%s4556_s0 + $0x234] ss:$20 sps:$4 sm:$0xff]  }
  0x3f   :  { %1597 = vmatpush1.bf16.msra.mxu0 %v3746_v34  ;;  %3041 = vmatprep.subr.bf16.mxu1 %v3545_v0 }
  0x40   :  { %2913 = vmatprep.subr.bf16.mxu0 %v3546_v39 }
  0x41   :  { %1335 = vmatmul.mubr.bf16.vlgmr.msra.gmra.mrb[0].mxu1 %v3338_v35  ;;  %v3432_v35 = vld [vmem:[%s4556_s0 + $0x230] ss:$20 sps:$4 sm:$0xff]  }
  0x42   :  { %1599 = vmatmul.mubr.bf16.vlgmr.msra.gmra.mrb[0].mxu0 %v3341_v36  ;;  %1342 = vmatprep.mubr.bf16.mxu1 %v3345_v37  ;;  %v3433_v36 = vld [vmem:[%s4556_s0 + $0x238] ss:$20 sps:$4 sm:$0xff]   ;;  %v3434_v37 = vld [vmem:[%s4556_s0 + $0x25c] ss:$20 sps:$4 sm:$0xff]  }
  0x43   :  { %2914 = vmatpush3.bf16.msra.mxu0 %v3344_v38  ;;  %3057 = vmatpush1.bf16.msra.mxu1 %v3576_v2  ;;  %v3377_v2 = vld [vmem:[%s4556_s0 + $0xf4] ss:$20 sps:$4 sm:$0xff]   ;;  %v3436_v38 = vld [vmem:[%s4556_s0 + $0x258] ss:$20 sps:$4 sm:$0xff]  }
  0x44   :  { %1606 = vmatprep.mubr.bf16.mxu0 %v3347_v40  ;;  %2915 = vmatprep.subr.bf16.mxu0 %v3546_v39  ;;  %v3437_v40 = vld [vmem:[%s4556_s0 + $0x10] ss:$20 sps:$4 sm:$0xff]  }
  0x45   :  { %3042 = vmatprep.subr.bf16.mxu1 %v3545_v0 }
  0x47   :  { %2916 = vmatpush3.bf16.msra.mxu0 %v3357_v41  ;;  %3058 = vmatpush1.bf16.msra.mxu1 %v3586_v4  ;;  %v3381_v4 = vld [vmem:[%s4556_s0 + $0xf0] ss:$20 sps:$4 sm:$0xff]  }
  0x48   :  { %3043 = vmatprep.subr.bf16.mxu1 %v3545_v0  ;;  %2917 = vmatprep.subr.bf16.mxu0 %v3546_v39  ;;  %v3438_v41 = vld [vmem:[%s4556_s0 + $0x284] ss:$20 sps:$4 sm:$0xff]  }
  0x49   :  { %1343 = vmatmul.mubr.bf16.gmra.mrb[4].mxu1 %v3349_v42  ;;  %v3440_v42 = vld [vmem:[%s4556_s0 + $0x280] ss:$20 sps:$4 sm:$0xff]  }
  0x4a   :  { %1607 = vmatmul.mubr.bf16.gmra.mrb[4].mxu0 %v3350_v43  ;;  %1350 = vmatprep.mubr.bf16.mxu1 %v3351_v44  ;;  %v3441_v43 = vld [vmem:[%s4556_s0 + $0x38] ss:$20 sps:$4 sm:$0xff]  }
  0x4b   :  { %1614 = vmatprep.mubr.bf16.mxu0 %v3353_v45  ;;  %3059 = vmatpush1.bf16.msra.mxu1 %v3597_v6  ;;  %v3383_v6 = vld [vmem:[%s4556_s0 + $0x11c] ss:$20 sps:$4 sm:$0xff]   ;;  %v3442_v44 = vld [vmem:[%s4556_s0 + $0x2ac] ss:$20 sps:$4 sm:$0xff]  }
  0x4c   :  { %2918 = vmatpush3.bf16.msra.mxu0 %v3376_v46  ;;  %3044 = vmatprep.subr.bf16.mxu1 %v3545_v0  ;;  %v3444_v45 = vld [vmem:[%s4556_s0 + $0x2a8] ss:$20 sps:$4 sm:$0xff]   ;;  %v3445_v46 = vld [vmem:[%s4556_s0 + $0x60] ss:$20 sps:$4 sm:$0xff]  }
  0x4d   :  { %2919 = vmatprep.subr.bf16.mxu0 %v3546_v39 }
  0x4f   :  { %3060 = vmatpush1.bf16.msra.mxu1 %v3608_v8  ;;  %v3387_v8 = vld [vmem:[%s4556_s0 + $0x118] ss:$20 sps:$4 sm:$0xff]  }
  0x50   :  { %2920 = vmatpush3.bf16.msra.mxu0 %v3389_v47  ;;  %3045 = vmatprep.subr.bf16.mxu1 %v3545_v0  ;;  %v3446_v47 = vld [vmem:[%s4556_s0 + $0x2d4] ss:$20 sps:$4 sm:$0xff]  }
  0x51   :  { %1351 = vmatmul.mubr.bf16.gmra.mrb[8].mxu1 %v3355_v48  ;;  %2921 = vmatprep.subr.bf16.mxu0 %v3546_v39  ;;  %v3448_v48 = vld [vmem:[%s4556_s0 + $0x2d0] ss:$20 sps:$4 sm:$0xff]  }
  0x52   :  { %1615 = vmatmul.mubr.bf16.gmra.mrb[8].mxu0 %v3356_v49  ;;  %1358 = vmatprep.mubr.bf16.mxu1 %v3358_v50  ;;  %v3449_v49 = vld [vmem:[%s4556_s0 + $0x88] ss:$20 sps:$4 sm:$0xff]  }
  0x53   :  { %1622 = vmatprep.mubr.bf16.mxu0 %v3360_v51  ;;  %3061 = vmatpush1.bf16.msra.mxu1 %v3619_v10  ;;  %v3390_v10 = vld [vmem:[%s4556_s0 + $0x144] ss:$20 sps:$4 sm:$0xff]   ;;  %v3450_v50 = vld [vmem:[%s4556_s0 + $0x2fc] ss:$20 sps:$4 sm:$0xff]  }
  0x54   :  { %3046 = vmatprep.subr.bf16.mxu1 %v3545_v0  ;;  %2922 = vmatpush3.bf16.msra.mxu0 %v3408_v52  ;;  %v3452_v51 = vld [vmem:[%s4556_s0 + $0x2f8] ss:$20 sps:$4 sm:$0xff]   ;;  %v3453_v52 = vld [vmem:[%s4556_s0 + $0xb0] ss:$20 sps:$4 sm:$0xff]  }
  0x55   :  { %2923 = vmatprep.subr.bf16.mxu0 %v3546_v39 }
  0x57   :  { %3062 = vmatpush1.bf16.msra.mxu1 %v3630_v12  ;;  %v3394_v12 = vld [vmem:[%s4556_s0 + $0x140] ss:$20 sps:$4 sm:$0xff]  }
  0x58   :  { %3047 = vmatprep.subr.bf16.mxu1 %v3545_v0  ;;  %2924 = vmatpush3.bf16.msra.mxu0 %v1300_v56  ;;  %v3458_v56 = vld [vmem:[%s4556_s0 + $0x34c] ss:$20 sps:$4 sm:$0xff]  }
  0x59   :  { %1359 = vmatmul.mubr.bf16.gmra.mrb[12].mxu1 %v3362_v54  ;;  %v3456_v54 = vld [vmem:[%s4556_s0 + $0x320] ss:$20 sps:$4 sm:$0xff]  }
  0x5a   :  { %1623 = vmatmul.mubr.bf16.gmra.mrb[12].mxu0 %v3363_v55  ;;  %1366 = vmatprep.mubr.bf16.mxu1 %v3364_v57  ;;  %v3457_v55 = vld [vmem:[%s4556_s0 + $0xd8] ss:$20 sps:$4 sm:$0xff]   ;;  %v3460_v57 = vld [vmem:[%s4556_s0 + $0x348] ss:$20 sps:$4 sm:$0xff]  }
  0x5b   :  { %1630 = vmatprep.mubr.bf16.mxu0 %v3366_v58  ;;  %3063 = vmatpush1.bf16.msra.mxu1 %v3641_v14  ;;  %v3396_v14 = vld [vmem:[%s4556_s0 + $0x16c] ss:$20 sps:$4 sm:$0xff]  }
  0x5c   :  { %3048 = vmatprep.subr.bf16.mxu1 %v3545_v0  ;;  %v3461_v58 = vld [vmem:[%s4556_s0 + $0x100] ss:$20 sps:$4 sm:$0xff]  }
  0x5f   :  { %3064 = vmatpush1.bf16.msra.mxu1 %v3652_v16  ;;  %v3401_v16 = vld [vmem:[%s4556_s0 + $0x170] ss:$20 sps:$4 sm:$0xff]  }
  0x60   :  { %3049 = vmatprep.subr.bf16.mxu1 %v3545_v0 }
  0x61   :  { %1367 = vmatmul.mubr.bf16.gmra.mrb[16].mxu1 %v3368_v59  ;;  %v3462_v59 = vld [vmem:[%s4556_s0 + $0x374] ss:$20 sps:$4 sm:$0xff]  }
  0x62   :  { %1631 = vmatmul.mubr.bf16.gmra.mrb[16].mxu0 %v3369_v60  ;;  %1374 = vmatprep.mubr.bf16.mxu1 %v3370_v61  ;;  %v3464_v60 = vld [vmem:[%s4556_s0 + $0x370] ss:$20 sps:$4 sm:$0xff]   ;;  %v3465_v61 = vld [vmem:[%s4556_s0 + $0x128] ss:$20 sps:$4 sm:$0xff]  }
  0x63   :  { %1638 = vmatprep.mubr.bf16.mxu0 %v3372_v62  ;;  %3065 = vmatpush1.bf16.msra.mxu1 %v3663_v18  ;;  %v3404_v18 = vld [vmem:[%s4556_s0 + $0x19c] ss:$20 sps:$4 sm:$0xff]  }
  0x64   :  { %3050 = vmatprep.subr.bf16.mxu1 %v3545_v0  ;;  %v3466_v62 = vld [vmem:[%s4556_s0 + $0x39c] ss:$20 sps:$4 sm:$0xff]  }
  0x67   :  { %3066 = vmatpush1.bf16.msra.mxu1 %v3680_v22  ;;  %v3411_v22 = vld [vmem:[%s4556_s0 + $0x1c4] ss:$20 sps:$4 sm:$0xff]  }
  0x68   :  { %3051 = vmatprep.subr.bf16.mxu1 %v3545_v0 }
  0x69   :  { %1375 = vmatmul.mubr.bf16.gmra.mrb[20].mxu1 %v3374_v63  ;;  %v3468_v63 = vld [vmem:[%s4556_s0 + $0x398] ss:$20 sps:$4 sm:$0xff]  }
  0x6a   :  { %1639 = vmatmul.mubr.bf16.gmra.mrb[20].mxu0 %v3375_v1  ;;  %1382 = vmatprep.mubr.bf16.mxu1 %v3377_v2  ;;  %v3469_v1 = vld [vmem:[%s4556_s0 + $0x150] ss:$20 sps:$4 sm:$0xff]  }
  0x6b   :  { %1646 = vmatprep.mubr.bf16.mxu0 %v3379_v3  ;;  %3067 = vmatpush1.bf16.msra.mxu1 %v3691_v24  ;;  %v3414_v24 = vld [vmem:[%s4556_s0 + $0x1c0] ss:$20 sps:$4 sm:$0xff]   ;;  %v3470_v2 = vld [vmem:[%s4556_s0 + $0x3c4] ss:$20 sps:$4 sm:$0xff]  }
  0x6c   :  { %3052 = vmatprep.subr.bf16.mxu1 %v3545_v0  ;;  %v3472_v3 = vld [vmem:[%s4556_s0 + $0x3c0] ss:$20 sps:$4 sm:$0xff]  }
  0x6f   :  { %3068 = vmatpush1.bf16.msra.mxu1 %v3702_v26  ;;  %v3417_v26 = vld [vmem:[%s4556_s0 + $0x1ec] ss:$20 sps:$4 sm:$0xff]  }
  0x70   :  { %3053 = vmatprep.subr.bf16.mxu1 %v3545_v0 }
  0x71   :  { %1383 = vmatmul.mubr.bf16.gmra.mrb[24].mxu1 %v3381_v4  ;;  %v3473_v4 = vld [vmem:[%s4556_s0 + $0x178] ss:$20 sps:$4 sm:$0xff]  }
  0x72   :  { %1647 = vmatmul.mubr.bf16.gmra.mrb[24].mxu0 %v3382_v5  ;;  %1390 = vmatprep.mubr.bf16.mxu1 %v3383_v6  ;;  %v3474_v5 = vld [vmem:[%s4556_s0 + $0x3ec] ss:$20 sps:$4 sm:$0xff]   ;;  %v3476_v6 = vld [vmem:[%s4556_s0 + $0x3e8] ss:$20 sps:$4 sm:$0xff]  }
  0x73   :  { %1654 = vmatprep.mubr.bf16.mxu0 %v3385_v7  ;;  %3069 = vmatpush1.bf16.msra.mxu1 %v3713_v28  ;;  %v3420_v28 = vld [vmem:[%s4556_s0 + $0x1e8] ss:$20 sps:$4 sm:$0xff]   ;;  %v3477_v7 = vld [vmem:[%s4556_s0 + $0x1a0] ss:$20 sps:$4 sm:$0xff]  }
  0x74   :  { %3054 = vmatprep.subr.bf16.mxu1 %v3545_v0 }
  0x77   :  { %3070 = vmatpush1.bf16.msra.mxu1 %v3724_v30  ;;  %v3424_v30 = vld [vmem:[%s4556_s0 + $0x214] ss:$20 sps:$4 sm:$0xff]  }
  0x78   :  { %3055 = vmatprep.subr.bf16.mxu1 %v3545_v0 }
  0x79   :  { %1391 = vmatmul.mubr.bf16.gmra.mrb[28].mxu1 %v3387_v8  ;;  %v3478_v8 = vld [vmem:[%s4556_s0 + $0x414] ss:$20 sps:$4 sm:$0xff]  }
  0x7a   :  { %1655 = vmatmul.mubr.bf16.gmra.mrb[28].mxu0 %v3388_v9  ;;  %1398 = vmatprep.mubr.bf16.mxu1 %v3390_v10  ;;  %v3480_v9 = vld [vmem:[%s4556_s0 + $0x410] ss:$20 sps:$4 sm:$0xff]   ;;  %v3481_v10 = vld [vmem:[%s4556_s0 + $0x1c8] ss:$20 sps:$4 sm:$0xff]  }
  0x7b   :  { %1662 = vmatprep.mubr.bf16.mxu0 %v3392_v11  ;;  %3071 = vmatpush1.bf16.msra.mxu1 %v3735_v32  ;;  %v3427_v32 = vld [vmem:[%s4556_s0 + $0x210] ss:$20 sps:$4 sm:$0xff]  }
  0x7c   :  { %3056 = vmatprep.subr.bf16.mxu1 %v3545_v0  ;;  %v3400_v0 = vld [vmem:[%s4556_s0 + $0x168] ss:$20 sps:$4 sm:$0xff]  }
  0x7d   :  { %v3482_v11 = vld [vmem:[%s4556_s0 + $0x43c] ss:$20 sps:$4 sm:$0xff]  }
  0x7f   :  { %3072 = vmatpush1.bf16.msra.mxu1 %v3746_v34  ;;  %v3430_v34 = vld [vmem:[%s4556_s0 + $0x23c] ss:$20 sps:$4 sm:$0xff]  }
  0x81   :  { %1399 = vmatmul.mubr.bf16.gmra.mrb[32].mxu1 %v3394_v12  ;;  %v183_v12 = vld [vmem:[%s4556_s0 + $0x460] sm:$0xff] }
  0x82   :  { %1663 = vmatmul.mubr.bf16.gmra.mrb[32].mxu0 %v3395_v13  ;;  %1406 = vmatprep.mubr.bf16.mxu1 %v3396_v14 }
  0x83   :  { %1670 = vmatprep.mubr.bf16.mxu0 %v3398_v15  ;;  %v3484_v15 = vld [vmem:[%s4556_s0 + $0x438] ss:$20 sps:$4 sm:$0xff]  }
  0x89   :  { %1407 = vmatmul.mubr.bf16.gmra.mrb[36].mxu1 %v3400_v0  ;;  %v3485_v0 = vld [vmem:[%s4556_s0 + $0x1f0] ss:$20 sps:$4 sm:$0xff]  }
  0x8a   :  { %1671 = vmatmul.mubr.bf16.gmra.mrb[36].mxu0 %v3401_v16  ;;  %1414 = vmatprep.mubr.bf16.mxu1 %v3402_v17  ;;  %v2526_v17 = vcombine.high %v183_v12, %v183_v12 }
  0x8b   :  { %1678 = vmatprep.mubr.bf16.mxu0 %v3404_v18 }
  0x91   :  { %1415 = vmatmul.mubr.bf16.gmra.mrb[40].mxu1 %v3406_v19 }
  0x92   :  { %1679 = vmatmul.mubr.bf16.gmra.mrb[40].mxu0 %v3407_v20  ;;  %1422 = vmatprep.mubr.bf16.mxu1 %v3409_v21  ;;  %v2525_v21 = vcombine.low %v183_v12, %v183_v12 }
  0x93   :  { %1686 = vmatprep.mubr.bf16.mxu0 %v3411_v22  ;;  %v3488_v22 = vld [vmem:[%s4556_s0 + $0x218] ss:$20 sps:$4 sm:$0xff]  }
  0x99   :  { %1423 = vmatmul.mubr.bf16.gmra.mrb[44].mxu1 %v3413_v23 }
  0x9a   :  { %1687 = vmatmul.mubr.bf16.gmra.mrb[44].mxu0 %v3414_v24  ;;  %1430 = vmatprep.mubr.bf16.mxu1 %v3415_v25  ;;  %v3491_v24 = vld [vmem:[%s4556_s0 + $0x264] ss:$20 sps:$4 sm:$0xff]  }
  0x9b   :  { %1694 = vmatprep.mubr.bf16.mxu0 %v3417_v26 }
  0xa1   :  { %1431 = vmatmul.mubr.bf16.gmra.mrb[48].mxu1 %v3419_v27  ;;  %v3489_v27 = vld [vmem:[%s4556_s0 + $0x260] ss:$20 sps:$4 sm:$0xff]  }
  0xa2   :  { %1695 = vmatmul.mubr.bf16.gmra.mrb[48].mxu0 %v3420_v28  ;;  %1438 = vmatprep.mubr.bf16.mxu1 %v3422_v29  ;;  %v3492_v29 = vld [vmem:[%s4556_s0 + $0x240] ss:$20 sps:$4 sm:$0xff]  }
  0xa3   :  { %1702 = vmatprep.mubr.bf16.mxu0 %v3424_v30 }
  0xa9   :  { %1439 = vmatmul.mubr.bf16.gmra.mrb[52].mxu1 %v3426_v31  ;;  %v3493_v31 = vld [vmem:[%s4556_s0 + $0x28c] ss:$20 sps:$4 sm:$0xff]  }
  0xaa   :  { %1703 = vmatmul.mubr.bf16.gmra.mrb[52].mxu0 %v3427_v32  ;;  %1446 = vmatprep.mubr.bf16.mxu1 %v3428_v33 }
  0xab   :  { %1710 = vmatprep.mubr.bf16.mxu0 %v3430_v34 }
  0xb1   :  { %1447 = vmatmul.mubr.bf16.gmra.mrb[56].mxu1 %v3432_v35  ;;  %v3495_v35 = vld [vmem:[%s4556_s0 + $0x288] ss:$20 sps:$4 sm:$0xff]  }
  0xb2   :  { %1711 = vmatmul.mubr.bf16.gmra.mrb[56].mxu0 %v3433_v36  ;;  %1454 = vmatprep.mubr.bf16.mxu1 %v3434_v37  ;;  %v3496_v36 = vld [vmem:[%s4556_s0 + $0x268] ss:$20 sps:$4 sm:$0xff]  }
  0xb3   :  { %2925 = vmatprep.mubr.msk.bf16.mxu0 %vm3547_vm1, %v3546_v39 }
  0xb9   :  { %1455 = vmatmul.mubr.bf16.gmra.mrb[60].mxu1 %v3436_v38  ;;  %v3497_v38 = vld [vmem:[%s4556_s0 + $0x2b4] ss:$20 sps:$4 sm:$0xff]  }
  0xba   :  { %2926 = vmatmul.mubr.msk.bf16.vlgmr.msra.gmra.mrb[0].mxu0 %vm1210_vm2, %v3437_v40  ;;  %1462 = vmatprep.mubr.bf16.mxu1 %v3438_v41 }
  0xbb   :  { %2929 = vmatprep.mubr.msk.bf16.mxu0 %vm3547_vm1, %v3546_v39 }
  0xc1   :  { %1463 = vmatmul.mubr.bf16.gmra.mrb[64].mxu1 %v3440_v42 }
  0xc2   :  { %2930 = vmatmul.mubr.msk.bf16.gmra.mrb[4].mxu0 %vm1210_vm2, %v3441_v43  ;;  %1470 = vmatprep.mubr.bf16.mxu1 %v3442_v44  ;;  %v3499_v43 = vld [vmem:[%s4556_s0 + $0x2b0] ss:$20 sps:$4 sm:$0xff]  }
  0xc3   :  { %2933 = vmatprep.mubr.msk.bf16.mxu0 %vm3547_vm1, %v3546_v39  ;;  %v3500_v44 = vld [vmem:[%s4556_s0 + $0x290] ss:$20 sps:$4 sm:$0xff]  }
  0xc9   :  { %1471 = vmatmul.mubr.bf16.gmra.mrb[68].mxu1 %v3444_v45 }
  0xca   :  { %2934 = vmatmul.mubr.msk.bf16.gmra.mrb[8].mxu0 %vm1210_vm2, %v3445_v46  ;;  %1478 = vmatprep.mubr.bf16.mxu1 %v3446_v47  ;;  %v3501_v46 = vld [vmem:[%s4556_s0 + $0x2dc] ss:$20 sps:$4 sm:$0xff]  }
  0xcb   :  { %2937 = vmatprep.mubr.msk.bf16.mxu0 %vm3547_vm1, %v3546_v39 }
  0xd1   :  { %1479 = vmatmul.mubr.bf16.gmra.mrb[72].mxu1 %v3448_v48 }
  0xd2   :  { %2938 = vmatmul.mubr.msk.bf16.gmra.mrb[12].mxu0 %vm1210_vm2, %v3449_v49  ;;  %1486 = vmatprep.mubr.bf16.mxu1 %v3450_v50  ;;  %v3503_v50 = vld [vmem:[%s4556_s0 + $0x2d8] ss:$20 sps:$4 sm:$0xff]  }
  0xd3   :  { %2941 = vmatprep.mubr.msk.bf16.mxu0 %vm3547_vm1, %v3546_v39 }
  0xd9   :  { %1487 = vmatmul.mubr.bf16.gmra.mrb[76].mxu1 %v3452_v51  ;;  %v3504_v51 = vld [vmem:[%s4556_s0 + $0x2b8] ss:$20 sps:$4 sm:$0xff]  }
  0xda   :  { %2942 = vmatmul.mubr.msk.bf16.gmra.mrb[16].mxu0 %vm1210_vm2, %v3453_v52  ;;  %1494 = vmatprep.mubr.bf16.mxu1 %v3454_v53  ;;  %v3505_v53 = vld [vmem:[%s4556_s0 + $0x304] ss:$20 sps:$4 sm:$0xff]  }
  0xdb   :  { %2945 = vmatprep.mubr.msk.bf16.mxu0 %vm3547_vm1, %v3546_v39 }
  0xe1   :  { %1495 = vmatmul.mubr.bf16.gmra.mrb[80].mxu1 %v3456_v54 }
  0xe2   :  { %2946 = vmatmul.mubr.msk.bf16.gmra.mrb[20].mxu0 %vm1210_vm2, %v3457_v55  ;;  %1502 = vmatprep.mubr.bf16.mxu1 %v3458_v56 }
  0xe3   :  { %2949 = vmatprep.mubr.msk.bf16.mxu0 %vm3547_vm1, %v3546_v39 }
  0xe9   :  { %1503 = vmatmul.mubr.bf16.gmra.mrb[84].mxu1 %v3460_v57  ;;  %v3507_v57 = vld [vmem:[%s4556_s0 + $0x300] ss:$20 sps:$4 sm:$0xff]  }
  0xea   :  { %2950 = vmatmul.mubr.msk.bf16.gmra.mrb[24].mxu0 %vm1210_vm2, %v3461_v58  ;;  %1510 = vmatprep.mubr.bf16.mxu1 %v3462_v59  ;;  %v3508_v58 = vld [vmem:[%s4556_s0 + $0x2e0] ss:$20 sps:$4 sm:$0xff]  }
  0xeb   :  { %2953 = vmatprep.mubr.msk.bf16.mxu0 %vm3547_vm1, %v3546_v39 }
  0xf1   :  { %1511 = vmatmul.mubr.bf16.gmra.mrb[88].mxu1 %v3464_v60  ;;  %v3509_v60 = vld [vmem:[%s4556_s0 + $0x32c] ss:$20 sps:$4 sm:$0xff]  }
  0xf2   :  { %2954 = vmatmul.mubr.msk.bf16.gmra.mrb[28].mxu0 %vm1210_vm2, %v3465_v61  ;;  %1518 = vmatprep.mubr.bf16.mxu1 %v3466_v62 }
  0xf3   :  { %2957 = vmatprep.mubr.msk.bf16.mxu0 %vm3547_vm1, %v3546_v39 }
  0xf9   :  { %1519 = vmatmul.mubr.bf16.gmra.mrb[92].mxu1 %v3468_v63 }
  0xfa   :  { %2958 = vmatmul.mubr.msk.bf16.gmra.mrb[32].mxu0 %vm1210_vm2, %v3469_v1  ;;  %1526 = vmatprep.mubr.bf16.mxu1 %v3470_v2  ;;  %v3511_v1 = vld [vmem:[%s4556_s0 + $0x328] ss:$20 sps:$4 sm:$0xff]  }
  0xfb   :  { %2961 = vmatprep.mubr.msk.bf16.mxu0 %vm3547_vm1, %v3546_v39  ;;  %v3512_v2 = vld [vmem:[%s4556_s0 + $0x308] ss:$20 sps:$4 sm:$0xff]  }
 0x101   :  { %1527 = vmatmul.mubr.bf16.gmra.mrb[96].mxu1 %v3472_v3 }
 0x102   :  { %2962 = vmatmul.mubr.msk.bf16.gmra.mrb[36].mxu0 %vm1210_vm2, %v3473_v4  ;;  %1534 = vmatprep.mubr.bf16.mxu1 %v3474_v5  ;;  %v3513_v4 = vld [vmem:[%s4556_s0 + $0x354] ss:$20 sps:$4 sm:$0xff]  }
 0x103   :  { %2965 = vmatprep.mubr.msk.bf16.mxu0 %vm3547_vm1, %v3546_v39 }
 0x109   :  { %1535 = vmatmul.mubr.bf16.gmra.mrb[100].mxu1 %v3476_v6 }
 0x10a   :  { %2966 = vmatmul.mubr.msk.bf16.gmra.mrb[40].mxu0 %vm1210_vm2, %v3477_v7  ;;  %1542 = vmatprep.mubr.bf16.mxu1 %v3478_v8  ;;  %v3515_v8 = vld [vmem:[%s4556_s0 + $0x350] ss:$20 sps:$4 sm:$0xff]  }
 0x10b   :  { %2969 = vmatprep.mubr.msk.bf16.mxu0 %vm3547_vm1, %v3546_v39 }
 0x111   :  { %1543 = vmatmul.mubr.bf16.gmra.mrb[104].mxu1 %v3480_v9  ;;  %v3516_v9 = vld [vmem:[%s4556_s0 + $0x330] ss:$20 sps:$4 sm:$0xff]  }
 0x112   :  { %2970 = vmatmul.mubr.msk.bf16.gmra.mrb[44].mxu0 %vm1210_vm2, %v3481_v10  ;;  %1550 = vmatprep.mubr.bf16.mxu1 %v3482_v11  ;;  %v3517_v11 = vld [vmem:[%s4556_s0 + $0x37c] ss:$20 sps:$4 sm:$0xff]  }
 0x113   :  { %2973 = vmatprep.mubr.msk.bf16.mxu0 %vm3547_vm1, %v3546_v39 }
 0x114   :  { %v4132_v13 = vpop.f32.mrb[0].mxu1 }
 0x115   :  { %v1338_v14 = vpop.f32.mrb[1].mxu1 }
 0x116   :  { %v4140_v16 = vpop.f32.mrb[2].mxu1 }
 0x117   :  { %v1341_v18 = vpop.f32.mrb[3].mxu1 }
 0x119   :  { %1551 = vmatmul.mubr.bf16.gmra.mrb[108].mxu1 %v3484_v15 }
 0x11a   :  { %2974 = vmatmul.mubr.msk.bf16.gmra.mrb[48].mxu0 %vm1210_vm2, %v3485_v0  ;;  %1558 = vmatprep.mubr.bf16.mxu1 %v2526_v17  ;;  %v3519_v0 = vld [vmem:[%s4556_s0 + $0x378] ss:$20 sps:$4 sm:$0xff]  }
 0x11b   :  { %2977 = vmatprep.mubr.msk.bf16.mxu0 %vm3547_vm1, %v3546_v39  ;;  %v3520_v17 = vld [vmem:[%s4556_s0 + $0x358] ss:$20 sps:$4 sm:$0xff]  }
 0x11c   :  { %v4145_v19 = vpop.f32.mrb[4].mxu1 }
 0x11d   :  { %v1346_v20 = vpop.f32.mrb[5].mxu1 }
 0x11e   :  { %v4150_v23 = vpop.f32.mrb[6].mxu1  ;;  %v3521_v20 = vld [vmem:[%s4556_s0 + $0x3a4] ss:$20 sps:$4 sm:$0xff]  }
 0x11f   :  { %v1349_v25 = vpop.f32.mrb[7].mxu1 }
 0x120   :  { %v3523_v25 = vld [vmem:[%s4556_s0 + $0x3a0] ss:$20 sps:$4 sm:$0xff]  }
 0x121   :  { %1559 = vmatmul.mubr.bf16.gmra.mrb[112].mxu1 %v2525_v21 }
 0x122   :  { %2978 = vmatmul.mubr.msk.bf16.gmra.mrb[52].mxu0 %vm1210_vm2, %v3488_v22  ;;  %1718 = vmatprep.mubr.bf16.mxu1 %v3491_v24 }
 0x123   :  { %2981 = vmatprep.mubr.msk.bf16.mxu0 %vm3547_vm1, %v3546_v39 }
 0x124   :  { %v4158_v26 = vpop.f32.mrb[8].mxu1 }
 0x125   :  { %v1354_v28 = vpop.f32.mrb[9].mxu1 }
 0x126   :  { %v4166_v30 = vpop.f32.mrb[10].mxu1 }
 0x127   :  { %v1357_v32 = vpop.f32.mrb[11].mxu1 }
 0x129   :  { %1719 = vmatmul.mubr.bf16.vlgmr.msra.gmra.mrb[60].mxu1 %v3489_v27  ;;  %v3524_v27 = vld [vmem:[%s4556_s0 + $0x380] ss:$20 sps:$4 sm:$0xff]  }
 0x12a   :  { %2982 = vmatmul.mubr.msk.bf16.gmra.mrb[56].mxu0 %vm1210_vm2, %v3492_v29  ;;  %1726 = vmatprep.mubr.bf16.mxu1 %v3493_v31  ;;  %v3525_v29 = vld [vmem:[%s4556_s0 + $0x3cc] ss:$20 sps:$4 sm:$0xff]  }
 0x12b   :  { %2985 = vmatprep.mubr.msk.bf16.mxu0 %vm3547_vm1, %v3546_v39 }
 0x12c   :  { %v4174_v33 = vpop.f32.mrb[12].mxu1 }
 0x12d   :  { %v1362_v34 = vpop.f32.mrb[13].mxu1 }
 0x12e   :  { %v4182_v37 = vpop.f32.mrb[14].mxu1 }
 0x12f   :  { %v1365_v40 = vpop.f32.mrb[15].mxu1 }
 0x130   :  { %v3529_v40 = vld [vmem:[%s4556_s0 + $0x3f4] ss:$20 sps:$4 sm:$0xff]  }
 0x131   :  { %1727 = vmatmul.mubr.bf16.gmra.mrb[64].mxu1 %v3495_v35  ;;  %v3527_v35 = vld [vmem:[%s4556_s0 + $0x3c8] ss:$20 sps:$4 sm:$0xff]  }
 0x132   :  { %2986 = vmatmul.mubr.msk.bf16.gmra.mrb[60].mxu0 %vm1210_vm2, %v3496_v36  ;;  %1734 = vmatprep.mubr.bf16.mxu1 %v3497_v38  ;;  %v3528_v36 = vld [vmem:[%s4556_s0 + $0x3a8] ss:$20 sps:$4 sm:$0xff]  }
 0x133   :  { %2989 = vmatprep.mubr.msk.bf16.mxu0 %vm3547_vm1, %v3546_v39 }
 0x134   :  { %v4190_v41 = vpop.f32.mrb[16].mxu1 }
 0x135   :  { %v1370_v42 = vpop.f32.mrb[17].mxu1 }
 0x136   :  { %v4198_v45 = vpop.f32.mrb[18].mxu1 }
 0x137   :  { %v1373_v47 = vpop.f32.mrb[19].mxu1 }
 0x138   :  { %v3532_v47 = vld [vmem:[%s4556_s0 + $0x3d0] ss:$20 sps:$4 sm:$0xff]  }
 0x139   :  { %1735 = vmatmul.mubr.bf16.gmra.mrb[68].mxu1 %v3499_v43 }
 0x13a   :  { %2990 = vmatmul.mubr.msk.bf16.gmra.mrb[64].mxu0 %vm1210_vm2, %v3500_v44  ;;  %1742 = vmatprep.mubr.bf16.mxu1 %v3501_v46  ;;  %v3531_v46 = vld [vmem:[%s4556_s0 + $0x3f0] ss:$20 sps:$4 sm:$0xff]  }
 0x13b   :  { %2993 = vmatprep.mubr.msk.bf16.mxu0 %vm3547_vm1, %v3546_v39 }
 0x13c   :  { %v4206_v48 = vpop.f32.mrb[20].mxu1 }
 0x13d   :  { %v1378_v49 = vpop.f32.mrb[21].mxu1 }
 0x13e   :  { %v4214_v52 = vpop.f32.mrb[22].mxu1 }
 0x13f   :  { %v1381_v54 = vpop.f32.mrb[23].mxu1 }
 0x141   :  { %1743 = vmatmul.mubr.bf16.gmra.mrb[72].mxu1 %v3503_v50  ;;  %v3533_v50 = vld [vmem:[%s4556_s0 + $0x41c] ss:$20 sps:$4 sm:$0xff]  }
 0x142   :  { %2994 = vmatmul.mubr.msk.bf16.gmra.mrb[68].mxu0 %vm1210_vm2, %v3504_v51  ;;  %1750 = vmatprep.mubr.bf16.mxu1 %v3505_v53 }
 0x143   :  { %2997 = vmatprep.mubr.msk.bf16.mxu0 %vm3547_vm1, %v3546_v39 }
 0x144   :  { %v4222_v55 = vpop.f32.mrb[24].mxu1 }
 0x145   :  { %v1386_v56 = vpop.f32.mrb[25].mxu1 }
 0x146   :  { %v4230_v59 = vpop.f32.mrb[26].mxu1  ;;  %v3535_v56 = vld [vmem:[%s4556_s0 + $0x418] ss:$20 sps:$4 sm:$0xff]  }
 0x147   :  { %v1389_v61 = vpop.f32.mrb[27].mxu1 }
 0x149   :  { %1751 = vmatmul.mubr.bf16.gmra.mrb[76].mxu1 %v3507_v57  ;;  %v3536_v57 = vld [vmem:[%s4556_s0 + $0x3f8] ss:$20 sps:$4 sm:$0xff]  }
 0x14a   :  { %2998 = vmatmul.mubr.msk.bf16.gmra.mrb[72].mxu0 %vm1210_vm2, %v3508_v58  ;;  %1758 = vmatprep.mubr.bf16.mxu1 %v3509_v60  ;;  %v3537_v60 = vld [vmem:[%s4556_s0 + $0x444] ss:$20 sps:$4 sm:$0xff]  }
 0x14b   :  { %3001 = vmatprep.mubr.msk.bf16.mxu0 %vm3547_vm1, %v3546_v39 }
 0x14c   :  { %v4238_v62 = vpop.f32.mrb[28].mxu1 }
 0x14d   :  { %v1394_v63 = vpop.f32.mrb[29].mxu1 }
 0x14e   :  { %v4246_v3 = vpop.f32.mrb[30].mxu1  ;;  %v184_v63 = vld [vmem:[%s4556_s0 + $0x468] sm:$0xff] }
 0x14f   :  { %v1397_v5 = vpop.f32.mrb[31].mxu1 }
 0x150   :  { %v3540_v5 = vld [vmem:[%s4556_s0 + $0x420] ss:$20 sps:$4 sm:$0xff]  }
 0x151   :  { %1759 = vmatmul.mubr.bf16.gmra.mrb[80].mxu1 %v3511_v1 }
 0x152   :  { %3002 = vmatmul.mubr.msk.bf16.gmra.mrb[76].mxu0 %vm1210_vm2, %v3512_v2  ;;  %1766 = vmatprep.mubr.bf16.mxu1 %v3513_v4  ;;  %v3539_v4 = vld [vmem:[%s4556_s0 + $0x440] ss:$20 sps:$4 sm:$0xff]  }
 0x153   :  { %3005 = vmatprep.mubr.msk.bf16.mxu0 %vm3547_vm1, %v3546_v39 }
 0x154   :  { %v4254_v6 = vpop.f32.mrb[32].mxu1 }
 0x155   :  { %v1402_v7 = vpop.f32.mrb[33].mxu1 }
 0x156   :  { %v4262_v10 = vpop.f32.mrb[34].mxu1 }
 0x157   :  { %v1405_v12 = vpop.f32.mrb[35].mxu1 }
 0x159   :  { %1767 = vmatmul.mubr.bf16.gmra.mrb[84].mxu1 %v3515_v8  ;;  %v2528_v8 = vcombine.high %v184_v63, %v184_v63 }
 0x15a   :  { %3006 = vmatmul.mubr.msk.bf16.gmra.mrb[80].mxu0 %vm1210_vm2, %v3516_v9  ;;  %1774 = vmatprep.mubr.bf16.mxu1 %v3517_v11  ;;  %v4366_v11 = vld [vmem:[%s4557_s2] ss:$0 sm:$0xff] }
 0x15b   :  { %3009 = vmatprep.mubr.msk.bf16.mxu0 %vm3547_vm1, %v3546_v39  ;;  %v1337_v12 = vadd.f32 %v4366_v11, %v4132_v13  ;;  %v1345_v13 = vadd.f32 %v4366_v11, %v4145_v19  ;;  %v1353_v19 = vadd.f32 %v4366_v11, %v4158_v26 }
 0x15c   :  { %v4270_v14 = vpop.f32.mrb[36].mxu1 }
 0x15d   :  { %v1410_v15 = vpop.f32.mrb[37].mxu1 }
 0x15e   :  { %v4278_v18 = vpop.f32.mrb[38].mxu1 }
 0x15f   :  { %v1413_v21 = vpop.f32.mrb[39].mxu1 }
 0x161   :  { %1775 = vmatmul.mubr.bf16.gmra.mrb[88].mxu1 %v3519_v0  ;;  %v2527_v0 = vcombine.low %v184_v63, %v184_v63  ;;  %v1364_v63 = vadd.f32 %v4366_v11, %v4182_v37 }
 0x162   :  { %3010 = vmatmul.mubr.msk.bf16.gmra.mrb[84].mxu0 %vm1210_vm2, %v3520_v17  ;;  %1782 = vmatprep.mubr.bf16.mxu1 %v3521_v20  ;;  %v1340_v17 = vadd.f32 %v4366_v11, %v4140_v16 }
 0x163   :  { %3013 = vmatprep.mubr.msk.bf16.mxu0 %vm3547_vm1, %v3546_v39 }
 0x164   :  { %v4286_v22 = vpop.f32.mrb[40].mxu1 }
 0x165   :  { %v1418_v24 = vpop.f32.mrb[41].mxu1 }
 0x166   :  { %v4294_v28 = vpop.f32.mrb[42].mxu1  ;;  %v3543_v24 = vld [vmem:[%s4556_s0 + $0x448] ss:$20 sps:$4 sm:$0xff]  }
 0x167   :  { %v1421_v31 = vpop.f32.mrb[43].mxu1 }
 0x169   :  { %1783 = vmatmul.mubr.bf16.gmra.mrb[92].mxu1 %v3523_v25 }
 0x16a   :  { %3014 = vmatmul.mubr.msk.bf16.gmra.mrb[88].mxu0 %vm1210_vm2, %v3524_v27  ;;  %1790 = vmatprep.mubr.bf16.mxu1 %v3525_v29 }
 0x16b   :  { %3017 = vmatprep.mubr.msk.bf16.mxu0 %vm3547_vm1, %v3546_v39 }
 0x16c   :  { %v4302_v32 = vpop.f32.mrb[44].mxu1 }
 0x16d   :  { %v1426_v34 = vpop.f32.mrb[45].mxu1 }
 0x16e   :  { %v4310_v38 = vpop.f32.mrb[46].mxu1  ;;  %v1348_v34 = vadd.f32 %v4366_v11, %v4150_v23 }
 0x16f   :  { %v1429_v42 = vpop.f32.mrb[47].mxu1 }
 0x171   :  { %1791 = vmatmul.mubr.bf16.gmra.mrb[96].mxu1 %v3527_v35 }
 0x172   :  { %3018 = vmatmul.mubr.msk.bf16.gmra.mrb[92].mxu0 %vm1210_vm2, %v3528_v36  ;;  %1798 = vmatprep.mubr.bf16.mxu1 %v3529_v40  ;;  %v3544_v40 = vld [vmem:[%s4556_s0 + $0x470] ss:$0 sps:$4 sm:$0xff]  }
 0x173   :  { %3021 = vmatprep.mubr.msk.bf16.mxu0 %vm3547_vm1, %v3546_v39 }
 0x174   :  { %v4318_v43 = vpop.f32.mrb[48].mxu1 }
 0x175   :  { %v1434_v44 = vpop.f32.mrb[49].mxu1 }
 0x176   :  { %v4326_v49 = vpop.f32.mrb[50].mxu1 }
 0x177   :  { %v1437_v51 = vpop.f32.mrb[51].mxu1 }
 0x179   :  { %1799 = vmatmul.mubr.bf16.gmra.mrb[100].mxu1 %v3531_v46 }
 0x17a   :  { %3022 = vmatmul.mubr.msk.bf16.gmra.mrb[96].mxu0 %vm1210_vm2, %v3532_v47  ;;  %1806 = vmatprep.mubr.bf16.mxu1 %v3533_v50  ;;  %v1356_v47 = vadd.f32 %v4366_v11, %v4166_v30 }
 0x17b   :  { %3025 = vmatprep.mubr.msk.bf16.mxu0 %vm3547_vm1, %v3546_v39 }
 0x17c   :  { %v4334_v53 = vpop.f32.mrb[52].mxu1 }
 0x17d   :  { %v1442_v54 = vpop.f32.mrb[53].mxu1 }
 0x17e   :  { %v4342_v58 = vpop.f32.mrb[54].mxu1 }
 0x17f   :  { %v1445_v61 = vpop.f32.mrb[55].mxu1 }
 0x180   :  { %v1361_v61 = vadd.f32 %v4366_v11, %v4174_v33 }
 0x181   :  { %1807 = vmatmul.mubr.bf16.gmra.mrb[104].mxu1 %v3535_v56 }
 0x182   :  { %3026 = vmatmul.mubr.msk.bf16.gmra.mrb[100].mxu0 %vm1210_vm2, %v3536_v57  ;;  %1814 = vmatprep.mubr.bf16.mxu1 %v3537_v60 }
 0x183   :  { %3029 = vmatprep.mubr.msk.bf16.mxu0 %vm3547_vm1, %v3546_v39 }
 0x184   :  { %v4353_v1 = vpop.f32.mrb[56].mxu1 }
 0x185   :  { %v1450_v2 = vpop.f32.mrb[57].mxu1 }
 0x186   :  { %v4361_v7 = vpop.f32.mrb[58].mxu1 }
 0x187   :  { %v1453_v9 = vpop.f32.mrb[59].mxu1 }
 0x189   :  { %1815 = vmatmul.mubr.bf16.gmra.mrb[108].mxu1 %v3539_v4 }
 0x18a   :  { %3030 = vmatmul.mubr.msk.bf16.gmra.mrb[104].mxu0 %vm1210_vm2, %v3540_v5  ;;  %1822 = vmatprep.mubr.bf16.mxu1 %v2528_v8 }
 0x18b   :  { %3033 = vmatprep.mubr.msk.bf16.mxu0 %vm3547_vm1, %v3546_v39 }
 0x18d   :  { %v1864_v15 = vpop.f32.mrb[0].mxu0 }
 0x18e   :  { %v3074_v20 = vadd.f32 %v1864_v15, %v1337_v12  ;;  %v2927_v21 = vpop.f32.mrb[1].mxu0  ;;  %v1369_v12 = vadd.f32 %v4366_v11, %v4190_v41  ;;  %v1372_v15 = vadd.f32 %v4366_v11, %v4198_v45 }
 0x18f   :  { %v1867_v25 = vpop.f32.mrb[2].mxu0 }
 0x190   :  { %v3076_v27 = vadd.f32 %v1867_v25, %v1340_v17  ;;  %v2928_v29 = vpop.f32.mrb[3].mxu0  ;;  %v1377_v25 = vadd.f32 %v4366_v11, %v4206_v48 }
 0x191   :  { %1823 = vmatmul.mubr.bf16.gmra.mrb[112].mxu1 %v2527_v0 }
 0x192   :  { %v2714_v31 = vpack.c.bf16 %v3076_v27, %v3074_v20  ;;  %3034 = vmatmul.mubr.msk.bf16.gmra.mrb[108].mxu0 %vm1210_vm2, %v3543_v24  ;;  %v1380_v27 = vadd.f32 %v4366_v11, %v4214_v52 }
 0x193   :  { %3037 = vmatprep.mubr.msk.bf16.mxu0 %vm3547_vm1, %v3546_v39 }
 0x194   :  { %2715 = vst [vmem:[%s4558_s3] sm:$0xff] %v2714_v31  }
 0x195   :  { %v1872_v16 = vpop.f32.mrb[4].mxu0 }
 0x196   :  { %v3078_v35 = vadd.f32 %v1872_v16, %v1345_v13  ;;  %v2931_v36 = vpop.f32.mrb[5].mxu0 }
 0x197   :  { %v1875_v42 = vpop.f32.mrb[6].mxu0  ;;  %v1388_v36 = vadd.f32 %v4366_v11, %v4230_v59 }
 0x198   :  { %v3080_v44 = vadd.f32 %v1875_v42, %v1348_v34  ;;  %v2932_v39 = vpop.f32.mrb[7].mxu0 }
 0x19a   :  { %v2719_v46 = vpack.c.bf16 %v3080_v44, %v3078_v35  ;;  %3038 = vmatmul.mubr.msk.bf16.gmra.mrb[112].mxu0 %vm1210_vm2, %v3544_v40  ;;  %v1385_v35 = vadd.f32 %v4366_v11, %v4222_v55 }
 0x19c   :  { %2851 = vst [vmem:[%s4558_s3 + $0x8] sm:$0xff] %v2719_v46  }
 0x19d   :  { %v1880_v23 = vpop.f32.mrb[8].mxu0 }
 0x19e   :  { %v3082_v50 = vadd.f32 %v1880_v23, %v1353_v19  ;;  %v2935_v51 = vpop.f32.mrb[9].mxu0  ;;  %v1393_v19 = vadd.f32 %v4366_v11, %v4238_v62  ;;  %v1396_v23 = vadd.f32 %v4366_v11, %v4246_v3 }
 0x19f   :  { %v1883_v54 = vpop.f32.mrb[10].mxu0 }
 0x1a0   :  { %v3084_v56 = vadd.f32 %v1883_v54, %v1356_v47  ;;  %v2936_v57 = vpop.f32.mrb[11].mxu0 }
 0x1a1   :  { %v1401_v57 = vadd.f32 %v4366_v11, %v4254_v6 }
 0x1a2   :  { %v2724_v60 = vpack.c.bf16 %v3084_v56, %v3082_v50 }
 0x1a4   :  { %2852 = vst [vmem:[%s4558_s3 + $0x10] sm:$0xff] %v2724_v60   ;;  %v1404_v60 = vadd.f32 %v4366_v11, %v4262_v10 }
 0x1a5   :  { %v1888_v26 = vpop.f32.mrb[12].mxu0 }
 0x1a6   :  { %v3086_v2 = vadd.f32 %v1888_v26, %v1361_v61  ;;  %v2939_v4 = vpop.f32.mrb[13].mxu0 }
 0x1a7   :  { %v1891_v30 = vpop.f32.mrb[14].mxu0 }
 0x1a8   :  { %v3088_v5 = vadd.f32 %v1891_v30, %v1364_v63  ;;  %v2940_v8 = vpop.f32.mrb[15].mxu0  ;;  %v1409_v30 = vadd.f32 %v4366_v11, %v4270_v14 }
 0x1aa   :  { %v2729_v9 = vpack.c.bf16 %v3088_v5, %v3086_v2  ;;  %v1412_v5 = vadd.f32 %v4366_v11, %v4278_v18 }
 0x1ac   :  { %2853 = vst [vmem:[%s4558_s3 + $0x18] sm:$0xff] %v2729_v9  }
 0x1ad   :  { %v1896_v33 = vpop.f32.mrb[16].mxu0 }
 0x1ae   :  { %v3090_v0 = vadd.f32 %v1896_v33, %v1369_v12  ;;  %v2943_v17 = vpop.f32.mrb[17].mxu0 }
 0x1af   :  { %v1899_v37 = vpop.f32.mrb[18].mxu0  ;;  %v1420_v17 = vadd.f32 %v4366_v11, %v4294_v28 }
 0x1b0   :  { %v3092_v20 = vadd.f32 %v1899_v37, %v1372_v15  ;;  %v2944_v21 = vpop.f32.mrb[19].mxu0 }
 0x1b2   :  { %v2734_v24 = vpack.c.bf16 %v3092_v20, %v3090_v0  ;;  %v1417_v0 = vadd.f32 %v4366_v11, %v4286_v22 }
 0x1b4   :  { %2854 = vst [vmem:[%s4558_s3 + $0x20] sm:$0xff] %v2734_v24  }
 0x1b5   :  { %v1904_v41 = vpop.f32.mrb[20].mxu0 }
 0x1b6   :  { %v3094_v29 = vadd.f32 %v1904_v41, %v1377_v25  ;;  %v2947_v31 = vpop.f32.mrb[21].mxu0  ;;  %v1425_v41 = vadd.f32 %v4366_v11, %v4302_v32 }
 0x1b7   :  { %v1907_v45 = vpop.f32.mrb[22].mxu0 }
 0x1b8   :  { %v3096_v13 = vadd.f32 %v1907_v45, %v1380_v27  ;;  %v2948_v16 = vpop.f32.mrb[23].mxu0  ;;  %v1428_v27 = vadd.f32 %v4366_v11, %v4310_v38 }
 0x1ba   :  { %v2739_v34 = vpack.c.bf16 %v3096_v13, %v3094_v29 }
 0x1bc   :  { %2855 = vst [vmem:[%s4558_s3 + $0x28] sm:$0xff] %v2739_v34   ;;  %v1433_v34 = vadd.f32 %v4366_v11, %v4318_v43 }
 0x1bd   :  { %v1912_v48 = vpop.f32.mrb[24].mxu0 }
 0x1be   :  { %v3098_v40 = vadd.f32 %v1912_v48, %v1385_v35  ;;  %v2951_v42 = vpop.f32.mrb[25].mxu0  ;;  %v1436_v35 = vadd.f32 %v4366_v11, %v4326_v49 }
 0x1bf   :  { %v1915_v52 = vpop.f32.mrb[26].mxu0 }
 0x1c0   :  { %v3100_v44 = vadd.f32 %v1915_v52, %v1388_v36  ;;  %v2952_v39 = vpop.f32.mrb[27].mxu0 }
 0x1c1   :  { %v1444_v39 = vadd.f32 %v4366_v11, %v4342_v58 }
 0x1c2   :  { %v2744_v46 = vpack.c.bf16 %v3100_v44, %v3098_v40  ;;  %v1441_v44 = vadd.f32 %v4366_v11, %v4334_v53 }
 0x1c4   :  { %2856 = vst [vmem:[%s4558_s3 + $0x30] sm:$0xff] %v2744_v46  }
 0x1c5   :  { %v1920_v55 = vpop.f32.mrb[28].mxu0 }
 0x1c6   :  { %v3102_v47 = vadd.f32 %v1920_v55, %v1393_v19  ;;  %v2955_v50 = vpop.f32.mrb[29].mxu0 }
 0x1c7   :  { %v1923_v59 = vpop.f32.mrb[30].mxu0  ;;  %v1449_v50 = vadd.f32 %v4366_v11, %v4353_v1 }
 0x1c8   :  { %v3104_v51 = vadd.f32 %v1923_v59, %v1396_v23  ;;  %v2956_v54 = vpop.f32.mrb[31].mxu0 }
 0x1c9   :  { %v1452_v54 = vadd.f32 %v4366_v11, %v4361_v7 }
 0x1ca   :  { %v2749_v56 = vpack.c.bf16 %v3104_v51, %v3102_v47 }
 0x1cc   :  { %2857 = vst [vmem:[%s4558_s3 + $0x38] sm:$0xff] %v2749_v56  }
 0x1cd   :  { %v1928_v62 = vpop.f32.mrb[32].mxu0 }
 0x1ce   :  { %v3106_v61 = vadd.f32 %v1928_v62, %v1401_v57  ;;  %v2959_v26 = vpop.f32.mrb[33].mxu0 }
 0x1cf   :  { %v1931_v3 = vpop.f32.mrb[34].mxu0 }
 0x1d0   :  { %v3108_v63 = vadd.f32 %v1931_v3, %v1404_v60  ;;  %v2960_v2 = vpop.f32.mrb[35].mxu0 }
 0x1d2   :  { %v2754_v4 = vpack.c.bf16 %v3108_v63, %v3106_v61 }
 0x1d4   :  { %2858 = vst [vmem:[%s4558_s3 + $0x40] sm:$0xff] %v2754_v4  }
 0x1d5   :  { %v1936_v6 = vpop.f32.mrb[36].mxu0 }
 0x1d6   :  { %v3110_v8 = vadd.f32 %v1936_v6, %v1409_v30  ;;  %v2963_v9 = vpop.f32.mrb[37].mxu0 }
 0x1d7   :  { %v1939_v10 = vpop.f32.mrb[38].mxu0 }
 0x1d8   :  { %v3112_v12 = vadd.f32 %v1939_v10, %v1412_v5  ;;  %v2964_v33 = vpop.f32.mrb[39].mxu0 }
 0x1da   :  { %v2759_v15 = vpack.c.bf16 %v3112_v12, %v3110_v8 }
 0x1dc   :  { %2859 = vst [vmem:[%s4558_s3 + $0x48] sm:$0xff] %v2759_v15  }
 0x1dd   :  { %v1944_v14 = vpop.f32.mrb[40].mxu0 }
 0x1de   :  { %v3114_v37 = vadd.f32 %v1944_v14, %v1417_v0  ;;  %v2967_v20 = vpop.f32.mrb[41].mxu0 }
 0x1df   :  { %v1947_v18 = vpop.f32.mrb[42].mxu0 }
 0x1e0   :  { %v3116_v21 = vadd.f32 %v1947_v18, %v1420_v17  ;;  %v2968_v24 = vpop.f32.mrb[43].mxu0 }
 0x1e2   :  { %v2764_v25 = vpack.c.bf16 %v3116_v21, %v3114_v37 }
 0x1e4   :  { %2860 = vst [vmem:[%s4558_s3 + $0x50] sm:$0xff] %v2764_v25  }
 0x1e5   :  { %v1952_v22 = vpop.f32.mrb[44].mxu0 }
 0x1e6   :  { %v3118_v29 = vadd.f32 %v1952_v22, %v1425_v41  ;;  %v2971_v31 = vpop.f32.mrb[45].mxu0 }
 0x1e7   :  { %v1955_v28 = vpop.f32.mrb[46].mxu0 }
 0x1e8   :  { %v3120_v45 = vadd.f32 %v1955_v28, %v1428_v27  ;;  %v2972_v13 = vpop.f32.mrb[47].mxu0 }
 0x1ea   :  { %v2769_v16 = vpack.c.bf16 %v3120_v45, %v3118_v29 }
 0x1ec   :  { %2861 = vst [vmem:[%s4558_s3 + $0x58] sm:$0xff] %v2769_v16  }
 0x1ed   :  { %v1960_v32 = vpop.f32.mrb[48].mxu0 }
 0x1ee   :  { %v3122_v48 = vadd.f32 %v1960_v32, %v1433_v34  ;;  %v2975_v36 = vpop.f32.mrb[49].mxu0 }
 0x1ef   :  { %v1963_v38 = vpop.f32.mrb[50].mxu0 }
 0x1f0   :  { %v3124_v40 = vadd.f32 %v1963_v38, %v1436_v35  ;;  %v2976_v42 = vpop.f32.mrb[51].mxu0 }
 0x1f2   :  { %v2774_v52 = vpack.c.bf16 %v3124_v40, %v3122_v48 }
 0x1f4   :  { %2862 = vst [vmem:[%s4558_s3 + $0x60] sm:$0xff] %v2774_v52  }
 0x1f5   :  { %v1968_v43 = vpop.f32.mrb[52].mxu0 }
 0x1f6   :  { %v3126_v46 = vadd.f32 %v1968_v43, %v1441_v44  ;;  %v2979_v19 = vpop.f32.mrb[53].mxu0 }
 0x1f7   :  { %v1971_v49 = vpop.f32.mrb[54].mxu0 }
 0x1f8   :  { %v3128_v55 = vadd.f32 %v1971_v49, %v1444_v39  ;;  %v2980_v23 = vpop.f32.mrb[55].mxu0 }
 0x1fa   :  { %v2779_v47 = vpack.c.bf16 %v3128_v55, %v3126_v46 }
 0x1fc   :  { %2863 = vst [vmem:[%s4558_s3 + $0x68] sm:$0xff] %v2779_v47   ;;  %v1720_v53 = vpop.f32.mrb[60].mxu1 }
 0x1fd   :  { %v1976_v59 = vpop.f32.mrb[56].mxu0  ;;  %v1722_v51 = vpop.f32.mrb[61].mxu1  ;;  %v3133_v1 = vadd.f32 %v4366_v11, %v1720_v53 }
 0x1fe   :  { %v3130_v58 = vadd.f32 %v1976_v59, %v1449_v50  ;;  %v2983_v56 = vpop.f32.mrb[57].mxu0  ;;  %v1723_v57 = vpop.f32.mrb[62].mxu1 }
 0x1ff   :  { %v1979_v62 = vpop.f32.mrb[58].mxu0  ;;  %v1725_v60 = vpop.f32.mrb[63].mxu1  ;;  %v3135_v30 = vadd.f32 %v4366_v11, %v1723_v57 }
 0x200   :  { %v3132_v61 = vadd.f32 %v1979_v62, %v1452_v54  ;;  %v2984_v26 = vpop.f32.mrb[59].mxu0 }
 0x202   :  { %v2784_v3 = vpack.c.bf16 %v3132_v61, %v3130_v58 }
 0x204   :  { %2864 = vst [vmem:[%s4558_s3 + $0x70] sm:$0xff] %v2784_v3   ;;  %v1728_v63 = vpop.f32.mrb[64].mxu1 }
 0x205   :  { %v1984_v2 = vpop.f32.mrb[60].mxu0  ;;  %v1730_v4 = vpop.f32.mrb[65].mxu1  ;;  %v3137_v15 = vadd.f32 %v4366_v11, %v1728_v63 }
 0x206   :  { %v3134_v7 = vadd.f32 %v3133_v1, %v1984_v2  ;;  %v2987_v6 = vpop.f32.mrb[61].mxu0  ;;  %v1731_v5 = vpop.f32.mrb[66].mxu1 }
 0x207   :  { %v1987_v8 = vpop.f32.mrb[62].mxu0  ;;  %v1733_v9 = vpop.f32.mrb[67].mxu1  ;;  %v3139_v37 = vadd.f32 %v4366_v11, %v1731_v5 }
 0x208   :  { %v3136_v10 = vadd.f32 %v3135_v30, %v1987_v8  ;;  %v2988_v12 = vpop.f32.mrb[63].mxu0 }
 0x20a   :  { %v2789_v33 = vpack.c.bf16 %v3136_v10, %v3134_v7 }
 0x20c   :  { %2865 = vst [vmem:[%s4558_s3 + $0x78] sm:$0xff] %v2789_v33   ;;  %v1736_v0 = vpop.f32.mrb[68].mxu1 }
 0x20d   :  { %v1992_v14 = vpop.f32.mrb[64].mxu0  ;;  %v1738_v17 = vpop.f32.mrb[69].mxu1  ;;  %v3141_v29 = vadd.f32 %v4366_v11, %v1736_v0 }
 0x20e   :  { %v3138_v20 = vadd.f32 %v3137_v15, %v1992_v14  ;;  %v2991_v18 = vpop.f32.mrb[65].mxu0  ;;  %v1739_v21 = vpop.f32.mrb[70].mxu1 }
 0x20f   :  { %v1995_v24 = vpop.f32.mrb[66].mxu0  ;;  %v1741_v25 = vpop.f32.mrb[71].mxu1  ;;  %v3143_v13 = vadd.f32 %v4366_v11, %v1739_v21 }
 0x210   :  { %v3140_v41 = vadd.f32 %v3139_v37, %v1995_v24  ;;  %v2992_v22 = vpop.f32.mrb[67].mxu0 }
 0x212   :  { %v2794_v27 = vpack.c.bf16 %v3140_v41, %v3138_v20 }
 0x214   :  { %2866 = vst [vmem:[%s4558_s3 + $0x80] sm:$0xff] %v2794_v27   ;;  %v1744_v31 = vpop.f32.mrb[72].mxu1 }
 0x215   :  { %v2000_v28 = vpop.f32.mrb[68].mxu0  ;;  %v1746_v45 = vpop.f32.mrb[73].mxu1  ;;  %v3145_v42 = vadd.f32 %v4366_v11, %v1744_v31 }
 0x216   :  { %v3142_v16 = vadd.f32 %v3141_v29, %v2000_v28  ;;  %v2995_v34 = vpop.f32.mrb[69].mxu0  ;;  %v1747_v32 = vpop.f32.mrb[74].mxu1 }
 0x217   :  { %v2003_v35 = vpop.f32.mrb[70].mxu0  ;;  %v1749_v48 = vpop.f32.mrb[75].mxu1  ;;  %v3147_v39 = vadd.f32 %v4366_v11, %v1747_v32 }
 0x218   :  { %v3144_v36 = vadd.f32 %v3143_v13, %v2003_v35  ;;  %v2996_v38 = vpop.f32.mrb[71].mxu0 }
 0x21a   :  { %v2799_v40 = vpack.c.bf16 %v3144_v36, %v3142_v16 }
 0x21c   :  { %2867 = vst [vmem:[%s4558_s3 + $0x88] sm:$0xff] %v2799_v40   ;;  %v1752_v52 = vpop.f32.mrb[76].mxu1 }
 0x21d   :  { %v2008_v44 = vpop.f32.mrb[72].mxu0  ;;  %v1754_v43 = vpop.f32.mrb[77].mxu1  ;;  %v3149_v59 = vadd.f32 %v4366_v11, %v1752_v52 }
 0x21e   :  { %v3146_v46 = vadd.f32 %v3145_v42, %v2008_v44  ;;  %v2999_v19 = vpop.f32.mrb[73].mxu0  ;;  %v1755_v49 = vpop.f32.mrb[78].mxu1 }
 0x21f   :  { %v2011_v55 = vpop.f32.mrb[74].mxu0  ;;  %v1757_v23 = vpop.f32.mrb[79].mxu1  ;;  %v3151_v56 = vadd.f32 %v4366_v11, %v1755_v49 }
 0x220   :  { %v3148_v47 = vadd.f32 %v3147_v39, %v2011_v55  ;;  %v3000_v50 = vpop.f32.mrb[75].mxu0 }
 0x222   :  { %v2804_v53 = vpack.c.bf16 %v3148_v47, %v3146_v46 }
 0x224   :  { %2868 = vst [vmem:[%s4558_s3 + $0x90] sm:$0xff] %v2804_v53   ;;  %v1760_v51 = vpop.f32.mrb[80].mxu1 }
 0x225   :  { %v2016_v54 = vpop.f32.mrb[76].mxu0  ;;  %v1762_v58 = vpop.f32.mrb[81].mxu1  ;;  %v3153_v2 = vadd.f32 %v4366_v11, %v1760_v51 }
 0x226   :  { %v3150_v57 = vadd.f32 %v3149_v59, %v2016_v54  ;;  %v3003_v62 = vpop.f32.mrb[77].mxu0  ;;  %v1763_v60 = vpop.f32.mrb[82].mxu1 }
 0x227   :  { %v2019_v61 = vpop.f32.mrb[78].mxu0  ;;  %v1765_v26 = vpop.f32.mrb[83].mxu1  ;;  %v3155_v6 = vadd.f32 %v4366_v11, %v1763_v60 }
 0x228   :  { %v3152_v3 = vadd.f32 %v3151_v56, %v2019_v61  ;;  %v3004_v1 = vpop.f32.mrb[79].mxu0 }
 0x22a   :  { %v2809_v63 = vpack.c.bf16 %v3152_v3, %v3150_v57 }
 0x22c   :  { %2869 = vst [vmem:[%s4558_s3 + $0x98] sm:$0xff] %v2809_v63   ;;  %v1768_v4 = vpop.f32.mrb[84].mxu1 }
 0x22d   :  { %v2024_v30 = vpop.f32.mrb[80].mxu0  ;;  %v1770_v7 = vpop.f32.mrb[85].mxu1  ;;  %v3157_v14 = vadd.f32 %v4366_v11, %v1768_v4 }
 0x22e   :  { %v3154_v5 = vadd.f32 %v3153_v2, %v2024_v30  ;;  %v3007_v8 = vpop.f32.mrb[81].mxu0  ;;  %v1771_v9 = vpop.f32.mrb[86].mxu1 }
 0x22f   :  { %v2027_v10 = vpop.f32.mrb[82].mxu0  ;;  %v1773_v12 = vpop.f32.mrb[87].mxu1  ;;  %v3159_v18 = vadd.f32 %v4366_v11, %v1771_v9 }
 0x230   :  { %v3156_v33 = vadd.f32 %v3155_v6, %v2027_v10  ;;  %v3008_v15 = vpop.f32.mrb[83].mxu0 }
 0x232   :  { %v2814_v0 = vpack.c.bf16 %v3156_v33, %v3154_v5 }
 0x234   :  { %2870 = vst [vmem:[%s4558_s3 + $0xa0] sm:$0xff] %v2814_v0   ;;  %v1776_v17 = vpop.f32.mrb[88].mxu1 }
 0x235   :  { %v2032_v37 = vpop.f32.mrb[84].mxu0  ;;  %v1778_v20 = vpop.f32.mrb[89].mxu1  ;;  %v3161_v28 = vadd.f32 %v4366_v11, %v1776_v17 }
 0x236   :  { %v3158_v21 = vadd.f32 %v3157_v14, %v2032_v37  ;;  %v3011_v24 = vpop.f32.mrb[85].mxu0  ;;  %v1779_v25 = vpop.f32.mrb[90].mxu1 }
 0x237   :  { %v2035_v41 = vpop.f32.mrb[86].mxu0  ;;  %v1781_v22 = vpop.f32.mrb[91].mxu1  ;;  %v3163_v34 = vadd.f32 %v4366_v11, %v1779_v25 }
 0x238   :  { %v3160_v27 = vadd.f32 %v3159_v18, %v2035_v41  ;;  %v3012_v29 = vpop.f32.mrb[87].mxu0 }
 0x23a   :  { %v2819_v31 = vpack.c.bf16 %v3160_v27, %v3158_v21 }
 0x23c   :  { %2871 = vst [vmem:[%s4558_s3 + $0xa8] sm:$0xff] %v2819_v31   ;;  %v1784_v45 = vpop.f32.mrb[92].mxu1 }
 0x23d   :  { %v2040_v13 = vpop.f32.mrb[88].mxu0  ;;  %v1786_v16 = vpop.f32.mrb[93].mxu1  ;;  %v3165_v44 = vadd.f32 %v4366_v11, %v1784_v45 }
 0x23e   :  { %v3162_v32 = vadd.f32 %v3161_v28, %v2040_v13  ;;  %v3015_v35 = vpop.f32.mrb[89].mxu0  ;;  %v1787_v48 = vpop.f32.mrb[94].mxu1 }
 0x23f   :  { %v2043_v36 = vpop.f32.mrb[90].mxu0  ;;  %v1789_v38 = vpop.f32.mrb[95].mxu1  ;;  %v3167_v19 = vadd.f32 %v4366_v11, %v1787_v48 }
 0x240   :  { %v3164_v40 = vadd.f32 %v3163_v34, %v2043_v36  ;;  %v3016_v42 = vpop.f32.mrb[91].mxu0 }
 0x242   :  { %v2824_v52 = vpack.c.bf16 %v3164_v40, %v3162_v32 }
 0x244   :  { %2872 = vst [vmem:[%s4558_s3 + $0xb0] sm:$0xff] %v2824_v52   ;;  %v1792_v43 = vpop.f32.mrb[96].mxu1 }
 0x245   :  { %v2048_v39 = vpop.f32.mrb[92].mxu0  ;;  %v1794_v46 = vpop.f32.mrb[97].mxu1  ;;  %v3169_v54 = vadd.f32 %v4366_v11, %v1792_v43 }
 0x246   :  { %v3166_v49 = vadd.f32 %v3165_v44, %v2048_v39  ;;  %v3019_v55 = vpop.f32.mrb[93].mxu0  ;;  %v1795_v23 = vpop.f32.mrb[98].mxu1 }
 0x247   :  { %v2051_v47 = vpop.f32.mrb[94].mxu0  ;;  %v1797_v50 = vpop.f32.mrb[99].mxu1  ;;  %v3171_v62 = vadd.f32 %v4366_v11, %v1795_v23 }
 0x248   :  { %v3168_v53 = vadd.f32 %v3167_v19, %v2051_v47  ;;  %v3020_v59 = vpop.f32.mrb[95].mxu0 }
 0x24a   :  { %v2829_v51 = vpack.c.bf16 %v3168_v53, %v3166_v49 }
 0x24c   :  { %2873 = vst [vmem:[%s4558_s3 + $0xb8] sm:$0xff] %v2829_v51   ;;  %v1800_v58 = vpop.f32.mrb[100].mxu1 }
 0x24d   :  { %v2056_v56 = vpop.f32.mrb[96].mxu0  ;;  %v1802_v57 = vpop.f32.mrb[101].mxu1  ;;  %v3173_v30 = vadd.f32 %v4366_v11, %v1800_v58 }
 0x24e   :  { %v3170_v60 = vadd.f32 %v3169_v54, %v2056_v56  ;;  %v3023_v61 = vpop.f32.mrb[97].mxu0  ;;  %v1803_v26 = vpop.f32.mrb[102].mxu1 }
 0x24f   :  { %v2059_v3 = vpop.f32.mrb[98].mxu0  ;;  %v1805_v1 = vpop.f32.mrb[103].mxu1  ;;  %v3175_v8 = vadd.f32 %v4366_v11, %v1803_v26 }
 0x250   :  { %v3172_v63 = vadd.f32 %v3171_v62, %v2059_v3  ;;  %v3024_v2 = vpop.f32.mrb[99].mxu0 }
 0x252   :  { %v2834_v4 = vpack.c.bf16 %v3172_v63, %v3170_v60 }
 0x254   :  { %2874 = vst [vmem:[%s4558_s3 + $0xc0] sm:$0xff] %v2834_v4   ;;  %v1808_v7 = vpop.f32.mrb[104].mxu1 }
 0x255   :  { %v2064_v6 = vpop.f32.mrb[100].mxu0  ;;  %v1810_v5 = vpop.f32.mrb[105].mxu1  ;;  %v3177_v37 = vadd.f32 %v4366_v11, %v1808_v7 }
 0x256   :  { %v3174_v9 = vadd.f32 %v3173_v30, %v2064_v6  ;;  %v3027_v10 = vpop.f32.mrb[101].mxu0  ;;  %v1811_v12 = vpop.f32.mrb[106].mxu1 }
 0x257   :  { %v2067_v33 = vpop.f32.mrb[102].mxu0  ;;  %v1813_v15 = vpop.f32.mrb[107].mxu1  ;;  %v3179_v24 = vadd.f32 %v4366_v11, %v1811_v12 }
 0x258   :  { %v3176_v0 = vadd.f32 %v3175_v8, %v2067_v33  ;;  %v3028_v14 = vpop.f32.mrb[103].mxu0 }
 0x25a   :  { %v2839_v17 = vpack.c.bf16 %v3176_v0, %v3174_v9 }
 0x25c   :  { %2875 = vst [vmem:[%s4558_s3 + $0xc8] sm:$0xff] %v2839_v17   ;;  %v1816_v20 = vpop.f32.mrb[108].mxu1 }
 0x25d   :  { %v2072_v18 = vpop.f32.mrb[104].mxu0  ;;  %v1818_v21 = vpop.f32.mrb[109].mxu1  ;;  %v3181_v13 = vadd.f32 %v4366_v11, %v1816_v20 }
 0x25e   :  { %v3178_v25 = vadd.f32 %v3177_v37, %v2072_v18  ;;  %v3031_v41 = vpop.f32.mrb[105].mxu0  ;;  %v1819_v22 = vpop.f32.mrb[110].mxu1 }
 0x25f   :  { %v2075_v27 = vpop.f32.mrb[106].mxu0  ;;  %v1821_v29 = vpop.f32.mrb[111].mxu1  ;;  %v3183_v35 = vadd.f32 %v4366_v11, %v1819_v22 }
 0x260   :  { %v3180_v31 = vadd.f32 %v3179_v24, %v2075_v27  ;;  %v3032_v28 = vpop.f32.mrb[107].mxu0 }
 0x262   :  { %v2844_v45 = vpack.c.bf16 %v3180_v31, %v3178_v25 }
 0x264   :  { %2876 = vst [vmem:[%s4558_s3 + $0xd0] sm:$0xff] %v2844_v45   ;;  %v1824_v16 = vpop.f32.mrb[112].mxu1 }
 0x265   :  { %v2080_v34 = vpop.f32.mrb[108].mxu0  ;;  %v1826_v32 = vpop.f32.mrb[113].mxu1  ;;  %v3185_v39 = vadd.f32 %v4366_v11, %v1824_v16 }
 0x266   :  { %v3182_v48 = vadd.f32 %v3181_v13, %v2080_v34  ;;  %v3035_v36 = vpop.f32.mrb[109].mxu0  ;;  %v1827_v38 = vpop.f32.mrb[114].mxu1 }
 0x267   :  { %v2083_v40 = vpop.f32.mrb[110].mxu0  ;;  %v1828_v42 = vpop.f32.mrb[115].mxu1 }
 0x268   :  { %v3184_v52 = vadd.f32 %v3183_v35, %v2083_v40  ;;  %v3036_v44 = vpop.f32.mrb[111].mxu0 }
 0x26a   :  { %v2849_v43 = vpack.c.bf16 %v3184_v52, %v3182_v48 }
 0x26c   :  { %2877 = vst [vmem:[%s4558_s3 + $0xd8] sm:$0xff] %v2849_v43  }
 0x26d   :  { %v2088_v46 = vpop.f32.mrb[112].mxu0 }
 0x26e   :  { %v3186_v19 = vadd.f32 %v3185_v39, %v2088_v46  ;;  %v3039_v49 = vpop.f32.mrb[113].mxu0 }
 0x26f   :  { %v2091_v55 = vpop.f32.mrb[114].mxu0 }
 0x270   :  { %v2710_v23 = vpack.c.bf16 %v3186_v19, %v3186_v19  ;;  %v3040_v47 = vpop.f32.mrb[115].mxu0 }
 0x272   :  { %2379 = vst [vmem:[%s4558_s3 + $0xe0] sm:$0xf] %v2710_v23 }

// kernel: alexnet_legacy_forward.8
= control target key start
LH: loop header
LB: loop body
LE: loop exit
PB: predicated region body
PF: predicated region fallthrough
CT: control target
= control target key end

     0   :  { %vm82_vm0 = vcmask 1043456   ;;  %s731_s0 = inlined_call_operand.vmem [shape: bf16[9,64,128], index: 0, kind: input, shape index: {}]   ;;  %s732_s1 = inlined_call_operand.vmem [shape: bf16[64,128], index: 1, kind: output, shape index: {}]  }
   0x1   :  { %v10_v0 = vld [vmem:[%s731_s0] sm:$0xf]  ;;  %v11_v3 = vld [vmem:[%s731_s0 + $0x4] sm:$0xf]  ;;  %v12_v39 = vld [vmem:[%s731_s0 + $0x8] sm:$0xf] }
   0x2   :  { %v18_v1 = vld [vmem:[%s731_s0 + $0x20] sm:$0xf]  ;;  %v19_v4 = vld [vmem:[%s731_s0 + $0x24] sm:$0xf]  ;;  %v85_v7 = vsel %vm82_vm0, %v10_v0, 4286644096 }
   0x3   :  { %v26_v2 = vld [vmem:[%s731_s0 + $0x40] sm:$0xf]  ;;  %v27_v5 = vld [vmem:[%s731_s0 + $0x44] sm:$0xf]  ;;  %v88_v8 = vsel %vm82_vm0, %v18_v1, 4286644096 }
   0x4   :  { %v34_v6 = vld [vmem:[%s731_s0 + $0x60] sm:$0xf]  ;;  %v92_v9 = vsel %vm82_vm0, %v26_v2, 4286644096  ;;  %v90_v11 = vmax.bf16 %v88_v8, %v85_v7  ;;  %v35_v12 = vld [vmem:[%s731_s0 + $0x64] sm:$0xf] }
   0x5   :  { %v42_v10 = vld [vmem:[%s731_s0 + $0x80] sm:$0xf]  ;;  %v96_v14 = vsel %vm82_vm0, %v34_v6, 4286644096  ;;  %v120_v16 = vsel %vm82_vm0, %v11_v3, 4286644096 }
   0x6   :  { %v50_v13 = vld [vmem:[%s731_s0 + $0xa0] sm:$0xf]  ;;  %v94_v15 = vmax.bf16 %v92_v9, %v90_v11  ;;  %v123_v17 = vsel %vm82_vm0, %v19_v4, 4286644096  ;;  %v127_v18 = vsel %vm82_vm0, %v27_v5, 4286644096 }
   0x7   :  { %v43_v19 = vld [vmem:[%s731_s0 + $0x84] sm:$0xf]  ;;  %v100_v20 = vsel %vm82_vm0, %v42_v10, 4286644096  ;;  %v125_v21 = vmax.bf16 %v123_v17, %v120_v16  ;;  %v58_v23 = vld [vmem:[%s731_s0 + $0xc0] sm:$0xf] }
   0x8   :  { %v51_v22 = vld [vmem:[%s731_s0 + $0xa4] sm:$0xf]  ;;  %v98_v24 = vmax.bf16 %v96_v14, %v94_v15  ;;  %v131_v25 = vsel %vm82_vm0, %v35_v12, 4286644096  ;;  %v104_v27 = vsel %vm82_vm0, %v50_v13, 4286644096 }
   0x9   :  { %v59_v26 = vld [vmem:[%s731_s0 + $0xc4] sm:$0xf]  ;;  %v129_v28 = vmax.bf16 %v127_v18, %v125_v21  ;;  %v66_v29 = vld [vmem:[%s731_s0 + $0xe0] sm:$0xf]  ;;  %v135_v32 = vsel %vm82_vm0, %v43_v19, 4286644096 }
   0xa   :  { %v74_v30 = vld [vmem:[%s731_s0 + $0x100] sm:$0xf]  ;;  %v102_v31 = vmax.bf16 %v100_v20, %v98_v24  ;;  %v67_v33 = vld [vmem:[%s731_s0 + $0xe4] sm:$0xf]  ;;  %v108_v34 = vsel %vm82_vm0, %v58_v23, 4286644096 }
   0xb   :  { %v133_v35 = vmax.bf16 %v131_v25, %v129_v28  ;;  %v139_v36 = vsel %vm82_vm0, %v51_v22, 4286644096  ;;  %v75_v37 = vld [vmem:[%s731_s0 + $0x104] sm:$0xf]  ;;  %v20_v40 = vld [vmem:[%s731_s0 + $0x28] sm:$0xf] }
   0xc   :  { %v106_v38 = vmax.bf16 %v104_v27, %v102_v31  ;;  %v28_v41 = vld [vmem:[%s731_s0 + $0x48] sm:$0xf]  ;;  %v112_v42 = vsel %vm82_vm0, %v66_v29, 4286644096  ;;  %v116_v43 = vsel %vm82_vm0, %v74_v30, 4286644096 }
   0xd   :  { %v137_v44 = vmax.bf16 %v135_v32, %v133_v35  ;;  %v143_v45 = vsel %vm82_vm0, %v59_v26, 4286644096  ;;  %v147_v47 = vsel %vm82_vm0, %v67_v33, 4286644096  ;;  %v13_v48 = vld [vmem:[%s731_s0 + $0xc] sm:$0xf] }
   0xe   :  { %v110_v46 = vmax.bf16 %v108_v34, %v106_v38  ;;  %v36_v49 = vld [vmem:[%s731_s0 + $0x68] sm:$0xf]  ;;  %v155_v51 = vsel %vm82_vm0, %v12_v39, 4286644096  ;;  %v158_v52 = vsel %vm82_vm0, %v20_v40, 4286644096 }
   0xf   :  { %v141_v50 = vmax.bf16 %v139_v36, %v137_v44  ;;  %v162_v53 = vsel %vm82_vm0, %v28_v41, 4286644096  ;;  %v21_v55 = vld [vmem:[%s731_s0 + $0x2c] sm:$0xf]  ;;  %v44_v57 = vld [vmem:[%s731_s0 + $0x88] sm:$0xf]  ;;  %v160_v58 = vmax.bf16 %v158_v52, %v155_v51 }
  0x10   :  { %v114_v54 = vmax.bf16 %v112_v42, %v110_v46  ;;  %v29_v56 = vld [vmem:[%s731_s0 + $0x4c] sm:$0xf]  ;;  %v151_v60 = vsel %vm82_vm0, %v75_v37, 4286644096  ;;  %v166_v61 = vsel %vm82_vm0, %v36_v49, 4286644096 }
  0x11   :  { %v145_v59 = vmax.bf16 %v143_v45, %v141_v50  ;;  %v37_v63 = vld [vmem:[%s731_s0 + $0x6c] sm:$0xf]  ;;  %v52_v0 = vld [vmem:[%s731_s0 + $0xa8] sm:$0xf]  ;;  %v164_v1 = vmax.bf16 %v162_v53, %v160_v58  ;;  %v190_v2 = vsel %vm82_vm0, %v13_v48, 4286644096 }
  0x12   :  { %v118_v62 = vmax.bf16 %v116_v43, %v114_v54  ;;  %v170_v4 = vsel %vm82_vm0, %v44_v57, 4286644096  ;;  %v193_v5 = vsel %vm82_vm0, %v21_v55, 4286644096  ;;  %v197_v6 = vsel %vm82_vm0, %v29_v56, 4286644096 }
  0x13   :  { %v149_v3 = vmax.bf16 %v147_v47, %v145_v59  ;;  %v45_v7 = vld [vmem:[%s731_s0 + $0x8c] sm:$0xf]  ;;  %v60_v8 = vld [vmem:[%s731_s0 + $0xc8] sm:$0xf]  ;;  %v168_v9 = vmax.bf16 %v166_v61, %v164_v1  ;;  %v195_v10 = vmax.bf16 %v193_v5, %v190_v2  ;;  %v412_v12 = vmov 0  }
  0x14   :  { %v364_v13 = vmax.bf16 %v412_v12, %v118_v62  ;;  %v174_v14 = vsel %vm82_vm0, %v52_v0, 4286644096  ;;  %v201_v15 = vsel %vm82_vm0, %v37_v63, 4286644096  ;;  %v53_v16 = vld [vmem:[%s731_s0 + $0xac] sm:$0xf] }
  0x15   :  { %v153_v11 = vmax.bf16 %v151_v60, %v149_v3  ;;  %v61_v17 = vld [vmem:[%s731_s0 + $0xcc] sm:$0xf]  ;;  %v68_v18 = vld [vmem:[%s731_s0 + $0xe8] sm:$0xf]  ;;  %v172_v19 = vmax.bf16 %v170_v4, %v168_v9  ;;  %v199_v20 = vmax.bf16 %v197_v6, %v195_v10  ;;  %v178_v23 = vsel %vm82_vm0, %v60_v8, 4286644096 }
  0x16   :  { %v76_v22 = vld [vmem:[%s731_s0 + $0x108] sm:$0xf]  ;;  %v205_v24 = vsel %vm82_vm0, %v45_v7, 4286644096  ;;  %v69_v25 = vld [vmem:[%s731_s0 + $0xec] sm:$0xf] }
  0x17   :  { %v365_v21 = vmax.bf16 %v412_v12, %v153_v11  ;;  %v176_v26 = vmax.bf16 %v174_v14, %v172_v19  ;;  %v203_v27 = vmax.bf16 %v201_v15, %v199_v20  ;;  %v14_v28 = vld [vmem:[%s731_s0 + $0x10] sm:$0xf]  ;;  %v77_v32 = vld [vmem:[%s731_s0 + $0x10c] sm:$0xf]  ;;  %v182_v33 = vsel %vm82_vm0, %v68_v18, 4286644096 }
  0x18   :  { %v22_v29 = vld [vmem:[%s731_s0 + $0x30] sm:$0xf]  ;;  %v209_v34 = vsel %vm82_vm0, %v53_v16, 4286644096  ;;  %v186_v36 = vsel %vm82_vm0, %v76_v22, 4286644096 }
  0x19   :  { %v30_v30 = vld [vmem:[%s731_s0 + $0x50] sm:$0xf]  ;;  %v404_v31 = vcombine.low %v364_v13, %v365_v21  ;;  %v180_v35 = vmax.bf16 %v178_v23, %v176_v26  ;;  %v207_v37 = vmax.bf16 %v205_v24, %v203_v27  ;;  %v213_v38 = vsel %vm82_vm0, %v61_v17, 4286644096  ;;  %v15_v45 = vld [vmem:[%s731_s0 + $0x14] sm:$0xf] }
  0x1a   :  { %v38_v39 = vld [vmem:[%s731_s0 + $0x70] sm:$0xf]  ;;  %v225_v40 = vsel %vm82_vm0, %v14_v28, 4286644096  ;;  %v228_v41 = vsel %vm82_vm0, %v22_v29, 4286644096 }
  0x1b   :  { %388 = vst [vmem:[%s732_s1] sm:$0xff] %v404_v31   ;;  %v232_v42 = vsel %vm82_vm0, %v30_v30, 4286644096  ;;  %v184_v43 = vmax.bf16 %v182_v33, %v180_v35  ;;  %v211_v44 = vmax.bf16 %v209_v34, %v207_v37  ;;  %v23_v46 = vld [vmem:[%s731_s0 + $0x34] sm:$0xf]  ;;  %v46_v47 = vld [vmem:[%s731_s0 + $0x90] sm:$0xf]  ;;  %v230_v48 = vmax.bf16 %v228_v41, %v225_v40 }
  0x1c   :  { %v217_v49 = vsel %vm82_vm0, %v69_v25, 4286644096  ;;  %v221_v50 = vsel %vm82_vm0, %v77_v32, 4286644096  ;;  %v236_v51 = vsel %vm82_vm0, %v38_v39, 4286644096 }
  0x1d   :  { %v188_v52 = vmax.bf16 %v186_v36, %v184_v43  ;;  %v215_v53 = vmax.bf16 %v213_v38, %v211_v44  ;;  %v31_v54 = vld [vmem:[%s731_s0 + $0x54] sm:$0xf]  ;;  %v54_v56 = vld [vmem:[%s731_s0 + $0xb0] sm:$0xf]  ;;  %v234_v57 = vmax.bf16 %v232_v42, %v230_v48  ;;  %v240_v58 = vsel %vm82_vm0, %v46_v47, 4286644096 }
  0x1e   :  { %v39_v55 = vld [vmem:[%s731_s0 + $0x74] sm:$0xf]  ;;  %v260_v59 = vsel %vm82_vm0, %v15_v45, 4286644096  ;;  %v263_v60 = vsel %vm82_vm0, %v23_v46, 4286644096 }
  0x1f   :  { %v219_v61 = vmax.bf16 %v217_v49, %v215_v53  ;;  %v47_v62 = vld [vmem:[%s731_s0 + $0x94] sm:$0xf]  ;;  %v62_v63 = vld [vmem:[%s731_s0 + $0xd0] sm:$0xf]  ;;  %v238_v0 = vmax.bf16 %v236_v51, %v234_v57  ;;  %v265_v1 = vmax.bf16 %v263_v60, %v260_v59  ;;  %v244_v2 = vsel %vm82_vm0, %v54_v56, 4286644096 }
  0x20   :  { %v267_v3 = vsel %vm82_vm0, %v31_v54, 4286644096  ;;  %v271_v4 = vsel %vm82_vm0, %v39_v55, 4286644096  ;;  %v366_v6 = vmax.bf16 %v412_v12, %v188_v52  ;;  %v55_v7 = vld [vmem:[%s731_s0 + $0xb4] sm:$0xf] }
  0x21   :  { %v223_v5 = vmax.bf16 %v221_v50, %v219_v61  ;;  %v70_v8 = vld [vmem:[%s731_s0 + $0xf0] sm:$0xf]  ;;  %v242_v10 = vmax.bf16 %v240_v58, %v238_v0  ;;  %v269_v11 = vmax.bf16 %v267_v3, %v265_v1  ;;  %v63_v13 = vld [vmem:[%s731_s0 + $0xd4] sm:$0xf]  ;;  %v248_v14 = vsel %vm82_vm0, %v62_v63, 4286644096 }
  0x22   :  { %v78_v9 = vld [vmem:[%s731_s0 + $0x110] sm:$0xf]  ;;  %v275_v15 = vsel %vm82_vm0, %v47_v62, 4286644096  ;;  %v71_v17 = vld [vmem:[%s731_s0 + $0xf4] sm:$0xf] }
  0x23   :  { %v367_v16 = vmax.bf16 %v412_v12, %v223_v5  ;;  %v246_v18 = vmax.bf16 %v244_v2, %v242_v10  ;;  %v273_v19 = vmax.bf16 %v271_v4, %v269_v11  ;;  %v16_v20 = vld [vmem:[%s731_s0 + $0x18] sm:$0xf]  ;;  %v252_v23 = vsel %vm82_vm0, %v70_v8, 4286644096  ;;  %v79_v27 = vld [vmem:[%s731_s0 + $0x114] sm:$0xf] }
  0x24   :  { %v24_v21 = vld [vmem:[%s731_s0 + $0x38] sm:$0xf]  ;;  %v256_v24 = vsel %vm82_vm0, %v78_v9, 4286644096  ;;  %v279_v25 = vsel %vm82_vm0, %v55_v7, 4286644096 }
  0x25   :  { %v32_v22 = vld [vmem:[%s731_s0 + $0x58] sm:$0xf]  ;;  %v405_v26 = vcombine.low %v366_v6, %v367_v16  ;;  %v250_v28 = vmax.bf16 %v248_v14, %v246_v18  ;;  %v277_v29 = vmax.bf16 %v275_v15, %v273_v19  ;;  %v283_v30 = vsel %vm82_vm0, %v63_v13, 4286644096  ;;  %v17_v37 = vld [vmem:[%s731_s0 + $0x1c] sm:$0xf] }
  0x26   :  { %v40_v31 = vld [vmem:[%s731_s0 + $0x78] sm:$0xf]  ;;  %v295_v32 = vsel %vm82_vm0, %v16_v20, 4286644096  ;;  %v298_v33 = vsel %vm82_vm0, %v24_v21, 4286644096 }
  0x27   :  { %v302_v34 = vsel %vm82_vm0, %v32_v22, 4286644096  ;;  %406 = vst [vmem:[%s732_s1 + $0x8] sm:$0xff] %v405_v26   ;;  %v254_v35 = vmax.bf16 %v252_v23, %v250_v28  ;;  %v281_v36 = vmax.bf16 %v279_v25, %v277_v29  ;;  %v25_v38 = vld [vmem:[%s731_s0 + $0x3c] sm:$0xf]  ;;  %v300_v40 = vmax.bf16 %v298_v33, %v295_v32 }
  0x28   :  { %v48_v39 = vld [vmem:[%s731_s0 + $0x98] sm:$0xf]  ;;  %v287_v41 = vsel %vm82_vm0, %v71_v17, 4286644096  ;;  %v33_v42 = vld [vmem:[%s731_s0 + $0x5c] sm:$0xf] }
  0x29   :  { %v306_v43 = vsel %vm82_vm0, %v40_v31, 4286644096  ;;  %v258_v44 = vmax.bf16 %v256_v24, %v254_v35  ;;  %v285_v45 = vmax.bf16 %v283_v30, %v281_v36  ;;  %v291_v46 = vsel %vm82_vm0, %v79_v27, 4286644096  ;;  %v41_v47 = vld [vmem:[%s731_s0 + $0x7c] sm:$0xf] }
  0x2a   :  { %v56_v48 = vld [vmem:[%s731_s0 + $0xb8] sm:$0xf]  ;;  %v304_v49 = vmax.bf16 %v302_v34, %v300_v40  ;;  %v310_v50 = vsel %vm82_vm0, %v48_v39, 4286644096  ;;  %v330_v51 = vsel %vm82_vm0, %v17_v37, 4286644096 }
  0x2b   :  { %v333_v52 = vsel %vm82_vm0, %v25_v38, 4286644096  ;;  %v289_v53 = vmax.bf16 %v287_v41, %v285_v45  ;;  %v49_v54 = vld [vmem:[%s731_s0 + $0x9c] sm:$0xf]  ;;  %v64_v55 = vld [vmem:[%s731_s0 + $0xd8] sm:$0xf]  ;;  %v368_v62 = vmax.bf16 %v412_v12, %v258_v44 }
  0x2c   :  { %v308_v56 = vmax.bf16 %v306_v43, %v304_v49  ;;  %v335_v57 = vmax.bf16 %v333_v52, %v330_v51  ;;  %v314_v58 = vsel %vm82_vm0, %v56_v48, 4286644096  ;;  %v337_v59 = vsel %vm82_vm0, %v33_v42, 4286644096  ;;  %v57_v63 = vld [vmem:[%s731_s0 + $0xbc] sm:$0xf] }
  0x2d   :  { %v341_v60 = vsel %vm82_vm0, %v41_v47, 4286644096  ;;  %v293_v61 = vmax.bf16 %v291_v46, %v289_v53  ;;  %v72_v0 = vld [vmem:[%s731_s0 + $0xf8] sm:$0xf]  ;;  %v318_v3 = vsel %vm82_vm0, %v64_v55, 4286644096 }
  0x2e   :  { %v312_v1 = vmax.bf16 %v310_v50, %v308_v56  ;;  %v339_v2 = vmax.bf16 %v337_v59, %v335_v57  ;;  %v345_v4 = vsel %vm82_vm0, %v49_v54, 4286644096  ;;  %v65_v6 = vld [vmem:[%s731_s0 + $0xdc] sm:$0xf]  ;;  %v80_v7 = vld [vmem:[%s731_s0 + $0x118] sm:$0xf] }
  0x2f   :  { %v369_v5 = vmax.bf16 %v412_v12, %v293_v61  ;;  %v322_v10 = vsel %vm82_vm0, %v72_v0, 4286644096  ;;  %v349_v11 = vsel %vm82_vm0, %v57_v63, 4286644096  ;;  %v73_v14 = vld [vmem:[%s731_s0 + $0xfc] sm:$0xf] }
  0x30   :  { %v316_v8 = vmax.bf16 %v314_v58, %v312_v1  ;;  %v343_v9 = vmax.bf16 %v341_v60, %v339_v2  ;;  %v326_v17 = vsel %vm82_vm0, %v80_v7, 4286644096  ;;  %v353_v18 = vsel %vm82_vm0, %v65_v6, 4286644096  ;;  %v81_v19 = vld [vmem:[%s731_s0 + $0x11c] sm:$0xf] }
  0x31   :  { %v407_v13 = vcombine.low %v368_v62, %v369_v5  ;;  %v357_v22 = vsel %vm82_vm0, %v73_v14, 4286644096  ;;  %v361_v25 = vsel %vm82_vm0, %v81_v19, 4286644096 }
  0x32   :  { %v320_v15 = vmax.bf16 %v318_v3, %v316_v8  ;;  %v347_v16 = vmax.bf16 %v345_v4, %v343_v9 }
  0x33   :  { %408 = vst [vmem:[%s732_s1 + $0x10] sm:$0xff] %v407_v13  }
  0x34   :  { %v324_v20 = vmax.bf16 %v322_v10, %v320_v15  ;;  %v351_v21 = vmax.bf16 %v349_v11, %v347_v16 }
  0x36   :  { %v328_v23 = vmax.bf16 %v326_v17, %v324_v20  ;;  %v355_v24 = vmax.bf16 %v353_v18, %v351_v21 }
  0x38   :  { %v359_v26 = vmax.bf16 %v357_v22, %v355_v24  ;;  %v370_v28 = vmax.bf16 %v412_v12, %v328_v23 }
  0x3a   :  { %v363_v27 = vmax.bf16 %v361_v25, %v359_v26 }
  0x3c   :  { %v371_v29 = vmax.bf16 %v412_v12, %v363_v27 }
  0x3e   :  { %v409_v30 = vcombine.low %v370_v28, %v371_v29 }
  0x40   :  { %410 = vst [vmem:[%s732_s1 + $0x18] sm:$0xff] %v409_v30  }

// kernel: alexnet_legacy_forward.9
= control target key start
LH: loop header
LB: loop body
LE: loop exit
PB: predicated region body
PF: predicated region fallthrough
CT: control target
= control target key end

     0   :  { %v6021_v1 = vmov 0   ;;  %vm84_vm0 = vsmask.f32 2304  ;;  %vm7817_vm1 = vcmask 1042432   ;;  %vm7816_vm3 = vcmask 1043458   ;;  %s7808_s1 = inlined_call_operand.vmem [shape: bf16[1152,128], index: 1, kind: input, shape index: {}]   ;;  %s7809_s0 = inlined_call_operand.vmem [shape: bf16[2,7,7,128], index: 0, kind: input, shape index: {}]   ;;  %s7810_s2 = inlined_call_operand.vmem [shape: f32[1,128], index: 2, kind: input, shape index: {}]   ;;  %s7811_s3 = inlined_call_operand.vmem [shape: bf16[1152,128], index: 3, kind: input, shape index: {}]   ;;  %s7812_s5 = inlined_call_operand.vmem [shape: bf16[1152,128], index: 5, kind: input, shape index: {}]   ;;  %s7813_s4 = inlined_call_operand.vmem [shape: f32[1,128], index: 4, kind: input, shape index: {}]   ;;  %s7814_s6 = inlined_call_operand.vmem [shape: f32[1,128], index: 6, kind: input, shape index: {}]   ;;  %s7815_s7 = inlined_call_operand.vmem [shape: f32[8,128], index: 7, kind: output, shape index: {}]  }
   0x1   :  { %v5726_v0 = vld [vmem:[%s7808_s1 + $0x40] sm:$0xff]   ;;  %27 = vst [vmem:[#allocation2] sm:$0xff] %v6021_v1  ;;  %32 = vst [vmem:[#allocation2 + $0x24] sm:$0xff] %v6021_v1  ;;  %v5730_v5 = vld [vmem:[%s7808_s1 + $0x48] sm:$0xff]   ;;  %vm299_vm4 = vcmask 1043457   ;;  %vm380_vm9 = vcmask 1043459  }
   0x2   :  { %28 = vst [vmem:[#allocation2 + $0x8] sm:$0xff] %v6021_v1  ;;  %29 = vst [vmem:[#allocation2 + $0x10] sm:$0xff] %v6021_v1  ;;  %v5727_v2 = vld [vmem:[%s7808_s1] sm:$0xff]   ;;  %5268 = vmatprep.subr.bf16.mxu0 %v5726_v0  ;;  %v5731_v6 = vld [vmem:[%s7808_s1 + $0x8] sm:$0xff]   ;;  %vm178_vm5 = vsmask.f32 7946 }
   0x3   :  { %30 = vst [vmem:[#allocation2 + $0x18] sm:$0xff] %v6021_v1  ;;  %31 = vst [vmem:[#allocation2 + $0x20] sm:$0xf] %v6021_v1  ;;  %v5728_v3 = vld [vmem:[%s7808_s1 + $0xc0] sm:$0xff]   ;;  %5269 = vmatpush3.bf16.msra.mxu0 %v5727_v2  ;;  %v5732_v7 = vld [vmem:[%s7808_s1 + $0xc8] sm:$0xff]   ;;  %vm7819_vm12 = vcmask 1040384  }
   0x4   :  { %33 = vst [vmem:[#allocation2 + $0x2c] sm:$0xff] %v6021_v1  ;;  %34 = vst [vmem:[#allocation2 + $0x34] sm:$0xff] %v6021_v1  ;;  %v5729_v4 = vld [vmem:[%s7808_s1 + $0x80] sm:$0xff]   ;;  %5308 = vmatprep.subr.bf16.mxu1 %v5728_v3  ;;  %5270 = vmatprep.subr.bf16.mxu0 %v5730_v5  ;;  %v5733_v8 = vld [vmem:[%s7808_s1 + $0x88] sm:$0xff]   ;;  %vm300_vm6 = vsmask.f32 3328 }
   0x5   :  { %35 = vst [vmem:[#allocation2 + $0x3c] sm:$0xff] %v6021_v1  ;;  %36 = vst [vmem:[#allocation2 + $0x44] sm:$0xf] %v6021_v1  ;;  %5309 = vmatpush3.bf16.msra.mxu1 %v5729_v4  ;;  %v5734_v9 = vld [vmem:[%s7808_s1 + $0x50] sm:$0xff]   ;;  %v5738_v13 = vld [vmem:[%s7808_s1 + $0x58] sm:$0xff]  }
   0x6   :  { %37 = vst [vmem:[#allocation2 + $0x48] sm:$0xff] %v6021_v1  ;;  %38 = vst [vmem:[#allocation2 + $0x50] sm:$0xff] %v6021_v1  ;;  %5310 = vmatprep.subr.bf16.mxu1 %v5732_v7  ;;  %v5735_v10 = vld [vmem:[%s7808_s1 + $0x10] sm:$0xff]   ;;  %v5739_v14 = vld [vmem:[%s7808_s1 + $0x18] sm:$0xff]   ;;  %vm381_vm10 = vsmask.f32 7950 }
   0x7   :  { %39 = vst [vmem:[#allocation2 + $0x58] sm:$0xff] %v6021_v1  ;;  %40 = vst [vmem:[#allocation2 + $0x60] sm:$0xff] %v6021_v1  ;;  %5271 = vmatpush3.bf16.msra.mxu0 %v5731_v6  ;;  %v5736_v11 = vld [vmem:[%s7808_s1 + $0xd0] sm:$0xff]   ;;  %v5740_v15 = vld [vmem:[%s7808_s1 + $0xd8] sm:$0xff]   ;;  %vm506_vm13 = vsmask.f32 256 }
   0x8   :  { %41 = vst [vmem:[#allocation2 + $0x68] sm:$0xf] %v6021_v1  ;;  %42 = vst [vmem:[#allocation2 + $0x6c] sm:$0xff] %v6021_v1  ;;  %5272 = vmatprep.subr.bf16.mxu0 %v5734_v9  ;;  %v5737_v12 = vld [vmem:[%s7808_s1 + $0x90] sm:$0xff]   ;;  %v5741_v16 = vld [vmem:[%s7808_s1 + $0x98] sm:$0xff]  }
   0x9   :  { %43 = vst [vmem:[#allocation2 + $0x74] sm:$0xff] %v6021_v1  ;;  %44 = vst [vmem:[#allocation2 + $0x7c] sm:$0xff] %v6021_v1  ;;  %5311 = vmatpush3.bf16.msra.mxu1 %v5733_v8  ;;  %v5742_v17 = vld [vmem:[%s7808_s1 + $0x60] sm:$0xff]   ;;  %v5746_v21 = vld [vmem:[%s7808_s1 + $0x68] sm:$0xff]   ;;  %vm7818_vm15 = vsmask.f32 7938 }
   0xa   :  { %45 = vst [vmem:[#allocation2 + $0x84] sm:$0xff] %v6021_v1  ;;  %46 = vst [vmem:[#allocation2 + $0x8c] sm:$0xf] %v6021_v1  ;;  %5312 = vmatprep.subr.bf16.mxu1 %v5736_v11  ;;  %v5743_v18 = vld [vmem:[%s7808_s1 + $0x20] sm:$0xff]   ;;  %v5747_v22 = vld [vmem:[%s7808_s1 + $0x28] sm:$0xff]  }
   0xb   :  { %47 = vst [vmem:[#allocation2 + $0x90] sm:$0xff] %v6021_v1  ;;  %48 = vst [vmem:[#allocation2 + $0x98] sm:$0xff] %v6021_v1  ;;  %5273 = vmatpush3.bf16.msra.mxu0 %v5735_v10  ;;  %v5744_v19 = vld [vmem:[%s7808_s1 + $0xe0] sm:$0xff]   ;;  %v5748_v23 = vld [vmem:[%s7808_s1 + $0xe8] sm:$0xff]  }
   0xc   :  { %49 = vst [vmem:[#allocation2 + $0xa0] sm:$0xff] %v6021_v1  ;;  %50 = vst [vmem:[#allocation2 + $0xa8] sm:$0xff] %v6021_v1  ;;  %5274 = vmatprep.subr.bf16.mxu0 %v5738_v13  ;;  %v5745_v20 = vld [vmem:[%s7808_s1 + $0xa0] sm:$0xff]   ;;  %v5749_v24 = vld [vmem:[%s7808_s1 + $0xa8] sm:$0xff]  }
   0xd   :  { %51 = vst [vmem:[#allocation2 + $0xb0] sm:$0xf] %v6021_v1  ;;  %52 = vst [vmem:[#allocation2 + $0xb4] sm:$0xff] %v6021_v1  ;;  %5313 = vmatpush3.bf16.msra.mxu1 %v5737_v12  ;;  %v5750_v25 = vld [vmem:[%s7808_s1 + $0x70] sm:$0xff]   ;;  %v5754_v29 = vld [vmem:[%s7808_s1 + $0x78] sm:$0xff]  }
   0xe   :  { %53 = vst [vmem:[#allocation2 + $0xbc] sm:$0xff] %v6021_v1  ;;  %54 = vst [vmem:[#allocation2 + $0xc4] sm:$0xff] %v6021_v1  ;;  %5314 = vmatprep.subr.bf16.mxu1 %v5740_v15  ;;  %v5751_v26 = vld [vmem:[%s7808_s1 + $0x30] sm:$0xff]   ;;  %v5755_v30 = vld [vmem:[%s7808_s1 + $0x38] sm:$0xff]  }
   0xf   :  { %55 = vst [vmem:[#allocation2 + $0xcc] sm:$0xff] %v6021_v1  ;;  %56 = vst [vmem:[#allocation2 + $0xd4] sm:$0xf] %v6021_v1  ;;  %5275 = vmatpush3.bf16.msra.mxu0 %v5739_v14  ;;  %v5752_v27 = vld [vmem:[%s7808_s1 + $0xf0] sm:$0xff]   ;;  %v5756_v31 = vld [vmem:[%s7808_s1 + $0xf8] sm:$0xff]  }
  0x10   :  { %57 = vst [vmem:[#allocation2 + $0xd8] sm:$0xff] %v6021_v1  ;;  %58 = vst [vmem:[#allocation2 + $0xe0] sm:$0xff] %v6021_v1  ;;  %5276 = vmatprep.subr.bf16.mxu0 %v5742_v17  ;;  %v5753_v28 = vld [vmem:[%s7808_s1 + $0xb0] sm:$0xff]   ;;  %v82_v32 = vld [vmem:[%s7809_s0] sm:$0x7] }
  0x11   :  { %59 = vst [vmem:[#allocation2 + $0xe8] sm:$0xff] %v6021_v1  ;;  %60 = vst [vmem:[#allocation2 + $0xf0] sm:$0xff] %v6021_v1  ;;  %5315 = vmatpush3.bf16.msra.mxu1 %v5741_v16  ;;  %v86_v34 = vld [vmem:[#allocation2] sm:$0x7]  ;;  %v4830_v37 = vld [vmem:[%s7809_s0 + $0x4] sm:$0x7] }
  0x12   :  { %61 = vst [vmem:[#allocation2 + $0xf8] sm:$0xf] %v6021_v1  ;;  %62 = vst [vmem:[#allocation4] sm:$0xff] %v6021_v1  ;;  %5316 = vmatprep.subr.bf16.mxu1 %v5744_v19  ;;  %v89_v36 = vld [vmem:[%s7809_s0] sm:$0x7]  ;;  %v167_v40 = vshrl.u32 %v4830_v37, 16 }
  0x13   :  { %63 = vst [vmem:[#allocation4 + $0x8] sm:$0xff] %v6021_v1  ;;  %64 = vst [vmem:[#allocation4 + $0x10] sm:$0xff] %v6021_v1  ;;  %5277 = vmatpush3.bf16.msra.mxu0 %v5743_v18  ;;  %v91_v38 = vshrl.u32 %v89_v36, 16  ;;  %v94_v39 = vshll.u32 %v89_v36, 16  ;;  %v170_v41 = vshll.u32 %v4830_v37, 16  ;;  %v5760_v45 = vld [vmem:[%s7808_s1 + $0xb8] sm:$0xff]  }
  0x14   :  { %65 = vst [vmem:[#allocation4 + $0x18] sm:$0xff] %v6021_v1  ;;  %66 = vst [vmem:[#allocation4 + $0x20] sm:$0xf] %v6021_v1  ;;  %5278 = vmatprep.subr.bf16.mxu0 %v5746_v21  ;;  %v6177_v42 = vld [vmem:[%s7809_s0 + $0x4] sm:$0x7]  ;;  %v169_v48 = vrot.slane %v167_v40, 5 }
  0x15   :  { %67 = vst [vmem:[#allocation4 + $0x24] sm:$0xff] %v6021_v1  ;;  %68 = vst [vmem:[#allocation4 + $0x2c] sm:$0xff] %v6021_v1  ;;  %5317 = vmatpush3.bf16.msra.mxu1 %v5745_v20  ;;  %v186_v43 = vrot.slane %v6177_v42, 6  ;;  %v4839_v44 = vld [vmem:[%s7809_s0 + $0x8] sm:$0x7]  ;;  %v93_v46 = vrot.slane %v91_v38, 4 }
  0x16   :  { %69 = vst [vmem:[#allocation4 + $0x34] sm:$0xff] %v6021_v1  ;;  %70 = vst [vmem:[#allocation4 + $0x3c] sm:$0xff] %v6021_v1  ;;  %5318 = vmatprep.subr.bf16.mxu1 %v5748_v23  ;;  %v96_v47 = vrot.slane %v94_v39, 5  ;;  %v172_v49 = vrot.slane %v170_v41, 6  ;;  %v302_v51 = vld [vmem:[#allocation2 + $0x24] sm:$0xe] }
  0x17   :  { %71 = vst [vmem:[#allocation4 + $0x44] sm:$0xf] %v6021_v1  ;;  %72 = vst [vmem:[#allocation4 + $0x48] sm:$0xff] %v6021_v1  ;;  %5279 = vmatpush3.bf16.msra.mxu0 %v5747_v22  ;;  %v100_v52 = vld [vmem:[#allocation2 + $0x4] sm:$0x7]  ;;  %v187_v53 = vrot.slane %v186_v43, 4 }
  0x18   :  { %73 = vst [vmem:[#allocation4 + $0x50] sm:$0xff] %v6021_v1  ;;  %74 = vst [vmem:[#allocation4 + $0x58] sm:$0xff] %v6021_v1  ;;  %5280 = vmatprep.subr.bf16.mxu0 %v5750_v25  ;;  %v297_v54 = vrot.slane %v4839_v44, 7  ;;  %v4840_v55 = vld [vmem:[%s7809_s0 + $0x8] sm:$0x7]  ;;  %v97_v56 = vor.u32 %v96_v47, %v93_v46  ;;  %v173_v57 = vor.u32 %v172_v49, %v169_v48  ;;  %v5761_v6 = vld [vmem:[%s7808_s1 + $0x140] sm:$0xff]  }
  0x19   :  { %75 = vst [vmem:[#allocation4 + $0x60] sm:$0xff] %v6021_v1  ;;  %76 = vst [vmem:[#allocation4 + $0x68] sm:$0xf] %v6021_v1  ;;  %5319 = vmatpush3.bf16.msra.mxu1 %v5749_v24  ;;  %v307_v58 = vshrl.u32 %v4840_v55, 16  ;;  %v310_v59 = vshll.u32 %v4840_v55, 16  ;;  %v5766_v37 = vld [vmem:[%s7808_s1 + $0x1c0] sm:$0xff]  }
  0x1a   :  { %77 = vst [vmem:[#allocation6] sm:$0xff] %v6021_v1  ;;  %78 = vst [vmem:[#allocation6 + $0x8] sm:$0xff] %v6021_v1  ;;  %5320 = vmatprep.subr.bf16.mxu1 %v5752_v27  ;;  %v6200_v60 = vld [vmem:[%s7809_s0 + $0xc] sm:$0x7]  ;;  %v314_v0 = vld [vmem:[#allocation2 + $0x28] sm:$0xe] }
  0x1b   :  { %79 = vst [vmem:[#allocation6 + $0x10] sm:$0xff] %v6021_v1  ;;  %80 = vst [vmem:[#allocation6 + $0x18] sm:$0xff] %v6021_v1  ;;  %5281 = vmatpush3.bf16.msra.mxu0 %v5751_v26  ;;  %v6205_v61 = vld [vmem:[%s7809_s0 + $0xc] sm:$0x7]  ;;  %v98_v2 = vrot.slane %v97_v56, 4  ;;  %v174_v3 = vrot.slane %v173_v57, 4 }
  0x1c   :  { %81 = vst [vmem:[#allocation6 + $0x20] sm:$0xf] %v6021_v1  ;;  %5282 = vmatprep.subr.bf16.mxu0 %v5754_v29  ;;  %vm6162_vm2 = vmand %vm7817_vm1, %vm84_vm0  ;;  %v370_v1 = vshll.u32 %v6200_v60, 16  ;;  %v309_v4 = vrot.slane %v307_v58, 7  ;;  %v389_v5 = vrot.slane %v6205_v61, 5  ;;  %v5892_v20 = vld [vmem:[%s7811_s3 + $0x188] sm:$0xff]  }
  0x1d   :  { %5321 = vmatpush3.bf16.msra.mxu1 %v5753_v28  ;;  %v87_v35 = vsel %vm6162_vm2, %v82_v32, %v86_v34  ;;  %vm6188_vm7 = vmand %vm299_vm4, %vm300_vm6  ;;  %193 = vst [vmem:[#allocation2 + $0x28] sm:$0x1] %v187_v53  ;;  %v101_v8 = vsel %vm6162_vm2, %v98_v2, %v100_v52  ;;  %v103_v12 = vld [vmem:[%s7809_s0] sm:$0xe]  ;;  %v108_v13 = vld [vmem:[#allocation2 + $0x8] sm:$0x7] }
  0x1e   :  { %5322 = vmatprep.subr.bf16.mxu1 %v5756_v31  ;;  %88 = vst [vmem:[#allocation2] sm:$0x7] %v87_v35  ;;  %vm6209_vm8 = vmand %vm7816_vm3, %vm178_vm5  ;;  %v303_v63 = vsel %vm6188_vm7, %v297_v54, %v302_v51  ;;  %v312_v10 = vor.u32 %v310_v59, %v309_v4  ;;  %v390_v11 = vrot.slane %v389_v5, 4  ;;  %v4822_v14 = vld [vmem:[%s7809_s0 + $0x4] sm:$0x7]  ;;  %v6234_v16 = vrot.slane %v370_v1, 5 }
  0x1f   :  { %5283 = vmatpush3.bf16.msra.mxu0 %v5755_v30  ;;  %304 = vst [vmem:[#allocation2 + $0x24] sm:$0xe] %v303_v63  ;;  %183 = vst [vmem:[#allocation2 + $0x24] sm:$0x1] %v174_v3  ;;  %v4821_v17 = vrot.slane %v103_v12, 9  ;;  %v373_v53 = vshrl.u32 %v6200_v60, 16 }
  0x20   :  { %5348 = vmatprep.subr.bf16.mxu0 %v5761_v6  ;;  %102 = vst [vmem:[#allocation2 + $0x4] sm:$0x7] %v101_v8  ;;  %v315_v15 = vsel %vm6188_vm7, %v312_v10, %v314_v0  ;;  %v113_v18 = vld [vmem:[#allocation2 + $0xc] sm:$0x7]  ;;  %v4832_v19 = vld [vmem:[%s7809_s0 + $0x4] sm:$0xe]  ;;  %vm6241_vm11 = vmand %vm380_vm9, %vm381_vm10 }
  0x21   :  { %5323 = vmatpush3.bf16.msra.mxu1 %v5760_v45  ;;  %396 = vst [vmem:[#allocation2 + $0x4c] sm:$0x3] %v390_v11  ;;  %316 = vst [vmem:[#allocation2 + $0x28] sm:$0xe] %v315_v15  ;;  %v114_v21 = vsel %vm6162_vm2, %v4822_v14, %v113_v18  ;;  %v196_v22 = vshrl.u32 %v4832_v19, 16  ;;  %v199_v23 = vshll.u32 %v4832_v19, 16  ;;  %v109_v26 = vsel %vm6162_vm2, %v4821_v17, %v108_v13 }
  0x22   :  { %v4833_v24 = vld [vmem:[%s7809_s0 + $0x8] sm:$0x7]  ;;  %115 = vst [vmem:[#allocation2 + $0xc] sm:$0x7] %v114_v21  ;;  %v318_v29 = vld [vmem:[#allocation2 + $0x2c] sm:$0xe]  ;;  %5388 = vmatprep.subr.bf16.mxu1 %v5766_v37  ;;  %vm6309_vm14 = vmand %vm7819_vm12, %vm506_vm13 }
  0x23   :  { %v4841_v25 = vld [vmem:[%s7809_s0 + $0x8] sm:$0xe]  ;;  %v212_v27 = vshrl.u32 %v4833_v24, 16  ;;  %v215_v28 = vshll.u32 %v4833_v24, 16  ;;  %v4842_v30 = vld [vmem:[%s7809_s0 + $0xc] sm:$0x7]  ;;  %vm6347_vm5 = vmand %vm7817_vm1, %vm7818_vm15 }
  0x24   :  { %110 = vst [vmem:[#allocation2 + $0x8] sm:$0x7] %v109_v26  ;;  %v198_v32 = vrot.slane %v196_v22, 6  ;;  %v201_v34 = vrot.slane %v199_v23, 7  ;;  %v319_v35 = vsel %vm6188_vm7, %v4841_v25, %v318_v29  ;;  %v323_v36 = vrot.slane %v4842_v30, 7  ;;  %v5768_v24 = vld [vmem:[%s7808_s1 + $0x148] sm:$0xff]  }
  0x25   :  { %v180_v7 = vld [vmem:[#allocation2] sm:$0xc]  ;;  %v214_v39 = vrot.slane %v212_v27, 5  ;;  %v217_v40 = vrot.slane %v215_v28, 6  ;;  %320 = vst [vmem:[#allocation2 + $0x2c] sm:$0xe] %v319_v35 }
  0x26   :  { %v181_v9 = vsel %vm6209_vm8, %v173_v57, %v180_v7  ;;  %v383_v31 = vld [vmem:[#allocation2 + $0x24] sm:$0x8]  ;;  %v325_v41 = vld [vmem:[#allocation2 + $0x30] sm:$0xe]  ;;  %v4850_v44 = vld [vmem:[%s7809_s0 + $0xc] sm:$0xe]  ;;  %v202_v45 = vor.u32 %v201_v34, %v198_v32 }
  0x27   :  { %182 = vst [vmem:[#allocation2] sm:$0xc] %v181_v9  ;;  %v384_v38 = vsel %vm6241_vm11, %v6234_v16, %v383_v31  ;;  %v326_v46 = vsel %vm6188_vm7, %v323_v36, %v325_v41  ;;  %v399_v47 = vshll.u32 %v4850_v44, 16  ;;  %v6274_v48 = vld [vmem:[%s7809_s0 + $0x10] sm:$0x7]  ;;  %v218_v51 = vor.u32 %v217_v40, %v214_v39  ;;  %v5769_v30 = vld [vmem:[%s7808_s1 + $0x108] sm:$0xff]  }
  0x28   :  { %385 = vst [vmem:[#allocation2 + $0x24] sm:$0x8] %v384_v38  ;;  %v190_v49 = vld [vmem:[#allocation2 + $0x4] sm:$0xc]  ;;  %327 = vst [vmem:[#allocation2 + $0x30] sm:$0xe] %v326_v46 }
  0x29   :  { %v415_v52 = vshll.u32 %v6274_v48, 16  ;;  %v191_v54 = vsel %vm6209_vm8, %v186_v43, %v190_v49  ;;  %v203_v55 = vrot.slane %v202_v45, 4  ;;  %v6282_v56 = vrot.slane %v399_v47, 6  ;;  %v393_v57 = vld [vmem:[#allocation2 + $0x28] sm:$0x8]  ;;  %v5767_v35 = vld [vmem:[%s7808_s1 + $0x180] sm:$0xff]  }
  0x2a   :  { %192 = vst [vmem:[#allocation2 + $0x4] sm:$0xc] %v191_v54  ;;  %v219_v58 = vrot.slane %v218_v51, 4  ;;  %v394_v63 = vsel %vm6241_vm11, %v389_v5, %v393_v57  ;;  %v222_v60 = vld [vmem:[#allocation2 + $0xc] sm:$0xc]  ;;  %v375_v2 = vrot.slane %v373_v53, 4 }
  0x2b   :  { %v6284_v59 = vrot.slane %v415_v52, 5  ;;  %209 = vst [vmem:[#allocation2 + $0x2c] sm:$0x1] %v203_v55  ;;  %395 = vst [vmem:[#allocation2 + $0x28] sm:$0x8] %v394_v63  ;;  %v223_v43 = vsel %vm6209_vm8, %v218_v51, %v222_v60  ;;  %v402_v3 = vshrl.u32 %v4850_v44, 16 }
  0x2c   :  { %v206_v42 = vld [vmem:[#allocation2 + $0x8] sm:$0xc]  ;;  %225 = vst [vmem:[#allocation2 + $0x30] sm:$0x1] %v219_v58  ;;  %224 = vst [vmem:[#allocation2 + $0xc] sm:$0xc] %v223_v43  ;;  %v376_v5 = vor.u32 %v375_v2, %v6234_v16 }
  0x2d   :  { %v207_v0 = vsel %vm6209_vm8, %v202_v45, %v206_v42  ;;  %v409_v1 = vld [vmem:[#allocation2 + $0x2c] sm:$0x8]  ;;  %v4857_v6 = vld [vmem:[%s7809_s0 + $0x10] sm:$0x7]  ;;  %v404_v10 = vrot.slane %v402_v3, 5  ;;  %v5765_v16 = vld [vmem:[%s7808_s1 + $0x100] sm:$0xff]  }
  0x2e   :  { %208 = vst [vmem:[#allocation2 + $0x8] sm:$0xc] %v207_v0  ;;  %v410_v61 = vsel %vm6241_vm11, %v6282_v56, %v409_v1  ;;  %v500_v8 = vrot.slane %v4857_v6, 6  ;;  %v4858_v9 = vld [vmem:[%s7809_s0 + $0x10] sm:$0x7]  ;;  %v377_v11 = vrot.slane %v376_v5, 4 }
  0x2f   :  { %411 = vst [vmem:[#allocation2 + $0x2c] sm:$0x8] %v410_v61  ;;  %v425_v4 = vld [vmem:[#allocation2 + $0x30] sm:$0x8]  ;;  %v508_v13 = vld [vmem:[#allocation2 + $0x6c] sm:$0x1]  ;;  %v405_v23 = vor.u32 %v404_v10, %v6282_v56 }
  0x30   :  { %v426_v7 = vsel %vm6241_vm11, %v6284_v59, %v425_v4  ;;  %v513_v14 = vshrl.u32 %v4858_v9, 16  ;;  %v516_v15 = vshll.u32 %v4858_v9, 16  ;;  %v501_v17 = vrot.slane %v500_v8, 4  ;;  %504 = vst [vmem:[#allocation2 + $0x48] sm:$0xc] %v500_v8  ;;  %v5775_v40 = vld [vmem:[%s7808_s1 + $0x150] sm:$0xff]  }
  0x31   :  { %427 = vst [vmem:[#allocation2 + $0x30] sm:$0x8] %v426_v7  ;;  %v4866_v18 = vld [vmem:[%s7809_s0 + $0x1c] sm:$0x7]  ;;  %v5757_v19 = vld [vmem:[#allocation2] ss:$36 sps:$4 sm:$0xff]  }
  0x32   :  { %v5759_v21 = vld [vmem:[#allocation2 + $0x4] ss:$36 sps:$4 sm:$0xff]   ;;  %386 = vst [vmem:[#allocation2 + $0x48] sm:$0x3] %v377_v11  ;;  %v515_v22 = vrot.slane %v513_v14, 6  ;;  %v509_v25 = vsel %vm6309_vm14, %v501_v17, %v508_v13  ;;  %v518_v26 = vrot.slane %v516_v15, 7 }
  0x33   :  { %v524_v27 = vld [vmem:[#allocation2 + $0x70] sm:$0x1]  ;;  %v613_v28 = vshrl.u32 %v4866_v18, 16  ;;  %v616_v29 = vshll.u32 %v4866_v18, 16  ;;  %1942 = vmatprep.mubr.bf16.mxu0 %v5759_v21  ;;  %510 = vst [vmem:[#allocation2 + $0x6c] sm:$0x1] %v509_v25 }
  0x34   :  { %v520_v31 = vrot.slane %v515_v22, 4  ;;  %v4875_v32 = vld [vmem:[%s7809_s0 + $0x20] sm:$0x7]  ;;  %1943 = vmatmul.mubr.bf16.vlgmr.msra.gmra.mrb[0].mxu0 %v5757_v19  ;;  %v519_v36 = vor.u32 %v518_v26, %v515_v22  ;;  %v5770_v41 = vld [vmem:[%s7808_s1 + $0x1c8] sm:$0xff]   ;;  %v406_v46 = vrot.slane %v405_v23, 4  ;;  %v418_v56 = vshrl.u32 %v6274_v48, 16 }
  0x35   :  { %v4876_v34 = vld [vmem:[%s7809_s0 + $0x20] sm:$0x7]  ;;  %v615_v37 = vrot.slane %v613_v28, 7  ;;  %v707_v38 = vrot.slane %v4875_v32, 5  ;;  %5349 = vmatpush3.bf16.msra.mxu0 %v5765_v16  ;;  %v5773_v57 = vld [vmem:[%s7808_s1 + $0x188] sm:$0xff]   ;;  %v5778_v61 = vld [vmem:[%s7808_s1 + $0x110] sm:$0xff]  }
  0x36   :  { %v720_v39 = vshrl.u32 %v4876_v34, 16  ;;  %v525_v44 = vsel %vm6309_vm14, %v520_v31, %v524_v27  ;;  %v723_v45 = vshll.u32 %v4876_v34, 16  ;;  %v5762_v47 = vld [vmem:[#allocation2 + $0x8] ss:$36 sps:$4 sm:$0xff]   ;;  %5350 = vmatprep.subr.bf16.mxu0 %v5768_v24  ;;  %523 = vst [vmem:[#allocation2 + $0x4c] sm:$0xc] %v519_v36 }
  0x37   :  { %526 = vst [vmem:[#allocation2 + $0x70] sm:$0x1] %v525_v44  ;;  %v618_v51 = vor.u32 %v616_v29, %v615_v37  ;;  %711 = vst [vmem:[#allocation2 + $0x6c] sm:$0x8] %v707_v38  ;;  %v6351_v53 = vrot.slane %v707_v38, 4  ;;  %v420_v43 = vrot.slane %v418_v56, 4 }
  0x38   :  { %v5764_v49 = vld [vmem:[#allocation2 + $0xc] ss:$36 sps:$4 sm:$0xff]   ;;  %v722_v54 = vrot.slane %v720_v39, 5  ;;  %v725_v55 = vrot.slane %v723_v45, 6  ;;  %412 = vst [vmem:[#allocation2 + $0x50] sm:$0x3] %v406_v46 }
  0x39   :  { %2006 = vmatprep.mubr.bf16.mxu1 %v5764_v49  ;;  %v4859_v58 = vld [vmem:[%s7809_s0 + $0x10] sm:$0xe]  ;;  %v534_v63 = vld [vmem:[#allocation2 + $0x74] sm:$0x1]  ;;  %5351 = vmatpush3.bf16.msra.mxu0 %v5769_v30  ;;  %v4867_v48 = vld [vmem:[%s7809_s0 + $0x1c] sm:$0x7]  ;;  %v421_v7 = vor.u32 %v420_v43, %v6284_v59 }
  0x3a   :  { %v4860_v60 = vld [vmem:[%s7809_s0 + $0x14] sm:$0x7]  ;;  %2007 = vmatmul.mubr.bf16.vlgmr.msra.gmra.mrb[0].mxu1 %v5762_v47  ;;  %v6366_v42 = vor.u32 %v725_v55, %v722_v54  ;;  %v529_v0 = vrot.slane %v4859_v58, 7  ;;  %v544_v2 = vld [vmem:[#allocation2 + $0x78] sm:$0x1]  ;;  %vm712_vm9 = vcmask 1041408   ;;  %5352 = vmatprep.subr.bf16.mxu0 %v5775_v40 }
  0x3b   :  { %v539_v1 = vrot.slane %v4860_v60, 6  ;;  %5389 = vmatpush3.bf16.msra.mxu1 %v5767_v35  ;;  %v622_v3 = vld [vmem:[#allocation2 + $0x6c] sm:$0x7]  ;;  %v4868_v4 = vld [vmem:[%s7809_s0 + $0x1c] sm:$0xe]  ;;  %v5780_v11 = vld [vmem:[%s7808_s1 + $0x1d0] sm:$0xff]  }
  0x3c   :  { %v4869_v5 = vld [vmem:[%s7809_s0 + $0x20] sm:$0x7]  ;;  %5390 = vmatprep.subr.bf16.mxu1 %v5770_v41  ;;  %v623_v6 = vsel %vm6347_vm5, %v618_v51, %v622_v3  ;;  %730 = vst [vmem:[#allocation2 + $0x70] sm:$0x8] %v6366_v42  ;;  %v530_v8 = vrot.slane %v529_v0, 4  ;;  %v631_v14 = vshrl.u32 %v4868_v4, 16 }
  0x3d   :  { %533 = vst [vmem:[#allocation2 + $0x50] sm:$0xc] %v529_v0  ;;  %543 = vst [vmem:[#allocation2 + $0x54] sm:$0xc] %v539_v1  ;;  %v4877_v9 = vld [vmem:[%s7809_s0 + $0x20] sm:$0xe]  ;;  %5353 = vmatpush3.bf16.msra.mxu0 %v5778_v61 }
  0x3e   :  { %v4878_v10 = vld [vmem:[%s7809_s0 + $0x24] sm:$0x7]  ;;  %624 = vst [vmem:[#allocation2 + $0x6c] sm:$0x7] %v623_v6  ;;  %v540_v13 = vrot.slane %v539_v1, 4  ;;  %v634_v15 = vshll.u32 %v4868_v4, 16  ;;  %v535_v18 = vsel %vm6309_vm14, %v530_v8, %v534_v63 }
  0x3f   :  { %v646_v59 = vshrl.u32 %v4869_v5, 16  ;;  %v626_v16 = vld [vmem:[#allocation2 + $0x70] sm:$0x7]  ;;  %v422_v17 = vrot.slane %v421_v7, 4  ;;  %v736_v19 = vrot.slane %v4877_v9, 6  ;;  %5391 = vmatpush3.bf16.msra.mxu1 %v5773_v57  ;;  %v633_v24 = vrot.slane %v631_v14, 4 }
  0x40   :  { %v5781_v21 = vld [vmem:[%s7808_s1 + $0x190] sm:$0xff]   ;;  %v627_v22 = vsel %vm6347_vm5, %v4867_v48, %v626_v16  ;;  %536 = vst [vmem:[#allocation2 + $0x74] sm:$0x1] %v535_v18  ;;  %v545_v23 = vsel %vm6309_vm14, %v540_v13, %v544_v2  ;;  %v636_v25 = vrot.slane %v634_v15, 5  ;;  %v649_v27 = vshll.u32 %v4869_v5, 16  ;;  %5392 = vmatprep.subr.bf16.mxu1 %v5780_v11  ;;  %v5782_v29 = vld [vmem:[%s7808_s1 + $0x158] sm:$0xff]  }
  0x41   :  { %628 = vst [vmem:[#allocation2 + $0x70] sm:$0x7] %v627_v22  ;;  %428 = vst [vmem:[#allocation2 + $0x54] sm:$0x3] %v422_v17  ;;  %v648_v26 = vrot.slane %v646_v59, 7  ;;  %v746_v28 = vrot.slane %v4878_v10, 5  ;;  %5354 = vmatprep.subr.bf16.mxu0 %v5782_v29 }
  0x42   :  { %546 = vst [vmem:[#allocation2 + $0x78] sm:$0x1] %v545_v23  ;;  %740 = vst [vmem:[#allocation2 + $0x74] sm:$0x8] %v736_v19  ;;  %vm827_vm10 = vsmask.f32 7942  ;;  %v637_v30 = vor.u32 %v636_v25, %v633_v24 }
  0x43   :  { %v727_v31 = vrot.slane %v6366_v42, 4  ;;  %750 = vst [vmem:[#allocation2 + $0x78] sm:$0x8] %v746_v28  ;;  %v5783_v32 = vld [vmem:[%s7808_s1 + $0x118] sm:$0xff]   ;;  %5393 = vmatpush3.bf16.msra.mxu1 %v5781_v21  ;;  %vm713_vm3 = vsmask.f32 1280  ;;  %v651_v37 = vor.u32 %v649_v27, %v648_v26  ;;  %vm6453_vm15 = vmand %vm299_vm4, %vm827_vm10 }
  0x44   :  { %v638_v34 = vrot.slane %v637_v30, 4  ;;  %v5784_v35 = vld [vmem:[%s7808_s1 + $0x1d8] sm:$0xff]   ;;  %5355 = vmatpush3.bf16.msra.mxu0 %v5783_v32  ;;  %v715_v36 = vld [vmem:[#allocation2 + $0x90] sm:$0x3]  ;;  %v6409_v38 = vrot.slane %v736_v19, 4  ;;  %vm6413_vm1 = vmand %vm712_vm9, %vm713_vm3  ;;  %v747_v57 = vrot.slane %v746_v28, 4 }
  0x45   :  { %5394 = vmatprep.subr.bf16.mxu1 %v5784_v35  ;;  %v731_v40 = vld [vmem:[#allocation2 + $0x94] sm:$0x3]  ;;  %v4884_v41 = vld [vmem:[%s7809_s0 + $0x24] sm:$0x7]  ;;  %v716_v45 = vsel %vm6413_vm1, %v6351_v53, %v715_v36  ;;  %v5774_v55 = vld [vmem:[#allocation2 + $0x48] ss:$36 sps:$4 sm:$0xff]  }
  0x46   :  { %v732_v46 = vsel %vm6413_vm1, %v727_v31, %v731_v40  ;;  %v819_v47 = vshrl.u32 %v4884_v41, 16  ;;  %v822_v49 = vshll.u32 %v4884_v41, 16  ;;  %v4885_v51 = vld [vmem:[%s7809_s0 + $0x24] sm:$0x7]  ;;  %717 = vst [vmem:[#allocation2 + $0x90] sm:$0x3] %v716_v45 }
  0x47   :  { %v640_v44 = vld [vmem:[#allocation2 + $0x74] sm:$0x7]  ;;  %733 = vst [vmem:[#allocation2 + $0x94] sm:$0x3] %v732_v46  ;;  %v5787_v60 = vld [vmem:[%s7808_s1 + $0x198] sm:$0xff]   ;;  %v834_v1 = vrot.slane %v4885_v51, 7 }
  0x48   :  { %v5771_v54 = vld [vmem:[#allocation2 + $0x4c] ss:$36 sps:$4 sm:$0xff]   ;;  %v641_v56 = vsel %vm6347_vm5, %v638_v34, %v640_v44  ;;  %v821_v53 = vrot.slane %v819_v47, 6  ;;  %v824_v63 = vrot.slane %v822_v49, 7  ;;  %v4893_v42 = vld [vmem:[%s7809_s0 + $0x28] sm:$0x7]  ;;  %5395 = vmatpush3.bf16.msra.mxu1 %v5787_v60 }
  0x49   :  { %642 = vst [vmem:[#allocation2 + $0x74] sm:$0x7] %v641_v56  ;;  %v653_v58 = vld [vmem:[#allocation2 + $0x78] sm:$0x7]  ;;  %1950 = vmatprep.mubr.bf16.mxu0 %v5771_v54  ;;  %v917_v43 = vld [vmem:[#allocation2 + $0xb4] sm:$0x7] }
  0x4a   :  { %v654_v48 = vsel %vm6347_vm5, %v651_v37, %v653_v58  ;;  %v4894_v0 = vld [vmem:[%s7809_s0 + $0x28] sm:$0x7]  ;;  %1951 = vmatmul.mubr.bf16.gmra.mrb[4].mxu0 %v5774_v55  ;;  %v918_v2 = vsel %vm6162_vm2, %v4893_v42, %v917_v43  ;;  %v4905_v4 = vld [vmem:[%s7809_s0 + $0x2c] sm:$0x7]  ;;  %v825_v5 = vor.u32 %v824_v63, %v821_v53  ;;  %v5789_v14 = vld [vmem:[%s7808_s1 + $0x160] sm:$0xff]  }
  0x4b   :  { %655 = vst [vmem:[#allocation2 + $0x78] sm:$0x7] %v654_v48  ;;  %v922_v61 = vshrl.u32 %v4894_v0, 16  ;;  %v925_v3 = vshll.u32 %v4894_v0, 16  ;;  %919 = vst [vmem:[#allocation2 + $0xb4] sm:$0x7] %v918_v2  ;;  %5356 = vmatprep.subr.bf16.mxu0 %v5789_v14 }
  0x4c   :  { %v997_v6 = vshrl.u32 %v4905_v4, 16  ;;  %v1000_v7 = vshll.u32 %v4905_v4, 16  ;;  %v6449_v8 = vld [vmem:[%s7809_s0 + $0x2c] sm:$0x7]  ;;  %v931_v15 = vld [vmem:[#allocation2 + $0xb8] sm:$0x7] }
  0x4d   :  { %v924_v10 = vrot.slane %v922_v61, 4  ;;  %v927_v11 = vrot.slane %v925_v3, 5  ;;  %v1013_v13 = vrot.slane %v6449_v8, 6  ;;  %v829_v17 = vld [vmem:[#allocation2 + $0x90] sm:$0xe]  ;;  %v5792_v35 = vld [vmem:[%s7808_s1 + $0x120] sm:$0xff]  }
  0x4e   :  { %v999_v59 = vrot.slane %v997_v6, 5  ;;  %v1002_v16 = vrot.slane %v1000_v7, 6  ;;  %v836_v18 = vld [vmem:[#allocation2 + $0x94] sm:$0xe]  ;;  %v741_v21 = vld [vmem:[#allocation2 + $0x98] sm:$0x3]  ;;  %v830_v22 = vsel %vm6453_vm15, %v825_v5, %v829_v17  ;;  %5357 = vmatpush3.bf16.msra.mxu0 %v5792_v35 }
  0x4f   :  { %v928_v19 = vor.u32 %v927_v11, %v924_v10  ;;  %v837_v23 = vsel %vm6453_vm15, %v834_v1, %v836_v18  ;;  %v742_v25 = vsel %vm6413_vm1, %v6409_v38, %v741_v21  ;;  %v751_v26 = vld [vmem:[#allocation2 + $0x9c] sm:$0x3]  ;;  %v4886_v27 = vld [vmem:[%s7809_s0 + $0x24] sm:$0xe]  ;;  %v4887_v28 = vld [vmem:[%s7809_s0 + $0x28] sm:$0x7] }
  0x50   :  { %v6465_v24 = vor.u32 %v1002_v16, %v999_v59  ;;  %831 = vst [vmem:[#allocation2 + $0x90] sm:$0xe] %v830_v22  ;;  %838 = vst [vmem:[#allocation2 + $0x94] sm:$0xe] %v837_v23  ;;  %v752_v30 = vsel %vm6413_vm1, %v747_v57, %v751_v26  ;;  %v841_v31 = vshrl.u32 %v4886_v27, 16  ;;  %v844_v32 = vshll.u32 %v4886_v27, 16 }
  0x51   :  { %v929_v29 = vrot.slane %v928_v19, 4  ;;  %743 = vst [vmem:[#allocation2 + $0x98] sm:$0x3] %v742_v25  ;;  %v4895_v34 = vld [vmem:[%s7809_s0 + $0x28] sm:$0xe]  ;;  %v853_v38 = vshrl.u32 %v4887_v28, 16 }
  0x52   :  { %v5776_v36 = vld [vmem:[#allocation2 + $0x54] ss:$36 sps:$4 sm:$0xff]   ;;  %753 = vst [vmem:[#allocation2 + $0x9c] sm:$0x3] %v752_v30  ;;  %v843_v44 = vrot.slane %v841_v31, 7  ;;  %v856_v45 = vshll.u32 %v4887_v28, 16 }
  0x53   :  { %v5779_v37 = vld [vmem:[#allocation2 + $0x50] ss:$36 sps:$4 sm:$0xff]   ;;  %v932_v40 = vsel %vm6162_vm2, %v929_v29, %v931_v15  ;;  %v4896_v46 = vrot.slane %v4895_v34, 9  ;;  %v5794_v47 = vld [vmem:[%s7808_s1 + $0x1e0] sm:$0xff]   ;;  %2014 = vmatprep.mubr.bf16.mxu1 %v5776_v36  ;;  %v855_v51 = vrot.slane %v853_v38, 6  ;;  %v5796_v48 = vld [vmem:[%s7808_s1 + $0x168] sm:$0xff]  }
  0x54   :  { %v1007_v41 = vld [vmem:[#allocation2 + $0xb4] sm:$0xc]  ;;  %933 = vst [vmem:[#allocation2 + $0xb8] sm:$0x7] %v932_v40  ;;  %v939_v54 = vld [vmem:[#allocation2 + $0xbc] sm:$0x7]  ;;  %2015 = vmatmul.mubr.bf16.gmra.mrb[4].mxu1 %v5779_v37  ;;  %v846_v57 = vor.u32 %v844_v32, %v843_v44  ;;  %5396 = vmatprep.subr.bf16.mxu1 %v5794_v47 }
  0x55   :  { %v1008_v49 = vsel %vm6209_vm8, %v6465_v24, %v1007_v41  ;;  %v4897_v55 = vld [vmem:[%s7809_s0 + $0x2c] sm:$0x7]  ;;  %v5795_v56 = vld [vmem:[%s7808_s1 + $0x1a0] sm:$0xff]   ;;  %v858_v58 = vrot.slane %v856_v45, 7  ;;  %v940_v53 = vsel %vm6162_vm2, %v4896_v46, %v939_v54  ;;  %v4908_v1 = vld [vmem:[%s7809_s0 + $0x30] sm:$0x7]  ;;  %5358 = vmatprep.subr.bf16.mxu0 %v5796_v48 }
  0x56   :  { %1009 = vst [vmem:[#allocation2 + $0xb4] sm:$0xc] %v1008_v49  ;;  %v943_v63 = vld [vmem:[#allocation2 + $0xc0] sm:$0x7]  ;;  %v4907_v60 = vld [vmem:[%s7809_s0 + $0x2c] sm:$0xe]  ;;  %5397 = vmatpush3.bf16.msra.mxu1 %v5795_v56 }
  0x57   :  { %941 = vst [vmem:[#allocation2 + $0xbc] sm:$0x7] %v940_v53  ;;  %v944_v42 = vsel %vm6162_vm2, %v4897_v55, %v943_v63  ;;  %v1023_v43 = vshrl.u32 %v4907_v60, 16  ;;  %v1026_v0 = vshll.u32 %v4907_v60, 16  ;;  %v859_v2 = vor.u32 %v858_v58, %v855_v51  ;;  %v5797_v7 = vld [vmem:[%s7808_s1 + $0x128] sm:$0xff]   ;;  %v5802_v8 = vld [vmem:[%s7808_s1 + $0x170] sm:$0xff]  }
  0x58   :  { %945 = vst [vmem:[#allocation2 + $0xc0] sm:$0x7] %v944_v42  ;;  %v1039_v61 = vshrl.u32 %v4908_v1, 16  ;;  %v1042_v3 = vshll.u32 %v4908_v1, 16  ;;  %v848_v4 = vld [vmem:[#allocation2 + $0x98] sm:$0xe]  ;;  %5359 = vmatpush3.bf16.msra.mxu0 %v5797_v7 }
  0x59   :  { %v1025_v5 = vrot.slane %v1023_v43, 6  ;;  %v1028_v6 = vrot.slane %v1026_v0, 7  ;;  %v849_v10 = vsel %vm6453_vm15, %v846_v57, %v848_v4  ;;  %v861_v11 = vld [vmem:[#allocation2 + $0x9c] sm:$0xe]  ;;  %v5798_v22 = vld [vmem:[%s7808_s1 + $0x1e8] sm:$0xff]   ;;  %v1004_v23 = vrot.slane %v6465_v24, 4  ;;  %5360 = vmatprep.subr.bf16.mxu0 %v5802_v8 }
  0x5a   :  { %v1041_v14 = vrot.slane %v1039_v61, 5  ;;  %v1044_v15 = vrot.slane %v1042_v3, 6  ;;  %850 = vst [vmem:[#allocation2 + $0x98] sm:$0xe] %v849_v10  ;;  %v862_v59 = vsel %vm6453_vm15, %v859_v2, %v861_v11  ;;  %v1014_v25 = vrot.slane %v1013_v13, 4  ;;  %v5800_v26 = vld [vmem:[%s7808_s1 + $0x1a8] sm:$0xff]   ;;  %5398 = vmatprep.subr.bf16.mxu1 %v5798_v22 }
  0x5b   :  { %v1029_v16 = vor.u32 %v1028_v6, %v1025_v5  ;;  %v1017_v17 = vld [vmem:[#allocation2 + $0xb8] sm:$0xc]  ;;  %863 = vst [vmem:[#allocation2 + $0x9c] sm:$0xe] %v862_v59  ;;  %1010 = vst [vmem:[#allocation2 + $0xd8] sm:$0x1] %v1004_v23  ;;  %5399 = vmatpush3.bf16.msra.mxu1 %v5800_v26 }
  0x5c   :  { %v1045_v18 = vor.u32 %v1044_v15, %v1041_v14  ;;  %v1018_v19 = vsel %vm6209_vm8, %v1013_v13, %v1017_v17  ;;  %1020 = vst [vmem:[#allocation2 + $0xdc] sm:$0x1] %v1014_v25  ;;  %v5804_v30 = vld [vmem:[%s7808_s1 + $0x130] sm:$0xff]   ;;  %v5808_v36 = vld [vmem:[%s7808_s1 + $0x178] sm:$0xff]   ;;  %v4823_v46 = vld [vmem:[%s7809_s0 + $0x4] sm:$0x7] }
  0x5d   :  { %1019 = vst [vmem:[#allocation2 + $0xb8] sm:$0xc] %v1018_v19  ;;  %v1030_v13 = vrot.slane %v1029_v16, 4  ;;  %v5806_v31 = vld [vmem:[%s7808_s1 + $0x1f0] sm:$0xff]   ;;  %5361 = vmatpush3.bf16.msra.mxu0 %v5804_v30  ;;  %v5809_v38 = vld [vmem:[%s7808_s1 + $0x138] sm:$0xff]   ;;  %v118_v49 = vshrl.u32 %v4823_v46, 16 }
  0x5e   :  { %v1033_v21 = vld [vmem:[#allocation2 + $0xbc] sm:$0xc]  ;;  %v1046_v24 = vrot.slane %v1045_v18, 4  ;;  %5400 = vmatprep.subr.bf16.mxu1 %v5806_v31  ;;  %v5807_v32 = vld [vmem:[%s7808_s1 + $0x1b0] sm:$0xff]   ;;  %5362 = vmatprep.subr.bf16.mxu0 %v5808_v36  ;;  %v121_v51 = vshll.u32 %v4823_v46, 16  ;;  %v6594_v19 = vld [vmem:[%s7808_s1 + $0x200] sm:$0xff]  }
  0x5f   :  { %v1034_v27 = vsel %vm6209_vm8, %v1029_v16, %v1033_v21  ;;  %v1049_v28 = vld [vmem:[#allocation2 + $0xc0] sm:$0xc]  ;;  %1036 = vst [vmem:[#allocation2 + $0xe0] sm:$0x1] %v1030_v13  ;;  %v5788_v35 = vld [vmem:[#allocation2 + $0x90] ss:$36 sps:$4 sm:$0xff]   ;;  %5401 = vmatpush3.bf16.msra.mxu1 %v5807_v32 }
  0x60   :  { %1035 = vst [vmem:[#allocation2 + $0xbc] sm:$0xc] %v1034_v27  ;;  %v1050_v29 = vsel %vm6209_vm8, %v1045_v18, %v1049_v28  ;;  %1052 = vst [vmem:[#allocation2 + $0xe4] sm:$0x1] %v1046_v24  ;;  %v5810_v45 = vld [vmem:[%s7808_s1 + $0x1f8] sm:$0xff]   ;;  %v120_v63 = vrot.slane %v118_v49, 4 }
  0x61   :  { %1051 = vst [vmem:[#allocation2 + $0xc0] sm:$0xc] %v1050_v29  ;;  %5363 = vmatpush3.bf16.msra.mxu0 %v5809_v38  ;;  %v5814_v54 = vld [vmem:[%s7808_s1 + $0x1b8] sm:$0xff]   ;;  %5402 = vmatprep.subr.bf16.mxu1 %v5810_v45  ;;  %v4824_v57 = vld [vmem:[%s7809_s0 + $0x4] sm:$0xe]  ;;  %v123_v60 = vrot.slane %v121_v51, 5 }
  0x62   :  { %v135_v58 = vld [vmem:[#allocation2 + $0x14] sm:$0x7]  ;;  %v6568_v53 = vld [vmem:[%s7809_s0 + $0x8] sm:$0x7]  ;;  %v4825_v48 = vrot.slane %v4824_v57, 9  ;;  %5659 = vmatprep.subr.bf16.mxu0 %v6594_v19 }
  0x63   :  { %v1152_v37 = vld [vmem:[#allocation2 + $0xd8] sm:$0xff]  ;;  %v228_v42 = vrot.slane %v6568_v53, 6  ;;  %v4835_v43 = vld [vmem:[%s7809_s0 + $0x8] sm:$0xe]  ;;  %5403 = vmatpush3.bf16.msra.mxu1 %v5814_v54  ;;  %v127_v1 = vld [vmem:[#allocation2 + $0x10] sm:$0x7]  ;;  %v124_v4 = vor.u32 %v123_v60, %v120_v63 }
  0x64   :  { %v5785_v34 = vld [vmem:[#allocation2 + $0x94] ss:$36 sps:$4 sm:$0xff]   ;;  %v4943_v44 = vcombine.high %v1152_v37, %v1152_v37  ;;  %v4942_v55 = vcombine.low %v1152_v37, %v1152_v37  ;;  %v238_v2 = vshrl.u32 %v4835_v43, 16  ;;  %v241_v61 = vshll.u32 %v4835_v43, 16  ;;  %v4843_v3 = vld [vmem:[%s7809_s0 + $0xc] sm:$0x7] }
  0x65   :  { %1958 = vmatprep.mubr.bf16.mxu0 %v5785_v34  ;;  %v136_v5 = vsel %vm6162_vm2, %v4825_v48, %v135_v58  ;;  %v229_v6 = vrot.slane %v228_v42, 4  ;;  %v330_v7 = vshrl.u32 %v4843_v3, 16  ;;  %v4844_v10 = vld [vmem:[%s7809_s0 + $0xc] sm:$0xe]  ;;  %v341_v11 = vld [vmem:[#allocation2 + $0x38] sm:$0xe] }
  0x66   :  { %1959 = vmatmul.mubr.bf16.gmra.mrb[8].mxu0 %v5788_v35  ;;  %137 = vst [vmem:[#allocation2 + $0x14] sm:$0x7] %v136_v5  ;;  %v240_v14 = vrot.slane %v238_v2, 6  ;;  %v243_v15 = vrot.slane %v241_v61, 7  ;;  %v333_v59 = vshll.u32 %v4843_v3, 16  ;;  %v342_v17 = vsel %vm6188_vm7, %v4844_v10, %v341_v11 }
  0x67   :  { %v5793_v41 = vld [vmem:[#allocation2 + $0x98] ss:$36 sps:$4 sm:$0xff]   ;;  %1966 = vmatprep.mubr.bf16.mxu0 %v4943_v44  ;;  %v1153_v47 = vld [vmem:[#allocation2 + $0xe0] sm:$0xff]  ;;  %v337_v16 = vld [vmem:[#allocation2 + $0x34] sm:$0xe]  ;;  %v125_v21 = vrot.slane %v124_v4, 4 }
  0x68   :  { %v5790_v40 = vld [vmem:[#allocation2 + $0x9c] ss:$36 sps:$4 sm:$0xff]   ;;  %v4945_v56 = vcombine.high %v1153_v47, %v1153_v47  ;;  %v4944_v0 = vcombine.low %v1153_v47, %v1153_v47  ;;  %v6589_v18 = vld [vmem:[%s7809_s0 + $0x10] sm:$0x7]  ;;  %235 = vst [vmem:[#allocation2 + $0x34] sm:$0x1] %v229_v6  ;;  %v244_v26 = vor.u32 %v243_v15, %v240_v14 }
  0x69   :  { %2022 = vmatprep.mubr.bf16.mxu1 %v5790_v40  ;;  %v332_v22 = vrot.slane %v330_v7, 7  ;;  %343 = vst [vmem:[#allocation2 + $0x38] sm:$0xe] %v342_v17  ;;  %v431_v23 = vrot.slane %v6589_v18, 5  ;;  %v6600_v25 = vld [vmem:[%s7809_s0 + $0x10] sm:$0xe]  ;;  %v128_v29 = vsel %vm6162_vm2, %v125_v21, %v127_v1 }
  0x6a   :  { %2023 = vmatmul.mubr.bf16.gmra.mrb[8].mxu1 %v5793_v41  ;;  %v441_v27 = vshll.u32 %v6600_v25, 16  ;;  %v444_v28 = vshrl.u32 %v6600_v25, 16  ;;  %v4826_v13 = vld [vmem:[%s7809_s0 + $0x8] sm:$0x7]  ;;  %129 = vst [vmem:[#allocation2 + $0x10] sm:$0x7] %v128_v29 }
  0x6b   :  { %2030 = vmatprep.mubr.bf16.mxu1 %v4945_v56  ;;  %v335_v8 = vor.u32 %v333_v59, %v332_v22  ;;  %v245_v24 = vrot.slane %v244_v26, 4  ;;  %v140_v31 = vld [vmem:[#allocation2 + $0x18] sm:$0x7]  ;;  %v4827_v32 = vld [vmem:[%s7809_s0 + $0x8] sm:$0x7]  ;;  %v432_v15 = vrot.slane %v431_v23, 4 }
  0x6c   :  { %v6610_v30 = vrot.slane %v441_v27, 6  ;;  %v141_v35 = vsel %vm6162_vm2, %v4826_v13, %v140_v31  ;;  %v145_v36 = vshrl.u32 %v4827_v32, 16  ;;  %v148_v37 = vshll.u32 %v4827_v32, 16  ;;  %v4836_v38 = vld [vmem:[%s7809_s0 + $0xc] sm:$0x7] }
  0x6d   :  { %v338_v34 = vsel %vm6188_vm7, %v335_v8, %v337_v16  ;;  %251 = vst [vmem:[#allocation2 + $0x38] sm:$0x1] %v245_v24  ;;  %142 = vst [vmem:[#allocation2 + $0x18] sm:$0x7] %v141_v35  ;;  %v255_v40 = vshrl.u32 %v4836_v38, 16  ;;  %v258_v41 = vshll.u32 %v4836_v38, 16 }
  0x6e   :  { %1967 = vmatmul.mubr.bf16.gmra.mrb[12].mxu0 %v4942_v55  ;;  %339 = vst [vmem:[#allocation2 + $0x34] sm:$0xe] %v338_v34  ;;  %v6625_v44 = vld [vmem:[%s7809_s0 + $0xc] sm:$0x7]  ;;  %v4845_v45 = vld [vmem:[%s7809_s0 + $0x10] sm:$0x7] }
  0x6f   :  { %v248_v46 = vld [vmem:[#allocation2 + $0x14] sm:$0xc]  ;;  %v147_v47 = vrot.slane %v145_v36, 4  ;;  %v150_v49 = vrot.slane %v148_v37, 5  ;;  %v271_v51 = vrot.slane %v6625_v44, 6  ;;  %v347_v54 = vrot.slane %v4845_v45, 7 }
  0x70   :  { %v249_v55 = vsel %vm6209_vm8, %v244_v26, %v248_v46  ;;  %v451_v56 = vld [vmem:[#allocation2 + $0x38] sm:$0x8]  ;;  %v257_v57 = vrot.slane %v255_v40, 5  ;;  %v260_v58 = vrot.slane %v258_v41, 6  ;;  %v349_v63 = vld [vmem:[#allocation2 + $0x3c] sm:$0xe] }
  0x71   :  { %250 = vst [vmem:[#allocation2 + $0x14] sm:$0xc] %v249_v55  ;;  %v452_v60 = vsel %vm6241_vm11, %v6610_v30, %v451_v56  ;;  %v151_v48 = vor.u32 %v150_v49, %v147_v47  ;;  %v154_v43 = vld [vmem:[#allocation2 + $0x1c] sm:$0x7]  ;;  %v350_v1 = vsel %vm6188_vm7, %v347_v54, %v349_v63  ;;  %v4846_v2 = vld [vmem:[%s7809_s0 + $0x10] sm:$0x7] }
  0x72   :  { %2031 = vmatmul.mubr.bf16.gmra.mrb[12].mxu1 %v4944_v0  ;;  %v272_v0 = vrot.slane %v271_v51, 4  ;;  %453 = vst [vmem:[#allocation2 + $0x38] sm:$0x8] %v452_v60  ;;  %v261_v61 = vor.u32 %v260_v58, %v257_v57  ;;  %351 = vst [vmem:[#allocation2 + $0x3c] sm:$0xe] %v350_v1  ;;  %v354_v3 = vshrl.u32 %v4846_v2, 16 }
  0x73   :  { %v357_v4 = vshll.u32 %v4846_v2, 16  ;;  %v6646_v5 = vld [vmem:[%s7809_s0 + $0x14] sm:$0x7]  ;;  %v232_v7 = vld [vmem:[#allocation2 + $0x10] sm:$0xc]  ;;  %v152_v10 = vrot.slane %v151_v48, 4 }
  0x74   :  { %v6651_v6 = vld [vmem:[%s7809_s0 + $0x14] sm:$0x7]  ;;  %278 = vst [vmem:[#allocation2 + $0x40] sm:$0x1] %v272_v0  ;;  %v361_v11 = vld [vmem:[#allocation2 + $0x40] sm:$0xe]  ;;  %v233_v59 = vsel %vm6209_vm8, %v228_v42, %v232_v7 }
  0x75   :  { %v458_v14 = vshll.u32 %v6646_v5, 16  ;;  %v262_v16 = vrot.slane %v261_v61, 4  ;;  %v356_v17 = vrot.slane %v354_v3, 7  ;;  %234 = vst [vmem:[#allocation2 + $0x10] sm:$0xc] %v233_v59  ;;  %v155_v22 = vsel %vm6162_vm2, %v152_v10, %v154_v43 }
  0x76   :  { %v435_v21 = vld [vmem:[#allocation2 + $0x34] sm:$0x8]  ;;  %v265_v25 = vld [vmem:[#allocation2 + $0x18] sm:$0xc]  ;;  %v474_v26 = vrot.slane %v6651_v6, 5  ;;  %v446_v27 = vrot.slane %v444_v28, 5 }
  0x77   :  { %438 = vst [vmem:[#allocation2 + $0x58] sm:$0x3] %v432_v15  ;;  %v436_v53 = vsel %vm6241_vm11, %v431_v23, %v435_v21  ;;  %156 = vst [vmem:[#allocation2 + $0x1c] sm:$0x7] %v155_v22  ;;  %v266_v42 = vsel %vm6209_vm8, %v261_v61, %v265_v25  ;;  %v359_v29 = vor.u32 %v357_v4, %v356_v17  ;;  %v6669_v8 = vrot.slane %v458_v14, 5  ;;  %v5819_v15 = vld [vmem:[%s7808_s1 + $0x208] sm:$0xff]  }
  0x78   :  { %268 = vst [vmem:[#allocation2 + $0x3c] sm:$0x1] %v262_v16  ;;  %v4861_v13 = vld [vmem:[%s7809_s0 + $0x14] sm:$0x7]  ;;  %437 = vst [vmem:[#allocation2 + $0x34] sm:$0x8] %v436_v53  ;;  %v447_v18 = vor.u32 %v446_v27, %v6610_v30 }
  0x79   :  { %v4862_v28 = vld [vmem:[%s7809_s0 + $0x14] sm:$0xe]  ;;  %267 = vst [vmem:[#allocation2 + $0x18] sm:$0xc] %v266_v42  ;;  %v549_v23 = vshrl.u32 %v4861_v13, 16  ;;  %v552_v24 = vshll.u32 %v4861_v13, 16  ;;  %v362_v32 = vsel %vm6188_vm7, %v359_v29, %v361_v11 }
  0x7a   :  { %v565_v31 = vrot.slane %v4862_v28, 7  ;;  %v560_v34 = vld [vmem:[#allocation2 + $0x7c] sm:$0x1]  ;;  %v570_v35 = vld [vmem:[#allocation2 + $0x80] sm:$0x1]  ;;  %v448_v40 = vrot.slane %v447_v18, 4 }
  0x7b   :  { %v4871_v36 = vld [vmem:[%s7809_s0 + $0x20] sm:$0xe]  ;;  %v4879_v37 = vld [vmem:[%s7809_s0 + $0x24] sm:$0x7]  ;;  %363 = vst [vmem:[#allocation2 + $0x40] sm:$0xe] %v362_v32 }
  0x7c   :  { %v468_v38 = vld [vmem:[#allocation2 + $0x3c] sm:$0x8]  ;;  %v551_v30 = vrot.slane %v549_v23, 6  ;;  %v554_v41 = vrot.slane %v552_v24, 7  ;;  %v566_v45 = vrot.slane %v565_v31, 4  ;;  %v662_v47 = vshrl.u32 %v4871_v36, 16 }
  0x7d   :  { %569 = vst [vmem:[#allocation2 + $0x5c] sm:$0xc] %v565_v31  ;;  %v469_v46 = vsel %vm6241_vm11, %v6669_v8, %v468_v38  ;;  %v665_v49 = vshll.u32 %v4871_v36, 16  ;;  %v756_v54 = vshrl.u32 %v4879_v37, 16  ;;  %v4880_v55 = vld [vmem:[%s7809_s0 + $0x24] sm:$0xe] }
  0x7e   :  { %470 = vst [vmem:[#allocation2 + $0x3c] sm:$0x8] %v469_v46  ;;  %454 = vst [vmem:[#allocation2 + $0x5c] sm:$0x3] %v448_v40  ;;  %v555_v56 = vor.u32 %v554_v41, %v551_v30  ;;  %v556_v57 = vrot.slane %v551_v30, 4  ;;  %v571_v58 = vsel %vm6309_vm14, %v566_v45, %v570_v35  ;;  %v759_v63 = vshll.u32 %v4879_v37, 16 }
  0x7f   :  { %572 = vst [vmem:[#allocation2 + $0x80] sm:$0x1] %v571_v58  ;;  %v664_v60 = vrot.slane %v662_v47, 4  ;;  %v667_v48 = vrot.slane %v665_v49, 5  ;;  %v758_v43 = vrot.slane %v756_v54, 5  ;;  %v772_v0 = vrot.slane %v4880_v55, 6 }
  0x80   :  { %v275_v1 = vld [vmem:[#allocation2 + $0x1c] sm:$0xc]  ;;  %559 = vst [vmem:[#allocation2 + $0x58] sm:$0xc] %v555_v56  ;;  %v561_v2 = vsel %vm6309_vm14, %v556_v57, %v560_v34  ;;  %v761_v61 = vrot.slane %v759_v63, 6  ;;  %v461_v3 = vshrl.u32 %v6646_v5, 16 }
  0x81   :  { %v475_v4 = vrot.slane %v474_v26, 4  ;;  %v5811_v7 = vld [vmem:[#allocation2 + $0x10] ss:$36 sps:$4 sm:$0xff]   ;;  %v276_v11 = vsel %vm6209_vm8, %v271_v51, %v275_v1  ;;  %562 = vst [vmem:[#allocation2 + $0x7c] sm:$0x1] %v561_v2  ;;  %v668_v14 = vor.u32 %v667_v48, %v664_v60  ;;  %v6706_v5 = vrot.slane %v772_v0, 4 }
  0x82   :  { %v5813_v10 = vld [vmem:[#allocation2 + $0x14] ss:$36 sps:$4 sm:$0xff]   ;;  %776 = vst [vmem:[#allocation2 + $0x80] sm:$0x8] %v772_v0  ;;  %277 = vst [vmem:[#allocation2 + $0x1c] sm:$0xc] %v276_v11  ;;  %v762_v59 = vor.u32 %v761_v61, %v758_v43 }
  0x83   :  { %v463_v16 = vrot.slane %v461_v3, 4  ;;  %481 = vst [vmem:[#allocation2 + $0x64] sm:$0x3] %v475_v4  ;;  %v4863_v44 = vld [vmem:[%s7809_s0 + $0x18] sm:$0x7]  ;;  %2070 = vmatprep.mubr.bf16.mxu0 %v5813_v10  ;;  %v669_v51 = vrot.slane %v668_v14, 4 }
  0x84   :  { %v478_v17 = vld [vmem:[#allocation2 + $0x40] sm:$0x8]  ;;  %v576_v21 = vrot.slane %v4863_v44, 6  ;;  %v4864_v22 = vld [vmem:[%s7809_s0 + $0x18] sm:$0x7]  ;;  %2071 = vmatmul.mubr.bf16.vlgmr.msra.gmra.mrb[16].mxu0 %v5811_v7  ;;  %v763_v53 = vrot.slane %v762_v59, 4 }
  0x85   :  { %v479_v25 = vsel %vm6241_vm11, %v474_v26, %v478_v17  ;;  %v4870_v27 = vld [vmem:[%s7809_s0 + $0x20] sm:$0x7]  ;;  %766 = vst [vmem:[#allocation2 + $0x7c] sm:$0x8] %v762_v59  ;;  %v5823_v42 = vld [vmem:[%s7808_s1 + $0x210] sm:$0xff]   ;;  %v464_v29 = vor.u32 %v463_v16, %v6669_v8  ;;  %v586_v28 = vshrl.u32 %v4864_v22, 16  ;;  %5660 = vmatpush3.bf16.msra.mxu0 %v6594_v19 }
  0x86   :  { %v581_v13 = vld [vmem:[#allocation2 + $0x84] sm:$0x1]  ;;  %480 = vst [vmem:[#allocation2 + $0x40] sm:$0x8] %v479_v25  ;;  %v577_v26 = vrot.slane %v576_v21, 4  ;;  %v589_v18 = vshll.u32 %v4864_v22, 16  ;;  %5661 = vmatprep.subr.bf16.mxu0 %v5819_v15 }
  0x87   :  { %v4872_v6 = vld [vmem:[%s7809_s0 + $0x24] sm:$0x7]  ;;  %580 = vst [vmem:[#allocation2 + $0x60] sm:$0xc] %v576_v21  ;;  %v597_v23 = vld [vmem:[#allocation2 + $0x88] sm:$0x1] }
  0x88   :  { %v677_v24 = vshrl.u32 %v4872_v6, 16  ;;  %v680_v31 = vshll.u32 %v4872_v6, 16  ;;  %v671_v32 = vld [vmem:[#allocation2 + $0x80] sm:$0x7]  ;;  %v465_v34 = vrot.slane %v464_v29, 4  ;;  %v588_v35 = vrot.slane %v586_v28, 6 }
  0x89   :  { %v6732_v8 = vld [vmem:[%s7809_s0 + $0x28] sm:$0x7]  ;;  %v672_v36 = vsel %vm6347_vm5, %v669_v51, %v671_v32  ;;  %v582_v19 = vsel %vm6309_vm14, %v577_v26, %v581_v13  ;;  %v591_v37 = vrot.slane %v589_v18, 7  ;;  %v657_v30 = vld [vmem:[#allocation2 + $0x7c] sm:$0x7]  ;;  %5662 = vmatpush3.bf16.msra.mxu0 %v5819_v15  ;;  %v5831_v4 = vld [vmem:[%s7808_s1 + $0x220] sm:$0xff]  }
  0x8a   :  { %v679_v38 = vrot.slane %v677_v24, 7  ;;  %v4882_v40 = vld [vmem:[%s7809_s0 + $0x28] sm:$0x7]  ;;  %673 = vst [vmem:[#allocation2 + $0x80] sm:$0x7] %v672_v36  ;;  %v593_v41 = vrot.slane %v588_v35, 4  ;;  %v658_v49 = vsel %vm6347_vm5, %v4870_v27, %v657_v30  ;;  %5663 = vmatprep.subr.bf16.mxu0 %v5823_v42 }
  0x8b   :  { %471 = vst [vmem:[#allocation2 + $0x60] sm:$0x3] %v465_v34  ;;  %583 = vst [vmem:[#allocation2 + $0x84] sm:$0x1] %v582_v19  ;;  %v783_v45 = vrot.slane %v6732_v8, 5  ;;  %v793_v46 = vshrl.u32 %v4882_v40, 16  ;;  %v592_v54 = vor.u32 %v591_v37, %v588_v35 }
  0x8c   :  { %v796_v47 = vshll.u32 %v4882_v40, 16  ;;  %659 = vst [vmem:[#allocation2 + $0x7c] sm:$0x7] %v658_v49  ;;  %v598_v55 = vsel %vm6309_vm14, %v593_v41, %v597_v23  ;;  %v5827_v58 = vld [vmem:[%s7808_s1 + $0x218] sm:$0xff]   ;;  %v767_v63 = vld [vmem:[#allocation2 + $0xa0] sm:$0x3]  ;;  %v682_v2 = vor.u32 %v680_v31, %v679_v38 }
  0x8d   :  { %787 = vst [vmem:[#allocation2 + $0x84] sm:$0x8] %v783_v45  ;;  %v795_v56 = vrot.slane %v793_v46, 5  ;;  %596 = vst [vmem:[#allocation2 + $0x64] sm:$0xc] %v592_v54  ;;  %v768_v60 = vsel %vm6413_vm1, %v763_v53, %v767_v63  ;;  %5664 = vmatpush3.bf16.msra.mxu0 %v5823_v42  ;;  %v5835_v29 = vld [vmem:[%s7808_s1 + $0x228] sm:$0xff]  }
  0x8e   :  { %v798_v57 = vrot.slane %v796_v47, 6  ;;  %599 = vst [vmem:[#allocation2 + $0x88] sm:$0x1] %v598_v55  ;;  %v777_v48 = vld [vmem:[#allocation2 + $0xa4] sm:$0x3]  ;;  %5665 = vmatprep.subr.bf16.mxu0 %v5827_v58  ;;  %v784_v6 = vrot.slane %v783_v45, 4 }
  0x8f   :  { %v4889_v43 = vld [vmem:[%s7809_s0 + $0x28] sm:$0xe]  ;;  %v5816_v0 = vld [vmem:[#allocation2 + $0x18] ss:$36 sps:$4 sm:$0xff]   ;;  %769 = vst [vmem:[#allocation2 + $0xa0] sm:$0x3] %v768_v60  ;;  %v778_v3 = vsel %vm6413_vm1, %v6706_v5, %v777_v48 }
  0x90   :  { %v5818_v1 = vld [vmem:[#allocation2 + $0x1c] ss:$36 sps:$4 sm:$0xff]   ;;  %v6754_v61 = vor.u32 %v798_v57, %v795_v56  ;;  %779 = vst [vmem:[#allocation2 + $0xa4] sm:$0x3] %v778_v3  ;;  %v4888_v7 = vld [vmem:[%s7809_s0 + $0x28] sm:$0x7] }
  0x91   :  { %v873_v10 = vshrl.u32 %v4889_v43, 16  ;;  %v876_v11 = vshll.u32 %v4889_v43, 16  ;;  %v4898_v14 = vld [vmem:[%s7809_s0 + $0x2c] sm:$0x7]  ;;  %2134 = vmatprep.mubr.bf16.mxu1 %v5818_v1  ;;  %v4873_v15 = vld [vmem:[%s7809_s0 + $0x24] sm:$0x7]  ;;  %5666 = vmatpush3.bf16.msra.mxu0 %v5827_v58 }
  0x92   :  { %803 = vst [vmem:[#allocation2 + $0x88] sm:$0x8] %v6754_v61  ;;  %v948_v59 = vshrl.u32 %v4898_v14, 16  ;;  %v951_v5 = vshll.u32 %v4898_v14, 16  ;;  %v4899_v16 = vld [vmem:[%s7809_s0 + $0x2c] sm:$0xe]  ;;  %2135 = vmatmul.mubr.bf16.vlgmr.msra.gmra.mrb[16].mxu1 %v5816_v0  ;;  %5667 = vmatprep.subr.bf16.mxu0 %v5831_v4 }
  0x93   :  { %v684_v44 = vld [vmem:[#allocation2 + $0x84] sm:$0x7]  ;;  %v875_v17 = vrot.slane %v873_v10, 7  ;;  %v4900_v51 = vrot.slane %v4899_v16, 9  ;;  %v965_v21 = vld [vmem:[#allocation2 + $0xc8] sm:$0x7] }
  0x94   :  { %v685_v22 = vsel %vm6347_vm5, %v682_v2, %v684_v44  ;;  %v866_v25 = vrot.slane %v4888_v7, 7  ;;  %v950_v27 = vrot.slane %v948_v59, 4  ;;  %v953_v53 = vrot.slane %v951_v5, 5  ;;  %v4910_v42 = vld [vmem:[%s7809_s0 + $0x30] sm:$0xe] }
  0x95   :  { %v5820_v13 = vld [vmem:[#allocation2 + $0x5c] ss:$36 sps:$4 sm:$0xff]   ;;  %686 = vst [vmem:[#allocation2 + $0x84] sm:$0x7] %v685_v22  ;;  %v878_v26 = vor.u32 %v876_v11, %v875_v17  ;;  %v957_v18 = vld [vmem:[#allocation2 + $0xc4] sm:$0x7]  ;;  %v966_v23 = vsel %vm6162_vm2, %v4900_v51, %v965_v21  ;;  %5668 = vmatpush3.bf16.msra.mxu0 %v5831_v4 }
  0x96   :  { %v5822_v28 = vld [vmem:[#allocation2 + $0x58] ss:$36 sps:$4 sm:$0xff]   ;;  %v688_v24 = vld [vmem:[#allocation2 + $0x88] sm:$0x7]  ;;  %v800_v31 = vrot.slane %v6754_v61, 4  ;;  %v954_v32 = vor.u32 %v953_v53, %v950_v27  ;;  %v1065_v34 = vshrl.u32 %v4910_v42, 16  ;;  %2078 = vmatprep.mubr.bf16.mxu0 %v5820_v13  ;;  %5669 = vmatprep.subr.bf16.mxu0 %v5835_v29 }
  0x97   :  { %967 = vst [vmem:[#allocation2 + $0xc8] sm:$0x7] %v966_v23  ;;  %v1068_v35 = vshll.u32 %v4910_v42, 16  ;;  %v689_v8 = vsel %vm6347_vm5, %v4873_v15, %v688_v24  ;;  %v868_v36 = vld [vmem:[#allocation2 + $0xa0] sm:$0xe]  ;;  %2079 = vmatmul.mubr.bf16.gmra.mrb[20].mxu0 %v5822_v28  ;;  %v5838_v45 = vld [vmem:[%s7808_s1 + $0x230] sm:$0xff]  }
  0x98   :  { %v6791_v19 = vld [vmem:[%s7809_s0 + $0x30] sm:$0x7]  ;;  %690 = vst [vmem:[#allocation2 + $0x88] sm:$0x7] %v689_v8  ;;  %v869_v37 = vsel %vm6453_vm15, %v866_v25, %v868_v36  ;;  %v880_v38 = vld [vmem:[#allocation2 + $0xa4] sm:$0xe] }
  0x99   :  { %v955_v40 = vrot.slane %v954_v32, 4  ;;  %v1067_v30 = vrot.slane %v1065_v34, 6  ;;  %v1070_v41 = vrot.slane %v1068_v35, 7  ;;  %870 = vst [vmem:[#allocation2 + $0xa0] sm:$0xe] %v869_v37  ;;  %v881_v46 = vsel %vm6453_vm15, %v878_v26, %v880_v38  ;;  %v5841_v11 = vld [vmem:[%s7808_s1 + $0x238] sm:$0xff]   ;;  %5670 = vmatpush3.bf16.msra.mxu0 %v5835_v29 }
  0x9a   :  { %v788_v47 = vld [vmem:[#allocation2 + $0xa8] sm:$0x3]  ;;  %v804_v49 = vld [vmem:[#allocation2 + $0xac] sm:$0x3]  ;;  %882 = vst [vmem:[#allocation2 + $0xa4] sm:$0xe] %v881_v46  ;;  %5671 = vmatprep.subr.bf16.mxu0 %v5838_v45 }
  0x9b   :  { %v4890_v54 = vld [vmem:[%s7809_s0 + $0x2c] sm:$0x7]  ;;  %v958_v55 = vsel %vm6162_vm2, %v955_v40, %v957_v18  ;;  %v1071_v56 = vor.u32 %v1070_v41, %v1067_v30  ;;  %v789_v57 = vsel %vm6413_vm1, %v784_v6, %v788_v47  ;;  %v805_v58 = vsel %vm6413_vm1, %v800_v31, %v804_v49  ;;  %v4901_v60 = vld [vmem:[%s7809_s0 + $0x30] sm:$0x7]  ;;  %v4911_v10 = vld [vmem:[%s7809_s0 + $0x34] sm:$0x7] }
  0x9c   :  { %v4891_v63 = vld [vmem:[%s7809_s0 + $0x2c] sm:$0x7]  ;;  %959 = vst [vmem:[#allocation2 + $0xc4] sm:$0x7] %v958_v55  ;;  %790 = vst [vmem:[#allocation2 + $0xa8] sm:$0x3] %v789_v57 }
  0x9d   :  { %v970_v48 = vld [vmem:[#allocation2 + $0xcc] sm:$0x7]  ;;  %806 = vst [vmem:[#allocation2 + $0xac] sm:$0x3] %v805_v58  ;;  %v886_v43 = vshrl.u32 %v4890_v54, 16  ;;  %v889_v0 = vshll.u32 %v4890_v54, 16  ;;  %5672 = vmatpush3.bf16.msra.mxu0 %v5838_v45 }
  0x9e   :  { %v971_v1 = vsel %vm6162_vm2, %v4901_v60, %v970_v48  ;;  %v4902_v2 = vld [vmem:[%s7809_s0 + $0x30] sm:$0x7]  ;;  %v1055_v61 = vrot.slane %v6791_v19, 6  ;;  %v899_v3 = vrot.slane %v4891_v63, 7  ;;  %v1075_v14 = vld [vmem:[#allocation2 + $0xc8] sm:$0xc]  ;;  %5673 = vmatprep.subr.bf16.mxu0 %v5841_v11 }
  0x9f   :  { %972 = vst [vmem:[#allocation2 + $0xcc] sm:$0x7] %v971_v1  ;;  %v975_v4 = vshrl.u32 %v4902_v2, 16  ;;  %v978_v7 = vshll.u32 %v4902_v2, 16  ;;  %v888_v15 = vrot.slane %v886_v43, 6  ;;  %v891_v59 = vrot.slane %v889_v0, 7 }
  0xa0   :  { %v1082_v5 = vshrl.u32 %v4911_v10, 16  ;;  %v1085_v16 = vshll.u32 %v4911_v10, 16  ;;  %v1076_v44 = vsel %vm6209_vm8, %v1071_v56, %v1075_v14  ;;  %v6832_v21 = vld [vmem:[%s7809_s0 + $0x34] sm:$0x7]  ;;  %v5824_v22 = vld [vmem:[#allocation2 + $0x64] ss:$36 sps:$4 sm:$0xff]  }
  0xa1   :  { %v977_v17 = vrot.slane %v975_v4, 4  ;;  %v980_v51 = vrot.slane %v978_v7, 5  ;;  %v5826_v25 = vld [vmem:[#allocation2 + $0x60] ss:$36 sps:$4 sm:$0xff]   ;;  %1077 = vst [vmem:[#allocation2 + $0xc8] sm:$0xc] %v1076_v44  ;;  %v892_v27 = vor.u32 %v891_v59, %v888_v15  ;;  %2142 = vmatprep.mubr.bf16.mxu1 %v5824_v22  ;;  %5674 = vmatpush3.bf16.msra.mxu0 %v5841_v11 }
  0xa2   :  { %v1084_v53 = vrot.slane %v1082_v5, 5  ;;  %v984_v13 = vld [vmem:[#allocation2 + $0xd0] sm:$0x7]  ;;  %v1087_v28 = vrot.slane %v1085_v16, 6  ;;  %v1098_v29 = vrot.slane %v6832_v21, 6  ;;  %v1056_v6 = vrot.slane %v1055_v61, 4  ;;  %2143 = vmatmul.mubr.bf16.gmra.mrb[20].mxu1 %v5826_v25 }
  0xa3   :  { %v981_v42 = vor.u32 %v980_v51, %v977_v17  ;;  %v1072_v26 = vrot.slane %v1071_v56, 4  ;;  %v1059_v18 = vld [vmem:[#allocation2 + $0xc4] sm:$0xc]  ;;  %v894_v23 = vld [vmem:[#allocation2 + $0xa8] sm:$0xe] }
  0xa4   :  { %v901_v24 = vld [vmem:[#allocation2 + $0xac] sm:$0xe]  ;;  %v1088_v31 = vor.u32 %v1087_v28, %v1084_v53  ;;  %1062 = vst [vmem:[#allocation2 + $0xe8] sm:$0x1] %v1056_v6  ;;  %v1060_v32 = vsel %vm6209_vm8, %v1055_v61, %v1059_v18  ;;  %v895_v34 = vsel %vm6453_vm15, %v892_v27, %v894_v23  ;;  %v1099_v38 = vrot.slane %v1098_v29, 4 }
  0xa5   :  { %v902_v35 = vsel %vm6453_vm15, %v899_v3, %v901_v24  ;;  %v982_v8 = vrot.slane %v981_v42, 4  ;;  %1078 = vst [vmem:[#allocation2 + $0xec] sm:$0x1] %v1072_v26  ;;  %1061 = vst [vmem:[#allocation2 + $0xc4] sm:$0xc] %v1060_v32 }
  0xa6   :  { %v1092_v36 = vld [vmem:[#allocation2 + $0xcc] sm:$0xc]  ;;  %896 = vst [vmem:[#allocation2 + $0xa8] sm:$0xe] %v895_v34  ;;  %903 = vst [vmem:[#allocation2 + $0xac] sm:$0xe] %v902_v35 }
  0xa7   :  { %v1093_v19 = vsel %vm6209_vm8, %v1088_v31, %v1092_v36  ;;  %v1089_v37 = vrot.slane %v1088_v31, 4  ;;  %v4828_v40 = vld [vmem:[%s7809_s0 + $0x8] sm:$0xe]  ;;  %v985_v30 = vsel %vm6162_vm2, %v982_v8, %v984_v13  ;;  %v162_v45 = vld [vmem:[#allocation2 + $0x20] sm:$0x7] }
  0xa8   :  { %1094 = vst [vmem:[#allocation2 + $0xcc] sm:$0xc] %v1093_v19  ;;  %v4829_v41 = vrot.slane %v4828_v40, 9  ;;  %v4838_v46 = vld [vmem:[%s7809_s0 + $0xc] sm:$0xe] }
  0xa9   :  { %986 = vst [vmem:[#allocation2 + $0xd0] sm:$0x7] %v985_v30  ;;  %1095 = vst [vmem:[#allocation2 + $0xf0] sm:$0x1] %v1089_v37  ;;  %v281_v47 = vshrl.u32 %v4838_v46, 16  ;;  %v284_v49 = vshll.u32 %v4838_v46, 16 }
  0xaa   :  { %1105 = vst [vmem:[#allocation2 + $0xf4] sm:$0x1] %v1099_v38  ;;  %v4847_v54 = vld [vmem:[%s7809_s0 + $0x10] sm:$0xe]  ;;  %v365_v55 = vld [vmem:[#allocation2 + $0x44] sm:$0xe]  ;;  %v163_v56 = vsel %vm6162_vm2, %v4829_v41, %v162_v45 }
  0xab   :  { %v366_v57 = vsel %vm6188_vm7, %v4847_v54, %v365_v55  ;;  %v4856_v58 = vld [vmem:[%s7809_s0 + $0x14] sm:$0xe]  ;;  %v4865_v63 = vld [vmem:[%s7809_s0 + $0x18] sm:$0xe]  ;;  %164 = vst [vmem:[#allocation2 + $0x20] sm:$0x7] %v163_v56 }
  0xac   :  { %v283_v60 = vrot.slane %v281_v47, 6  ;;  %v286_v48 = vrot.slane %v284_v49, 7  ;;  %367 = vst [vmem:[#allocation2 + $0x44] sm:$0xe] %v366_v57  ;;  %v484_v43 = vshll.u32 %v4856_v58, 16  ;;  %v487_v0 = vshrl.u32 %v4856_v58, 16 }
  0xad   :  { %v607_v1 = vld [vmem:[#allocation2 + $0x8c] sm:$0x1]  ;;  %v4874_v50 = vld [vmem:[%s7809_s0 + $0x24] sm:$0xe]  ;;  %v602_v2 = vrot.slane %v4865_v63, 7  ;;  %vm2414_vm7 = vcmask 1045508  }
  0xae   :  { %v693_v61 = vshrl.u32 %v4874_v50, 16  ;;  %v696_v3 = vshll.u32 %v4874_v50, 16  ;;  %v4883_v4 = vld [vmem:[%s7809_s0 + $0x28] sm:$0xe]  ;;  %v287_v10 = vor.u32 %v286_v48, %v283_v60  ;;  %v486_v11 = vrot.slane %v484_v43, 6 }
  0xaf   :  { %v1154_v7 = vld [vmem:[#allocation2 + $0xe8] sm:$0xff]  ;;  %v489_v14 = vrot.slane %v487_v0, 5  ;;  %v809_v15 = vrot.slane %v4883_v4, 6  ;;  %v814_v59 = vld [vmem:[#allocation2 + $0xb0] sm:$0x3]  ;;  %v603_v17 = vrot.slane %v602_v2, 4 }
  0xb0   :  { %v5828_v5 = vld [vmem:[#allocation2 + $0xa4] ss:$36 sps:$4 sm:$0xff]   ;;  %v4947_v44 = vcombine.high %v1154_v7, %v1154_v7  ;;  %606 = vst [vmem:[#allocation2 + $0x68] sm:$0xc] %v602_v2  ;;  %v288_v51 = vrot.slane %v287_v10, 4  ;;  %v695_v25 = vrot.slane %v693_v61, 4  ;;  %v4946_v30 = vcombine.low %v1154_v7, %v1154_v7 }
  0xb1   :  { %v5830_v16 = vld [vmem:[#allocation2 + $0xa0] ss:$36 sps:$4 sm:$0xff]   ;;  %v490_v22 = vor.u32 %v489_v14, %v486_v11  ;;  %v698_v27 = vrot.slane %v696_v3, 5  ;;  %813 = vst [vmem:[#allocation2 + $0x8c] sm:$0x8] %v809_v15  ;;  %2086 = vmatprep.mubr.bf16.mxu0 %v5828_v5  ;;  %v608_v13 = vsel %vm6309_vm14, %v603_v17, %v607_v1  ;;  %v810_v28 = vrot.slane %v809_v15, 4 }
  0xb2   :  { %v4892_v53 = vld [vmem:[%s7809_s0 + $0x2c] sm:$0xe]  ;;  %v1102_v42 = vld [vmem:[#allocation2 + $0xd0] sm:$0xc]  ;;  %2087 = vmatmul.mubr.bf16.gmra.mrb[24].mxu0 %v5830_v16  ;;  %294 = vst [vmem:[#allocation2 + $0x44] sm:$0x1] %v288_v51 }
  0xb3   :  { %v906_v6 = vshrl.u32 %v4892_v53, 16  ;;  %v1103_v26 = vsel %vm6209_vm8, %v1098_v29, %v1102_v42  ;;  %v491_v18 = vrot.slane %v490_v22, 4  ;;  %609 = vst [vmem:[#allocation2 + $0x8c] sm:$0x1] %v608_v13  ;;  %v4903_v23 = vld [vmem:[%s7809_s0 + $0x30] sm:$0xe]  ;;  %2094 = vmatprep.mubr.bf16.mxu0 %v4947_v44  ;;  %v699_v34 = vor.u32 %v698_v27, %v695_v25 }
  0xb4   :  { %v992_v24 = vld [vmem:[#allocation2 + $0xd4] sm:$0x7]  ;;  %1104 = vst [vmem:[#allocation2 + $0xd0] sm:$0xc] %v1103_v26  ;;  %v291_v31 = vld [vmem:[#allocation2 + $0x20] sm:$0xc]  ;;  %v815_v35 = vsel %vm6413_vm1, %v810_v28, %v814_v59 }
  0xb5   :  { %v494_v32 = vld [vmem:[#allocation2 + $0x44] sm:$0x8]  ;;  %v4904_v21 = vrot.slane %v4903_v23, 9  ;;  %v292_v29 = vsel %vm6209_vm8, %v287_v10, %v291_v31  ;;  %497 = vst [vmem:[#allocation2 + $0x68] sm:$0x3] %v491_v18  ;;  %v908_v36 = vrot.slane %v906_v6, 7 }
  0xb6   :  { %v495_v8 = vsel %vm6241_vm11, %v486_v11, %v494_v32  ;;  %816 = vst [vmem:[#allocation2 + $0xb0] sm:$0x3] %v815_v35  ;;  %v909_v19 = vshll.u32 %v4892_v53, 16  ;;  %v4913_v37 = vld [vmem:[%s7809_s0 + $0x34] sm:$0xe]  ;;  %v700_v41 = vrot.slane %v699_v34, 4 }
  0xb7   :  { %293 = vst [vmem:[#allocation2 + $0x20] sm:$0xc] %v292_v29  ;;  %496 = vst [vmem:[#allocation2 + $0x44] sm:$0x8] %v495_v8  ;;  %v993_v38 = vsel %vm6162_vm2, %v4904_v21, %v992_v24  ;;  %v1108_v40 = vshrl.u32 %v4913_v37, 16  ;;  %v1111_v45 = vshll.u32 %v4913_v37, 16 }
  0xb8   :  { %994 = vst [vmem:[#allocation2 + $0xd4] sm:$0x7] %v993_v38  ;;  %v1155_v46 = vld [vmem:[#allocation2 + $0xf0] sm:$0xff]  ;;  %v911_v49 = vor.u32 %v909_v19, %v908_v36  ;;  %v5834_v57 = vld [vmem:[#allocation2 + $0xa8] ss:$36 sps:$4 sm:$0xff]   ;;  %vm2317_vm2 = vcmask 1044484  }
  0xb9   :  { %v1110_v47 = vrot.slane %v1108_v40, 6  ;;  %v1113_v54 = vrot.slane %v1111_v45, 7  ;;  %v4949_v58 = vcombine.high %v1155_v46, %v1155_v46  ;;  %v4948_v52 = vcombine.low %v1155_v46, %v1155_v46  ;;  %v4914_v7 = vld [vmem:[%s7810_s2] ss:$0 sm:$0xff] }
  0xba   :  { %v702_v55 = vld [vmem:[#allocation2 + $0x8c] sm:$0x7]  ;;  %2095 = vmatmul.mubr.bf16.gmra.mrb[28].mxu0 %v4946_v30  ;;  %vm2329_vm4 = vsmask.f32 4368 }
  0xbb   :  { %v5832_v56 = vld [vmem:[#allocation2 + $0xac] ss:$36 sps:$4 sm:$0xff]   ;;  %v703_v63 = vsel %vm6347_vm5, %v700_v41, %v702_v55  ;;  %v1114_v60 = vor.u32 %v1113_v54, %v1110_v47  ;;  %vm2524_vm5 = vsmask.f32 7440 }
  0xbc   :  { %704 = vst [vmem:[#allocation2 + $0x8c] sm:$0x7] %v703_v63  ;;  %2150 = vmatprep.mubr.bf16.mxu1 %v5832_v56 }
  0xbd   :  { %v913_v33 = vld [vmem:[#allocation2 + $0xb0] sm:$0xe]  ;;  %2151 = vmatmul.mubr.bf16.gmra.mrb[24].mxu1 %v5834_v57  ;;  %v1115_v1 = vrot.slane %v1114_v60, 4 }
  0xbe   :  { %v5842_v48 = vld [vmem:[#allocation2 + $0x20] ss:$36 sps:$4 sm:$0xff]   ;;  %v914_v43 = vsel %vm6453_vm15, %v911_v49, %v913_v33  ;;  %2158 = vmatprep.mubr.bf16.mxu1 %v4949_v58  ;;  %vm2390_vm15 = vsmask.f32 6416 }
  0xbf   :  { %915 = vst [vmem:[#allocation2 + $0xb0] sm:$0xe] %v914_v43  ;;  %v1118_v0 = vld [vmem:[#allocation2 + $0xd4] sm:$0xc]  ;;  %5675 = vmatprep.mubr.bf16.mxu0 %v5842_v48  ;;  %1121 = vst [vmem:[#allocation2 + $0xf8] sm:$0x1] %v1115_v1 }
  0xc0   :  { %v1119_v50 = vsel %vm6209_vm8, %v1114_v60, %v1118_v0  ;;  %vm7066_vm8 = vmor %vm7819_vm12, %vm2317_vm2  ;;  %vm2632_vm2 = vsmask.f32 5392 }
  0xc1   :  { %1120 = vst [vmem:[#allocation2 + $0xd4] sm:$0xc] %v1119_v50  ;;  %vm7095_vm12 = vmor %vm506_vm13, %vm2329_vm4  ;;  %vm2710_vm4 = vcmask 1046532  }
  0xc2   :  { %vm7107_vm13 = vmor %vm712_vm9, %vm2414_vm7 }
  0xc3   :  { %v5843_v2 = vld [vmem:[#allocation2 + $0x68] ss:$36 sps:$4 sm:$0xff]   ;;  %vm7126_vm7 = vmor %vm84_vm0, %vm2390_vm15 }
  0xc4   :  { %5676 = vmatmul.mubr.bf16.vlgmr.msra.gmra.mrb[32].mxu0 %v5843_v2  ;;  %vm7138_vm0 = vmor %vm300_vm6, %vm2524_vm5 }
  0xc5   :  { %2159 = vmatmul.mubr.bf16.gmra.mrb[28].mxu1 %v4948_v52  ;;  %vm7158_vm15 = vmor %vm713_vm3, %vm2632_vm2  ;;  %vm7851_vm3 = vsmask.f32 7938  ;;  %vm7857_vm2 = vcmask 1043458  }
  0xc6   :  { %v5845_v3 = vld [vmem:[#allocation2 + $0xf8] ss:$0 sps:$4 sm:$0xff]   ;;  %vm7183_vm5 = vmand %vm712_vm9, %vm7851_vm3  ;;  %vm7854_vm9 = vcmask 1042432  }
  0xc8   :  { %v5844_v61 = vld [vmem:[#allocation2 + $0xb0] ss:$36 sps:$4 sm:$0xff]  }
  0xc9   :  { %5679 = vmatprep.mubr.bf16.mxu0 %v5844_v61 }
  0xcc   :  { %5680 = vmatmul.mubr.bf16.gmra.mrb[36].mxu0 %v5845_v3 }
 0x107   :  { %v5284_v9 = vpop.f32.mrb[0].mxu0 }
 0x108   :  { %v5285_v4 = vpop.f32.mrb[1].mxu0 }
 0x109   :  { %v5286_v10 = vadd.f32 %v5285_v4, %v5284_v9  ;;  %v5287_v11 = vpop.f32.mrb[2].mxu0  ;;  %v5846_v9 = vld [vmem:[%s7811_s3 + $0xc0] sm:$0xff]  }
 0x10a   :  { %v5288_v62 = vpop.f32.mrb[3].mxu0  ;;  %v5847_v4 = vld [vmem:[%s7811_s3 + $0x40] sm:$0xff]   ;;  %5468 = vmatprep.subr.bf16.mxu0 %v5846_v9 }
 0x10b   :  { %v5289_v14 = vadd.f32 %v5288_v62, %v5287_v11  ;;  %v1945_v15 = vadd.f32 %v5286_v10, %v4914_v7  ;;  %v5848_v10 = vld [vmem:[%s7811_s3 + $0x80] sm:$0xff]   ;;  %5440 = vmatprep.subr.bf16.mxu1 %v5847_v4  ;;  %v5850_v11 = vld [vmem:[%s7811_s3 + $0xc8] sm:$0xff]  }
 0x10c   :  { %5469 = vmatpush3.bf16.msra.mxu0 %v5848_v10  ;;  %v5851_v62 = vld [vmem:[%s7811_s3 + $0x48] sm:$0xff]  }
 0x10d   :  { %v5324_v59 = vpop.f32.mrb[0].mxu1  ;;  %v1948_v16 = vadd.f32 %v5289_v14, %v4914_v7  ;;  %5470 = vmatprep.subr.bf16.mxu0 %v5850_v11  ;;  %v5852_v14 = vld [vmem:[%s7811_s3 + $0x88] sm:$0xff]  }
 0x10e   :  { %v5325_v5 = vpop.f32.mrb[1].mxu1 }
 0x10f   :  { %v5326_v44 = vadd.f32 %v5325_v5, %v5324_v59  ;;  %v5327_v17 = vpop.f32.mrb[2].mxu1  ;;  %v5854_v59 = vld [vmem:[%s7811_s3 + $0xd0] sm:$0xff]  }
 0x110   :  { %v5328_v51 = vpop.f32.mrb[3].mxu1  ;;  %5471 = vmatpush3.bf16.msra.mxu0 %v5852_v14  ;;  %v5855_v5 = vld [vmem:[%s7811_s3 + $0x50] sm:$0xff]  }
 0x111   :  { %v6904_v22 = vadd.f32 %v5326_v44, %v1945_v15  ;;  %v5329_v25 = vadd.f32 %v5328_v51, %v5327_v17  ;;  %v5853_v15 = vld [vmem:[%s7811_s3 + $0x8] sm:$0xff]   ;;  %5472 = vmatprep.subr.bf16.mxu0 %v5854_v59  ;;  %v5857_v44 = vld [vmem:[%s7811_s3 + $0x10] sm:$0xff]   ;;  %v5858_v17 = vld [vmem:[%s7811_s3 + $0xd8] sm:$0xff]  }
 0x112   :  { %v5859_v51 = vld [vmem:[%s7811_s3 + $0x58] sm:$0xff]  }
 0x113   :  { %v6906_v27 = vadd.f32 %v5329_v25, %v1948_v16  ;;  %v5856_v16 = vld [vmem:[%s7811_s3 + $0x90] sm:$0xff]  }
 0x114   :  { %5473 = vmatpush3.bf16.msra.mxu0 %v5856_v16 }
 0x115   :  { %5474 = vmatprep.subr.bf16.mxu0 %v5858_v17 }
 0x11d   :  { %v5290_v53 = vpop.f32.mrb[4].mxu0 }
 0x11e   :  { %v5291_v42 = vpop.f32.mrb[5].mxu0 }
 0x11f   :  { %v5292_v13 = vadd.f32 %v5291_v42, %v5290_v53  ;;  %v5293_v28 = vpop.f32.mrb[6].mxu0  ;;  %v5860_v53 = vld [vmem:[%s7811_s3 + $0x98] sm:$0xff]  }
 0x120   :  { %v5294_v6 = vpop.f32.mrb[7].mxu0  ;;  %5475 = vmatpush3.bf16.msra.mxu0 %v5860_v53 }
 0x121   :  { %v5295_v26 = vadd.f32 %v5294_v6, %v5293_v28  ;;  %v1953_v18 = vadd.f32 %v5292_v13, %v4914_v7  ;;  %v5861_v13 = vld [vmem:[%s7811_s3 + $0x18] sm:$0xff]  }
 0x123   :  { %v1956_v31 = vadd.f32 %v5295_v26, %v4914_v7  ;;  %v5862_v26 = vld [vmem:[%s7811_s3 + $0xe0] sm:$0xff]  }
 0x124   :  { %5476 = vmatprep.subr.bf16.mxu0 %v5862_v26 }
 0x127   :  { %v5330_v23 = vpop.f32.mrb[4].mxu1 }
 0x128   :  { %v5331_v24 = vpop.f32.mrb[5].mxu1 }
 0x129   :  { %v5332_v32 = vadd.f32 %v5331_v24, %v5330_v23  ;;  %v5333_v34 = vpop.f32.mrb[6].mxu1  ;;  %v5863_v23 = vld [vmem:[%s7811_s3 + $0x60] sm:$0xff]  }
 0x12a   :  { %v5334_v35 = vpop.f32.mrb[7].mxu1 }
 0x12b   :  { %v6908_v21 = vadd.f32 %v5332_v32, %v1953_v18  ;;  %v5335_v29 = vadd.f32 %v5334_v35, %v5333_v34  ;;  %v5864_v32 = vld [vmem:[%s7811_s3 + $0xa0] sm:$0xff]  }
 0x12c   :  { %v5865_v34 = vld [vmem:[%s7811_s3 + $0x20] sm:$0xff]   ;;  %5477 = vmatpush3.bf16.msra.mxu0 %v5864_v32 }
 0x12d   :  { %v6910_v8 = vadd.f32 %v5335_v29, %v1956_v31  ;;  %v5866_v29 = vld [vmem:[%s7811_s3 + $0xe8] sm:$0xff]  }
 0x12e   :  { %5478 = vmatprep.subr.bf16.mxu0 %v5866_v29 }
 0x139   :  { %v5296_v36 = vpop.f32.mrb[8].mxu0 }
 0x13a   :  { %v5297_v19 = vpop.f32.mrb[9].mxu0 }
 0x13b   :  { %v5298_v37 = vadd.f32 %v5297_v19, %v5296_v36  ;;  %v5299_v38 = vpop.f32.mrb[10].mxu0  ;;  %v5868_v36 = vld [vmem:[%s7811_s3 + $0xa8] sm:$0xff]   ;;  %v5870_v19 = vld [vmem:[%s7811_s3 + $0xf0] sm:$0xff]  }
 0x13c   :  { %v5300_v30 = vpop.f32.mrb[11].mxu0  ;;  %5479 = vmatpush3.bf16.msra.mxu0 %v5868_v36 }
 0x13d   :  { %v5336_v40 = vpop.f32.mrb[8].mxu1  ;;  %v1961_v41 = vadd.f32 %v5298_v37, %v4914_v7  ;;  %v5301_v45 = vadd.f32 %v5300_v30, %v5299_v38  ;;  %v5871_v38 = vld [vmem:[%s7811_s3 + $0x70] sm:$0xff]   ;;  %5480 = vmatprep.subr.bf16.mxu0 %v5870_v19 }
 0x13e   :  { %v5337_v46 = vpop.f32.mrb[9].mxu1  ;;  %v5872_v30 = vld [vmem:[%s7811_s3 + $0xb0] sm:$0xff]  }
 0x13f   :  { %v5338_v47 = vadd.f32 %v5337_v46, %v5336_v40  ;;  %v5339_v49 = vpop.f32.mrb[10].mxu1  ;;  %v1964_v54 = vadd.f32 %v5301_v45, %v4914_v7  ;;  %v5873_v46 = vld [vmem:[%s7811_s3 + $0x30] sm:$0xff]  }
 0x140   :  { %v5340_v55 = vpop.f32.mrb[11].mxu1  ;;  %5481 = vmatpush3.bf16.msra.mxu0 %v5872_v30 }
 0x141   :  { %v6912_v56 = vadd.f32 %v5338_v47, %v1961_v41  ;;  %v5341_v57 = vadd.f32 %v5340_v55, %v5339_v49  ;;  %v5302_v58 = vpop.f32.mrb[12].mxu0  ;;  %v5874_v49 = vld [vmem:[%s7811_s3 + $0xf8] sm:$0xff]  }
 0x142   :  { %v5303_v60 = vpop.f32.mrb[13].mxu0  ;;  %5482 = vmatprep.subr.bf16.mxu0 %v5874_v49 }
 0x143   :  { %v6914_v63 = vadd.f32 %v5341_v57, %v1964_v54  ;;  %v5304_v33 = vadd.f32 %v5303_v60, %v5302_v58  ;;  %v5305_v48 = vpop.f32.mrb[14].mxu0  ;;  %v5875_v57 = vld [vmem:[%s7811_s3 + $0x78] sm:$0xff]  }
 0x144   :  { %v5306_v0 = vpop.f32.mrb[15].mxu0  ;;  %v5876_v60 = vld [vmem:[%s7811_s3 + $0xb8] sm:$0xff]  }
 0x145   :  { %v5342_v43 = vpop.f32.mrb[12].mxu1  ;;  %v1969_v1 = vadd.f32 %v5304_v33, %v4914_v7  ;;  %v5849_v7 = vld [vmem:[%s7811_s3] sm:$0xff]   ;;  %5483 = vmatpush3.bf16.msra.mxu0 %v5876_v60 }
 0x146   :  { %v5343_v50 = vpop.f32.mrb[13].mxu1  ;;  %5441 = vmatpush3.bf16.msra.mxu1 %v5849_v7 }
 0x147   :  { %v5344_v52 = vadd.f32 %v5343_v50, %v5342_v43  ;;  %v5345_v2 = vpop.f32.mrb[14].mxu1  ;;  %5442 = vmatprep.subr.bf16.mxu1 %v5851_v62  ;;  %v5877_v43 = vld [vmem:[%s7811_s3 + $0x38] sm:$0xff]   ;;  %v5881_v50 = vld [vmem:[%s7811_s3 + $0x1c0] sm:$0xff]  }
 0x148   :  { %v5346_v61 = vpop.f32.mrb[15].mxu1  ;;  %v5885_v2 = vld [vmem:[%s7811_s3 + $0x140] sm:$0xff]   ;;  %5524 = vmatprep.subr.bf16.mxu0 %v5881_v50 }
 0x149   :  { %v6916_v3 = vadd.f32 %v5344_v52, %v1969_v1 }
 0x14a   :  { %5443 = vmatpush3.bf16.msra.mxu1 %v5853_v15 }
 0x14b   :  { %5444 = vmatprep.subr.bf16.mxu1 %v5855_v5 }
 0x14e   :  { %5445 = vmatpush3.bf16.msra.mxu1 %v5857_v44 }
 0x14f   :  { %5446 = vmatprep.subr.bf16.mxu1 %v5859_v51 }
 0x152   :  { %5447 = vmatpush3.bf16.msra.mxu1 %v5861_v13 }
 0x153   :  { %5448 = vmatprep.subr.bf16.mxu1 %v5863_v23 }
 0x156   :  { %5449 = vmatpush3.bf16.msra.mxu1 %v5865_v34 }
 0x157   :  { %v5364_v25 = vpop.f32.mrb[16].mxu0 }
 0x158   :  { %v5365_v42 = vpop.f32.mrb[17].mxu0 }
 0x159   :  { %v5366_v28 = vadd.f32 %v5365_v42, %v5364_v25  ;;  %v5367_v6 = vpop.f32.mrb[18].mxu0 }
 0x15a   :  { %v5368_v18 = vpop.f32.mrb[19].mxu0 }
 0x15b   :  { %v2073_v24 = vadd.f32 %v5366_v28, %v6904_v22  ;;  %v5369_v31 = vadd.f32 %v5368_v18, %v5367_v6  ;;  %v5867_v22 = vld [vmem:[%s7811_s3 + $0x68] sm:$0xff]  }
 0x15c   :  { %5450 = vmatprep.subr.bf16.mxu1 %v5867_v22 }
 0x15d   :  { %v2076_v35 = vadd.f32 %v5369_v31, %v6906_v27  ;;  %v5869_v27 = vld [vmem:[%s7811_s3 + $0x28] sm:$0xff]  }
 0x15e   :  { %5451 = vmatpush3.bf16.msra.mxu1 %v5869_v27 }
 0x15f   :  { %5452 = vmatprep.subr.bf16.mxu1 %v5871_v38 }
 0x162   :  { %5453 = vmatpush3.bf16.msra.mxu1 %v5873_v46 }
 0x163   :  { %5454 = vmatprep.subr.bf16.mxu1 %v5875_v57 }
 0x165   :  { %v5404_v37 = vpop.f32.mrb[16].mxu1 }
 0x166   :  { %v5405_v40 = vpop.f32.mrb[17].mxu1  ;;  %5455 = vmatpush3.bf16.msra.mxu1 %v5877_v43 }
 0x167   :  { %v5406_v41 = vadd.f32 %v5405_v40, %v5404_v37  ;;  %v5407_v45 = vpop.f32.mrb[18].mxu1  ;;  %5496 = vmatprep.subr.bf16.mxu1 %v5885_v2 }
 0x168   :  { %v5408_v47 = vpop.f32.mrb[19].mxu1 }
 0x169   :  { %v5409_v54 = vadd.f32 %v5408_v47, %v5407_v45  ;;  %v2137_v55 = vadd.f32 %v5406_v41, %v2073_v24 }
 0x16a   :  { %v5370_v58 = vpop.f32.mrb[20].mxu0 }
 0x16b   :  { %v5371_v33 = vpop.f32.mrb[21].mxu0  ;;  %v2140_v48 = vadd.f32 %v5409_v54, %v2076_v35 }
 0x16c   :  { %v5372_v0 = vadd.f32 %v5371_v33, %v5370_v58  ;;  %v5373_v1 = vpop.f32.mrb[22].mxu0 }
 0x16d   :  { %v5374_v52 = vpop.f32.mrb[23].mxu0 }
 0x16e   :  { %v2081_v61 = vadd.f32 %v5372_v0, %v6908_v21  ;;  %v5375_v9 = vadd.f32 %v5374_v52, %v5373_v1 }
 0x170   :  { %v2084_v4 = vadd.f32 %v5375_v9, %v6910_v8 }
 0x175   :  { %v5410_v10 = vpop.f32.mrb[20].mxu1 }
 0x176   :  { %v5411_v7 = vpop.f32.mrb[21].mxu1 }
 0x177   :  { %v5412_v11 = vadd.f32 %v5411_v7, %v5410_v10  ;;  %v5413_v62 = vpop.f32.mrb[22].mxu1 }
 0x178   :  { %v5414_v14 = vpop.f32.mrb[23].mxu1 }
 0x179   :  { %v5415_v15 = vadd.f32 %v5414_v14, %v5413_v62  ;;  %v2145_v59 = vadd.f32 %v5412_v11, %v2081_v61  ;;  %v2543_v14 = vld [vmem:[#allocation4 + $0x30] sm:$0x1] }
 0x17b   :  { %v2148_v5 = vadd.f32 %v5415_v15, %v2084_v4 }
 0x185   :  { %v5376_v16 = vpop.f32.mrb[24].mxu0 }
 0x186   :  { %v5377_v44 = vpop.f32.mrb[25].mxu0 }
 0x187   :  { %v5378_v17 = vadd.f32 %v5377_v44, %v5376_v16  ;;  %v5379_v51 = vpop.f32.mrb[26].mxu0  ;;  %v2553_v16 = vld [vmem:[#allocation4 + $0x34] sm:$0x1] }
 0x188   :  { %v5380_v25 = vpop.f32.mrb[27].mxu0 }
 0x189   :  { %v2089_v21 = vadd.f32 %v5378_v17, %v6912_v56  ;;  %v5381_v53 = vadd.f32 %v5380_v25, %v5379_v51  ;;  %v2600_v17 = vld [vmem:[#allocation4 + $0x44] sm:$0x1] }
 0x18b   :  { %v2092_v42 = vadd.f32 %v5381_v53, %v6914_v63 }
 0x18d   :  { %v5382_v13 = vpop.f32.mrb[28].mxu0 }
 0x18e   :  { %v5383_v8 = vpop.f32.mrb[29].mxu0 }
 0x18f   :  { %v5384_v28 = vadd.f32 %v5383_v8, %v5382_v13  ;;  %v5385_v6 = vpop.f32.mrb[30].mxu0 }
 0x190   :  { %v5416_v26 = vpop.f32.mrb[24].mxu1  ;;  %v5386_v18 = vpop.f32.mrb[31].mxu0  ;;  %v2569_v6 = vld [vmem:[#allocation4 + $0x38] sm:$0x1] }
 0x191   :  { %v5417_v23 = vpop.f32.mrb[25].mxu1  ;;  %v2097_v24 = vadd.f32 %v5384_v28, %v6916_v3 }
 0x192   :  { %v5418_v31 = vadd.f32 %v5417_v23, %v5416_v26  ;;  %v5419_v32 = vpop.f32.mrb[26].mxu1 }
 0x193   :  { %v5420_v34 = vpop.f32.mrb[27].mxu1 }
 0x194   :  { %v5421_v35 = vadd.f32 %v5420_v34, %v5419_v32  ;;  %v2153_v29 = vadd.f32 %v5418_v31, %v2089_v21 }
 0x196   :  { %v2156_v22 = vadd.f32 %v5421_v35, %v2092_v42  ;;  %v2579_v42 = vld [vmem:[#allocation4 + $0x3c] sm:$0x1] }
 0x197   :  { %v5677_v36 = vpop.f32.mrb[32].mxu0 }
 0x198   :  { %v5422_v56 = vpop.f32.mrb[28].mxu1  ;;  %v2209_v27 = vadd.f32 %v5677_v36, %v2145_v59  ;;  %v2200_v19 = vpop.f32.mrb[33].mxu0 }
 0x199   :  { %v5423_v63 = vpop.f32.mrb[29].mxu1  ;;  %v2201_v37 = vadd.f32 %v2200_v19, %v2137_v55  ;;  %v5678_v38 = vpop.f32.mrb[34].mxu0 }
 0x19a   :  { %v5424_v40 = vadd.f32 %v5423_v63, %v5422_v56  ;;  %v2212_v30 = vadd.f32 %v5678_v38, %v2148_v5  ;;  %v2203_v41 = vpop.f32.mrb[35].mxu0  ;;  %v5425_v45 = vpop.f32.mrb[30].mxu1  ;;  %v2232_v3 = vmax.f32 %v2209_v27, 0.0 }
 0x19b   :  { %v2204_v46 = vadd.f32 %v2203_v41, %v2140_v48  ;;  %v5426_v47 = vpop.f32.mrb[31].mxu1  ;;  %v2230_v57 = vmax.f32 %v2201_v37, 0.0 }
 0x19c   :  { %v2233_v49 = vmax.f32 %v2212_v30, 0.0  ;;  %v2161_v54 = vadd.f32 %v5424_v40, %v2097_v24  ;;  %v2594_v40 = vld [vmem:[#allocation4 + $0x40] sm:$0x1] }
 0x19d   :  { %v2231_v58 = vmax.f32 %v2204_v46, 0.0 }
 0x19e   :  { %v5254_v60 = vpack.c.bf16 %v2233_v49, %v2232_v3 }
 0x19f   :  { %v5249_v33 = vpack.c.bf16 %v2231_v58, %v2230_v57  ;;  %v5681_v43 = vpop.f32.mrb[36].mxu0 }
 0x1a0   :  { %5266 = vst [vmem:[#allocation3 + $0x8] sm:$0xff] %v5254_v60   ;;  %v2225_v0 = vadd.f32 %v5681_v43, %v2161_v54  ;;  %v2216_v1 = vpop.f32.mrb[37].mxu0  ;;  %v2274_v60 = vld [vmem:[#allocation4] sm:$0x3] }
 0x1a1   :  { %5250 = vst [vmem:[#allocation3] sm:$0xff] %v5249_v33   ;;  %v2217_v55 = vadd.f32 %v2216_v1, %v2153_v29  ;;  %v5682_v50 = vpop.f32.mrb[38].mxu0 }
 0x1a2   :  { %v2236_v52 = vmax.f32 %v2225_v0, 0.0  ;;  %v2219_v2 = vpop.f32.mrb[39].mxu0  ;;  %v2296_v50 = vld [vmem:[#allocation4 + $0x8] sm:$0x3] }
 0x1a3   :  { %v2220_v61 = vadd.f32 %v2219_v2, %v2156_v22  ;;  %v2234_v48 = vmax.f32 %v2217_v55, 0.0 }
 0x1a4   :  { %v5242_v9 = vpack.c.bf16 %v2236_v52, %v2236_v52 }
 0x1a5   :  { %v2235_v4 = vmax.f32 %v2220_v61, 0.0 }
 0x1a6   :  { %2272 = vst [vmem:[#allocation3 + $0x18] sm:$0xf] %v5242_v9 }
 0x1a7   :  { %v7027_v10 = vld [vmem:[#allocation3 + $0x8] sm:$0x1]  ;;  %v5259_v11 = vpack.c.bf16 %v2235_v4, %v2234_v48  ;;  %v2572_v53 = vld [vmem:[#allocation3 + $0x8] sm:$0xc]  ;;  %v2598_v56 = vld [vmem:[#allocation3 + $0xc] sm:$0x1] }
 0x1a8   :  { %v2466_v7 = vld [vmem:[#allocation3 + $0x8] sm:$0x3]  ;;  %v2460_v51 = vrot.slane %v7027_v10, 6  ;;  %v2574_v26 = vrot.slane %v2572_v53, 7  ;;  %v2582_v18 = vld [vmem:[#allocation3 + $0x8] sm:$0xc]  ;;  %v2601_v37 = vsel %vm6309_vm14, %v2598_v56, %v2600_v17 }
 0x1a9   :  { %v7029_v62 = vld [vmem:[#allocation3 + $0x8] sm:$0x1]  ;;  %v2468_v15 = vshrl.u32 %v2466_v7, 16  ;;  %5267 = vst [vmem:[#allocation3 + $0x10] sm:$0xff] %v5259_v11   ;;  %v2471_v13 = vshll.u32 %v2466_v7, 16  ;;  %v2584_v32 = vshrl.u32 %v2582_v18, 16 }
 0x1aa   :  { %v2536_v59 = vshrl.u32 %v7029_v62, 16  ;;  %v2546_v5 = vld [vmem:[#allocation3 + $0x8] sm:$0x3]  ;;  %v2532_v23 = vshll.u32 %v7029_v62, 16  ;;  %v2597_v34 = vld [vmem:[#allocation3 + $0x8] sm:$0x8] }
 0x1ab   :  { %v2556_v44 = vld [vmem:[#allocation3 + $0x8] sm:$0x3]  ;;  %v2548_v25 = vrot.slane %v2546_v5, 5  ;;  %v7036_v35 = vrot.slane %v2468_v15, 6  ;;  %v2575_v22 = vrot.slane %v2574_v26, 4  ;;  %v2587_v36 = vshll.u32 %v2582_v18, 16 }
 0x1ac   :  { %v2558_v21 = vshrl.u32 %v2556_v44, 16  ;;  %v2544_v8 = vsel %vm6309_vm14, %v2536_v59, %v2543_v14  ;;  %v2561_v28 = vshll.u32 %v2556_v44, 16  ;;  %2599 = vst [vmem:[#allocation4 + $0x20] sm:$0x8] %v2597_v34  ;;  %2578 = vst [vmem:[#allocation4 + $0x18] sm:$0x8] %v2574_v26 }
 0x1ad   :  { %2545 = vst [vmem:[#allocation4 + $0x30] sm:$0x1] %v2544_v8  ;;  %v2549_v24 = vrot.slane %v2548_v25, 4  ;;  %2552 = vst [vmem:[#allocation4 + $0x10] sm:$0x8] %v2548_v25  ;;  %v2586_v63 = vrot.slane %v2584_v32, 7  ;;  %v2580_v30 = vsel %vm6309_vm14, %v2575_v22, %v2579_v42 }
 0x1ae   :  { %v2560_v31 = vrot.slane %v2558_v21, 5  ;;  %v2563_v29 = vrot.slane %v2561_v28, 6  ;;  %v2608_v38 = vld [vmem:[#allocation3 + $0xc] sm:$0x6]  ;;  %2602 = vst [vmem:[#allocation4 + $0x44] sm:$0x1] %v2601_v37 }
 0x1af   :  { %v2554_v27 = vsel %vm6309_vm14, %v2549_v24, %v2553_v16  ;;  %v2610_v41 = vshrl.u32 %v2608_v38, 16  ;;  %v2613_v45 = vshll.u32 %v2608_v38, 16  ;;  %v7044_v46 = vld [vmem:[#allocation3 + $0xc] sm:$0x6]  ;;  %v2630_v47 = vld [vmem:[#allocation3 + $0xc] sm:$0x8]  ;;  %v2589_v57 = vor.u32 %v2587_v36, %v2586_v63 }
 0x1b0   :  { %v2565_v19 = vrot.slane %v2560_v31, 4  ;;  %2555 = vst [vmem:[#allocation4 + $0x34] sm:$0x1] %v2554_v27  ;;  %v2564_v3 = vor.u32 %v2563_v29, %v2560_v31  ;;  %v7046_v49 = vrot.slane %v2471_v13, 7  ;;  %2581 = vst [vmem:[#allocation4 + $0x3c] sm:$0x1] %v2580_v30 }
 0x1b1   :  { %v2590_v58 = vrot.slane %v2586_v63, 4  ;;  %v2612_v33 = vrot.slane %v2610_v41, 4  ;;  %v2615_v43 = vrot.slane %v2613_v45, 5  ;;  %v2635_v0 = vshrl.u32 %v2630_v47, 16  ;;  %v2721_v55 = vld [vmem:[#allocation3 + $0xc] sm:$0x8] }
 0x1b2   :  { %v2570_v54 = vsel %vm6309_vm14, %v2565_v19, %v2569_v6  ;;  %v2638_v1 = vshll.u32 %v2630_v47, 16  ;;  %2568 = vst [vmem:[#allocation4 + $0x14] sm:$0x8] %v2564_v3  ;;  %v7050_v52 = vrot.slane %v2532_v23, 5  ;;  %v5040_v2 = vrot.slane %v7044_v46, 9 }
 0x1b3   :  { %2571 = vst [vmem:[#allocation4 + $0x38] sm:$0x1] %v2570_v54  ;;  %v7053_v61 = vld [vmem:[#allocation3 + $0xc] sm:$0x8]  ;;  %2593 = vst [vmem:[#allocation4 + $0x1c] sm:$0x8] %v2589_v57  ;;  %v2595_v48 = vsel %vm6309_vm14, %v2590_v58, %v2594_v40  ;;  %v2616_v17 = vor.u32 %v2615_v43, %v2612_v33 }
 0x1b4   :  { %v2273_v9 = vld [vmem:[#allocation3] sm:$0x3]  ;;  %v2637_v4 = vrot.slane %v2635_v0, 6  ;;  %v2640_v7 = vrot.slane %v2638_v1, 7  ;;  %2596 = vst [vmem:[#allocation4 + $0x40] sm:$0x1] %v2595_v48 }
 0x1b5   :  { %v2275_v11 = vsel %vm6413_vm1, %v2273_v9, %v2274_v60  ;;  %v2277_v62 = vld [vmem:[#allocation3] sm:$0x3]  ;;  %v2724_v15 = vshrl.u32 %v2721_v55, 16  ;;  %v2299_v44 = vld [vmem:[#allocation3] sm:$0xc]  ;;  %v5041_v23 = vrot.slane %v7053_v61, 11 }
 0x1b6   :  { %v2291_v14 = vld [vmem:[#allocation3] sm:$0x6]  ;;  %v2279_v59 = vshrl.u32 %v2277_v62, 16  ;;  %v2282_v5 = vshll.u32 %v2277_v62, 16  ;;  %2276 = vst [vmem:[#allocation4] sm:$0x3] %v2275_v11  ;;  %v2641_v25 = vor.u32 %v2640_v7, %v2637_v4 }
 0x1b7   :  { %v5030_v16 = vrot.slane %v2291_v14, 9  ;;  %v7059_v21 = vld [vmem:[#allocation3 + $0xc] sm:$0x8]  ;;  %v2301_v53 = vshrl.u32 %v2299_v44, 16  ;;  %v2304_v42 = vshll.u32 %v2299_v44, 16  ;;  %v7071_v36 = vrot.slane %v2724_v15, 9 }
 0x1b8   :  { %v2313_v13 = vld [vmem:[#allocation3] sm:$0x8]  ;;  %v2281_v8 = vrot.slane %v2279_v59, 4  ;;  %v2284_v28 = vrot.slane %v2282_v5, 5  ;;  %v2314_v6 = vld [vmem:[#allocation3 + $0x4] sm:$0x1] }
 0x1b9   :  { %v5031_v26 = vrot.slane %v2313_v13, 11  ;;  %v2297_v18 = vsel %vm6413_vm1, %v5030_v16, %v2296_v50  ;;  %v2303_v24 = vrot.slane %v2301_v53, 6  ;;  %v2306_v31 = vrot.slane %v2304_v42, 7  ;;  %v2327_v29 = vld [vmem:[#allocation3] sm:$0x8] }
 0x1ba   :  { %v2321_v34 = vrot.slane %v2314_v6, 7  ;;  %2298 = vst [vmem:[#allocation4 + $0x8] sm:$0x3] %v2297_v18  ;;  %v5044_v22 = vrot.slane %v7059_v21, 9  ;;  %v2285_v56 = vor.u32 %v2284_v28, %v2281_v8  ;;  %v2328_v27 = vld [vmem:[#allocation3 + $0x4] sm:$0x1] }
 0x1bb   :  { %v2332_v19 = vshrl.u32 %v2327_v29, 16  ;;  %v2310_v63 = vld [vmem:[#allocation4 + $0xc] sm:$0x3]  ;;  %v7073_v37 = vrot.slane %v2616_v17, 4  ;;  %v7075_v38 = vrot.slane %v2641_v25, 4  ;;  %v2307_v40 = vor.u32 %v2306_v31, %v2303_v24 }
 0x1bc   :  { %v2337_v30 = vshrl.u32 %v2328_v27, 16  ;;  %v2356_v41 = vld [vmem:[#allocation3 + $0x4] sm:$0x6]  ;;  %v7081_v47 = vsel %vm7066_vm8, %v5031_v26, %v2321_v34  ;;  %v2340_v3 = vshll.u32 %v2328_v27, 16  ;;  %v7087_v60 = vrot.slane %v2285_v56, 4 }
 0x1bd   :  { %v7083_v54 = vld [vmem:[#allocation3 + $0x4] sm:$0x6]  ;;  %v2358_v57 = vshrl.u32 %v2356_v41, 16  ;;  %v2308_v33 = vrot.slane %v2307_v40, 4  ;;  %v2361_v0 = vshll.u32 %v2356_v41, 16  ;;  %v7091_v50 = vrot.slane %v2332_v19, 11 }
 0x1be   :  { %v7085_v58 = vld [vmem:[#allocation3 + $0x4] sm:$0xc]  ;;  %v2339_v43 = vrot.slane %v2337_v30, 7  ;;  %v7089_v1 = vld [vmem:[#allocation3] sm:$0xc]  ;;  %v5033_v13 = vrot.slane %v7083_v54, 9 }
 0x1bf   :  { %v2388_v55 = vld [vmem:[#allocation3] sm:$0x8]  ;;  %v2360_v9 = vrot.slane %v2358_v57, 5  ;;  %v2389_v48 = vld [vmem:[#allocation3 + $0x4] sm:$0x1]  ;;  %v2363_v14 = vrot.slane %v2361_v0, 6  ;;  %v2311_v16 = vsel %vm6413_vm1, %v2308_v33, %v2310_v63 }
 0x1c0   :  { %v2393_v4 = vshrl.u32 %v2388_v55, 16  ;;  %v2396_v7 = vshll.u32 %v2388_v55, 16  ;;  %v7099_v62 = vor.u32 %v2340_v3, %v2339_v43  ;;  %v2402_v15 = vshll.u32 %v2389_v48, 16  ;;  %v2410_v59 = vld [vmem:[#allocation3] sm:$0x8] }
 0x1c1   :  { %v2411_v5 = vld [vmem:[#allocation3 + $0x4] sm:$0x1]  ;;  %v5036_v25 = vrot.slane %v2410_v59, 10  ;;  %v2424_v42 = vld [vmem:[#allocation3 + $0x4] sm:$0x6]  ;;  %v2364_v8 = vor.u32 %v2363_v14, %v2360_v9 }
 0x1c2   :  { %v2395_v44 = vrot.slane %v2393_v4, 5  ;;  %v2398_v17 = vrot.slane %v2396_v7, 6  ;;  %v2418_v53 = vrot.slane %v2411_v5, 6  ;;  %2312 = vst [vmem:[#allocation4 + $0xc] sm:$0x3] %v2311_v16  ;;  %v2426_v26 = vshrl.u32 %v2424_v42, 16 }
 0x1c3   :  { %v2440_v18 = vld [vmem:[#allocation3 + $0x4] sm:$0xc]  ;;  %v7116_v19 = vrot.slane %v2402_v15, 6  ;;  %v2493_v41 = vld [vmem:[#allocation4 + $0x24] sm:$0x1]  ;;  %v2429_v33 = vshll.u32 %v2424_v42, 16 }
 0x1c4   :  { %v2399_v34 = vor.u32 %v2398_v17, %v2395_v44  ;;  %v2442_v29 = vshrl.u32 %v2440_v18, 16  ;;  %v2454_v56 = vld [vmem:[#allocation3 + $0x4] sm:$0x8]  ;;  %v2486_v27 = vld [vmem:[#allocation3 + $0x4] sm:$0x6]  ;;  %v2428_v63 = vrot.slane %v2426_v26, 7  ;;  %v7120_v57 = vsel %vm7107_vm13, %v5036_v25, %v2418_v53 }
 0x1c5   :  { %v2445_v40 = vshll.u32 %v2440_v18, 16  ;;  %v5037_v30 = vrot.slane %v2454_v56, 10  ;;  %v2496_v3 = vld [vmem:[#allocation3 + $0x4] sm:$0x6]  ;;  %v2488_v43 = vrot.slane %v2486_v27, 6  ;;  %v7122_v48 = vrot.slane %v2364_v8, 4 }
 0x1c6   :  { %v2498_v0 = vshrl.u32 %v2496_v3, 16  ;;  %v2512_v55 = vld [vmem:[#allocation3 + $0x4] sm:$0xc]  ;;  %v2288_v9 = vld [vmem:[#allocation4 + $0x4] sm:$0x3]  ;;  %v7130_v7 = vrot.slane %v2399_v34, 4  ;;  %v7134_v44 = vor.u32 %v2429_v33, %v2428_v63 }
 0x1c7   :  { %v7132_v14 = vrot.slane %v2442_v29, 4  ;;  %v2501_v15 = vshll.u32 %v2496_v3, 16  ;;  %v2519_v59 = vld [vmem:[#allocation4 + $0x2c] sm:$0x1]  ;;  %v2522_v5 = vld [vmem:[#allocation3 + $0x4] sm:$0x8]  ;;  %v7148_v34 = vsel %vm7107_vm13, %v5037_v30, %v2460_v51  ;;  %v2289_v30 = vsel %vm6413_vm1, %v7087_v60, %v2288_v9  ;;  %vm7211_vm13 = vmand %vm7857_vm2, %vm300_vm6 }
 0x1c8   :  { %v2509_v16 = vld [vmem:[#allocation4 + $0x28] sm:$0x1]  ;;  %v2489_v17 = vrot.slane %v2488_v43, 4  ;;  %v2500_v25 = vrot.slane %v2498_v0, 6  ;;  %v2514_v53 = vrot.slane %v2512_v55, 7  ;;  %v7142_v18 = vrot.slane %v2445_v40, 5 }
 0x1c9   :  { %2492 = vst [vmem:[#allocation4] sm:$0x8] %v2488_v43  ;;  %v2913_v42 = vld [vmem:[#allocation3 + $0x18] sm:$0x1]  ;;  %v2353_v26 = vld [vmem:[#allocation4 + $0x18] sm:$0x3]  ;;  %v7863_v46 = vsel %vm7126_vm7, %v7130_v7, %v7116_v19 }
 0x1ca   :  { %v2503_v29 = vrot.slane %v2501_v15, 7  ;;  %v2527_v56 = vshrl.u32 %v2522_v5, 16  ;;  %2917 = vst [vmem:[#allocation4 + $0x68] sm:$0x1] %v2913_v42  ;;  %v2631_v27 = vld [vmem:[#allocation3 + $0x10] sm:$0x1]  ;;  %v2494_v63 = vsel %vm6309_vm14, %v2489_v17, %v2493_v41 }
 0x1cb   :  { %v2505_v3 = vrot.slane %v2500_v25, 4  ;;  %v2515_v33 = vrot.slane %v2514_v53, 4  ;;  %2518 = vst [vmem:[#allocation4 + $0x8] sm:$0x8] %v2514_v53  ;;  %v2644_v43 = vshll.u32 %v2631_v27, 16  ;;  %vm2383_vm6 = vcmask 1042433  }
 0x1cc   :  { %v2367_v0 = vld [vmem:[#allocation4 + $0x1c] sm:$0x3]  ;;  %2495 = vst [vmem:[#allocation4 + $0x24] sm:$0x1] %v2494_v63  ;;  %v2653_v6 = vld [vmem:[#allocation3 + $0x10] sm:$0x1]  ;;  %v2535_v40 = vsel %vm7138_vm0, %v2527_v56, %v7050_v52  ;;  %v2504_v41 = vor.u32 %v2503_v29, %v2500_v25 }
 0x1cd   :  { %v2324_v55 = vld [vmem:[#allocation4 + $0x10] sm:$0x3]  ;;  %v2520_v15 = vsel %vm6309_vm14, %v2515_v33, %v2519_v59  ;;  %v2646_v5 = vrot.slane %v2644_v43, 7  ;;  %v2658_v53 = vrot.slane %v2653_v6, 7  ;;  %v2661_v42 = vld [vmem:[#allocation4 + $0x34] sm:$0x3]  ;;  %v2510_v8 = vsel %vm6309_vm14, %v2505_v3, %v2509_v16 }
 0x1ce   :  { %v2649_v17 = vld [vmem:[#allocation4 + $0x30] sm:$0x3]  ;;  %v2664_v27 = vld [vmem:[#allocation3 + $0x10] sm:$0x3]  ;;  %2542 = vst [vmem:[#allocation4 + $0xc] sm:$0x8] %v2535_v40  ;;  %v2354_v59 = vsel %vm6413_vm1, %v5033_v13, %v2353_v26  ;;  %v2368_v29 = vsel %vm6413_vm1, %v7122_v48, %v2367_v0  ;;  %v2325_v48 = vsel %vm6413_vm1, %v7081_v47, %v2324_v55 }
 0x1cf   :  { %2290 = vst [vmem:[#allocation4 + $0x4] sm:$0x3] %v2289_v30  ;;  %2521 = vst [vmem:[#allocation4 + $0x2c] sm:$0x1] %v2520_v15  ;;  %v7172_v52 = vld [vmem:[#allocation3 + $0x18] sm:$0x1]  ;;  %v2647_v63 = vsel %vm7158_vm15, %v7075_v38, %v2646_v5  ;;  %v2659_v54 = vsel %vm7066_vm8, %v5041_v23, %v2658_v53 }
 0x1d0   :  { %v2666_v56 = vshrl.u32 %v2664_v27, 16  ;;  %v2669_v60 = vshll.u32 %v2664_v27, 16  ;;  %v2676_v9 = vld [vmem:[#allocation3 + $0x10] sm:$0x6]  ;;  %v2681_v25 = vld [vmem:[#allocation4 + $0x3c] sm:$0x3]  ;;  %v2650_v43 = vsel %vm7183_vm5, %v2647_v63, %v2649_v17  ;;  %v2662_v38 = vsel %vm7183_vm5, %v2659_v54, %v2661_v42  ;;  %vm7203_vm8 = vmor %vm7854_vm9, %vm2710_vm4 }
 0x1d1   :  { %2508 = vst [vmem:[#allocation4 + $0x4] sm:$0x8] %v2504_v41  ;;  %2511 = vst [vmem:[#allocation4 + $0x28] sm:$0x1] %v2510_v8  ;;  %v2673_v13 = vld [vmem:[#allocation4 + $0x38] sm:$0x3] }
 0x1d2   :  { %v5042_v26 = vrot.slane %v2676_v9, 9  ;;  %v2684_v3 = vld [vmem:[#allocation3 + $0x10] sm:$0xc]  ;;  %2355 = vst [vmem:[#allocation4 + $0x18] sm:$0x3] %v2354_v59  ;;  %v2668_v61 = vrot.slane %v2666_v56, 7  ;;  %vm7282_vm4 = vmand %vm2383_vm6, %vm827_vm10 }
 0x1d3   :  { %v2698_v33 = vld [vmem:[#allocation3 + $0x10] sm:$0xc]  ;;  %2369 = vst [vmem:[#allocation4 + $0x1c] sm:$0x3] %v2368_v29  ;;  %v2686_v0 = vshrl.u32 %v2684_v3, 16  ;;  %v2689_v40 = vshll.u32 %v2684_v3, 16 }
 0x1d4   :  { %v2703_v32 = vld [vmem:[#allocation4 + $0x44] sm:$0x3]  ;;  %v2707_v23 = vld [vmem:[#allocation3 + $0x10] sm:$0x1]  ;;  %v2761_v6 = vld [vmem:[#allocation4 + $0x34] sm:$0xc]  ;;  %v2682_v47 = vsel %vm7183_vm5, %v5042_v26, %v2681_v25  ;;  %v2671_v15 = vor.u32 %v2669_v60, %v2668_v61 }
 0x1d5   :  { %2326 = vst [vmem:[#allocation4 + $0x10] sm:$0x3] %v2325_v48  ;;  %v5043_v30 = vrot.slane %v2698_v33, 10  ;;  %v2714_v41 = vrot.slane %v2707_v23, 5  ;;  %v2722_v55 = vld [vmem:[#allocation3 + $0x10] sm:$0x1] }
 0x1d6   :  { %2651 = vst [vmem:[#allocation4 + $0x30] sm:$0x3] %v2650_v43  ;;  %2663 = vst [vmem:[#allocation4 + $0x34] sm:$0x3] %v2662_v38  ;;  %v2688_v5 = vrot.slane %v2686_v0, 5  ;;  %v2729_v53 = vshrl.u32 %v2722_v55, 16  ;;  %v2674_v29 = vsel %vm7183_vm5, %v2671_v15, %v2673_v13 }
 0x1d7   :  { %v2732_v42 = vshll.u32 %v2722_v55, 16  ;;  %v2741_v27 = vld [vmem:[#allocation3 + $0x10] sm:$0x3]  ;;  %2683 = vst [vmem:[#allocation4 + $0x3c] sm:$0x3] %v2682_v47  ;;  %v2691_v56 = vrot.slane %v2689_v40, 6  ;;  %v2704_v9 = vsel %vm7183_vm5, %v5043_v30, %v2703_v32  ;;  %v7222_v60 = vsel %vm7203_vm8, %v5044_v22, %v2714_v41 }
 0x1d8   :  { %v2748_v25 = vld [vmem:[#allocation3 + $0x10] sm:$0x6]  ;;  %v7226_v63 = vrot.slane %v2729_v53, 5  ;;  %2705 = vst [vmem:[#allocation4 + $0x44] sm:$0x3] %v2704_v9  ;;  %v2743_v48 = vrot.slane %v2741_v27, 6 }
 0x1d9   :  { %v2760_v59 = vld [vmem:[#allocation3 + $0x10] sm:$0xc]  ;;  %v7228_v54 = vrot.slane %v2732_v42, 6  ;;  %v2750_v26 = vshrl.u32 %v2748_v25, 16  ;;  %v2692_v33 = vor.u32 %v2691_v56, %v2688_v5  ;;  %v7232_v43 = vld [vmem:[#allocation3 + $0x14] sm:$0x3] }
 0x1da   :  { %v2764_v3 = vld [vmem:[#allocation3 + $0x10] sm:$0xc]  ;;  %v2762_v21 = vsel %vm7211_vm13, %v2760_v59, %v2761_v6  ;;  %v2785_v38 = vld [vmem:[#allocation3 + $0x14] sm:$0x3]  ;;  %2675 = vst [vmem:[#allocation4 + $0x38] sm:$0x3] %v2674_v29 }
 0x1db   :  { %v2766_v22 = vshrl.u32 %v2764_v3, 16  ;;  %v2745_v61 = vld [vmem:[#allocation4 + $0x2c] sm:$0xc]  ;;  %v2752_v0 = vrot.slane %v2750_v26, 7  ;;  %v2753_v32 = vshll.u32 %v2748_v25, 16  ;;  %v2769_v23 = vshll.u32 %v2764_v3, 16 }
 0x1dc   :  { %v7236_v51 = vld [vmem:[#allocation3 + $0x14] sm:$0x6]  ;;  %2763 = vst [vmem:[#allocation4 + $0x34] sm:$0xc] %v2762_v21  ;;  %v2787_v30 = vshrl.u32 %v2785_v38, 16  ;;  %v2790_v6 = vshll.u32 %v2785_v38, 16 }
 0x1dd   :  { %v2768_v47 = vrot.slane %v2766_v22, 4  ;;  %v7239_v41 = vld [vmem:[#allocation3 + $0x10] sm:$0x6]  ;;  %v7241_v55 = vrot.slane %v2692_v33, 4  ;;  %v2755_v15 = vor.u32 %v2753_v32, %v2752_v0  ;;  %v2771_v5 = vrot.slane %v2769_v23, 5 }
 0x1de   :  { %v7820_v53 = vrot.slane %v7239_v41, 6  ;;  %v2815_v42 = vld [vmem:[#allocation3 + $0x10] sm:$0xc]  ;;  %v7244_v27 = vrot.slane %v2787_v30, 6  ;;  %v7246_v56 = vrot.slane %v2790_v6, 7  ;;  %v2746_v22 = vsel %vm7211_vm13, %v2743_v48, %v2745_v61 }
 0x1df   :  { %v2817_v9 = vshll.u32 %v2815_v42, 16  ;;  %v2820_v25 = vshrl.u32 %v2815_v42, 16  ;;  %v7248_v59 = vld [vmem:[#allocation3 + $0x10] sm:$0xc]  ;;  %v2772_v29 = vor.u32 %v2771_v5, %v2768_v47  ;;  %v2841_v33 = vld [vmem:[#allocation3 + $0x14] sm:$0x3] }
 0x1e0   :  { %v2808_v26 = vrot.slane %v7820_v53, 4  ;;  %v7822_v3 = vrot.slane %v7248_v59, 7  ;;  %v7253_v21 = vld [vmem:[#allocation3 + $0x14] sm:$0x3]  ;;  %v2757_v38 = vld [vmem:[#allocation4 + $0x30] sm:$0xc] }
 0x1e1   :  { %v7258_v32 = vrot.slane %v2817_v9, 7  ;;  %v7260_v23 = vrot.slane %v2820_v25, 6  ;;  %v2843_v30 = vshll.u32 %v2841_v33, 16  ;;  %v2867_v47 = vld [vmem:[#allocation3 + $0x14] sm:$0x6]  ;;  %v2846_v53 = vshrl.u32 %v2841_v33, 16 }
 0x1e2   :  { %2747 = vst [vmem:[#allocation4 + $0x2c] sm:$0xc] %v2746_v22  ;;  %v2718_v6 = vld [vmem:[#allocation4 + $0x24] sm:$0xc]  ;;  %v2834_v42 = vrot.slane %v7822_v3, 4  ;;  %v7821_v48 = vrot.slane %v7253_v21, 5 }
 0x1e3   :  { %v7267_v61 = vld [vmem:[#allocation3 + $0x14] sm:$0xc]  ;;  %2814 = vst [vmem:[#allocation4 + $0x48] sm:$0x1] %v2808_v26  ;;  %v7269_v9 = vrot.slane %v2772_v29, 4  ;;  %v7271_v25 = vrot.slane %v2843_v30, 5  ;;  %v2823_v8 = vor.u32 %v7260_v23, %v7258_v32  ;;  %v2719_v10 = vsel %vm7211_vm13, %v7222_v60, %v2718_v6 }
 0x1e4   :  { %v2869_v0 = vshll.u32 %v2867_v47, 16  ;;  %v2872_v28 = vshrl.u32 %v2867_v47, 16  ;;  %v7273_v22 = vld [vmem:[#allocation3 + $0x14] sm:$0x8]  ;;  %v2848_v24 = vrot.slane %v2846_v53, 4  ;;  %v2860_v33 = vrot.slane %v7821_v48, 4 }
 0x1e5   :  { %v2885_v5 = vrot.slane %v7267_v61, 7  ;;  %2840 = vst [vmem:[#allocation4 + $0x50] sm:$0x1] %v2834_v42  ;;  %v2738_v45 = vld [vmem:[#allocation4 + $0x28] sm:$0xc]  ;;  %v2898_v53 = vshrl.u32 %v7273_v22, 16  ;;  %v2758_v48 = vsel %vm7211_vm13, %v2755_v15, %v2757_v38 }
 0x1e6   :  { %v2782_v26 = vld [vmem:[#allocation4 + $0x3c] sm:$0xc]  ;;  %v7286_v30 = vrot.slane %v2869_v0, 6  ;;  %v7288_v47 = vrot.slane %v2872_v28, 5  ;;  %v2421_v23 = vld [vmem:[#allocation4 + $0x8] sm:$0x6]  ;;  %v2849_v42 = vor.u32 %v2848_v24, %v7271_v25 }
 0x1e7   :  { %v2603_v3 = vld [vmem:[#allocation3 + $0xc] sm:$0x3]  ;;  %v2886_v40 = vrot.slane %v2885_v5, 4  ;;  %2866 = vst [vmem:[#allocation4 + $0x58] sm:$0x1] %v2860_v33  ;;  %v2422_v0 = vsel %vm7282_vm4, %v7120_v57, %v2421_v23  ;;  %v5046_v38 = vrot.slane %v2898_v53, 11 }
 0x1e8   :  { %v2433_v13 = vld [vmem:[#allocation4 + $0xc] sm:$0x6]  ;;  %2759 = vst [vmem:[#allocation4 + $0x30] sm:$0xc] %v2758_v48  ;;  %v2795_v31 = vld [vmem:[#allocation4 + $0x40] sm:$0xc]  ;;  %v2875_v24 = vor.u32 %v7288_v47, %v7286_v30 }
 0x1e9   :  { %v2627_v28 = vld [vmem:[#allocation4 + $0x2c] sm:$0x3]  ;;  %v2345_v15 = vld [vmem:[#allocation4 + $0x14] sm:$0x3]  ;;  %2423 = vst [vmem:[#allocation4 + $0x8] sm:$0x6] %v2422_v0  ;;  %v2434_v33 = vsel %vm7282_vm4, %v7134_v44, %v2433_v13  ;;  %v7864_v13 = vor.u32 %v7228_v54, %v7226_v63 }
 0x1ea   :  { %v2628_v57 = vsel %vm7183_vm5, %v5040_v2, %v2627_v28  ;;  %v2385_v48 = vld [vmem:[#allocation4] sm:$0x6]  ;;  %v2407_v23 = vld [vmem:[#allocation4 + $0x4] sm:$0x6]  ;;  %2720 = vst [vmem:[#allocation4 + $0x24] sm:$0xc] %v2719_v10 }
 0x1eb   :  { %v2775_v60 = vld [vmem:[#allocation4 + $0x38] sm:$0xc]  ;;  %v2436_v6 = vld [vmem:[#allocation3 + $0x4] sm:$0x6]  ;;  %2892 = vst [vmem:[#allocation4 + $0x60] sm:$0x1] %v2886_v40  ;;  %v2408_v2 = vsel %vm7282_vm4, %v7863_v46, %v2407_v23 }
 0x1ec   :  { %2435 = vst [vmem:[#allocation4 + $0xc] sm:$0x6] %v2434_v33  ;;  %2629 = vst [vmem:[#allocation4 + $0x2c] sm:$0x3] %v2628_v57  ;;  %v2837_v47 = vld [vmem:[#allocation4 + $0x2c] sm:$0x8] }
 0x1ed   :  { %v7862_v53 = vrot.slane %v7089_v1, 9  ;;  %v2605_v44 = vld [vmem:[#allocation4 + $0x24] sm:$0x3]  ;;  %v2619_v10 = vld [vmem:[#allocation4 + $0x28] sm:$0x3]  ;;  %v2736_v1 = vsel %vm7126_vm7, %v7071_v36, %v7864_v13  ;;  %v7865_v40 = vrot.slane %v7232_v43, 6 }
 0x1ee   :  { %v2375_v33 = vld [vmem:[#allocation4 + $0x20] sm:$0x3]  ;;  %v2802_v57 = vld [vmem:[#allocation4 + $0x44] sm:$0xc]  ;;  %v7866_v19 = vrot.slane %v7248_v59, 7  ;;  %v2606_v63 = vsel %vm7183_vm5, %v2603_v3, %v2605_v44  ;;  %v2620_v36 = vsel %vm7183_vm5, %v7073_v37, %v2619_v10  ;;  %v2739_v4 = vsel %vm7211_vm13, %v2736_v1, %v2738_v45 }
 0x1ef   :  { %v2386_v0 = vsel %vm7282_vm4, %v7862_v53, %v2385_v48  ;;  %v2783_v28 = vsel %vm7211_vm13, %v7865_v40, %v2782_v26  ;;  %2409 = vst [vmem:[#allocation4 + $0x4] sm:$0x6] %v2408_v2  ;;  %v2463_v54 = vld [vmem:[#allocation4 + $0x18] sm:$0x6]  ;;  %v2476_v43 = vld [vmem:[#allocation4 + $0x1c] sm:$0x6]  ;;  %v7867_v37 = vor.u32 %v7046_v49, %v7036_v35  ;;  %v7869_v35 = vsel %vm7095_vm12, %v7091_v50, %v7099_v62 }
 0x1f0   :  { %v2838_v7 = vsel %vm6241_vm11, %v7866_v19, %v2837_v47  ;;  %2387 = vst [vmem:[#allocation4] sm:$0x6] %v2386_v0  ;;  %v2695_v26 = vld [vmem:[#allocation4 + $0x40] sm:$0x3]  ;;  %2784 = vst [vmem:[#allocation4 + $0x3c] sm:$0xc] %v2783_v28  ;;  %v2464_v3 = vsel %vm7282_vm4, %v7148_v34, %v2463_v54  ;;  %v2346_v49 = vsel %vm6413_vm1, %v7869_v35, %v2345_v15 }
 0x1f1   :  { %2839 = vst [vmem:[#allocation4 + $0x2c] sm:$0x8] %v2838_v7  ;;  %2607 = vst [vmem:[#allocation4 + $0x24] sm:$0x3] %v2606_v63  ;;  %v2850_v59 = vrot.slane %v2849_v42, 4  ;;  %v2824_v48 = vrot.slane %v2823_v8, 4  ;;  %v2477_v45 = vsel %vm7282_vm4, %v7867_v37, %v2476_v43  ;;  %v2696_v53 = vsel %vm7183_vm5, %v7241_v55, %v2695_v26 }
 0x1f2   :  { %2621 = vst [vmem:[#allocation4 + $0x28] sm:$0x3] %v2620_v36  ;;  %2740 = vst [vmem:[#allocation4 + $0x28] sm:$0xc] %v2739_v4  ;;  %v2437_v23 = vld [vmem:[#allocation4 + $0x10] sm:$0x6]  ;;  %v7868_v8 = vor.u32 %v7246_v56, %v7244_v27 }
 0x1f3   :  { %v2863_v47 = vld [vmem:[#allocation4 + $0x34] sm:$0x8]  ;;  %2465 = vst [vmem:[#allocation4 + $0x18] sm:$0x6] %v2464_v3  ;;  %2478 = vst [vmem:[#allocation4 + $0x1c] sm:$0x6] %v2477_v45  ;;  %v2438_v42 = vsel %vm7282_vm4, %v2436_v6, %v2437_v23 }
 0x1f4   :  { %v2796_v34 = vsel %vm7211_vm13, %v7868_v8, %v2795_v31  ;;  %2856 = vst [vmem:[#allocation4 + $0x54] sm:$0x1] %v2850_v59  ;;  %2830 = vst [vmem:[#allocation4 + $0x4c] sm:$0x1] %v2824_v48  ;;  %v2776_v31 = vsel %vm7211_vm13, %v7269_v9, %v2775_v60  ;;  %v7870_v16 = vrot.slane %v7253_v21, 5  ;;  %v7871_v62 = vshll.u32 %v7172_v52, 16 }
 0x1f5   :  { %2697 = vst [vmem:[#allocation4 + $0x40] sm:$0x3] %v2696_v53  ;;  %2797 = vst [vmem:[#allocation4 + $0x40] sm:$0xc] %v2796_v34  ;;  %v2876_v27 = vrot.slane %v2875_v24, 4  ;;  %v7872_v15 = vrot.slane %v7085_v58, 10  ;;  %v2448_v24 = vor.u32 %v7142_v18, %v7132_v14 }
 0x1f6   :  { %2347 = vst [vmem:[#allocation4 + $0x14] sm:$0x3] %v2346_v49  ;;  %2439 = vst [vmem:[#allocation4 + $0x10] sm:$0x6] %v2438_v42  ;;  %v2864_v50 = vsel %vm6241_vm11, %v7870_v16, %v2863_v47  ;;  %v2905_v55 = vsel %vm7095_vm12, %v5046_v38, %v7871_v62  ;;  %v2853_v56 = vld [vmem:[#allocation4 + $0x30] sm:$0x8] }
 0x1f7   :  { %2777 = vst [vmem:[#allocation4 + $0x38] sm:$0xc] %v2776_v31  ;;  %2865 = vst [vmem:[#allocation4 + $0x34] sm:$0x8] %v2864_v50  ;;  %v2376_v9 = vsel %vm6413_vm1, %v7872_v15, %v2375_v33  ;;  %v7873_v21 = vrot.slane %v7236_v51, 7  ;;  %v2854_v11 = vsel %vm6241_vm11, %v7271_v25, %v2853_v56  ;;  %v7874_v39 = vrot.slane %v7239_v41, 6 }
 0x1f8   :  { %2911 = vst [vmem:[#allocation4 + $0x64] sm:$0x1] %v2905_v55  ;;  %v2811_v52 = vld [vmem:[#allocation4 + $0x24] sm:$0x8]  ;;  %2882 = vst [vmem:[#allocation4 + $0x5c] sm:$0x1] %v2876_v27 }
 0x1f9   :  { %v2803_v60 = vsel %vm7211_vm13, %v7873_v21, %v2802_v57  ;;  %2377 = vst [vmem:[#allocation4 + $0x20] sm:$0x3] %v2376_v9  ;;  %2855 = vst [vmem:[#allocation4 + $0x30] sm:$0x8] %v2854_v11  ;;  %v2812_v58 = vsel %vm6241_vm11, %v7874_v39, %v2811_v52  ;;  %v2479_v51 = vld [vmem:[#allocation3 + $0x8] sm:$0x3] }
 0x1fa   :  { %2804 = vst [vmem:[#allocation4 + $0x44] sm:$0xc] %v2803_v60  ;;  %2813 = vst [vmem:[#allocation4 + $0x24] sm:$0x8] %v2812_v58  ;;  %v2889_v17 = vld [vmem:[#allocation4 + $0x3c] sm:$0x8] }
 0x1fb   :  { %v2827_v38 = vld [vmem:[#allocation4 + $0x28] sm:$0x8]  ;;  %v2890_v25 = vsel %vm6241_vm11, %v2885_v5, %v2889_v17  ;;  %v2481_v14 = vrot.slane %v2479_v51, 7  ;;  %v2449_v18 = vrot.slane %v2448_v24, 4  ;;  %v2896_v41 = vshll.u32 %v7273_v22, 16  ;;  %v2929_v10 = vld [vmem:[#allocation4 + $0x50] sm:$0xff]  ;;  %vm7875_vm1 = vmmov %vm7851_vm3 }
 0x1fc   :  { %v2828_v6 = vsel %vm6241_vm11, %v7258_v32, %v2827_v38  ;;  %2891 = vst [vmem:[#allocation4 + $0x3c] sm:$0x8] %v2890_v25  ;;  %v2908_v0 = vld [vmem:[#allocation4 + $0x40] sm:$0x8]  ;;  %v2912_v46 = vld [vmem:[#allocation3 + $0x14] sm:$0x8]  ;;  %v5059_v48 = vcombine.low %v2929_v10, %v2929_v10 }
 0x1fd   :  { %2829 = vst [vmem:[#allocation4 + $0x28] sm:$0x8] %v2828_v6  ;;  %v5886_v2 = vld [vmem:[%s7811_s3 + $0x180] sm:$0xff]   ;;  %v2451_v61 = vld [vmem:[#allocation4 + $0x14] sm:$0x6]  ;;  %v2909_v5 = vsel %vm6241_vm11, %v2896_v41, %v2908_v0  ;;  %v5894_v43 = vld [vmem:[%s7811_s3 + $0x1d0] sm:$0xff]  }
 0x1fe   :  { %v2879_v44 = vld [vmem:[#allocation4 + $0x38] sm:$0x8]  ;;  %v2452_v32 = vsel %vm7282_vm4, %v2449_v18, %v2451_v61  ;;  %v5878_v40 = vld [vmem:[#allocation4 + $0x8] ss:$36 sps:$4 sm:$0xff]   ;;  %2910 = vst [vmem:[#allocation4 + $0x40] sm:$0x8] %v2909_v5 }
 0x1ff   :  { %v2880_v22 = vsel %vm6241_vm11, %v7286_v30, %v2879_v44  ;;  %2453 = vst [vmem:[#allocation4 + $0x14] sm:$0x6] %v2452_v32  ;;  %v5890_v57 = vld [vmem:[%s7811_s3 + $0x1c8] sm:$0xff]   ;;  %v5060_v30 = vcombine.high %v2929_v10, %v2929_v10  ;;  %v5888_v7 = vld [vmem:[%s7811_s3 + $0x100] sm:$0xff]   ;;  %v5896_v59 = vld [vmem:[%s7811_s3 + $0x150] sm:$0xff]  }
 0x200   :  { %v2483_v13 = vld [vmem:[#allocation4 + $0x20] sm:$0x6]  ;;  %v5880_v28 = vld [vmem:[#allocation4 + $0xc] ss:$36 sps:$4 sm:$0xff]   ;;  %2881 = vst [vmem:[#allocation4 + $0x38] sm:$0x8] %v2880_v22 }
 0x201   :  { %v2914_v1 = vld [vmem:[#allocation4 + $0x44] sm:$0x8]  ;;  %v2484_v33 = vsel %vm7282_vm4, %v2481_v14, %v2483_v13  ;;  %3674 = vmatprep.mubr.bf16.mxu0 %v5880_v28  ;;  %v2928_v63 = vld [vmem:[#allocation4 + $0x48] sm:$0xff]  ;;  %v5891_v4 = vld [vmem:[%s7811_s3 + $0x148] sm:$0xff]  }
 0x202   :  { %2485 = vst [vmem:[#allocation4 + $0x20] sm:$0x6] %v2484_v33  ;;  %v2915_v19 = vsel %vm6241_vm11, %v2912_v46, %v2914_v1  ;;  %3675 = vmatmul.mubr.bf16.vlgmr.msra.gmra.mrb[40].mxu0 %v5878_v40  ;;  %v5882_v36 = vld [vmem:[#allocation4] ss:$36 sps:$4 sm:$0xff]   ;;  %v5058_v54 = vcombine.high %v2928_v63, %v2928_v63  ;;  %v5893_v26 = vld [vmem:[%s7811_s3 + $0x108] sm:$0xff]   ;;  %v5897_v3 = vld [vmem:[%s7811_s3 + $0x190] sm:$0xff]   ;;  %v5057_v47 = vcombine.low %v2928_v63, %v2928_v63 }
 0x203   :  { %2916 = vst [vmem:[#allocation4 + $0x44] sm:$0x8] %v2915_v19  ;;  %5525 = vmatpush3.bf16.msra.mxu0 %v5886_v2  ;;  %3682 = vmatprep.mubr.bf16.mxu0 %v5060_v30  ;;  %v5906_v45 = vld [vmem:[%s7811_s3 + $0x1d8] sm:$0xff]   ;;  %v5899_v23 = vld [vmem:[%s7811_s3 + $0x110] sm:$0xff]   ;;  %v5910_v35 = vld [vmem:[%s7811_s3 + $0x1e0] sm:$0xff]   ;;  %vm7876_vm11 = vcmask 1040384  }
 0x204   :  { %v5884_v29 = vld [vmem:[#allocation4 + $0x4] ss:$36 sps:$4 sm:$0xff]   ;;  %5526 = vmatprep.subr.bf16.mxu0 %v5890_v57  ;;  %v5914_v16 = vld [vmem:[%s7811_s3 + $0x1e8] sm:$0xff]   ;;  %v5918_v27 = vld [vmem:[%s7811_s3 + $0x1f0] sm:$0xff]  }
 0x205   :  { %3626 = vmatprep.mubr.bf16.mxu1 %v5884_v29  ;;  %v5902_v37 = vld [vmem:[#allocation4 + $0x1c] ss:$36 sps:$4 sm:$0xff]   ;;  %v5911_v42 = vld [vmem:[%s7811_s3 + $0x160] sm:$0xff]   ;;  %v5915_v62 = vld [vmem:[%s7811_s3 + $0x168] sm:$0xff]  }
 0x206   :  { %3627 = vmatmul.mubr.bf16.vlgmr.msra.gmra.mrb[32].mxu1 %v5882_v36  ;;  %v5907_v53 = vld [vmem:[%s7811_s3 + $0x158] sm:$0xff]   ;;  %v5912_v31 = vld [vmem:[%s7811_s3 + $0x1a0] sm:$0xff]   ;;  %v5916_v55 = vld [vmem:[%s7811_s3 + $0x1a8] sm:$0xff]  }
 0x207   :  { %5497 = vmatpush3.bf16.msra.mxu1 %v5888_v7  ;;  %3634 = vmatprep.mubr.bf16.mxu1 %v5058_v54  ;;  %v5908_v8 = vld [vmem:[%s7811_s3 + $0x198] sm:$0xff]   ;;  %v5905_v34 = vld [vmem:[#allocation4 + $0x14] ss:$36 sps:$4 sm:$0xff]   ;;  %v5913_v50 = vld [vmem:[%s7811_s3 + $0x120] sm:$0xff]  }
 0x208   :  { %5498 = vmatprep.subr.bf16.mxu1 %v5891_v4  ;;  %5527 = vmatpush3.bf16.msra.mxu0 %v5892_v20  ;;  %v5909_v49 = vld [vmem:[%s7811_s3 + $0x118] sm:$0xff]   ;;  %v5917_v56 = vld [vmem:[%s7811_s3 + $0x128] sm:$0xff]   ;;  %v5919_v15 = vld [vmem:[%s7811_s3 + $0x170] sm:$0xff]  }
 0x209   :  { %5528 = vmatprep.subr.bf16.mxu0 %v5894_v43  ;;  %v5920_v9 = vld [vmem:[%s7811_s3 + $0x1b0] sm:$0xff]   ;;  %v5922_v21 = vld [vmem:[%s7811_s3 + $0x1f8] sm:$0xff]   ;;  %v5927_v58 = vld [vmem:[%s7811_s3 + $0x200] sm:$0xff]  }
 0x20a   :  { %3683 = vmatmul.mubr.bf16.gmra.mrb[44].mxu0 %v5059_v48  ;;  %v5921_v60 = vld [vmem:[%s7811_s3 + $0x130] sm:$0xff]   ;;  %v5923_v11 = vld [vmem:[%s7811_s3 + $0x178] sm:$0xff]   ;;  %v5903_v25 = vld [vmem:[#allocation4 + $0x10] ss:$36 sps:$4 sm:$0xff]  }
 0x20b   :  { %5499 = vmatpush3.bf16.msra.mxu1 %v5893_v26  ;;  %3770 = vmatprep.mubr.bf16.mxu0 %v5902_v37  ;;  %v5924_v52 = vld [vmem:[%s7811_s3 + $0x1b8] sm:$0xff]   ;;  %v5900_v51 = vld [vmem:[#allocation4 + $0x18] ss:$36 sps:$4 sm:$0xff]   ;;  %v5929_v6 = vld [vmem:[%s7811_s3 + $0x208] sm:$0xff]  }
 0x20c   :  { %5500 = vmatprep.subr.bf16.mxu1 %v5896_v59  ;;  %5529 = vmatpush3.bf16.msra.mxu0 %v5897_v3  ;;  %v5925_v24 = vld [vmem:[%s7811_s3 + $0x138] sm:$0xff]   ;;  %v2930_v38 = vld [vmem:[#allocation4 + $0x58] sm:$0xff]  ;;  %v5935_v61 = vld [vmem:[%s7811_s3 + $0x220] sm:$0xff]  }
 0x20d   :  { %5530 = vmatprep.subr.bf16.mxu0 %v5906_v45  ;;  %v2931_v39 = vld [vmem:[#allocation4 + $0x60] sm:$0xff]  ;;  %v5062_v14 = vcombine.high %v2930_v38, %v2930_v38  ;;  %v5932_v18 = vld [vmem:[%s7811_s3 + $0x210] sm:$0xff]   ;;  %v5061_v0 = vcombine.low %v2930_v38, %v2930_v38  ;;  %v5936_v44 = vld [vmem:[%s7811_s3 + $0x228] sm:$0xff]  }
 0x20e   :  { %3635 = vmatmul.mubr.bf16.gmra.mrb[36].mxu1 %v5057_v47  ;;  %v5064_v17 = vcombine.high %v2931_v39, %v2931_v39  ;;  %v5063_v41 = vcombine.low %v2931_v39, %v2931_v39  ;;  %v5934_v46 = vld [vmem:[%s7811_s3 + $0x218] sm:$0xff]   ;;  %v5937_v10 = vld [vmem:[%s7811_s3 + $0x230] sm:$0xff]   ;;  %v5939_v32 = vld [vmem:[#allocation4 + $0x68] ss:$0 sps:$4 sm:$0xff]  }
 0x20f   :  { %5501 = vmatpush3.bf16.msra.mxu1 %v5899_v23  ;;  %3722 = vmatprep.mubr.bf16.mxu1 %v5905_v34  ;;  %v5933_v2 = vld [vmem:[#allocation4 + $0x20] ss:$36 sps:$4 sm:$0xff]   ;;  %v5940_v22 = vld [vmem:[%s7812_s5 + $0x40] sm:$0xff]   ;;  %v5944_v28 = vld [vmem:[%s7812_s5 + $0x48] sm:$0xff]  }
 0x210   :  { %5502 = vmatprep.subr.bf16.mxu1 %v5907_v53  ;;  %5531 = vmatpush3.bf16.msra.mxu0 %v5908_v8  ;;  %v5938_v5 = vld [vmem:[%s7811_s3 + $0x238] sm:$0xff]   ;;  %v5941_v13 = vld [vmem:[%s7812_s5] sm:$0xff]   ;;  %v5945_v33 = vld [vmem:[%s7812_s5 + $0x8] sm:$0xff]  }
 0x211   :  { %5532 = vmatprep.subr.bf16.mxu0 %v5910_v35  ;;  %v5942_v1 = vld [vmem:[%s7812_s5 + $0xc0] sm:$0xff]   ;;  %v5946_v57 = vld [vmem:[%s7812_s5 + $0xc8] sm:$0xff]   ;;  %v5948_v30 = vld [vmem:[%s7812_s5 + $0x50] sm:$0xff]  }
 0x212   :  { %v5943_v40 = vld [vmem:[%s7812_s5 + $0x80] sm:$0xff]   ;;  %v5947_v19 = vld [vmem:[%s7812_s5 + $0x88] sm:$0xff]   ;;  %v5949_v7 = vld [vmem:[%s7812_s5 + $0x10] sm:$0xff]  }
 0x213   :  { %5503 = vmatpush3.bf16.msra.mxu1 %v5909_v49  ;;  %v5950_v63 = vld [vmem:[%s7812_s5 + $0xd0] sm:$0xff]   ;;  %v5952_v29 = vld [vmem:[%s7812_s5 + $0x58] sm:$0xff]   ;;  %v5956_v43 = vld [vmem:[%s7812_s5 + $0x60] sm:$0xff]  }
 0x214   :  { %5504 = vmatprep.subr.bf16.mxu1 %v5911_v42  ;;  %5533 = vmatpush3.bf16.msra.mxu0 %v5912_v31  ;;  %v5951_v36 = vld [vmem:[%s7812_s5 + $0x90] sm:$0xff]   ;;  %v5953_v4 = vld [vmem:[%s7812_s5 + $0x18] sm:$0xff]   ;;  %v5957_v26 = vld [vmem:[%s7812_s5 + $0x20] sm:$0xff]  }
 0x215   :  { %5534 = vmatprep.subr.bf16.mxu0 %v5914_v16  ;;  %v5954_v20 = vld [vmem:[%s7812_s5 + $0xd8] sm:$0xff]   ;;  %v5958_v59 = vld [vmem:[%s7812_s5 + $0xe0] sm:$0xff]   ;;  %v5960_v3 = vld [vmem:[%s7812_s5 + $0x68] sm:$0xff]  }
 0x216   :  { %v5955_v54 = vld [vmem:[%s7812_s5 + $0x98] sm:$0xff]   ;;  %v5959_v48 = vld [vmem:[%s7812_s5 + $0xa0] sm:$0xff]   ;;  %v5961_v37 = vld [vmem:[%s7812_s5 + $0x28] sm:$0xff]  }
 0x217   :  { %5505 = vmatpush3.bf16.msra.mxu1 %v5913_v50  ;;  %v5962_v45 = vld [vmem:[%s7812_s5 + $0xe8] sm:$0xff]   ;;  %v5964_v47 = vld [vmem:[%s7812_s5 + $0x70] sm:$0xff]   ;;  %v5968_v35 = vld [vmem:[%s7812_s5 + $0x78] sm:$0xff]  }
 0x218   :  { %5506 = vmatprep.subr.bf16.mxu1 %v5915_v62  ;;  %5535 = vmatpush3.bf16.msra.mxu0 %v5916_v55  ;;  %v5963_v23 = vld [vmem:[%s7812_s5 + $0xa8] sm:$0xff]   ;;  %v5965_v53 = vld [vmem:[%s7812_s5 + $0x30] sm:$0xff]   ;;  %v5969_v49 = vld [vmem:[%s7812_s5 + $0x38] sm:$0xff]  }
 0x219   :  { %5536 = vmatprep.subr.bf16.mxu0 %v5918_v27  ;;  %v5966_v8 = vld [vmem:[%s7812_s5 + $0xf0] sm:$0xff]   ;;  %v5970_v42 = vld [vmem:[%s7812_s5 + $0xf8] sm:$0xff]   ;;  %v5974_v16 = vld [vmem:[%s7812_s5 + $0x140] sm:$0xff]  }
 0x21a   :  { %v5967_v34 = vld [vmem:[%s7812_s5 + $0xb0] sm:$0xff]   ;;  %v5971_v31 = vld [vmem:[%s7812_s5 + $0xb8] sm:$0xff]   ;;  %v5980_v62 = vld [vmem:[%s7812_s5 + $0x1c0] sm:$0xff]  }
 0x21b   :  { %5507 = vmatpush3.bf16.msra.mxu1 %v5917_v56  ;;  %vm7650_vm12 = vmand %vm7876_vm11, %vm7875_vm1 }
 0x21c   :  { %5508 = vmatprep.subr.bf16.mxu1 %v5919_v15  ;;  %5537 = vmatpush3.bf16.msra.mxu0 %v5920_v9  ;;  %v5047_v15 = vld [vmem:[%s7813_s4] ss:$0 sm:$0xff] }
 0x21d   :  { %5538 = vmatprep.subr.bf16.mxu0 %v5922_v21 }
 0x21f   :  { %5509 = vmatpush3.bf16.msra.mxu1 %v5921_v60 }
 0x220   :  { %5510 = vmatprep.subr.bf16.mxu1 %v5923_v11  ;;  %5539 = vmatpush3.bf16.msra.mxu0 %v5924_v52 }
 0x221   :  { %5562 = vmatprep.subr.bf16.mxu0 %v5940_v22 }
 0x223   :  { %5511 = vmatpush3.bf16.msra.mxu1 %v5925_v24  ;;  %3771 = vmatmul.mubr.bf16.vlgmr.msra.gmra.mrb[48].mxu0 %v5900_v51 }
 0x224   :  { %3778 = vmatprep.mubr.bf16.mxu0 %v5064_v17  ;;  %5683 = vmatprep.subr.bf16.mxu1 %v5927_v58 }
 0x225   :  { %5563 = vmatpush3.bf16.msra.mxu0 %v5941_v13 }
 0x226   :  { %3723 = vmatmul.mubr.bf16.vlgmr.msra.gmra.mrb[40].mxu1 %v5903_v25  ;;  %5564 = vmatprep.subr.bf16.mxu0 %v5944_v28 }
 0x227   :  { %3730 = vmatprep.mubr.bf16.mxu1 %v5062_v14  ;;  %5684 = vmatpush3.bf16.msra.mxu1 %v5927_v58 }
 0x228   :  { %5685 = vmatprep.subr.bf16.mxu1 %v5929_v6 }
 0x229   :  { %5565 = vmatpush3.bf16.msra.mxu0 %v5945_v33 }
 0x22a   :  { %5566 = vmatprep.subr.bf16.mxu0 %v5948_v30 }
 0x22b   :  { %5686 = vmatpush3.bf16.msra.mxu1 %v5929_v6  ;;  %3779 = vmatmul.mubr.bf16.gmra.mrb[52].mxu0 %v5063_v41 }
 0x22c   :  { %5687 = vmatprep.subr.bf16.mxu1 %v5932_v18 }
 0x22d   :  { %5567 = vmatpush3.bf16.msra.mxu0 %v5949_v7 }
 0x22e   :  { %3731 = vmatmul.mubr.bf16.gmra.mrb[44].mxu1 %v5061_v0  ;;  %5568 = vmatprep.subr.bf16.mxu0 %v5952_v29 }
 0x22f   :  { %5688 = vmatpush3.bf16.msra.mxu1 %v5932_v18  ;;  %5699 = vmatprep.mubr.bf16.mxu1 %v5933_v2 }
 0x230   :  { %5689 = vmatprep.subr.bf16.mxu1 %v5934_v46 }
 0x231   :  { %5569 = vmatpush3.bf16.msra.mxu0 %v5953_v4 }
 0x232   :  { %5570 = vmatprep.subr.bf16.mxu0 %v5956_v43 }
 0x233   :  { %5690 = vmatpush3.bf16.msra.mxu1 %v5934_v46 }
 0x234   :  { %5691 = vmatprep.subr.bf16.mxu1 %v5935_v61 }
 0x235   :  { %5571 = vmatpush3.bf16.msra.mxu0 %v5957_v26 }
 0x236   :  { %5572 = vmatprep.subr.bf16.mxu0 %v5960_v3 }
 0x237   :  { %5692 = vmatpush3.bf16.msra.mxu1 %v5935_v61 }
 0x238   :  { %5693 = vmatprep.subr.bf16.mxu1 %v5936_v44 }
 0x239   :  { %5573 = vmatpush3.bf16.msra.mxu0 %v5961_v37 }
 0x23a   :  { %5574 = vmatprep.subr.bf16.mxu0 %v5964_v47 }
 0x23b   :  { %5694 = vmatpush3.bf16.msra.mxu1 %v5936_v44 }
 0x23c   :  { %5695 = vmatprep.subr.bf16.mxu1 %v5937_v10 }
 0x23d   :  { %5575 = vmatpush3.bf16.msra.mxu0 %v5965_v53 }
 0x23e   :  { %5576 = vmatprep.subr.bf16.mxu0 %v5968_v35 }
 0x23f   :  { %5696 = vmatpush3.bf16.msra.mxu1 %v5937_v10 }
 0x240   :  { %5697 = vmatprep.subr.bf16.mxu1 %v5938_v5 }
 0x241   :  { %5577 = vmatpush3.bf16.msra.mxu0 %v5969_v49 }
 0x242   :  { %5606 = vmatprep.subr.bf16.mxu0 %v5974_v16 }
 0x243   :  { %5698 = vmatpush3.bf16.msra.mxu1 %v5938_v5 }
 0x244   :  { %5584 = vmatprep.subr.bf16.mxu1 %v5942_v1 }
 0x246   :  { %5700 = vmatmul.mubr.bf16.vlgmr.msra.gmra.mrb[48].mxu1 %v5939_v32 }
 0x247   :  { %5585 = vmatpush3.bf16.msra.mxu1 %v5943_v40 }
 0x248   :  { %5586 = vmatprep.subr.bf16.mxu1 %v5946_v57 }
 0x24b   :  { %5587 = vmatpush3.bf16.msra.mxu1 %v5947_v19 }
 0x24c   :  { %5588 = vmatprep.subr.bf16.mxu1 %v5950_v63 }
 0x24f   :  { %5589 = vmatpush3.bf16.msra.mxu1 %v5951_v36 }
 0x250   :  { %5590 = vmatprep.subr.bf16.mxu1 %v5954_v20 }
 0x253   :  { %5591 = vmatpush3.bf16.msra.mxu1 %v5955_v54 }
 0x254   :  { %5592 = vmatprep.subr.bf16.mxu1 %v5958_v59 }
 0x257   :  { %5593 = vmatpush3.bf16.msra.mxu1 %v5959_v48 }
 0x258   :  { %5594 = vmatprep.subr.bf16.mxu1 %v5962_v45 }
 0x25b   :  { %5595 = vmatpush3.bf16.msra.mxu1 %v5963_v23 }
 0x25c   :  { %5596 = vmatprep.subr.bf16.mxu1 %v5966_v8 }
 0x25f   :  { %5597 = vmatpush3.bf16.msra.mxu1 %v5967_v34 }
 0x260   :  { %5598 = vmatprep.subr.bf16.mxu1 %v5970_v42 }
 0x263   :  { %5599 = vmatpush3.bf16.msra.mxu1 %v5971_v31 }
 0x264   :  { %5628 = vmatprep.subr.bf16.mxu1 %v5980_v62 }
 0x2d5   :  { %v5484_v50 = vpop.f32.mrb[40].mxu0 }
 0x2d6   :  { %v5485_v55 = vpop.f32.mrb[41].mxu0 }
 0x2d7   :  { %v5486_v27 = vadd.f32 %v5485_v55, %v5484_v50  ;;  %v5487_v56 = vpop.f32.mrb[42].mxu0 }
 0x2d8   :  { %v5488_v9 = vpop.f32.mrb[43].mxu0 }
 0x2d9   :  { %v5456_v21 = vpop.f32.mrb[32].mxu1  ;;  %v5489_v60 = vadd.f32 %v5488_v9, %v5487_v56 }
 0x2da   :  { %v5457_v11 = vpop.f32.mrb[33].mxu1 }
 0x2db   :  { %v5458_v52 = vadd.f32 %v5457_v11, %v5456_v21  ;;  %v5459_v24 = vpop.f32.mrb[34].mxu1  ;;  %v3854_v21 = vld [vmem:[#allocation6] sm:$0x1]  ;;  %v3864_v11 = vld [vmem:[#allocation6 + $0x4] sm:$0x1] }
 0x2dc   :  { %v5460_v39 = vpop.f32.mrb[35].mxu1 }
 0x2dd   :  { %v3629_v58 = vadd.f32 %v5458_v52, %v5047_v15  ;;  %v5461_v51 = vadd.f32 %v5460_v39, %v5459_v24  ;;  %v5490_v17 = vpop.f32.mrb[44].mxu0  ;;  %v3872_v52 = vld [vmem:[#allocation6 + $0x8] sm:$0x1]  ;;  %v3890_v24 = vld [vmem:[#allocation6 + $0x10] sm:$0x1] }
 0x2de   :  { %v5491_v38 = vpop.f32.mrb[45].mxu0 }
 0x2df   :  { %v3632_v25 = vadd.f32 %v5461_v51, %v5047_v15  ;;  %v5492_v6 = vadd.f32 %v5491_v38, %v5490_v17  ;;  %v5493_v14 = vpop.f32.mrb[46].mxu0  ;;  %v3677_v18 = vadd.f32 %v5486_v27, %v3629_v58  ;;  %v3908_v17 = vld [vmem:[#allocation6 + $0x18] sm:$0x1] }
 0x2e0   :  { %v5494_v41 = vpop.f32.mrb[47].mxu0 }
 0x2e1   :  { %v5462_v0 = vpop.f32.mrb[36].mxu1  ;;  %v3680_v46 = vadd.f32 %v5489_v60, %v3632_v25  ;;  %v3922_v60 = vld [vmem:[#allocation6 + $0x20] sm:$0x1]  ;;  %v3882_v41 = vld [vmem:[#allocation6 + $0xc] sm:$0x1] }
 0x2e2   :  { %v5463_v2 = vpop.f32.mrb[37].mxu1 }
 0x2e3   :  { %v5464_v61 = vadd.f32 %v5463_v2, %v5462_v0  ;;  %v5465_v44 = vpop.f32.mrb[38].mxu1 }
 0x2e4   :  { %v5466_v10 = vpop.f32.mrb[39].mxu1 }
 0x2e5   :  { %v3637_v5 = vadd.f32 %v5464_v61, %v5047_v15 }
 0x2e7   :  { %v3685_v32 = vadd.f32 %v5492_v6, %v3637_v5 }
 0x2f6   :  { %v5540_v22 = vpop.f32.mrb[48].mxu0 }
 0x2f7   :  { %v5541_v13 = vpop.f32.mrb[49].mxu0 }
 0x2f8   :  { %v5542_v1 = vadd.f32 %v5541_v13, %v5540_v22  ;;  %v5543_v40 = vpop.f32.mrb[50].mxu0 }
 0x2f9   :  { %v5512_v28 = vpop.f32.mrb[40].mxu1  ;;  %v5544_v33 = vpop.f32.mrb[51].mxu0 }
 0x2fa   :  { %v5513_v57 = vpop.f32.mrb[41].mxu1  ;;  %v5545_v19 = vadd.f32 %v5544_v33, %v5543_v40 }
 0x2fb   :  { %v5514_v30 = vadd.f32 %v5513_v57, %v5512_v28  ;;  %v5515_v7 = vpop.f32.mrb[42].mxu1 }
 0x2fc   :  { %v5516_v63 = vpop.f32.mrb[43].mxu1 }
 0x2fd   :  { %v3725_v36 = vadd.f32 %v5514_v30, %v3677_v18  ;;  %v5517_v29 = vadd.f32 %v5516_v63, %v5515_v7  ;;  %v3918_v63 = vld [vmem:[#allocation6 + $0x1c] sm:$0x1] }
 0x2fe   :  { %v5546_v4 = vpop.f32.mrb[52].mxu0 }
 0x2ff   :  { %v3728_v20 = vadd.f32 %v5517_v29, %v3680_v46  ;;  %v5547_v54 = vpop.f32.mrb[53].mxu0  ;;  %v3773_v43 = vadd.f32 %v5542_v1, %v3725_v36 }
 0x300   :  { %v5548_v26 = vadd.f32 %v5547_v54, %v5546_v4  ;;  %v5549_v59 = vpop.f32.mrb[54].mxu0 }
 0x301   :  { %v5518_v48 = vpop.f32.mrb[44].mxu1  ;;  %v5550_v3 = vpop.f32.mrb[55].mxu0  ;;  %v3776_v37 = vadd.f32 %v5545_v19, %v3728_v20  ;;  %v3900_v19 = vld [vmem:[#allocation6 + $0x14] sm:$0x1] }
 0x302   :  { %v5519_v45 = vpop.f32.mrb[45].mxu1 }
 0x303   :  { %v5520_v23 = vadd.f32 %v5519_v45, %v5518_v48  ;;  %v5521_v47 = vpop.f32.mrb[46].mxu1 }
 0x304   :  { %v5522_v53 = vpop.f32.mrb[47].mxu1 }
 0x305   :  { %v3733_v8 = vadd.f32 %v5520_v23, %v3685_v32 }
 0x307   :  { %v3781_v34 = vadd.f32 %v5548_v26, %v3733_v8  ;;  %v6001_v26 = vld [vmem:[%s7812_s5 + $0x128] sm:$0xff]  }
 0x319   :  { %v5701_v35 = vpop.f32.mrb[48].mxu1 }
 0x31a   :  { %v3829_v49 = vadd.f32 %v5701_v35, %v3781_v34  ;;  %v3820_v42 = vpop.f32.mrb[49].mxu1 }
 0x31b   :  { %v3821_v31 = vadd.f32 %v3820_v42, %v3773_v43  ;;  %v5702_v16 = vpop.f32.mrb[50].mxu1 }
 0x31c   :  { %v3836_v50 = vmax.f32 %v3829_v49, 0.0  ;;  %v3823_v62 = vpop.f32.mrb[51].mxu1 }
 0x31d   :  { %v3824_v55 = vadd.f32 %v3823_v62, %v3776_v37  ;;  %v3834_v56 = vmax.f32 %v3821_v31, 0.0 }
 0x31e   :  { %v5245_v27 = vpack.c.bf16 %v3836_v50, %v3836_v50 }
 0x31f   :  { %v3835_v15 = vmax.f32 %v3824_v55, 0.0 }
 0x320   :  { %3852 = vst [vmem:[#allocation5 + $0x8] sm:$0xf] %v5245_v27 }
 0x321   :  { %v5264_v9 = vpack.c.bf16 %v3835_v15, %v3834_v56 }
 0x323   :  { %5265 = vst [vmem:[#allocation5] sm:$0xff] %v5264_v9  }
 0x327   :  { %v3984_v53 = vld [vmem:[#allocation5 + $0x8] sm:$0x1] }
 0x328   :  { %v3992_v8 = vld [vmem:[#allocation5 + $0x8] sm:$0x1] }
 0x32a   :  { %v3853_v39 = vld [vmem:[#allocation5] sm:$0x1]  ;;  %v3867_v51 = vld [vmem:[#allocation5] sm:$0x2]  ;;  %v3885_v14 = vld [vmem:[#allocation5] sm:$0x4] }
 0x32b   :  { %v3857_v58 = vld [vmem:[#allocation5] sm:$0x1]  ;;  %v5142_v25 = vrot.slane %v3867_v51, 9  ;;  %v3875_v6 = vld [vmem:[#allocation5] sm:$0x2]  ;;  %v3855_v18 = vsel %vm6309_vm14, %v3853_v39, %v3854_v21  ;;  %v5144_v46 = vrot.slane %v3885_v14, 10 }
 0x32c   :  { %v3859_v38 = vshrl.u32 %v3857_v58, 16  ;;  %v3877_v0 = vshrl.u32 %v3875_v6, 16  ;;  %v3893_v2 = vld [vmem:[#allocation5] sm:$0x4]  ;;  %v3903_v61 = vld [vmem:[#allocation5] sm:$0x8] }
 0x32d   :  { %3856 = vst [vmem:[#allocation6] sm:$0x1] %v3855_v18  ;;  %v3895_v44 = vshrl.u32 %v3893_v2, 16  ;;  %v5146_v10 = vrot.slane %v3903_v61, 11  ;;  %v3911_v5 = vld [vmem:[#allocation5] sm:$0x8]  ;;  %v3873_v13 = vsel %vm6309_vm14, %v5142_v25, %v3872_v52  ;;  %v3891_v57 = vsel %vm6309_vm14, %v5144_v46, %v3890_v24 }
 0x32e   :  { %v3921_v32 = vld [vmem:[#allocation5 + $0x4] sm:$0x1]  ;;  %v3865_v22 = vsel %vm6309_vm14, %v3859_v38, %v3864_v11  ;;  %v5143_v1 = vrot.slane %v3877_v0, 9  ;;  %v3913_v40 = vshrl.u32 %v3911_v5, 16  ;;  %v3930_v33 = vld [vmem:[#allocation5 + $0x4] sm:$0x2] }
 0x32f   :  { %v3923_v28 = vsel %vm6309_vm14, %v3921_v32, %v3922_v60  ;;  %3866 = vst [vmem:[#allocation6 + $0x4] sm:$0x1] %v3865_v22  ;;  %3874 = vst [vmem:[#allocation6 + $0x8] sm:$0x1] %v3873_v13  ;;  %v5145_v30 = vrot.slane %v3895_v44, 10  ;;  %v3909_v7 = vsel %vm6309_vm14, %v5146_v10, %v3908_v17  ;;  %v3932_v29 = vshll.u32 %v3930_v33, 16 }
 0x330   :  { %3924 = vst [vmem:[#allocation6 + $0x20] sm:$0x1] %v3923_v28  ;;  %3892 = vst [vmem:[#allocation6 + $0x10] sm:$0x1] %v3891_v57  ;;  %v5147_v36 = vrot.slane %v3913_v40, 11  ;;  %v3883_v20 = vsel %vm6309_vm14, %v5143_v1, %v3882_v41  ;;  %v3986_v39 = vshll.u32 %v3984_v53, 16 }
 0x331   :  { %v3948_v4 = vld [vmem:[#allocation5 + $0x4] sm:$0x4]  ;;  %3910 = vst [vmem:[#allocation6 + $0x18] sm:$0x1] %v3909_v7  ;;  %v3940_v54 = vld [vmem:[#allocation5 + $0x4] sm:$0x2]  ;;  %v3901_v59 = vsel %vm6309_vm14, %v5145_v30, %v3900_v19 }
 0x332   :  { %v3966_v43 = vld [vmem:[#allocation5 + $0x4] sm:$0x8]  ;;  %3884 = vst [vmem:[#allocation6 + $0xc] sm:$0x1] %v3883_v20  ;;  %v3925_v48 = vld [vmem:[#allocation5 + $0x4] sm:$0x1]  ;;  %v3919_v37 = vsel %vm6309_vm14, %v5147_v36, %v3918_v63 }
 0x333   :  { %v3958_v3 = vld [vmem:[#allocation5 + $0x4] sm:$0x4]  ;;  %3902 = vst [vmem:[#allocation6 + $0x14] sm:$0x1] %v3901_v59  ;;  %v3950_v45 = vshll.u32 %v3948_v4, 16  ;;  %v5148_v34 = vrot.slane %v3932_v29, 9 }
 0x334   :  { %v3976_v23 = vld [vmem:[#allocation5 + $0x4] sm:$0x8]  ;;  %v3927_v47 = vld [vmem:[#allocation6] sm:$0x1]  ;;  %3920 = vst [vmem:[#allocation6 + $0x1c] sm:$0x1] %v3919_v37 }
 0x335   :  { %v5149_v35 = vrot.slane %v3940_v54, 9  ;;  %v3968_v49 = vshll.u32 %v3966_v43, 16  ;;  %v3928_v42 = vsel %vm7650_vm12, %v3925_v48, %v3927_v47  ;;  %v5151_v31 = vrot.slane %v3958_v3, 10  ;;  %v5975_v41 = vld [vmem:[%s7812_s5 + $0x100] sm:$0xff]   ;;  %v5982_v0 = vld [vmem:[%s7812_s5 + $0x148] sm:$0xff]   ;;  %v5988_v40 = vld [vmem:[%s7812_s5 + $0x150] sm:$0xff]  }
 0x336   :  { %3929 = vst [vmem:[#allocation6] sm:$0x1] %v3928_v42  ;;  %v3937_v16 = vld [vmem:[#allocation6 + $0x4] sm:$0x1]  ;;  %v3945_v50 = vld [vmem:[#allocation6 + $0x8] sm:$0x1] }
 0x337   :  { %v5153_v62 = vrot.slane %v3976_v23, 11  ;;  %v3938_v12 = vsel %vm7650_vm12, %v5148_v34, %v3937_v16  ;;  %v3946_v55 = vsel %vm7650_vm12, %v5149_v35, %v3945_v50  ;;  %v3963_v27 = vld [vmem:[#allocation6 + $0x10] sm:$0x1]  ;;  %v3993_v56 = vld [vmem:[#allocation6 + $0x20] sm:$0x1]  ;;  %v5150_v15 = vrot.slane %v3950_v45, 10 }
 0x338   :  { %3939 = vst [vmem:[#allocation6 + $0x4] sm:$0x1] %v3938_v12  ;;  %3947 = vst [vmem:[#allocation6 + $0x8] sm:$0x1] %v3946_v55  ;;  %v3964_v9 = vsel %vm7650_vm12, %v5151_v31, %v3963_v27  ;;  %v3981_v21 = vld [vmem:[#allocation6 + $0x18] sm:$0x1]  ;;  %v3994_v60 = vsel %vm7650_vm12, %v3992_v8, %v3993_v56 }
 0x339   :  { %v5152_v11 = vrot.slane %v3968_v49, 11  ;;  %v3955_v52 = vld [vmem:[#allocation6 + $0xc] sm:$0x1]  ;;  %3965 = vst [vmem:[#allocation6 + $0x10] sm:$0x1] %v3964_v9  ;;  %v3982_v24 = vsel %vm7650_vm12, %v5153_v62, %v3981_v21  ;;  %v5981_v10 = vld [vmem:[%s7812_s5 + $0x180] sm:$0xff]  }
 0x33a   :  { %3995 = vst [vmem:[#allocation6 + $0x20] sm:$0x1] %v3994_v60  ;;  %v3956_v58 = vsel %vm7650_vm12, %v5150_v15, %v3955_v52  ;;  %v3973_v51 = vld [vmem:[#allocation6 + $0x14] sm:$0x1]  ;;  %3983 = vst [vmem:[#allocation6 + $0x18] sm:$0x1] %v3982_v24 }
 0x33b   :  { %3957 = vst [vmem:[#allocation6 + $0xc] sm:$0x1] %v3956_v58  ;;  %v3974_v17 = vsel %vm7650_vm12, %v5152_v11, %v3973_v51  ;;  %v3989_v38 = vld [vmem:[#allocation6 + $0x1c] sm:$0x1]  ;;  %v5989_v33 = vld [vmem:[%s7812_s5 + $0x110] sm:$0xff]   ;;  %v5992_v19 = vld [vmem:[%s7812_s5 + $0x158] sm:$0xff]  }
 0x33c   :  { %3975 = vst [vmem:[#allocation6 + $0x14] sm:$0x1] %v3974_v17  ;;  %v3990_v25 = vsel %vm7650_vm12, %v3986_v39, %v3989_v38  ;;  %v5985_v22 = vld [vmem:[%s7812_s5 + $0x108] sm:$0xff]   ;;  %v5990_v57 = vld [vmem:[%s7812_s5 + $0x1d0] sm:$0xff]   ;;  %v5993_v7 = vld [vmem:[%s7812_s5 + $0x118] sm:$0xff]   ;;  %v6022_v42 = vmov 0.0  }
 0x33d   :  { %3991 = vst [vmem:[#allocation6 + $0x1c] sm:$0x1] %v3990_v25  ;;  %v5986_v13 = vld [vmem:[%s7812_s5 + $0x1c8] sm:$0xff]   ;;  %v5991_v30 = vld [vmem:[%s7812_s5 + $0x190] sm:$0xff]   ;;  %v5994_v63 = vld [vmem:[%s7812_s5 + $0x1d8] sm:$0xff]   ;;  %vm6023_vm14 = vmmov 0  }
 0x33e   :  { %v5987_v28 = vld [vmem:[%s7812_s5 + $0x188] sm:$0xff]   ;;  %v5996_v36 = vld [vmem:[%s7812_s5 + $0x160] sm:$0xff]   ;;  %v5995_v29 = vld [vmem:[%s7812_s5 + $0x198] sm:$0xff]  }
 0x33f   :  { %v3996_v6 = vld [vmem:[#allocation6] sm:$0xff]  ;;  %v5997_v4 = vld [vmem:[%s7812_s5 + $0x120] sm:$0xff]   ;;  %v6000_v54 = vld [vmem:[%s7812_s5 + $0x168] sm:$0xff]  }
 0x340   :  { %v5155_v14 = vcombine.low %v3996_v6, %v3996_v6  ;;  %v5156_v18 = vcombine.high %v3996_v6, %v3996_v6  ;;  %v5998_v20 = vld [vmem:[%s7812_s5 + $0x1e0] sm:$0xff]   ;;  %v6002_v59 = vld [vmem:[%s7812_s5 + $0x1e8] sm:$0xff]   ;;  %v6004_v48 = vld [vmem:[%s7812_s5 + $0x170] sm:$0xff]  }
 0x341   :  { %v5999_v43 = vld [vmem:[%s7812_s5 + $0x1a0] sm:$0xff]   ;;  %v6003_v3 = vld [vmem:[%s7812_s5 + $0x1a8] sm:$0xff]   ;;  %v6005_v37 = vld [vmem:[%s7812_s5 + $0x130] sm:$0xff]  }
 0x342   :  { %4648 = vmatprep.mubr.bf16.mxu0 %v5156_v18  ;;  %v3997_v46 = vld [vmem:[#allocation6 + $0x8] sm:$0xff]  ;;  %v6006_v45 = vld [vmem:[%s7812_s5 + $0x1f0] sm:$0xff]   ;;  %v6012_v35 = vld [vmem:[%s7812_s5 + $0x200] sm:$0xff]  }
 0x343   :  { %4649 = vmatmul.mubr.bf16.vlgmr.msra.gmra.mrb[56].mxu0 %v5155_v14  ;;  %v5157_v2 = vcombine.low %v3997_v46, %v3997_v46  ;;  %v5158_v61 = vcombine.high %v3997_v46, %v3997_v46  ;;  %v7682_v44 = vld [vmem:[#allocation6 + $0x10] sm:$0xff]  ;;  %v6008_v23 = vld [vmem:[%s7812_s5 + $0x178] sm:$0xff]   ;;  %v6007_v47 = vld [vmem:[%s7812_s5 + $0x1b0] sm:$0xff]  }
 0x344   :  { %5607 = vmatpush3.bf16.msra.mxu0 %v5975_v41  ;;  %v5160_v5 = vcombine.high %v7682_v44, %v7682_v44  ;;  %v7689_v32 = vld [vmem:[#allocation6 + $0x18] sm:$0xff]  ;;  %v6009_v53 = vld [vmem:[%s7812_s5 + $0x138] sm:$0xff]   ;;  %v5159_v49 = vcombine.low %v7682_v44, %v7682_v44  ;;  %v6014_v50 = vld [vmem:[%s7812_s5 + $0x210] sm:$0xff]  }
 0x345   :  { %4688 = vmatprep.mubr.bf16.mxu1 %v5158_v61  ;;  %5608 = vmatprep.subr.bf16.mxu0 %v5982_v0  ;;  %v5162_v1 = vcombine.high %v7689_v32, %v7689_v32  ;;  %v6010_v8 = vld [vmem:[%s7812_s5 + $0x1f8] sm:$0xff]   ;;  %v5161_v31 = vcombine.low %v7689_v32, %v7689_v32  ;;  %v6013_v16 = vld [vmem:[%s7812_s5 + $0x208] sm:$0xff]   ;;  %v6016_v12 = vld [vmem:[%s7812_s5 + $0x220] sm:$0xff]  }
 0x346   :  { %4728 = vmatprep.mubr.bf16.mxu0 %v5160_v5  ;;  %4689 = vmatmul.mubr.bf16.vlgmr.msra.gmra.mrb[52].mxu1 %v5157_v2  ;;  %v6011_v34 = vld [vmem:[%s7812_s5 + $0x1b8] sm:$0xff]   ;;  %v6017_v55 = vld [vmem:[%s7812_s5 + $0x228] sm:$0xff]   ;;  %v6018_v27 = vld [vmem:[%s7812_s5 + $0x230] sm:$0xff]  }
 0x347   :  { %5629 = vmatpush3.bf16.msra.mxu1 %v5981_v10  ;;  %4768 = vmatprep.mubr.bf16.mxu1 %v5162_v1  ;;  %v6015_v62 = vld [vmem:[%s7812_s5 + $0x218] sm:$0xff]   ;;  %v6020_v15 = vld [vmem:[#allocation6 + $0x20] ss:$0 sps:$4 sm:$0xff]   ;;  %v5154_v21 = vld [vmem:[%s7814_s6] ss:$0 sm:$0xff] }
 0x348   :  { %5609 = vmatpush3.bf16.msra.mxu0 %v5985_v22  ;;  %5630 = vmatprep.subr.bf16.mxu1 %v5986_v13  ;;  %v6019_v56 = vld [vmem:[%s7812_s5 + $0x238] sm:$0xff]  }
 0x349   :  { %5610 = vmatprep.subr.bf16.mxu0 %v5988_v40 }
 0x34b   :  { %5631 = vmatpush3.bf16.msra.mxu1 %v5987_v28 }
 0x34c   :  { %5611 = vmatpush3.bf16.msra.mxu0 %v5989_v33  ;;  %5632 = vmatprep.subr.bf16.mxu1 %v5990_v57 }
 0x34d   :  { %5612 = vmatprep.subr.bf16.mxu0 %v5992_v19 }
 0x34f   :  { %5633 = vmatpush3.bf16.msra.mxu1 %v5991_v30 }
 0x350   :  { %5613 = vmatpush3.bf16.msra.mxu0 %v5993_v7  ;;  %5634 = vmatprep.subr.bf16.mxu1 %v5994_v63 }
 0x351   :  { %5614 = vmatprep.subr.bf16.mxu0 %v5996_v36 }
 0x353   :  { %5635 = vmatpush3.bf16.msra.mxu1 %v5995_v29 }
 0x354   :  { %5615 = vmatpush3.bf16.msra.mxu0 %v5997_v4  ;;  %5636 = vmatprep.subr.bf16.mxu1 %v5998_v20 }
 0x355   :  { %5616 = vmatprep.subr.bf16.mxu0 %v6000_v54 }
 0x357   :  { %5637 = vmatpush3.bf16.msra.mxu1 %v5999_v43 }
 0x358   :  { %5617 = vmatpush3.bf16.msra.mxu0 %v6001_v26  ;;  %5638 = vmatprep.subr.bf16.mxu1 %v6002_v59 }
 0x359   :  { %5618 = vmatprep.subr.bf16.mxu0 %v6004_v48 }
 0x35b   :  { %5639 = vmatpush3.bf16.msra.mxu1 %v6003_v3 }
 0x35c   :  { %5619 = vmatpush3.bf16.msra.mxu0 %v6005_v37  ;;  %5640 = vmatprep.subr.bf16.mxu1 %v6006_v45 }
 0x35d   :  { %5620 = vmatprep.subr.bf16.mxu0 %v6008_v23 }
 0x35f   :  { %5641 = vmatpush3.bf16.msra.mxu1 %v6007_v47 }
 0x360   :  { %5621 = vmatpush3.bf16.msra.mxu0 %v6009_v53  ;;  %5642 = vmatprep.subr.bf16.mxu1 %v6010_v8 }
 0x361   :  { %5703 = vmatprep.subr.bf16.mxu0 %v6022_v42 }
 0x363   :  { %5643 = vmatpush3.bf16.msra.mxu1 %v6011_v34  ;;  %4729 = vmatmul.mubr.bf16.vlgmr.msra.gmra.mrb[60].mxu0 %v5159_v49 }
 0x364   :  { %5704 = vmatpush3.bf16.msra.mxu0 %v6012_v35  ;;  %5719 = vmatprep.mubr.msk.bf16.mxu0 %vm6023_vm14, %v6022_v42 }
 0x365   :  { %5705 = vmatprep.subr.bf16.mxu0 %v6022_v42 }
 0x366   :  { %4769 = vmatmul.mubr.bf16.vlgmr.msra.gmra.mrb[56].mxu1 %v5161_v31 }
 0x368   :  { %5706 = vmatpush3.bf16.msra.mxu0 %v6013_v16 }
 0x369   :  { %5707 = vmatprep.subr.bf16.mxu0 %v6022_v42 }
 0x36c   :  { %5708 = vmatpush3.bf16.msra.mxu0 %v6014_v50 }
 0x36d   :  { %5709 = vmatprep.subr.bf16.mxu0 %v6022_v42 }
 0x370   :  { %5710 = vmatpush3.bf16.msra.mxu0 %v6015_v62 }
 0x371   :  { %5711 = vmatprep.subr.bf16.mxu0 %v6022_v42 }
 0x374   :  { %5712 = vmatpush3.bf16.msra.mxu0 %v6016_v12 }
 0x375   :  { %5713 = vmatprep.subr.bf16.mxu0 %v6022_v42 }
 0x378   :  { %5714 = vmatpush3.bf16.msra.mxu0 %v6017_v55 }
 0x379   :  { %5715 = vmatprep.subr.bf16.mxu0 %v6022_v42 }
 0x37c   :  { %5716 = vmatpush3.bf16.msra.mxu0 %v6018_v27 }
 0x37d   :  { %5717 = vmatprep.subr.bf16.mxu0 %v6022_v42 }
 0x380   :  { %5718 = vmatpush3.bf16.msra.mxu0 %v6019_v56 }
 0x383   :  { %5720 = vmatmul.mubr.bf16.vlgmr.msra.gmra.mrb[64].mxu0 %v6020_v15 }
 0x416   :  { %v5578_v9 = vpop.f32.mrb[56].mxu0 }
 0x417   :  { %v5579_v60 = vpop.f32.mrb[57].mxu0 }
 0x418   :  { %v5580_v11 = vadd.f32 %v5579_v60, %v5578_v9  ;;  %v5581_v52 = vpop.f32.mrb[58].mxu0 }
 0x419   :  { %v5600_v24 = vpop.f32.mrb[52].mxu1  ;;  %v5582_v39 = vpop.f32.mrb[59].mxu0 }
 0x41a   :  { %v4651_v58 = vadd.f32 %v5580_v11, %v5154_v21  ;;  %v5601_v51 = vpop.f32.mrb[53].mxu1 }
 0x41b   :  { %v5602_v17 = vadd.f32 %v5601_v51, %v5600_v24  ;;  %v5603_v38 = vpop.f32.mrb[54].mxu1 }
 0x41c   :  { %v5604_v25 = vpop.f32.mrb[55].mxu1 }
 0x41d   :  { %v4691_v6 = vadd.f32 %v5602_v17, %v4651_v58 }
 0x436   :  { %v5622_v14 = vpop.f32.mrb[60].mxu0 }
 0x437   :  { %v5623_v18 = vpop.f32.mrb[61].mxu0 }
 0x438   :  { %v5624_v41 = vadd.f32 %v5623_v18, %v5622_v14  ;;  %v5625_v0 = vpop.f32.mrb[62].mxu0 }
 0x439   :  { %v5644_v46 = vpop.f32.mrb[56].mxu1  ;;  %v5626_v2 = vpop.f32.mrb[63].mxu0 }
 0x43a   :  { %v4731_v61 = vadd.f32 %v5624_v41, %v4691_v6  ;;  %v5645_v44 = vpop.f32.mrb[57].mxu1 }
 0x43b   :  { %v5646_v10 = vadd.f32 %v5645_v44, %v5644_v46  ;;  %v5647_v5 = vpop.f32.mrb[58].mxu1 }
 0x43c   :  { %v5648_v32 = vpop.f32.mrb[59].mxu1 }
 0x43d   :  { %v4771_v22 = vadd.f32 %v5646_v10, %v4731_v61 }
 0x456   :  { %v4810_v13 = vpop.f32.mrb[64].mxu0 }
 0x457   :  { %v4811_v1 = vadd.f32 %v4810_v13, %v4771_v22  ;;  %v5721_v40 = vpop.f32.mrb[65].mxu0 }
 0x458   :  { %v4813_v28 = vpop.f32.mrb[66].mxu0 }
 0x459   :  { %4816 = vst [vmem:[%s7815_s7] sm:$0xff] %v4811_v1  ;;  %v5722_v33 = vpop.f32.mrb[67].mxu0 }

</bundles_post_ra>
